<compile_context>
chip_gen: v7x
topology: tpu7x:2x2x1
jax: 0.10.0
libtpu: 0.0.40
codegen_flags: <defaults>
</compile_context>

<pallas_src>
import functools
import math

import numpy as np
import jax
import jax.numpy as jnp
from jax import lax
from jax.experimental import pallas as pl
from jax.experimental.pallas import tpu as pltpu

# ---- model hyper-parameters (small, synthetic) ------------------------------
D_MODEL = 32
N_HEADS = 4
D_HEAD = D_MODEL // N_HEADS
D_FF = 64
N_LAYERS = 2
VOCAB = 16
MAX_LEN = 64
EPS = 1e-6
_NEG_INF = -1e9
SLAB_LANES = 128


def _round_up(x, m):
    return -(-x // m) * m


# =========================== weight slab layout ===============================
# One fixed, named layout shared by init (packing) and the kernel (slicing).

def _weight_layout():
    entries = []

    def add(name, r, c):
        entries.append((name, r, c))

    add("src_lut", VOCAB, D_MODEL)
    add("tgt_lut", VOCAB, D_MODEL)
    add("pe", MAX_LEN, D_MODEL)
    for l in range(N_LAYERS):                                  # encoder layers
        p = f"enc{l}_"
        add(p + "wqkv", D_MODEL, 3 * D_MODEL); add(p + "bqkv", 1, 3 * D_MODEL)
        add(p + "wo", D_MODEL, D_MODEL);       add(p + "bo", 1, D_MODEL)
        add(p + "ln1", 2, D_MODEL);            add(p + "ln2", 2, D_MODEL)
        add(p + "w1", D_MODEL, D_FF);          add(p + "b1", 1, D_FF)
        add(p + "w2", D_FF, D_MODEL);          add(p + "b2", 1, D_MODEL)
    add("enc_ln", 2, D_MODEL)                                  # encoder final LN
    for l in range(N_LAYERS):                                  # decoder layers
        p = f"dec{l}_"
        add(p + "s_wqkv", D_MODEL, 3 * D_MODEL); add(p + "s_bqkv", 1, 3 * D_MODEL)
        add(p + "s_wo", D_MODEL, D_MODEL);       add(p + "s_bo", 1, D_MODEL)
        add(p + "c_wqkv", D_MODEL, 3 * D_MODEL); add(p + "c_bqkv", 1, 3 * D_MODEL)
        add(p + "c_wo", D_MODEL, D_MODEL);       add(p + "c_bo", 1, D_MODEL)
        add(p + "ln1", 2, D_MODEL); add(p + "ln2", 2, D_MODEL); add(p + "ln3", 2, D_MODEL)
        add(p + "w1", D_MODEL, D_FF);            add(p + "b1", 1, D_FF)
        add(p + "w2", D_FF, D_MODEL);            add(p + "b2", 1, D_MODEL)
    add("dec_ln", 2, D_MODEL)                                  # decoder final LN

    offsets = {}
    row = 0
    for name, r, c in entries:
        offsets[name] = (row, r, c)
        row += _round_up(r, 8)          # every block starts on an 8-sublane boundary
    return entries, offsets, _round_up(row, 8)


# ============================ fused forward kernel ============================

def _fused_kernel(src_tok_ref, tgt_tok_ref, smask_ref, tmask_ref, w_ref, out_ref,
                  *, offs, B, Ss, St):
    def W(name, rows=None):
        off, r, c = offs[name]
        rr = r if rows is None else rows
        return w_ref[off:off + rr, :c]          # static slice of the weight slab

    # ------------------- embeddings (in-kernel, one-hot matmul) ---------------
    def embed(tok_ref, lut_name, S):
        tok = tok_ref[...]                                           # (B*S, 1) int32
        oh = (tok == lax.broadcasted_iota(jnp.int32, (B * S, VOCAB), 1)
              ).astype(jnp.float32)                                  # (B*S, V)
        x = jnp.dot(oh, W(lut_name), preferred_element_type=jnp.float32)
        pe = W("pe", rows=S)                                         # (S, D)
        return x + jnp.concatenate([pe] * B, axis=0)                 # (B*S, D)

    x = embed(src_tok_ref, "src_lut", Ss)        # (B*Ss, D)
    y = embed(tgt_tok_ref, "tgt_lut", St)        # (B*St, D)

    # ---------------- additive masks (once per batch, outside head loops) -----
    src_add = [jnp.where(smask_ref[b] > 0.0, 0.0, _NEG_INF) for b in range(B)]  # (1, Ss)
    tgt_add = [jnp.where(tmask_ref[b] > 0.0, 0.0, _NEG_INF) for b in range(B)]  # (St, St)

    # ------------------------------- helpers -----------------------------------
    def ln(h, name):
        gb = W(name)                                                 # (2, D)
        mean = jnp.mean(h, axis=-1, keepdims=True)
        var = jnp.mean(jnp.square(h - mean), axis=-1, keepdims=True)
        return (h - mean) * lax.rsqrt(var + EPS) * gb[0:1, :] + gb[1:2, :]

    def attn_heads(q, k, v, add):
        # q:(Sq,D) k,v:(Sk,D) add broadcastable to (Sq,Sk); 1/sqrt(d) folded in W_q.
        ctxs = []
        for h in range(N_HEADS):
            sl = slice(h * D_HEAD, (h + 1) * D_HEAD)
            s = lax.dot_general(q[:, sl], k[:, sl], (((1,), (1,)), ((), ())),
                                preferred_element_type=jnp.float32)
            s = s + add
            s = s - jnp.max(s, axis=-1, keepdims=True)
            p = jnp.exp(s)
            p = p * pl.reciprocal(jnp.sum(p, axis=-1, keepdims=True), approx=True)
            ctxs.append(jnp.dot(p, v[:, sl], preferred_element_type=jnp.float32))
        return jnp.concatenate(ctxs, axis=-1)                        # (Sq, D)

    def mha_self(h, S, adds, pfx):
        qkv = jnp.dot(h, W(pfx + "wqkv"),
                      preferred_element_type=jnp.float32) + W(pfx + "bqkv")  # (B*S, 3D)
        rows = []
        for b in range(B):
            r = slice(b * S, (b + 1) * S)
            rows.append(attn_heads(qkv[r, :D_MODEL],
                                   qkv[r, D_MODEL:2 * D_MODEL],
                                   qkv[r, 2 * D_MODEL:],
                                   adds[b]))
        ctx = jnp.concatenate(rows, axis=0)                          # (B*S, D)
        return jnp.dot(ctx, W(pfx + "wo"),
                       preferred_element_type=jnp.float32) + W(pfx + "bo")

    def mha_cross(hq, mem, Sq, Sk, adds, pfx):
        wqkv = W(pfx + "wqkv"); bqkv = W(pfx + "bqkv")
        q = jnp.dot(hq, wqkv[:, :D_MODEL],
                    preferred_element_type=jnp.float32) + bqkv[:, :D_MODEL]   # (B*Sq, D)
        kv = jnp.dot(mem, wqkv[:, D_MODEL:],
                     preferred_element_type=jnp.float32) + bqkv[:, D_MODEL:]  # (B*Sk, 2D)
        rows = []
        for b in range(B):
            rq = slice(b * Sq, (b + 1) * Sq)
            rk = slice(b * Sk, (b + 1) * Sk)
            rows.append(attn_heads(q[rq], kv[rk, :D_MODEL], kv[rk, D_MODEL:], adds[b]))
        ctx = jnp.concatenate(rows, axis=0)
        return jnp.dot(ctx, W(pfx + "wo"),
                       preferred_element_type=jnp.float32) + W(pfx + "bo")

    def ffn(h, pfx):
        f = jnp.maximum(
            jnp.dot(h, W(pfx + "w1"), preferred_element_type=jnp.float32) + W(pfx + "b1"),
            0.0)
        return jnp.dot(f, W(pfx + "w2"),
                       preferred_element_type=jnp.float32) + W(pfx + "b2")

    # ------------------------------- encoder -----------------------------------
    for l in range(N_LAYERS):
        p = f"enc{l}_"
        x = x + mha_self(ln(x, p + "ln1"), Ss, src_add, p)
        x = x + ffn(ln(x, p + "ln2"), p)
    memory = ln(x, "enc_ln")

    # ------------------------------- decoder -----------------------------------
    for l in range(N_LAYERS):
        p = f"dec{l}_"
        y = y + mha_self(ln(y, p + "ln1"), St, tgt_add, p + "s_")
        y = y + mha_cross(ln(y, p + "ln2"), memory, St, Ss, src_add, p + "c_")
        y = y + ffn(ln(y, p + "ln3"), p)
    y = ln(y, "dec_ln")

    for b in range(B):
        out_ref[b] = y[b * St:(b + 1) * St, :].astype(out_ref.dtype)


# =============================== host wrapper =================================

def encoder_decoder_forward(src, tgt, src_mask, tgt_mask, params):
    # == EncoderDecoder.forward: decode(encode(src, src_mask), src_mask, tgt, tgt_mask)
    # TODO(synk): `generator` is part of __init__ but never called in forward(); omitted.
    B, Ss = src.shape
    St = tgt.shape[1]

    kernel = functools.partial(_fused_kernel, offs=params["offsets"],
                               B=B, Ss=Ss, St=St)

    # contiguous (row-major) reshapes -> bitcasts, no extra device work
    src_tok = src.reshape(B * Ss, 1).astype(jnp.int32)
    tgt_tok = tgt.reshape(B * St, 1).astype(jnp.int32)
    src_m = jnp.broadcast_to(src_mask, (B, 1, Ss)).astype(jnp.float32)
    tgt_m = jnp.broadcast_to(tgt_mask, (B, St, St)).astype(jnp.float32)

    vmem = pltpu.MemorySpace.VMEM
    return pl.pallas_call(
        kernel,
        out_shape=jax.ShapeDtypeStruct((B, St, D_MODEL), jnp.float32),
        in_specs=[pl.BlockSpec(memory_space=vmem)] * 5,
        out_specs=pl.BlockSpec(memory_space=vmem),
    )(src_tok, tgt_tok, src_m, tgt_m, params["slab"])


# =============================== parameter init ===============================

def _sinusoidal_pe(max_len, d_model):
    pos = np.arange(max_len, dtype=np.float32)[:, None]
    div = np.exp(np.arange(0, d_model, 2, dtype=np.float32)
                 * (-math.log(10000.0) / d_model))
    pe = np.zeros((max_len, d_model), np.float32)
    pe[:, 0::2] = np.sin(pos * div)
    pe[:, 1::2] = np.cos(pos * div)
    return pe


def init_params(key):
    entries, offsets, total_rows = _weight_layout()
    keys = iter(jax.random.split(key, 4 * len(entries)))

    def rnd(shape, scale=0.05):
        return scale * jax.random.normal(next(keys), shape, dtype=jnp.float32)

    def make(name, r, c):
        if name in ("src_lut", "tgt_lut"):
            return rnd((r, c), 1.0) * math.sqrt(D_MODEL)        # embed scale folded in
        if name == "pe":
            return jnp.asarray(_sinusoidal_pe(r, c))
        if name.endswith("wqkv"):
            w = rnd((r, c))
            return w.at[:, :D_MODEL].multiply(1.0 / math.sqrt(D_HEAD))  # Q scale folded in
        if name.endswith(("ln1", "ln2", "ln3")) or name in ("enc_ln", "dec_ln"):
            return jnp.stack([jnp.ones((c,), jnp.float32),
                              jnp.zeros((c,), jnp.float32)])    # (2, D): gamma, beta
        if name.endswith(("wo", "w1", "w2")):
            return rnd((r, c))
        return jnp.zeros((r, c), jnp.float32)                   # biases

    slab = np.zeros((total_rows, SLAB_LANES), np.float32)
    for name, r, c in entries:
        off, _, _ = offsets[name]
        slab[off:off + r, :c] = np.asarray(make(name, r, c), np.float32)

    return {"slab": jnp.asarray(slab), "offsets": offsets}


# ==================================== main ====================================

if __name__ == "__main__":
    key = jax.random.PRNGKey(0)
    k_par, k_src, k_tgt = jax.random.split(key, 3)

    B, S_SRC, S_TGT = 2, 8, 8
    params = init_params(k_par)

    src = jax.random.randint(k_src, (B, S_SRC), 1, VOCAB, dtype=jnp.int32)
    tgt = jax.random.randint(k_tgt, (B, S_TGT), 1, VOCAB, dtype=jnp.int32)

    # src_mask: (B, 1, S_src) key-padding mask (last 2 src tokens of batch 1 padded)
    src_mask = jnp.ones((B, 1, S_SRC), jnp.float32)
    src_mask = src_mask.at[1, 0, S_SRC - 2:].set(0.0)
    # tgt_mask: per-batch (B, S_tgt, S_tgt) causal mask
    tgt_mask = jnp.broadcast_to(jnp.tril(jnp.ones((S_TGT, S_TGT), jnp.float32)),
                                (B, S_TGT, S_TGT))

    fwd = jax.jit(functools.partial(encoder_decoder_forward, params=params))
    out = fwd(src, tgt, src_mask, tgt_mask)
    out = jax.block_until_ready(out)

    assert out.shape == (B, S_TGT, D_MODEL)
    assert bool(jnp.all(jnp.isfinite(out)))
    print("KERNEL_OK")
</pallas_src>

<mosaic_0001>
module attributes {stable_mosaic.version = 11 : i64} {
  func.func @_fused_kernel(%arg0: memref<16x1xi32, #tpu.memory_space<vmem>>, %arg1: memref<16x1xi32, #tpu.memory_space<vmem>>, %arg2: memref<2x1x8xf32, #tpu.memory_space<vmem>>, %arg3: memref<2x8x8xf32, #tpu.memory_space<vmem>>, %arg4: memref<1120x128xf32, #tpu.memory_space<vmem>>, %arg5: memref<2x8x32xf32, #tpu.memory_space<vmem>>) attributes {dimension_semantics = [], scalar_prefetch = 0 : i64, scratch_operands = 0 : i64, tpu.core_type = #tpu.core_type<tc>} {
    %c0 = arith.constant 0 : index
    %c0_0 = arith.constant 0 : index
    %0 = vector.load %arg0[%c0, %c0_0] : memref<16x1xi32, #tpu.memory_space<vmem>>, vector<16x1xi32>
    %1 = tpu.iota {dimensions = array<i32: 1>} : vector<16x16xi32>
    %2 = vector.broadcast %0 : vector<16x1xi32> to vector<16x16xi32>
    %3 = arith.cmpi eq, %2, %1 : vector<16x16xi32>
    %4 = arith.extui %3 : vector<16x16xi1> to vector<16x16xi32>
    %5 = arith.sitofp %4 : vector<16x16xi32> to vector<16x16xf32>
    %c0_1 = arith.constant 0 : index
    %c0_2 = arith.constant 0 : index
    %6 = vector.load %arg4[%c0_1, %c0_2] : memref<1120x128xf32, #tpu.memory_space<vmem>>, vector<16x32xf32>
    %cst = arith.constant dense<0.000000e+00> : vector<16x32xf32>
    %7 = tpu.matmul %5, %6, %cst {dimension_numbers = #tpu.dot_dimension_numbers<[1], [0], [0], [1], [0, 0, 1, 1], [], []>} : vector<16x16xf32>, vector<16x32xf32>, vector<16x32xf32> -> vector<16x32xf32>
    %c32 = arith.constant 32 : index
    %c0_3 = arith.constant 0 : index
    %8 = vector.load %arg4[%c32, %c0_3] : memref<1120x128xf32, #tpu.memory_space<vmem>>, vector<8x32xf32>
    %9 = tpu.concatenate %8, %8 in 0 : vector<8x32xf32>, vector<8x32xf32> -> vector<16x32xf32>
    %10 = arith.addf %7, %9 : vector<16x32xf32>
    %c0_4 = arith.constant 0 : index
    %c0_5 = arith.constant 0 : index
    %11 = vector.load %arg1[%c0_4, %c0_5] : memref<16x1xi32, #tpu.memory_space<vmem>>, vector<16x1xi32>
    %12 = tpu.iota {dimensions = array<i32: 1>} : vector<16x16xi32>
    %13 = vector.broadcast %11 : vector<16x1xi32> to vector<16x16xi32>
    %14 = arith.cmpi eq, %13, %12 : vector<16x16xi32>
    %15 = arith.extui %14 : vector<16x16xi1> to vector<16x16xi32>
    %16 = arith.sitofp %15 : vector<16x16xi32> to vector<16x16xf32>
    %c16 = arith.constant 16 : index
    %c0_6 = arith.constant 0 : index
    %17 = vector.load %arg4[%c16, %c0_6] : memref<1120x128xf32, #tpu.memory_space<vmem>>, vector<16x32xf32>
    %cst_7 = arith.constant dense<0.000000e+00> : vector<16x32xf32>
    %18 = tpu.matmul %16, %17, %cst_7 {dimension_numbers = #tpu.dot_dimension_numbers<[1], [0], [0], [1], [0, 0, 1, 1], [], []>} : vector<16x16xf32>, vector<16x32xf32>, vector<16x32xf32> -> vector<16x32xf32>
    %c32_8 = arith.constant 32 : index
    %c0_9 = arith.constant 0 : index
    %19 = vector.load %arg4[%c32_8, %c0_9] : memref<1120x128xf32, #tpu.memory_space<vmem>>, vector<8x32xf32>
    %20 = tpu.concatenate %19, %19 in 0 : vector<8x32xf32>, vector<8x32xf32> -> vector<16x32xf32>
    %21 = arith.addf %18, %20 : vector<16x32xf32>
    %c0_10 = arith.constant 0 : index
    %c0_11 = arith.constant 0 : index
    %c0_12 = arith.constant 0 : index
    %22 = vector.load %arg2[%c0_10, %c0_11, %c0_12] : memref<2x1x8xf32, #tpu.memory_space<vmem>>, vector<1x1x8xf32>
    %23 = vector.shape_cast %22 : vector<1x1x8xf32> to vector<1x8xf32>
    %cst_13 = arith.constant 0.000000e+00 : f32
    %24 = vector.broadcast %cst_13 : f32 to vector<1x8xf32>
    %25 = arith.cmpf ogt, %23, %24 : vector<1x8xf32>
    %cst_14 = arith.constant 0.000000e+00 : f32
    %cst_15 = arith.constant -1.000000e+09 : f32
    %26 = vector.broadcast %cst_14 : f32 to vector<1x8xf32>
    %27 = vector.broadcast %cst_15 : f32 to vector<1x8xf32>
    %28 = arith.select %25, %26, %27 : vector<1x8xi1>, vector<1x8xf32>
    %c1 = arith.constant 1 : index
    %c0_16 = arith.constant 0 : index
    %c0_17 = arith.constant 0 : index
    %29 = vector.load %arg2[%c1, %c0_16, %c0_17] : memref<2x1x8xf32, #tpu.memory_space<vmem>>, vector<1x1x8xf32>
    %30 = vector.shape_cast %29 : vector<1x1x8xf32> to vector<1x8xf32>
    %cst_18 = arith.constant 0.000000e+00 : f32
    %31 = vector.broadcast %cst_18 : f32 to vector<1x8xf32>
    %32 = arith.cmpf ogt, %30, %31 : vector<1x8xf32>
    %cst_19 = arith.constant 0.000000e+00 : f32
    %cst_20 = arith.constant -1.000000e+09 : f32
    %33 = vector.broadcast %cst_19 : f32 to vector<1x8xf32>
    %34 = vector.broadcast %cst_20 : f32 to vector<1x8xf32>
    %35 = arith.select %32, %33, %34 : vector<1x8xi1>, vector<1x8xf32>
    %c0_21 = arith.constant 0 : index
    %c0_22 = arith.constant 0 : index
    %c0_23 = arith.constant 0 : index
    %36 = vector.load %arg3[%c0_21, %c0_22, %c0_23] : memref<2x8x8xf32, #tpu.memory_space<vmem>>, vector<1x8x8xf32>
    %37 = vector.shape_cast %36 : vector<1x8x8xf32> to vector<8x8xf32>
    %cst_24 = arith.constant 0.000000e+00 : f32
    %38 = vector.broadcast %cst_24 : f32 to vector<8x8xf32>
    %39 = arith.cmpf ogt, %37, %38 : vector<8x8xf32>
    %cst_25 = arith.constant 0.000000e+00 : f32
    %cst_26 = arith.constant -1.000000e+09 : f32
    %40 = vector.broadcast %cst_25 : f32 to vector<8x8xf32>
    %41 = vector.broadcast %cst_26 : f32 to vector<8x8xf32>
    %42 = arith.select %39, %40, %41 : vector<8x8xi1>, vector<8x8xf32>
    %c1_27 = arith.constant 1 : index
    %c0_28 = arith.constant 0 : index
    %c0_29 = arith.constant 0 : index
    %43 = vector.load %arg3[%c1_27, %c0_28, %c0_29] : memref<2x8x8xf32, #tpu.memory_space<vmem>>, vector<1x8x8xf32>
    %44 = vector.shape_cast %43 : vector<1x8x8xf32> to vector<8x8xf32>
    %cst_30 = arith.constant 0.000000e+00 : f32
    %45 = vector.broadcast %cst_30 : f32 to vector<8x8xf32>
    %46 = arith.cmpf ogt, %44, %45 : vector<8x8xf32>
    %cst_31 = arith.constant 0.000000e+00 : f32
    %cst_32 = arith.constant -1.000000e+09 : f32
    %47 = vector.broadcast %cst_31 : f32 to vector<8x8xf32>
    %48 = vector.broadcast %cst_32 : f32 to vector<8x8xf32>
    %49 = arith.select %46, %47, %48 : vector<8x8xi1>, vector<8x8xf32>
    %c176 = arith.constant 176 : index
    %c0_33 = arith.constant 0 : index
    %50 = vector.load %arg4[%c176, %c0_33] : memref<1120x128xf32, #tpu.memory_space<vmem>>, vector<2x32xf32>
    %cst_34 = arith.constant dense<0.000000e+00> : vector<16xf32>
    %51 = vector.multi_reduction <add>, %10, %cst_34 [1] : vector<16x32xf32> to vector<16xf32>
    %52 = vector.shape_cast %51 : vector<16xf32> to vector<16x1xf32>
    %cst_35 = arith.constant 3.200000e+01 : f32
    %53 = vector.broadcast %cst_35 : f32 to vector<16x1xf32>
    %54 = arith.divf %52, %53 : vector<16x1xf32>
    %55 = vector.broadcast %54 : vector<16x1xf32> to vector<16x32xf32>
    %56 = arith.subf %10, %55 : vector<16x32xf32>
    %57 = arith.mulf %56, %56 : vector<16x32xf32>
    %cst_36 = arith.constant dense<0.000000e+00> : vector<16xf32>
    %58 = vector.multi_reduction <add>, %57, %cst_36 [1] : vector<16x32xf32> to vector<16xf32>
    %59 = vector.shape_cast %58 : vector<16xf32> to vector<16x1xf32>
    %cst_37 = arith.constant 3.200000e+01 : f32
    %60 = vector.broadcast %cst_37 : f32 to vector<16x1xf32>
    %61 = arith.divf %59, %60 : vector<16x1xf32>
    %62 = vector.broadcast %54 : vector<16x1xf32> to vector<16x32xf32>
    %63 = arith.subf %10, %62 : vector<16x32xf32>
    %cst_38 = arith.constant 9.99999997E-7 : f32
    %64 = vector.broadcast %cst_38 : f32 to vector<16x1xf32>
    %65 = arith.addf %61, %64 : vector<16x1xf32>
    %66 = math.rsqrt %65 : vector<16x1xf32>
    %67 = vector.broadcast %66 : vector<16x1xf32> to vector<16x32xf32>
    %68 = arith.mulf %63, %67 : vector<16x32xf32>
    %69 = vector.extract_strided_slice %50 {offsets = [0, 0], sizes = [1, 32], strides = [1, 1]} : vector<2x32xf32> to vector<1x32xf32>
    %70 = vector.broadcast %69 : vector<1x32xf32> to vector<16x32xf32>
    %71 = arith.mulf %68, %70 : vector<16x32xf32>
    %72 = vector.extract_strided_slice %50 {offsets = [1, 0], sizes = [1, 32], strides = [1, 1]} : vector<2x32xf32> to vector<1x32xf32>
    %73 = vector.broadcast %72 : vector<1x32xf32> to vector<16x32xf32>
    %74 = arith.addf %71, %73 : vector<16x32xf32>
    %c96 = arith.constant 96 : index
    %c0_39 = arith.constant 0 : index
    %75 = vector.load %arg4[%c96, %c0_39] : memref<1120x128xf32, #tpu.memory_space<vmem>>, vector<32x96xf32>
    %cst_40 = arith.constant dense<0.000000e+00> : vector<16x96xf32>
    %76 = tpu.matmul %74, %75, %cst_40 {dimension_numbers = #tpu.dot_dimension_numbers<[1], [0], [0], [1], [0, 0, 1, 1], [], []>} : vector<16x32xf32>, vector<32x96xf32>, vector<16x96xf32> -> vector<16x96xf32>
    %c128 = arith.constant 128 : index
    %c0_41 = arith.constant 0 : index
    %77 = vector.load %arg4[%c128, %c0_41] : memref<1120x128xf32, #tpu.memory_space<vmem>>, vector<1x96xf32>
    %78 = vector.broadcast %77 : vector<1x96xf32> to vector<16x96xf32>
    %79 = arith.addf %76, %78 : vector<16x96xf32>
    %80 = vector.extract_strided_slice %79 {offsets = [0, 0], sizes = [8, 32], strides = [1, 1]} : vector<16x96xf32> to vector<8x32xf32>
    %81 = vector.extract_strided_slice %79 {offsets = [0, 32], sizes = [8, 32], strides = [1, 1]} : vector<16x96xf32> to vector<8x32xf32>
    %82 = vector.extract_strided_slice %79 {offsets = [0, 64], sizes = [8, 32], strides = [1, 1]} : vector<16x96xf32> to vector<8x32xf32>
    %83 = vector.extract_strided_slice %80 {offsets = [0, 0], sizes = [8, 8], strides = [1, 1]} : vector<8x32xf32> to vector<8x8xf32>
    %84 = vector.extract_strided_slice %81 {offsets = [0, 0], sizes = [8, 8], strides = [1, 1]} : vector<8x32xf32> to vector<8x8xf32>
    %cst_42 = arith.constant dense<0.000000e+00> : vector<8x8xf32>
    %85 = tpu.matmul %83, %84, %cst_42 {dimension_numbers = #tpu.dot_dimension_numbers<[1], [1], [0], [0], [0, 0, 1, 0], [], []>} : vector<8x8xf32>, vector<8x8xf32>, vector<8x8xf32> -> vector<8x8xf32>
    %86 = vector.broadcast %28 : vector<1x8xf32> to vector<8x8xf32>
    %87 = arith.addf %85, %86 : vector<8x8xf32>
    %cst_43 = arith.constant dense<0xFF800000> : vector<8xf32>
    %88 = vector.multi_reduction <maximumf>, %87, %cst_43 [1] : vector<8x8xf32> to vector<8xf32>
    %89 = vector.shape_cast %88 : vector<8xf32> to vector<8x1xf32>
    %90 = vector.broadcast %89 : vector<8x1xf32> to vector<8x8xf32>
    %91 = arith.subf %87, %90 : vector<8x8xf32>
    %92 = math.exp %91 : vector<8x8xf32>
    %cst_44 = arith.constant dense<0.000000e+00> : vector<8xf32>
    %93 = vector.multi_reduction <add>, %92, %cst_44 [1] : vector<8x8xf32> to vector<8xf32>
    %94 = vector.shape_cast %93 : vector<8xf32> to vector<8x1xf32>
    %95 = tpu.reciprocal %94 {approx = true} : vector<8x1xf32> -> vector<8x1xf32>
    %96 = vector.broadcast %95 : vector<8x1xf32> to vector<8x8xf32>
    %97 = arith.mulf %92, %96 : vector<8x8xf32>
    %98 = vector.extract_strided_slice %82 {offsets = [0, 0], sizes = [8, 8], strides = [1, 1]} : vector<8x32xf32> to vector<8x8xf32>
    %cst_45 = arith.constant dense<0.000000e+00> : vector<8x8xf32>
    %99 = tpu.matmul %97, %98, %cst_45 {dimension_numbers = #tpu.dot_dimension_numbers<[1], [0], [0], [1], [0, 0, 1, 1], [], []>} : vector<8x8xf32>, vector<8x8xf32>, vector<8x8xf32> -> vector<8x8xf32>
    %100 = vector.extract_strided_slice %80 {offsets = [0, 8], sizes = [8, 8], strides = [1, 1]} : vector<8x32xf32> to vector<8x8xf32>
    %101 = vector.extract_strided_slice %81 {offsets = [0, 8], sizes = [8, 8], strides = [1, 1]} : vector<8x32xf32> to vector<8x8xf32>
    %cst_46 = arith.constant dense<0.000000e+00> : vector<8x8xf32>
    %102 = tpu.matmul %100, %101, %cst_46 {dimension_numbers = #tpu.dot_dimension_numbers<[1], [1], [0], [0], [0, 0, 1, 0], [], []>} : vector<8x8xf32>, vector<8x8xf32>, vector<8x8xf32> -> vector<8x8xf32>
    %103 = vector.broadcast %28 : vector<1x8xf32> to vector<8x8xf32>
    %104 = arith.addf %102, %103 : vector<8x8xf32>
    %cst_47 = arith.constant dense<0xFF800000> : vector<8xf32>
    %105 = vector.multi_reduction <maximumf>, %104, %cst_47 [1] : vector<8x8xf32> to vector<8xf32>
    %106 = vector.shape_cast %105 : vector<8xf32> to vector<8x1xf32>
    %107 = vector.broadcast %106 : vector<8x1xf32> to vector<8x8xf32>
    %108 = arith.subf %104, %107 : vector<8x8xf32>
    %109 = math.exp %108 : vector<8x8xf32>
    %cst_48 = arith.constant dense<0.000000e+00> : vector<8xf32>
    %110 = vector.multi_reduction <add>, %109, %cst_48 [1] : vector<8x8xf32> to vector<8xf32>
    %111 = vector.shape_cast %110 : vector<8xf32> to vector<8x1xf32>
    %112 = tpu.reciprocal %111 {approx = true} : vector<8x1xf32> -> vector<8x1xf32>
    %113 = vector.broadcast %112 : vector<8x1xf32> to vector<8x8xf32>
    %114 = arith.mulf %109, %113 : vector<8x8xf32>
    %115 = vector.extract_strided_slice %82 {offsets = [0, 8], sizes = [8, 8], strides = [1, 1]} : vector<8x32xf32> to vector<8x8xf32>
    %cst_49 = arith.constant dense<0.000000e+00> : vector<8x8xf32>
    %116 = tpu.matmul %114, %115, %cst_49 {dimension_numbers = #tpu.dot_dimension_numbers<[1], [0], [0], [1], [0, 0, 1, 1], [], []>} : vector<8x8xf32>, vector<8x8xf32>, vector<8x8xf32> -> vector<8x8xf32>
    %117 = vector.extract_strided_slice %80 {offsets = [0, 16], sizes = [8, 8], strides = [1, 1]} : vector<8x32xf32> to vector<8x8xf32>
    %118 = vector.extract_strided_slice %81 {offsets = [0, 16], sizes = [8, 8], strides = [1, 1]} : vector<8x32xf32> to vector<8x8xf32>
    %cst_50 = arith.constant dense<0.000000e+00> : vector<8x8xf32>
    %119 = tpu.matmul %117, %118, %cst_50 {dimension_numbers = #tpu.dot_dimension_numbers<[1], [1], [0], [0], [0, 0, 1, 0], [], []>} : vector<8x8xf32>, vector<8x8xf32>, vector<8x8xf32> -> vector<8x8xf32>
    %120 = vector.broadcast %28 : vector<1x8xf32> to vector<8x8xf32>
    %121 = arith.addf %119, %120 : vector<8x8xf32>
    %cst_51 = arith.constant dense<0xFF800000> : vector<8xf32>
    %122 = vector.multi_reduction <maximumf>, %121, %cst_51 [1] : vector<8x8xf32> to vector<8xf32>
    %123 = vector.shape_cast %122 : vector<8xf32> to vector<8x1xf32>
    %124 = vector.broadcast %123 : vector<8x1xf32> to vector<8x8xf32>
    %125 = arith.subf %121, %124 : vector<8x8xf32>
    %126 = math.exp %125 : vector<8x8xf32>
    %cst_52 = arith.constant dense<0.000000e+00> : vector<8xf32>
    %127 = vector.multi_reduction <add>, %126, %cst_52 [1] : vector<8x8xf32> to vector<8xf32>
    %128 = vector.shape_cast %127 : vector<8xf32> to vector<8x1xf32>
    %129 = tpu.reciprocal %128 {approx = true} : vector<8x1xf32> -> vector<8x1xf32>
    %130 = vector.broadcast %129 : vector<8x1xf32> to vector<8x8xf32>
    %131 = arith.mulf %126, %130 : vector<8x8xf32>
    %132 = vector.extract_strided_slice %82 {offsets = [0, 16], sizes = [8, 8], strides = [1, 1]} : vector<8x32xf32> to vector<8x8xf32>
    %cst_53 = arith.constant dense<0.000000e+00> : vector<8x8xf32>
    %133 = tpu.matmul %131, %132, %cst_53 {dimension_numbers = #tpu.dot_dimension_numbers<[1], [0], [0], [1], [0, 0, 1, 1], [], []>} : vector<8x8xf32>, vector<8x8xf32>, vector<8x8xf32> -> vector<8x8xf32>
    %134 = vector.extract_strided_slice %80 {offsets = [0, 24], sizes = [8, 8], strides = [1, 1]} : vector<8x32xf32> to vector<8x8xf32>
    %135 = vector.extract_strided_slice %81 {offsets = [0, 24], sizes = [8, 8], strides = [1, 1]} : vector<8x32xf32> to vector<8x8xf32>
    %cst_54 = arith.constant dense<0.000000e+00> : vector<8x8xf32>
    %136 = tpu.matmul %134, %135, %cst_54 {dimension_numbers = #tpu.dot_dimension_numbers<[1], [1], [0], [0], [0, 0, 1, 0], [], []>} : vector<8x8xf32>, vector<8x8xf32>, vector<8x8xf32> -> vector<8x8xf32>
    %137 = vector.broadcast %28 : vector<1x8xf32> to vector<8x8xf32>
    %138 = arith.addf %136, %137 : vector<8x8xf32>
    %cst_55 = arith.constant dense<0xFF800000> : vector<8xf32>
    %139 = vector.multi_reduction <maximumf>, %138, %cst_55 [1] : vector<8x8xf32> to vector<8xf32>
    %140 = vector.shape_cast %139 : vector<8xf32> to vector<8x1xf32>
    %141 = vector.broadcast %140 : vector<8x1xf32> to vector<8x8xf32>
    %142 = arith.subf %138, %141 : vector<8x8xf32>
    %143 = math.exp %142 : vector<8x8xf32>
    %cst_56 = arith.constant dense<0.000000e+00> : vector<8xf32>
    %144 = vector.multi_reduction <add>, %143, %cst_56 [1] : vector<8x8xf32> to vector<8xf32>
    %145 = vector.shape_cast %144 : vector<8xf32> to vector<8x1xf32>
    %146 = tpu.reciprocal %145 {approx = true} : vector<8x1xf32> -> vector<8x1xf32>
    %147 = vector.broadcast %146 : vector<8x1xf32> to vector<8x8xf32>
    %148 = arith.mulf %143, %147 : vector<8x8xf32>
    %149 = vector.extract_strided_slice %82 {offsets = [0, 24], sizes = [8, 8], strides = [1, 1]} : vector<8x32xf32> to vector<8x8xf32>
    %cst_57 = arith.constant dense<0.000000e+00> : vector<8x8xf32>
    %150 = tpu.matmul %148, %149, %cst_57 {dimension_numbers = #tpu.dot_dimension_numbers<[1], [0], [0], [1], [0, 0, 1, 1], [], []>} : vector<8x8xf32>, vector<8x8xf32>, vector<8x8xf32> -> vector<8x8xf32>
    %151 = tpu.concatenate %99, %116, %133, %150 in 1 : vector<8x8xf32>, vector<8x8xf32>, vector<8x8xf32>, vector<8x8xf32> -> vector<8x32xf32>
    %152 = vector.extract_strided_slice %79 {offsets = [8, 0], sizes = [8, 32], strides = [1, 1]} : vector<16x96xf32> to vector<8x32xf32>
    %153 = vector.extract_strided_slice %79 {offsets = [8, 32], sizes = [8, 32], strides = [1, 1]} : vector<16x96xf32> to vector<8x32xf32>
    %154 = vector.extract_strided_slice %79 {offsets = [8, 64], sizes = [8, 32], strides = [1, 1]} : vector<16x96xf32> to vector<8x32xf32>
    %155 = vector.extract_strided_slice %152 {offsets = [0, 0], sizes = [8, 8], strides = [1, 1]} : vector<8x32xf32> to vector<8x8xf32>
    %156 = vector.extract_strided_slice %153 {offsets = [0, 0], sizes = [8, 8], strides = [1, 1]} : vector<8x32xf32> to vector<8x8xf32>
    %cst_58 = arith.constant dense<0.000000e+00> : vector<8x8xf32>
    %157 = tpu.matmul %155, %156, %cst_58 {dimension_numbers = #tpu.dot_dimension_numbers<[1], [1], [0], [0], [0, 0, 1, 0], [], []>} : vector<8x8xf32>, vector<8x8xf32>, vector<8x8xf32> -> vector<8x8xf32>
    %158 = vector.broadcast %35 : vector<1x8xf32> to vector<8x8xf32>
    %159 = arith.addf %157, %158 : vector<8x8xf32>
    %cst_59 = arith.constant dense<0xFF800000> : vector<8xf32>
    %160 = vector.multi_reduction <maximumf>, %159, %cst_59 [1] : vector<8x8xf32> to vector<8xf32>
    %161 = vector.shape_cast %160 : vector<8xf32> to vector<8x1xf32>
    %162 = vector.broadcast %161 : vector<8x1xf32> to vector<8x8xf32>
    %163 = arith.subf %159, %162 : vector<8x8xf32>
    %164 = math.exp %163 : vector<8x8xf32>
    %cst_60 = arith.constant dense<0.000000e+00> : vector<8xf32>
    %165 = vector.multi_reduction <add>, %164, %cst_60 [1] : vector<8x8xf32> to vector<8xf32>
    %166 = vector.shape_cast %165 : vector<8xf32> to vector<8x1xf32>
    %167 = tpu.reciprocal %166 {approx = true} : vector<8x1xf32> -> vector<8x1xf32>
    %168 = vector.broadcast %167 : vector<8x1xf32> to vector<8x8xf32>
    %169 = arith.mulf %164, %168 : vector<8x8xf32>
    %170 = vector.extract_strided_slice %154 {offsets = [0, 0], sizes = [8, 8], strides = [1, 1]} : vector<8x32xf32> to vector<8x8xf32>
    %cst_61 = arith.constant dense<0.000000e+00> : vector<8x8xf32>
    %171 = tpu.matmul %169, %170, %cst_61 {dimension_numbers = #tpu.dot_dimension_numbers<[1], [0], [0], [1], [0, 0, 1, 1], [], []>} : vector<8x8xf32>, vector<8x8xf32>, vector<8x8xf32> -> vector<8x8xf32>
    %172 = vector.extract_strided_slice %152 {offsets = [0, 8], sizes = [8, 8], strides = [1, 1]} : vector<8x32xf32> to vector<8x8xf32>
    %173 = vector.extract_strided_slice %153 {offsets = [0, 8], sizes = [8, 8], strides = [1, 1]} : vector<8x32xf32> to vector<8x8xf32>
    %cst_62 = arith.constant dense<0.000000e+00> : vector<8x8xf32>
    %174 = tpu.matmul %172, %173, %cst_62 {dimension_numbers = #tpu.dot_dimension_numbers<[1], [1], [0], [0], [0, 0, 1, 0], [], []>} : vector<8x8xf32>, vector<8x8xf32>, vector<8x8xf32> -> vector<8x8xf32>
    %175 = vector.broadcast %35 : vector<1x8xf32> to vector<8x8xf32>
    %176 = arith.addf %174, %175 : vector<8x8xf32>
    %cst_63 = arith.constant dense<0xFF800000> : vector<8xf32>
    %177 = vector.multi_reduction <maximumf>, %176, %cst_63 [1] : vector<8x8xf32> to vector<8xf32>
    %178 = vector.shape_cast %177 : vector<8xf32> to vector<8x1xf32>
    %179 = vector.broadcast %178 : vector<8x1xf32> to vector<8x8xf32>
    %180 = arith.subf %176, %179 : vector<8x8xf32>
    %181 = math.exp %180 : vector<8x8xf32>
    %cst_64 = arith.constant dense<0.000000e+00> : vector<8xf32>
    %182 = vector.multi_reduction <add>, %181, %cst_64 [1] : vector<8x8xf32> to vector<8xf32>
    %183 = vector.shape_cast %182 : vector<8xf32> to vector<8x1xf32>
    %184 = tpu.reciprocal %183 {approx = true} : vector<8x1xf32> -> vector<8x1xf32>
    %185 = vector.broadcast %184 : vector<8x1xf32> to vector<8x8xf32>
    %186 = arith.mulf %181, %185 : vector<8x8xf32>
    %187 = vector.extract_strided_slice %154 {offsets = [0, 8], sizes = [8, 8], strides = [1, 1]} : vector<8x32xf32> to vector<8x8xf32>
    %cst_65 = arith.constant dense<0.000000e+00> : vector<8x8xf32>
    %188 = tpu.matmul %186, %187, %cst_65 {dimension_numbers = #tpu.dot_dimension_numbers<[1], [0], [0], [1], [0, 0, 1, 1], [], []>} : vector<8x8xf32>, vector<8x8xf32>, vector<8x8xf32> -> vector<8x8xf32>
    %189 = vector.extract_strided_slice %152 {offsets = [0, 16], sizes = [8, 8], strides = [1, 1]} : vector<8x32xf32> to vector<8x8xf32>
    %190 = vector.extract_strided_slice %153 {offsets = [0, 16], sizes = [8, 8], strides = [1, 1]} : vector<8x32xf32> to vector<8x8xf32>
    %cst_66 = arith.constant dense<0.000000e+00> : vector<8x8xf32>
    %191 = tpu.matmul %189, %190, %cst_66 {dimension_numbers = #tpu.dot_dimension_numbers<[1], [1], [0], [0], [0, 0, 1, 0], [], []>} : vector<8x8xf32>, vector<8x8xf32>, vector<8x8xf32> -> vector<8x8xf32>
    %192 = vector.broadcast %35 : vector<1x8xf32> to vector<8x8xf32>
    %193 = arith.addf %191, %192 : vector<8x8xf32>
    %cst_67 = arith.constant dense<0xFF800000> : vector<8xf32>
    %194 = vector.multi_reduction <maximumf>, %193, %cst_67 [1] : vector<8x8xf32> to vector<8xf32>
    %195 = vector.shape_cast %194 : vector<8xf32> to vector<8x1xf32>
    %196 = vector.broadcast %195 : vector<8x1xf32> to vector<8x8xf32>
    %197 = arith.subf %193, %196 : vector<8x8xf32>
    %198 = math.exp %197 : vector<8x8xf32>
    %cst_68 = arith.constant dense<0.000000e+00> : vector<8xf32>
    %199 = vector.multi_reduction <add>, %198, %cst_68 [1] : vector<8x8xf32> to vector<8xf32>
    %200 = vector.shape_cast %199 : vector<8xf32> to vector<8x1xf32>
    %201 = tpu.reciprocal %200 {approx = true} : vector<8x1xf32> -> vector<8x1xf32>
    %202 = vector.broadcast %201 : vector<8x1xf32> to vector<8x8xf32>
    %203 = arith.mulf %198, %202 : vector<8x8xf32>
    %204 = vector.extract_strided_slice %154 {offsets = [0, 16], sizes = [8, 8], strides = [1, 1]} : vector<8x32xf32> to vector<8x8xf32>
    %cst_69 = arith.constant dense<0.000000e+00> : vector<8x8xf32>
    %205 = tpu.matmul %203, %204, %cst_69 {dimension_numbers = #tpu.dot_dimension_numbers<[1], [0], [0], [1], [0, 0, 1, 1], [], []>} : vector<8x8xf32>, vector<8x8xf32>, vector<8x8xf32> -> vector<8x8xf32>
    %206 = vector.extract_strided_slice %152 {offsets = [0, 24], sizes = [8, 8], strides = [1, 1]} : vector<8x32xf32> to vector<8x8xf32>
    %207 = vector.extract_strided_slice %153 {offsets = [0, 24], sizes = [8, 8], strides = [1, 1]} : vector<8x32xf32> to vector<8x8xf32>
    %cst_70 = arith.constant dense<0.000000e+00> : vector<8x8xf32>
    %208 = tpu.matmul %206, %207, %cst_70 {dimension_numbers = #tpu.dot_dimension_numbers<[1], [1], [0], [0], [0, 0, 1, 0], [], []>} : vector<8x8xf32>, vector<8x8xf32>, vector<8x8xf32> -> vector<8x8xf32>
    %209 = vector.broadcast %35 : vector<1x8xf32> to vector<8x8xf32>
    %210 = arith.addf %208, %209 : vector<8x8xf32>
    %cst_71 = arith.constant dense<0xFF800000> : vector<8xf32>
    %211 = vector.multi_reduction <maximumf>, %210, %cst_71 [1] : vector<8x8xf32> to vector<8xf32>
    %212 = vector.shape_cast %211 : vector<8xf32> to vector<8x1xf32>
    %213 = vector.broadcast %212 : vector<8x1xf32> to vector<8x8xf32>
    %214 = arith.subf %210, %213 : vector<8x8xf32>
    %215 = math.exp %214 : vector<8x8xf32>
    %cst_72 = arith.constant dense<0.000000e+00> : vector<8xf32>
    %216 = vector.multi_reduction <add>, %215, %cst_72 [1] : vector<8x8xf32> to vector<8xf32>
    %217 = vector.shape_cast %216 : vector<8xf32> to vector<8x1xf32>
    %218 = tpu.reciprocal %217 {approx = true} : vector<8x1xf32> -> vector<8x1xf32>
    %219 = vector.broadcast %218 : vector<8x1xf32> to vector<8x8xf32>
    %220 = arith.mulf %215, %219 : vector<8x8xf32>
    %221 = vector.extract_strided_slice %154 {offsets = [0, 24], sizes = [8, 8], strides = [1, 1]} : vector<8x32xf32> to vector<8x8xf32>
    %cst_73 = arith.constant dense<0.000000e+00> : vector<8x8xf32>
    %222 = tpu.matmul %220, %221, %cst_73 {dimension_numbers = #tpu.dot_dimension_numbers<[1], [0], [0], [1], [0, 0, 1, 1], [], []>} : vector<8x8xf32>, vector<8x8xf32>, vector<8x8xf32> -> vector<8x8xf32>
    %223 = tpu.concatenate %171, %188, %205, %222 in 1 : vector<8x8xf32>, vector<8x8xf32>, vector<8x8xf32>, vector<8x8xf32> -> vector<8x32xf32>
    %224 = tpu.concatenate %151, %223 in 0 : vector<8x32xf32>, vector<8x32xf32> -> vector<16x32xf32>
    %c136 = arith.constant 136 : index
    %c0_74 = arith.constant 0 : index
    %225 = vector.load %arg4[%c136, %c0_74] : memref<1120x128xf32, #tpu.memory_space<vmem>>, vector<32x32xf32>
    %cst_75 = arith.constant dense<0.000000e+00> : vector<16x32xf32>
    %226 = tpu.matmul %224, %225, %cst_75 {dimension_numbers = #tpu.dot_dimension_numbers<[1], [0], [0], [1], [0, 0, 1, 1], [], []>} : vector<16x32xf32>, vector<32x32xf32>, vector<16x32xf32> -> vector<16x32xf32>
    %c168 = arith.constant 168 : index
    %c0_76 = arith.constant 0 : index
    %227 = vector.load %arg4[%c168, %c0_76] : memref<1120x128xf32, #tpu.memory_space<vmem>>, vector<1x32xf32>
    %228 = vector.broadcast %227 : vector<1x32xf32> to vector<16x32xf32>
    %229 = arith.addf %226, %228 : vector<16x32xf32>
    %230 = arith.addf %10, %229 : vector<16x32xf32>
    %c184 = arith.constant 184 : index
    %c0_77 = arith.constant 0 : index
    %231 = vector.load %arg4[%c184, %c0_77] : memref<1120x128xf32, #tpu.memory_space<vmem>>, vector<2x32xf32>
    %cst_78 = arith.constant dense<0.000000e+00> : vector<16xf32>
    %232 = vector.multi_reduction <add>, %230, %cst_78 [1] : vector<16x32xf32> to vector<16xf32>
    %233 = vector.shape_cast %232 : vector<16xf32> to vector<16x1xf32>
    %cst_79 = arith.constant 3.200000e+01 : f32
    %234 = vector.broadcast %cst_79 : f32 to vector<16x1xf32>
    %235 = arith.divf %233, %234 : vector<16x1xf32>
    %236 = vector.broadcast %235 : vector<16x1xf32> to vector<16x32xf32>
    %237 = arith.subf %230, %236 : vector<16x32xf32>
    %238 = arith.mulf %237, %237 : vector<16x32xf32>
    %cst_80 = arith.constant dense<0.000000e+00> : vector<16xf32>
    %239 = vector.multi_reduction <add>, %238, %cst_80 [1] : vector<16x32xf32> to vector<16xf32>
    %240 = vector.shape_cast %239 : vector<16xf32> to vector<16x1xf32>
    %cst_81 = arith.constant 3.200000e+01 : f32
    %241 = vector.broadcast %cst_81 : f32 to vector<16x1xf32>
    %242 = arith.divf %240, %241 : vector<16x1xf32>
    %243 = vector.broadcast %235 : vector<16x1xf32> to vector<16x32xf32>
    %244 = arith.subf %230, %243 : vector<16x32xf32>
    %cst_82 = arith.constant 9.99999997E-7 : f32
    %245 = vector.broadcast %cst_82 : f32 to vector<16x1xf32>
    %246 = arith.addf %242, %245 : vector<16x1xf32>
    %247 = math.rsqrt %246 : vector<16x1xf32>
    %248 = vector.broadcast %247 : vector<16x1xf32> to vector<16x32xf32>
    %249 = arith.mulf %244, %248 : vector<16x32xf32>
    %250 = vector.extract_strided_slice %231 {offsets = [0, 0], sizes = [1, 32], strides = [1, 1]} : vector<2x32xf32> to vector<1x32xf32>
    %251 = vector.broadcast %250 : vector<1x32xf32> to vector<16x32xf32>
    %252 = arith.mulf %249, %251 : vector<16x32xf32>
    %253 = vector.extract_strided_slice %231 {offsets = [1, 0], sizes = [1, 32], strides = [1, 1]} : vector<2x32xf32> to vector<1x32xf32>
    %254 = vector.broadcast %253 : vector<1x32xf32> to vector<16x32xf32>
    %255 = arith.addf %252, %254 : vector<16x32xf32>
    %c192 = arith.constant 192 : index
    %c0_83 = arith.constant 0 : index
    %256 = vector.load %arg4[%c192, %c0_83] : memref<1120x128xf32, #tpu.memory_space<vmem>>, vector<32x64xf32>
    %cst_84 = arith.constant dense<0.000000e+00> : vector<16x64xf32>
    %257 = tpu.matmul %255, %256, %cst_84 {dimension_numbers = #tpu.dot_dimension_numbers<[1], [0], [0], [1], [0, 0, 1, 1], [], []>} : vector<16x32xf32>, vector<32x64xf32>, vector<16x64xf32> -> vector<16x64xf32>
    %c224 = arith.constant 224 : index
    %c0_85 = arith.constant 0 : index
    %258 = vector.load %arg4[%c224, %c0_85] : memref<1120x128xf32, #tpu.memory_space<vmem>>, vector<1x64xf32>
    %259 = vector.broadcast %258 : vector<1x64xf32> to vector<16x64xf32>
    %260 = arith.addf %257, %259 : vector<16x64xf32>
    %cst_86 = arith.constant 0.000000e+00 : f32
    %261 = vector.broadcast %cst_86 : f32 to vector<16x64xf32>
    %262 = arith.maximumf %260, %261 : vector<16x64xf32>
    %c232 = arith.constant 232 : index
    %c0_87 = arith.constant 0 : index
    %263 = vector.load %arg4[%c232, %c0_87] : memref<1120x128xf32, #tpu.memory_space<vmem>>, vector<64x32xf32>
    %cst_88 = arith.constant dense<0.000000e+00> : vector<16x32xf32>
    %264 = tpu.matmul %262, %263, %cst_88 {dimension_numbers = #tpu.dot_dimension_numbers<[1], [0], [0], [1], [0, 0, 1, 1], [], []>} : vector<16x64xf32>, vector<64x32xf32>, vector<16x32xf32> -> vector<16x32xf32>
    %c296 = arith.constant 296 : index
    %c0_89 = arith.constant 0 : index
    %265 = vector.load %arg4[%c296, %c0_89] : memref<1120x128xf32, #tpu.memory_space<vmem>>, vector<1x32xf32>
    %266 = vector.broadcast %265 : vector<1x32xf32> to vector<16x32xf32>
    %267 = arith.addf %264, %266 : vector<16x32xf32>
    %268 = arith.addf %230, %267 : vector<16x32xf32>
    %c384 = arith.constant 384 : index
    %c0_90 = arith.constant 0 : index
    %269 = vector.load %arg4[%c384, %c0_90] : memref<1120x128xf32, #tpu.memory_space<vmem>>, vector<2x32xf32>
    %cst_91 = arith.constant dense<0.000000e+00> : vector<16xf32>
    %270 = vector.multi_reduction <add>, %268, %cst_91 [1] : vector<16x32xf32> to vector<16xf32>
    %271 = vector.shape_cast %270 : vector<16xf32> to vector<16x1xf32>
    %cst_92 = arith.constant 3.200000e+01 : f32
    %272 = vector.broadcast %cst_92 : f32 to vector<16x1xf32>
    %273 = arith.divf %271, %272 : vector<16x1xf32>
    %274 = vector.broadcast %273 : vector<16x1xf32> to vector<16x32xf32>
    %275 = arith.subf %268, %274 : vector<16x32xf32>
    %276 = arith.mulf %275, %275 : vector<16x32xf32>
    %cst_93 = arith.constant dense<0.000000e+00> : vector<16xf32>
    %277 = vector.multi_reduction <add>, %276, %cst_93 [1] : vector<16x32xf32> to vector<16xf32>
    %278 = vector.shape_cast %277 : vector<16xf32> to vector<16x1xf32>
    %cst_94 = arith.constant 3.200000e+01 : f32
    %279 = vector.broadcast %cst_94 : f32 to vector<16x1xf32>
    %280 = arith.divf %278, %279 : vector<16x1xf32>
    %281 = vector.broadcast %273 : vector<16x1xf32> to vector<16x32xf32>
    %282 = arith.subf %268, %281 : vector<16x32xf32>
    %cst_95 = arith.constant 9.99999997E-7 : f32
    %283 = vector.broadcast %cst_95 : f32 to vector<16x1xf32>
    %284 = arith.addf %280, %283 : vector<16x1xf32>
    %285 = math.rsqrt %284 : vector<16x1xf32>
    %286 = vector.broadcast %285 : vector<16x1xf32> to vector<16x32xf32>
    %287 = arith.mulf %282, %286 : vector<16x32xf32>
    %288 = vector.extract_strided_slice %269 {offsets = [0, 0], sizes = [1, 32], strides = [1, 1]} : vector<2x32xf32> to vector<1x32xf32>
    %289 = vector.broadcast %288 : vector<1x32xf32> to vector<16x32xf32>
    %290 = arith.mulf %287, %289 : vector<16x32xf32>
    %291 = vector.extract_strided_slice %269 {offsets = [1, 0], sizes = [1, 32], strides = [1, 1]} : vector<2x32xf32> to vector<1x32xf32>
    %292 = vector.broadcast %291 : vector<1x32xf32> to vector<16x32xf32>
    %293 = arith.addf %290, %292 : vector<16x32xf32>
    %c304 = arith.constant 304 : index
    %c0_96 = arith.constant 0 : index
    %294 = vector.load %arg4[%c304, %c0_96] : memref<1120x128xf32, #tpu.memory_space<vmem>>, vector<32x96xf32>
    %cst_97 = arith.constant dense<0.000000e+00> : vector<16x96xf32>
    %295 = tpu.matmul %293, %294, %cst_97 {dimension_numbers = #tpu.dot_dimension_numbers<[1], [0], [0], [1], [0, 0, 1, 1], [], []>} : vector<16x32xf32>, vector<32x96xf32>, vector<16x96xf32> -> vector<16x96xf32>
    %c336 = arith.constant 336 : index
    %c0_98 = arith.constant 0 : index
    %296 = vector.load %arg4[%c336, %c0_98] : memref<1120x128xf32, #tpu.memory_space<vmem>>, vector<1x96xf32>
    %297 = vector.broadcast %296 : vector<1x96xf32> to vector<16x96xf32>
    %298 = arith.addf %295, %297 : vector<16x96xf32>
    %299 = vector.extract_strided_slice %298 {offsets = [0, 0], sizes = [8, 32], strides = [1, 1]} : vector<16x96xf32> to vector<8x32xf32>
    %300 = vector.extract_strided_slice %298 {offsets = [0, 32], sizes = [8, 32], strides = [1, 1]} : vector<16x96xf32> to vector<8x32xf32>
    %301 = vector.extract_strided_slice %298 {offsets = [0, 64], sizes = [8, 32], strides = [1, 1]} : vector<16x96xf32> to vector<8x32xf32>
    %302 = vector.extract_strided_slice %299 {offsets = [0, 0], sizes = [8, 8], strides = [1, 1]} : vector<8x32xf32> to vector<8x8xf32>
    %303 = vector.extract_strided_slice %300 {offsets = [0, 0], sizes = [8, 8], strides = [1, 1]} : vector<8x32xf32> to vector<8x8xf32>
    %cst_99 = arith.constant dense<0.000000e+00> : vector<8x8xf32>
    %304 = tpu.matmul %302, %303, %cst_99 {dimension_numbers = #tpu.dot_dimension_numbers<[1], [1], [0], [0], [0, 0, 1, 0], [], []>} : vector<8x8xf32>, vector<8x8xf32>, vector<8x8xf32> -> vector<8x8xf32>
    %305 = vector.broadcast %28 : vector<1x8xf32> to vector<8x8xf32>
    %306 = arith.addf %304, %305 : vector<8x8xf32>
    %cst_100 = arith.constant dense<0xFF800000> : vector<8xf32>
    %307 = vector.multi_reduction <maximumf>, %306, %cst_100 [1] : vector<8x8xf32> to vector<8xf32>
    %308 = vector.shape_cast %307 : vector<8xf32> to vector<8x1xf32>
    %309 = vector.broadcast %308 : vector<8x1xf32> to vector<8x8xf32>
    %310 = arith.subf %306, %309 : vector<8x8xf32>
    %311 = math.exp %310 : vector<8x8xf32>
    %cst_101 = arith.constant dense<0.000000e+00> : vector<8xf32>
    %312 = vector.multi_reduction <add>, %311, %cst_101 [1] : vector<8x8xf32> to vector<8xf32>
    %313 = vector.shape_cast %312 : vector<8xf32> to vector<8x1xf32>
    %314 = tpu.reciprocal %313 {approx = true} : vector<8x1xf32> -> vector<8x1xf32>
    %315 = vector.broadcast %314 : vector<8x1xf32> to vector<8x8xf32>
    %316 = arith.mulf %311, %315 : vector<8x8xf32>
    %317 = vector.extract_strided_slice %301 {offsets = [0, 0], sizes = [8, 8], strides = [1, 1]} : vector<8x32xf32> to vector<8x8xf32>
    %cst_102 = arith.constant dense<0.000000e+00> : vector<8x8xf32>
    %318 = tpu.matmul %316, %317, %cst_102 {dimension_numbers = #tpu.dot_dimension_numbers<[1], [0], [0], [1], [0, 0, 1, 1], [], []>} : vector<8x8xf32>, vector<8x8xf32>, vector<8x8xf32> -> vector<8x8xf32>
    %319 = vector.extract_strided_slice %299 {offsets = [0, 8], sizes = [8, 8], strides = [1, 1]} : vector<8x32xf32> to vector<8x8xf32>
    %320 = vector.extract_strided_slice %300 {offsets = [0, 8], sizes = [8, 8], strides = [1, 1]} : vector<8x32xf32> to vector<8x8xf32>
    %cst_103 = arith.constant dense<0.000000e+00> : vector<8x8xf32>
    %321 = tpu.matmul %319, %320, %cst_103 {dimension_numbers = #tpu.dot_dimension_numbers<[1], [1], [0], [0], [0, 0, 1, 0], [], []>} : vector<8x8xf32>, vector<8x8xf32>, vector<8x8xf32> -> vector<8x8xf32>
    %322 = vector.broadcast %28 : vector<1x8xf32> to vector<8x8xf32>
    %323 = arith.addf %321, %322 : vector<8x8xf32>
    %cst_104 = arith.constant dense<0xFF800000> : vector<8xf32>
    %324 = vector.multi_reduction <maximumf>, %323, %cst_104 [1] : vector<8x8xf32> to vector<8xf32>
    %325 = vector.shape_cast %324 : vector<8xf32> to vector<8x1xf32>
    %326 = vector.broadcast %325 : vector<8x1xf32> to vector<8x8xf32>
    %327 = arith.subf %323, %326 : vector<8x8xf32>
    %328 = math.exp %327 : vector<8x8xf32>
    %cst_105 = arith.constant dense<0.000000e+00> : vector<8xf32>
    %329 = vector.multi_reduction <add>, %328, %cst_105 [1] : vector<8x8xf32> to vector<8xf32>
    %330 = vector.shape_cast %329 : vector<8xf32> to vector<8x1xf32>
    %331 = tpu.reciprocal %330 {approx = true} : vector<8x1xf32> -> vector<8x1xf32>
    %332 = vector.broadcast %331 : vector<8x1xf32> to vector<8x8xf32>
    %333 = arith.mulf %328, %332 : vector<8x8xf32>
    %334 = vector.extract_strided_slice %301 {offsets = [0, 8], sizes = [8, 8], strides = [1, 1]} : vector<8x32xf32> to vector<8x8xf32>
    %cst_106 = arith.constant dense<0.000000e+00> : vector<8x8xf32>
    %335 = tpu.matmul %333, %334, %cst_106 {dimension_numbers = #tpu.dot_dimension_numbers<[1], [0], [0], [1], [0, 0, 1, 1], [], []>} : vector<8x8xf32>, vector<8x8xf32>, vector<8x8xf32> -> vector<8x8xf32>
    %336 = vector.extract_strided_slice %299 {offsets = [0, 16], sizes = [8, 8], strides = [1, 1]} : vector<8x32xf32> to vector<8x8xf32>
    %337 = vector.extract_strided_slice %300 {offsets = [0, 16], sizes = [8, 8], strides = [1, 1]} : vector<8x32xf32> to vector<8x8xf32>
    %cst_107 = arith.constant dense<0.000000e+00> : vector<8x8xf32>
    %338 = tpu.matmul %336, %337, %cst_107 {dimension_numbers = #tpu.dot_dimension_numbers<[1], [1], [0], [0], [0, 0, 1, 0], [], []>} : vector<8x8xf32>, vector<8x8xf32>, vector<8x8xf32> -> vector<8x8xf32>
    %339 = vector.broadcast %28 : vector<1x8xf32> to vector<8x8xf32>
    %340 = arith.addf %338, %339 : vector<8x8xf32>
    %cst_108 = arith.constant dense<0xFF800000> : vector<8xf32>
    %341 = vector.multi_reduction <maximumf>, %340, %cst_108 [1] : vector<8x8xf32> to vector<8xf32>
    %342 = vector.shape_cast %341 : vector<8xf32> to vector<8x1xf32>
    %343 = vector.broadcast %342 : vector<8x1xf32> to vector<8x8xf32>
    %344 = arith.subf %340, %343 : vector<8x8xf32>
    %345 = math.exp %344 : vector<8x8xf32>
    %cst_109 = arith.constant dense<0.000000e+00> : vector<8xf32>
    %346 = vector.multi_reduction <add>, %345, %cst_109 [1] : vector<8x8xf32> to vector<8xf32>
    %347 = vector.shape_cast %346 : vector<8xf32> to vector<8x1xf32>
    %348 = tpu.reciprocal %347 {approx = true} : vector<8x1xf32> -> vector<8x1xf32>
    %349 = vector.broadcast %348 : vector<8x1xf32> to vector<8x8xf32>
    %350 = arith.mulf %345, %349 : vector<8x8xf32>
    %351 = vector.extract_strided_slice %301 {offsets = [0, 16], sizes = [8, 8], strides = [1, 1]} : vector<8x32xf32> to vector<8x8xf32>
    %cst_110 = arith.constant dense<0.000000e+00> : vector<8x8xf32>
    %352 = tpu.matmul %350, %351, %cst_110 {dimension_numbers = #tpu.dot_dimension_numbers<[1], [0], [0], [1], [0, 0, 1, 1], [], []>} : vector<8x8xf32>, vector<8x8xf32>, vector<8x8xf32> -> vector<8x8xf32>
    %353 = vector.extract_strided_slice %299 {offsets = [0, 24], sizes = [8, 8], strides = [1, 1]} : vector<8x32xf32> to vector<8x8xf32>
    %354 = vector.extract_strided_slice %300 {offsets = [0, 24], sizes = [8, 8], strides = [1, 1]} : vector<8x32xf32> to vector<8x8xf32>
    %cst_111 = arith.constant dense<0.000000e+00> : vector<8x8xf32>
    %355 = tpu.matmul %353, %354, %cst_111 {dimension_numbers = #tpu.dot_dimension_numbers<[1], [1], [0], [0], [0, 0, 1, 0], [], []>} : vector<8x8xf32>, vector<8x8xf32>, vector<8x8xf32> -> vector<8x8xf32>
    %356 = vector.broadcast %28 : vector<1x8xf32> to vector<8x8xf32>
    %357 = arith.addf %355, %356 : vector<8x8xf32>
    %cst_112 = arith.constant dense<0xFF800000> : vector<8xf32>
    %358 = vector.multi_reduction <maximumf>, %357, %cst_112 [1] : vector<8x8xf32> to vector<8xf32>
    %359 = vector.shape_cast %358 : vector<8xf32> to vector<8x1xf32>
    %360 = vector.broadcast %359 : vector<8x1xf32> to vector<8x8xf32>
    %361 = arith.subf %357, %360 : vector<8x8xf32>
    %362 = math.exp %361 : vector<8x8xf32>
    %cst_113 = arith.constant dense<0.000000e+00> : vector<8xf32>
    %363 = vector.multi_reduction <add>, %362, %cst_113 [1] : vector<8x8xf32> to vector<8xf32>
    %364 = vector.shape_cast %363 : vector<8xf32> to vector<8x1xf32>
    %365 = tpu.reciprocal %364 {approx = true} : vector<8x1xf32> -> vector<8x1xf32>
    %366 = vector.broadcast %365 : vector<8x1xf32> to vector<8x8xf32>
    %367 = arith.mulf %362, %366 : vector<8x8xf32>
    %368 = vector.extract_strided_slice %301 {offsets = [0, 24], sizes = [8, 8], strides = [1, 1]} : vector<8x32xf32> to vector<8x8xf32>
    %cst_114 = arith.constant dense<0.000000e+00> : vector<8x8xf32>
    %369 = tpu.matmul %367, %368, %cst_114 {dimension_numbers = #tpu.dot_dimension_numbers<[1], [0], [0], [1], [0, 0, 1, 1], [], []>} : vector<8x8xf32>, vector<8x8xf32>, vector<8x8xf32> -> vector<8x8xf32>
    %370 = tpu.concatenate %318, %335, %352, %369 in 1 : vector<8x8xf32>, vector<8x8xf32>, vector<8x8xf32>, vector<8x8xf32> -> vector<8x32xf32>
    %371 = vector.extract_strided_slice %298 {offsets = [8, 0], sizes = [8, 32], strides = [1, 1]} : vector<16x96xf32> to vector<8x32xf32>
    %372 = vector.extract_strided_slice %298 {offsets = [8, 32], sizes = [8, 32], strides = [1, 1]} : vector<16x96xf32> to vector<8x32xf32>
    %373 = vector.extract_strided_slice %298 {offsets = [8, 64], sizes = [8, 32], strides = [1, 1]} : vector<16x96xf32> to vector<8x32xf32>
    %374 = vector.extract_strided_slice %371 {offsets = [0, 0], sizes = [8, 8], strides = [1, 1]} : vector<8x32xf32> to vector<8x8xf32>
    %375 = vector.extract_strided_slice %372 {offsets = [0, 0], sizes = [8, 8], strides = [1, 1]} : vector<8x32xf32> to vector<8x8xf32>
    %cst_115 = arith.constant dense<0.000000e+00> : vector<8x8xf32>
    %376 = tpu.matmul %374, %375, %cst_115 {dimension_numbers = #tpu.dot_dimension_numbers<[1], [1], [0], [0], [0, 0, 1, 0], [], []>} : vector<8x8xf32>, vector<8x8xf32>, vector<8x8xf32> -> vector<8x8xf32>
    %377 = vector.broadcast %35 : vector<1x8xf32> to vector<8x8xf32>
    %378 = arith.addf %376, %377 : vector<8x8xf32>
    %cst_116 = arith.constant dense<0xFF800000> : vector<8xf32>
    %379 = vector.multi_reduction <maximumf>, %378, %cst_116 [1] : vector<8x8xf32> to vector<8xf32>
    %380 = vector.shape_cast %379 : vector<8xf32> to vector<8x1xf32>
    %381 = vector.broadcast %380 : vector<8x1xf32> to vector<8x8xf32>
    %382 = arith.subf %378, %381 : vector<8x8xf32>
    %383 = math.exp %382 : vector<8x8xf32>
    %cst_117 = arith.constant dense<0.000000e+00> : vector<8xf32>
    %384 = vector.multi_reduction <add>, %383, %cst_117 [1] : vector<8x8xf32> to vector<8xf32>
    %385 = vector.shape_cast %384 : vector<8xf32> to vector<8x1xf32>
    %386 = tpu.reciprocal %385 {approx = true} : vector<8x1xf32> -> vector<8x1xf32>
    %387 = vector.broadcast %386 : vector<8x1xf32> to vector<8x8xf32>
    %388 = arith.mulf %383, %387 : vector<8x8xf32>
    %389 = vector.extract_strided_slice %373 {offsets = [0, 0], sizes = [8, 8], strides = [1, 1]} : vector<8x32xf32> to vector<8x8xf32>
    %cst_118 = arith.constant dense<0.000000e+00> : vector<8x8xf32>
    %390 = tpu.matmul %388, %389, %cst_118 {dimension_numbers = #tpu.dot_dimension_numbers<[1], [0], [0], [1], [0, 0, 1, 1], [], []>} : vector<8x8xf32>, vector<8x8xf32>, vector<8x8xf32> -> vector<8x8xf32>
    %391 = vector.extract_strided_slice %371 {offsets = [0, 8], sizes = [8, 8], strides = [1, 1]} : vector<8x32xf32> to vector<8x8xf32>
    %392 = vector.extract_strided_slice %372 {offsets = [0, 8], sizes = [8, 8], strides = [1, 1]} : vector<8x32xf32> to vector<8x8xf32>
    %cst_119 = arith.constant dense<0.000000e+00> : vector<8x8xf32>
    %393 = tpu.matmul %391, %392, %cst_119 {dimension_numbers = #tpu.dot_dimension_numbers<[1], [1], [0], [0], [0, 0, 1, 0], [], []>} : vector<8x8xf32>, vector<8x8xf32>, vector<8x8xf32> -> vector<8x8xf32>
    %394 = vector.broadcast %35 : vector<1x8xf32> to vector<8x8xf32>
    %395 = arith.addf %393, %394 : vector<8x8xf32>
    %cst_120 = arith.constant dense<0xFF800000> : vector<8xf32>
    %396 = vector.multi_reduction <maximumf>, %395, %cst_120 [1] : vector<8x8xf32> to vector<8xf32>
    %397 = vector.shape_cast %396 : vector<8xf32> to vector<8x1xf32>
    %398 = vector.broadcast %397 : vector<8x1xf32> to vector<8x8xf32>
    %399 = arith.subf %395, %398 : vector<8x8xf32>
    %400 = math.exp %399 : vector<8x8xf32>
    %cst_121 = arith.constant dense<0.000000e+00> : vector<8xf32>
    %401 = vector.multi_reduction <add>, %400, %cst_121 [1] : vector<8x8xf32> to vector<8xf32>
    %402 = vector.shape_cast %401 : vector<8xf32> to vector<8x1xf32>
    %403 = tpu.reciprocal %402 {approx = true} : vector<8x1xf32> -> vector<8x1xf32>
    %404 = vector.broadcast %403 : vector<8x1xf32> to vector<8x8xf32>
    %405 = arith.mulf %400, %404 : vector<8x8xf32>
    %406 = vector.extract_strided_slice %373 {offsets = [0, 8], sizes = [8, 8], strides = [1, 1]} : vector<8x32xf32> to vector<8x8xf32>
    %cst_122 = arith.constant dense<0.000000e+00> : vector<8x8xf32>
    %407 = tpu.matmul %405, %406, %cst_122 {dimension_numbers = #tpu.dot_dimension_numbers<[1], [0], [0], [1], [0, 0, 1, 1], [], []>} : vector<8x8xf32>, vector<8x8xf32>, vector<8x8xf32> -> vector<8x8xf32>
    %408 = vector.extract_strided_slice %371 {offsets = [0, 16], sizes = [8, 8], strides = [1, 1]} : vector<8x32xf32> to vector<8x8xf32>
    %409 = vector.extract_strided_slice %372 {offsets = [0, 16], sizes = [8, 8], strides = [1, 1]} : vector<8x32xf32> to vector<8x8xf32>
    %cst_123 = arith.constant dense<0.000000e+00> : vector<8x8xf32>
    %410 = tpu.matmul %408, %409, %cst_123 {dimension_numbers = #tpu.dot_dimension_numbers<[1], [1], [0], [0], [0, 0, 1, 0], [], []>} : vector<8x8xf32>, vector<8x8xf32>, vector<8x8xf32> -> vector<8x8xf32>
    %411 = vector.broadcast %35 : vector<1x8xf32> to vector<8x8xf32>
    %412 = arith.addf %410, %411 : vector<8x8xf32>
    %cst_124 = arith.constant dense<0xFF800000> : vector<8xf32>
    %413 = vector.multi_reduction <maximumf>, %412, %cst_124 [1] : vector<8x8xf32> to vector<8xf32>
    %414 = vector.shape_cast %413 : vector<8xf32> to vector<8x1xf32>
    %415 = vector.broadcast %414 : vector<8x1xf32> to vector<8x8xf32>
    %416 = arith.subf %412, %415 : vector<8x8xf32>
    %417 = math.exp %416 : vector<8x8xf32>
    %cst_125 = arith.constant dense<0.000000e+00> : vector<8xf32>
    %418 = vector.multi_reduction <add>, %417, %cst_125 [1] : vector<8x8xf32> to vector<8xf32>
    %419 = vector.shape_cast %418 : vector<8xf32> to vector<8x1xf32>
    %420 = tpu.reciprocal %419 {approx = true} : vector<8x1xf32> -> vector<8x1xf32>
    %421 = vector.broadcast %420 : vector<8x1xf32> to vector<8x8xf32>
    %422 = arith.mulf %417, %421 : vector<8x8xf32>
    %423 = vector.extract_strided_slice %373 {offsets = [0, 16], sizes = [8, 8], strides = [1, 1]} : vector<8x32xf32> to vector<8x8xf32>
    %cst_126 = arith.constant dense<0.000000e+00> : vector<8x8xf32>
    %424 = tpu.matmul %422, %423, %cst_126 {dimension_numbers = #tpu.dot_dimension_numbers<[1], [0], [0], [1], [0, 0, 1, 1], [], []>} : vector<8x8xf32>, vector<8x8xf32>, vector<8x8xf32> -> vector<8x8xf32>
    %425 = vector.extract_strided_slice %371 {offsets = [0, 24], sizes = [8, 8], strides = [1, 1]} : vector<8x32xf32> to vector<8x8xf32>
    %426 = vector.extract_strided_slice %372 {offsets = [0, 24], sizes = [8, 8], strides = [1, 1]} : vector<8x32xf32> to vector<8x8xf32>
    %cst_127 = arith.constant dense<0.000000e+00> : vector<8x8xf32>
    %427 = tpu.matmul %425, %426, %cst_127 {dimension_numbers = #tpu.dot_dimension_numbers<[1], [1], [0], [0], [0, 0, 1, 0], [], []>} : vector<8x8xf32>, vector<8x8xf32>, vector<8x8xf32> -> vector<8x8xf32>
    %428 = vector.broadcast %35 : vector<1x8xf32> to vector<8x8xf32>
    %429 = arith.addf %427, %428 : vector<8x8xf32>
    %cst_128 = arith.constant dense<0xFF800000> : vector<8xf32>
    %430 = vector.multi_reduction <maximumf>, %429, %cst_128 [1] : vector<8x8xf32> to vector<8xf32>
    %431 = vector.shape_cast %430 : vector<8xf32> to vector<8x1xf32>
    %432 = vector.broadcast %431 : vector<8x1xf32> to vector<8x8xf32>
    %433 = arith.subf %429, %432 : vector<8x8xf32>
    %434 = math.exp %433 : vector<8x8xf32>
    %cst_129 = arith.constant dense<0.000000e+00> : vector<8xf32>
    %435 = vector.multi_reduction <add>, %434, %cst_129 [1] : vector<8x8xf32> to vector<8xf32>
    %436 = vector.shape_cast %435 : vector<8xf32> to vector<8x1xf32>
    %437 = tpu.reciprocal %436 {approx = true} : vector<8x1xf32> -> vector<8x1xf32>
    %438 = vector.broadcast %437 : vector<8x1xf32> to vector<8x8xf32>
    %439 = arith.mulf %434, %438 : vector<8x8xf32>
    %440 = vector.extract_strided_slice %373 {offsets = [0, 24], sizes = [8, 8], strides = [1, 1]} : vector<8x32xf32> to vector<8x8xf32>
    %cst_130 = arith.constant dense<0.000000e+00> : vector<8x8xf32>
    %441 = tpu.matmul %439, %440, %cst_130 {dimension_numbers = #tpu.dot_dimension_numbers<[1], [0], [0], [1], [0, 0, 1, 1], [], []>} : vector<8x8xf32>, vector<8x8xf32>, vector<8x8xf32> -> vector<8x8xf32>
    %442 = tpu.concatenate %390, %407, %424, %441 in 1 : vector<8x8xf32>, vector<8x8xf32>, vector<8x8xf32>, vector<8x8xf32> -> vector<8x32xf32>
    %443 = tpu.concatenate %370, %442 in 0 : vector<8x32xf32>, vector<8x32xf32> -> vector<16x32xf32>
    %c344 = arith.constant 344 : index
    %c0_131 = arith.constant 0 : index
    %444 = vector.load %arg4[%c344, %c0_131] : memref<1120x128xf32, #tpu.memory_space<vmem>>, vector<32x32xf32>
    %cst_132 = arith.constant dense<0.000000e+00> : vector<16x32xf32>
    %445 = tpu.matmul %443, %444, %cst_132 {dimension_numbers = #tpu.dot_dimension_numbers<[1], [0], [0], [1], [0, 0, 1, 1], [], []>} : vector<16x32xf32>, vector<32x32xf32>, vector<16x32xf32> -> vector<16x32xf32>
    %c376 = arith.constant 376 : index
    %c0_133 = arith.constant 0 : index
    %446 = vector.load %arg4[%c376, %c0_133] : memref<1120x128xf32, #tpu.memory_space<vmem>>, vector<1x32xf32>
    %447 = vector.broadcast %446 : vector<1x32xf32> to vector<16x32xf32>
    %448 = arith.addf %445, %447 : vector<16x32xf32>
    %449 = arith.addf %268, %448 : vector<16x32xf32>
    %c392 = arith.constant 392 : index
    %c0_134 = arith.constant 0 : index
    %450 = vector.load %arg4[%c392, %c0_134] : memref<1120x128xf32, #tpu.memory_space<vmem>>, vector<2x32xf32>
    %cst_135 = arith.constant dense<0.000000e+00> : vector<16xf32>
    %451 = vector.multi_reduction <add>, %449, %cst_135 [1] : vector<16x32xf32> to vector<16xf32>
    %452 = vector.shape_cast %451 : vector<16xf32> to vector<16x1xf32>
    %cst_136 = arith.constant 3.200000e+01 : f32
    %453 = vector.broadcast %cst_136 : f32 to vector<16x1xf32>
    %454 = arith.divf %452, %453 : vector<16x1xf32>
    %455 = vector.broadcast %454 : vector<16x1xf32> to vector<16x32xf32>
    %456 = arith.subf %449, %455 : vector<16x32xf32>
    %457 = arith.mulf %456, %456 : vector<16x32xf32>
    %cst_137 = arith.constant dense<0.000000e+00> : vector<16xf32>
    %458 = vector.multi_reduction <add>, %457, %cst_137 [1] : vector<16x32xf32> to vector<16xf32>
    %459 = vector.shape_cast %458 : vector<16xf32> to vector<16x1xf32>
    %cst_138 = arith.constant 3.200000e+01 : f32
    %460 = vector.broadcast %cst_138 : f32 to vector<16x1xf32>
    %461 = arith.divf %459, %460 : vector<16x1xf32>
    %462 = vector.broadcast %454 : vector<16x1xf32> to vector<16x32xf32>
    %463 = arith.subf %449, %462 : vector<16x32xf32>
    %cst_139 = arith.constant 9.99999997E-7 : f32
    %464 = vector.broadcast %cst_139 : f32 to vector<16x1xf32>
    %465 = arith.addf %461, %464 : vector<16x1xf32>
    %466 = math.rsqrt %465 : vector<16x1xf32>
    %467 = vector.broadcast %466 : vector<16x1xf32> to vector<16x32xf32>
    %468 = arith.mulf %463, %467 : vector<16x32xf32>
    %469 = vector.extract_strided_slice %450 {offsets = [0, 0], sizes = [1, 32], strides = [1, 1]} : vector<2x32xf32> to vector<1x32xf32>
    %470 = vector.broadcast %469 : vector<1x32xf32> to vector<16x32xf32>
    %471 = arith.mulf %468, %470 : vector<16x32xf32>
    %472 = vector.extract_strided_slice %450 {offsets = [1, 0], sizes = [1, 32], strides = [1, 1]} : vector<2x32xf32> to vector<1x32xf32>
    %473 = vector.broadcast %472 : vector<1x32xf32> to vector<16x32xf32>
    %474 = arith.addf %471, %473 : vector<16x32xf32>
    %c400 = arith.constant 400 : index
    %c0_140 = arith.constant 0 : index
    %475 = vector.load %arg4[%c400, %c0_140] : memref<1120x128xf32, #tpu.memory_space<vmem>>, vector<32x64xf32>
    %cst_141 = arith.constant dense<0.000000e+00> : vector<16x64xf32>
    %476 = tpu.matmul %474, %475, %cst_141 {dimension_numbers = #tpu.dot_dimension_numbers<[1], [0], [0], [1], [0, 0, 1, 1], [], []>} : vector<16x32xf32>, vector<32x64xf32>, vector<16x64xf32> -> vector<16x64xf32>
    %c432 = arith.constant 432 : index
    %c0_142 = arith.constant 0 : index
    %477 = vector.load %arg4[%c432, %c0_142] : memref<1120x128xf32, #tpu.memory_space<vmem>>, vector<1x64xf32>
    %478 = vector.broadcast %477 : vector<1x64xf32> to vector<16x64xf32>
    %479 = arith.addf %476, %478 : vector<16x64xf32>
    %cst_143 = arith.constant 0.000000e+00 : f32
    %480 = vector.broadcast %cst_143 : f32 to vector<16x64xf32>
    %481 = arith.maximumf %479, %480 : vector<16x64xf32>
    %c440 = arith.constant 440 : index
    %c0_144 = arith.constant 0 : index
    %482 = vector.load %arg4[%c440, %c0_144] : memref<1120x128xf32, #tpu.memory_space<vmem>>, vector<64x32xf32>
    %cst_145 = arith.constant dense<0.000000e+00> : vector<16x32xf32>
    %483 = tpu.matmul %481, %482, %cst_145 {dimension_numbers = #tpu.dot_dimension_numbers<[1], [0], [0], [1], [0, 0, 1, 1], [], []>} : vector<16x64xf32>, vector<64x32xf32>, vector<16x32xf32> -> vector<16x32xf32>
    %c504 = arith.constant 504 : index
    %c0_146 = arith.constant 0 : index
    %484 = vector.load %arg4[%c504, %c0_146] : memref<1120x128xf32, #tpu.memory_space<vmem>>, vector<1x32xf32>
    %485 = vector.broadcast %484 : vector<1x32xf32> to vector<16x32xf32>
    %486 = arith.addf %483, %485 : vector<16x32xf32>
    %487 = arith.addf %449, %486 : vector<16x32xf32>
    %c512 = arith.constant 512 : index
    %c0_147 = arith.constant 0 : index
    %488 = vector.load %arg4[%c512, %c0_147] : memref<1120x128xf32, #tpu.memory_space<vmem>>, vector<2x32xf32>
    %cst_148 = arith.constant dense<0.000000e+00> : vector<16xf32>
    %489 = vector.multi_reduction <add>, %487, %cst_148 [1] : vector<16x32xf32> to vector<16xf32>
    %490 = vector.shape_cast %489 : vector<16xf32> to vector<16x1xf32>
    %cst_149 = arith.constant 3.200000e+01 : f32
    %491 = vector.broadcast %cst_149 : f32 to vector<16x1xf32>
    %492 = arith.divf %490, %491 : vector<16x1xf32>
    %493 = vector.broadcast %492 : vector<16x1xf32> to vector<16x32xf32>
    %494 = arith.subf %487, %493 : vector<16x32xf32>
    %495 = arith.mulf %494, %494 : vector<16x32xf32>
    %cst_150 = arith.constant dense<0.000000e+00> : vector<16xf32>
    %496 = vector.multi_reduction <add>, %495, %cst_150 [1] : vector<16x32xf32> to vector<16xf32>
    %497 = vector.shape_cast %496 : vector<16xf32> to vector<16x1xf32>
    %cst_151 = arith.constant 3.200000e+01 : f32
    %498 = vector.broadcast %cst_151 : f32 to vector<16x1xf32>
    %499 = arith.divf %497, %498 : vector<16x1xf32>
    %500 = vector.broadcast %492 : vector<16x1xf32> to vector<16x32xf32>
    %501 = arith.subf %487, %500 : vector<16x32xf32>
    %cst_152 = arith.constant 9.99999997E-7 : f32
    %502 = vector.broadcast %cst_152 : f32 to vector<16x1xf32>
    %503 = arith.addf %499, %502 : vector<16x1xf32>
    %504 = math.rsqrt %503 : vector<16x1xf32>
    %505 = vector.broadcast %504 : vector<16x1xf32> to vector<16x32xf32>
    %506 = arith.mulf %501, %505 : vector<16x32xf32>
    %507 = vector.extract_strided_slice %488 {offsets = [0, 0], sizes = [1, 32], strides = [1, 1]} : vector<2x32xf32> to vector<1x32xf32>
    %508 = vector.broadcast %507 : vector<1x32xf32> to vector<16x32xf32>
    %509 = arith.mulf %506, %508 : vector<16x32xf32>
    %510 = vector.extract_strided_slice %488 {offsets = [1, 0], sizes = [1, 32], strides = [1, 1]} : vector<2x32xf32> to vector<1x32xf32>
    %511 = vector.broadcast %510 : vector<1x32xf32> to vector<16x32xf32>
    %512 = arith.addf %509, %511 : vector<16x32xf32>
    %c680 = arith.constant 680 : index
    %c0_153 = arith.constant 0 : index
    %513 = vector.load %arg4[%c680, %c0_153] : memref<1120x128xf32, #tpu.memory_space<vmem>>, vector<2x32xf32>
    %cst_154 = arith.constant dense<0.000000e+00> : vector<16xf32>
    %514 = vector.multi_reduction <add>, %21, %cst_154 [1] : vector<16x32xf32> to vector<16xf32>
    %515 = vector.shape_cast %514 : vector<16xf32> to vector<16x1xf32>
    %cst_155 = arith.constant 3.200000e+01 : f32
    %516 = vector.broadcast %cst_155 : f32 to vector<16x1xf32>
    %517 = arith.divf %515, %516 : vector<16x1xf32>
    %518 = vector.broadcast %517 : vector<16x1xf32> to vector<16x32xf32>
    %519 = arith.subf %21, %518 : vector<16x32xf32>
    %520 = arith.mulf %519, %519 : vector<16x32xf32>
    %cst_156 = arith.constant dense<0.000000e+00> : vector<16xf32>
    %521 = vector.multi_reduction <add>, %520, %cst_156 [1] : vector<16x32xf32> to vector<16xf32>
    %522 = vector.shape_cast %521 : vector<16xf32> to vector<16x1xf32>
    %cst_157 = arith.constant 3.200000e+01 : f32
    %523 = vector.broadcast %cst_157 : f32 to vector<16x1xf32>
    %524 = arith.divf %522, %523 : vector<16x1xf32>
    %525 = vector.broadcast %517 : vector<16x1xf32> to vector<16x32xf32>
    %526 = arith.subf %21, %525 : vector<16x32xf32>
    %cst_158 = arith.constant 9.99999997E-7 : f32
    %527 = vector.broadcast %cst_158 : f32 to vector<16x1xf32>
    %528 = arith.addf %524, %527 : vector<16x1xf32>
    %529 = math.rsqrt %528 : vector<16x1xf32>
    %530 = vector.broadcast %529 : vector<16x1xf32> to vector<16x32xf32>
    %531 = arith.mulf %526, %530 : vector<16x32xf32>
    %532 = vector.extract_strided_slice %513 {offsets = [0, 0], sizes = [1, 32], strides = [1, 1]} : vector<2x32xf32> to vector<1x32xf32>
    %533 = vector.broadcast %532 : vector<1x32xf32> to vector<16x32xf32>
    %534 = arith.mulf %531, %533 : vector<16x32xf32>
    %535 = vector.extract_strided_slice %513 {offsets = [1, 0], sizes = [1, 32], strides = [1, 1]} : vector<2x32xf32> to vector<1x32xf32>
    %536 = vector.broadcast %535 : vector<1x32xf32> to vector<16x32xf32>
    %537 = arith.addf %534, %536 : vector<16x32xf32>
    %c520 = arith.constant 520 : index
    %c0_159 = arith.constant 0 : index
    %538 = vector.load %arg4[%c520, %c0_159] : memref<1120x128xf32, #tpu.memory_space<vmem>>, vector<32x96xf32>
    %cst_160 = arith.constant dense<0.000000e+00> : vector<16x96xf32>
    %539 = tpu.matmul %537, %538, %cst_160 {dimension_numbers = #tpu.dot_dimension_numbers<[1], [0], [0], [1], [0, 0, 1, 1], [], []>} : vector<16x32xf32>, vector<32x96xf32>, vector<16x96xf32> -> vector<16x96xf32>
    %c552 = arith.constant 552 : index
    %c0_161 = arith.constant 0 : index
    %540 = vector.load %arg4[%c552, %c0_161] : memref<1120x128xf32, #tpu.memory_space<vmem>>, vector<1x96xf32>
    %541 = vector.broadcast %540 : vector<1x96xf32> to vector<16x96xf32>
    %542 = arith.addf %539, %541 : vector<16x96xf32>
    %543 = vector.extract_strided_slice %542 {offsets = [0, 0], sizes = [8, 32], strides = [1, 1]} : vector<16x96xf32> to vector<8x32xf32>
    %544 = vector.extract_strided_slice %542 {offsets = [0, 32], sizes = [8, 32], strides = [1, 1]} : vector<16x96xf32> to vector<8x32xf32>
    %545 = vector.extract_strided_slice %542 {offsets = [0, 64], sizes = [8, 32], strides = [1, 1]} : vector<16x96xf32> to vector<8x32xf32>
    %546 = vector.extract_strided_slice %543 {offsets = [0, 0], sizes = [8, 8], strides = [1, 1]} : vector<8x32xf32> to vector<8x8xf32>
    %547 = vector.extract_strided_slice %544 {offsets = [0, 0], sizes = [8, 8], strides = [1, 1]} : vector<8x32xf32> to vector<8x8xf32>
    %cst_162 = arith.constant dense<0.000000e+00> : vector<8x8xf32>
    %548 = tpu.matmul %546, %547, %cst_162 {dimension_numbers = #tpu.dot_dimension_numbers<[1], [1], [0], [0], [0, 0, 1, 0], [], []>} : vector<8x8xf32>, vector<8x8xf32>, vector<8x8xf32> -> vector<8x8xf32>
    %549 = arith.addf %548, %42 : vector<8x8xf32>
    %cst_163 = arith.constant dense<0xFF800000> : vector<8xf32>
    %550 = vector.multi_reduction <maximumf>, %549, %cst_163 [1] : vector<8x8xf32> to vector<8xf32>
    %551 = vector.shape_cast %550 : vector<8xf32> to vector<8x1xf32>
    %552 = vector.broadcast %551 : vector<8x1xf32> to vector<8x8xf32>
    %553 = arith.subf %549, %552 : vector<8x8xf32>
    %554 = math.exp %553 : vector<8x8xf32>
    %cst_164 = arith.constant dense<0.000000e+00> : vector<8xf32>
    %555 = vector.multi_reduction <add>, %554, %cst_164 [1] : vector<8x8xf32> to vector<8xf32>
    %556 = vector.shape_cast %555 : vector<8xf32> to vector<8x1xf32>
    %557 = tpu.reciprocal %556 {approx = true} : vector<8x1xf32> -> vector<8x1xf32>
    %558 = vector.broadcast %557 : vector<8x1xf32> to vector<8x8xf32>
    %559 = arith.mulf %554, %558 : vector<8x8xf32>
    %560 = vector.extract_strided_slice %545 {offsets = [0, 0], sizes = [8, 8], strides = [1, 1]} : vector<8x32xf32> to vector<8x8xf32>
    %cst_165 = arith.constant dense<0.000000e+00> : vector<8x8xf32>
    %561 = tpu.matmul %559, %560, %cst_165 {dimension_numbers = #tpu.dot_dimension_numbers<[1], [0], [0], [1], [0, 0, 1, 1], [], []>} : vector<8x8xf32>, vector<8x8xf32>, vector<8x8xf32> -> vector<8x8xf32>
    %562 = vector.extract_strided_slice %543 {offsets = [0, 8], sizes = [8, 8], strides = [1, 1]} : vector<8x32xf32> to vector<8x8xf32>
    %563 = vector.extract_strided_slice %544 {offsets = [0, 8], sizes = [8, 8], strides = [1, 1]} : vector<8x32xf32> to vector<8x8xf32>
    %cst_166 = arith.constant dense<0.000000e+00> : vector<8x8xf32>
    %564 = tpu.matmul %562, %563, %cst_166 {dimension_numbers = #tpu.dot_dimension_numbers<[1], [1], [0], [0], [0, 0, 1, 0], [], []>} : vector<8x8xf32>, vector<8x8xf32>, vector<8x8xf32> -> vector<8x8xf32>
    %565 = arith.addf %564, %42 : vector<8x8xf32>
    %cst_167 = arith.constant dense<0xFF800000> : vector<8xf32>
    %566 = vector.multi_reduction <maximumf>, %565, %cst_167 [1] : vector<8x8xf32> to vector<8xf32>
    %567 = vector.shape_cast %566 : vector<8xf32> to vector<8x1xf32>
    %568 = vector.broadcast %567 : vector<8x1xf32> to vector<8x8xf32>
    %569 = arith.subf %565, %568 : vector<8x8xf32>
    %570 = math.exp %569 : vector<8x8xf32>
    %cst_168 = arith.constant dense<0.000000e+00> : vector<8xf32>
    %571 = vector.multi_reduction <add>, %570, %cst_168 [1] : vector<8x8xf32> to vector<8xf32>
    %572 = vector.shape_cast %571 : vector<8xf32> to vector<8x1xf32>
    %573 = tpu.reciprocal %572 {approx = true} : vector<8x1xf32> -> vector<8x1xf32>
    %574 = vector.broadcast %573 : vector<8x1xf32> to vector<8x8xf32>
    %575 = arith.mulf %570, %574 : vector<8x8xf32>
    %576 = vector.extract_strided_slice %545 {offsets = [0, 8], sizes = [8, 8], strides = [1, 1]} : vector<8x32xf32> to vector<8x8xf32>
    %cst_169 = arith.constant dense<0.000000e+00> : vector<8x8xf32>
    %577 = tpu.matmul %575, %576, %cst_169 {dimension_numbers = #tpu.dot_dimension_numbers<[1], [0], [0], [1], [0, 0, 1, 1], [], []>} : vector<8x8xf32>, vector<8x8xf32>, vector<8x8xf32> -> vector<8x8xf32>
    %578 = vector.extract_strided_slice %543 {offsets = [0, 16], sizes = [8, 8], strides = [1, 1]} : vector<8x32xf32> to vector<8x8xf32>
    %579 = vector.extract_strided_slice %544 {offsets = [0, 16], sizes = [8, 8], strides = [1, 1]} : vector<8x32xf32> to vector<8x8xf32>
    %cst_170 = arith.constant dense<0.000000e+00> : vector<8x8xf32>
    %580 = tpu.matmul %578, %579, %cst_170 {dimension_numbers = #tpu.dot_dimension_numbers<[1], [1], [0], [0], [0, 0, 1, 0], [], []>} : vector<8x8xf32>, vector<8x8xf32>, vector<8x8xf32> -> vector<8x8xf32>
    %581 = arith.addf %580, %42 : vector<8x8xf32>
    %cst_171 = arith.constant dense<0xFF800000> : vector<8xf32>
    %582 = vector.multi_reduction <maximumf>, %581, %cst_171 [1] : vector<8x8xf32> to vector<8xf32>
    %583 = vector.shape_cast %582 : vector<8xf32> to vector<8x1xf32>
    %584 = vector.broadcast %583 : vector<8x1xf32> to vector<8x8xf32>
    %585 = arith.subf %581, %584 : vector<8x8xf32>
    %586 = math.exp %585 : vector<8x8xf32>
    %cst_172 = arith.constant dense<0.000000e+00> : vector<8xf32>
    %587 = vector.multi_reduction <add>, %586, %cst_172 [1] : vector<8x8xf32> to vector<8xf32>
    %588 = vector.shape_cast %587 : vector<8xf32> to vector<8x1xf32>
    %589 = tpu.reciprocal %588 {approx = true} : vector<8x1xf32> -> vector<8x1xf32>
    %590 = vector.broadcast %589 : vector<8x1xf32> to vector<8x8xf32>
    %591 = arith.mulf %586, %590 : vector<8x8xf32>
    %592 = vector.extract_strided_slice %545 {offsets = [0, 16], sizes = [8, 8], strides = [1, 1]} : vector<8x32xf32> to vector<8x8xf32>
    %cst_173 = arith.constant dense<0.000000e+00> : vector<8x8xf32>
    %593 = tpu.matmul %591, %592, %cst_173 {dimension_numbers = #tpu.dot_dimension_numbers<[1], [0], [0], [1], [0, 0, 1, 1], [], []>} : vector<8x8xf32>, vector<8x8xf32>, vector<8x8xf32> -> vector<8x8xf32>
    %594 = vector.extract_strided_slice %543 {offsets = [0, 24], sizes = [8, 8], strides = [1, 1]} : vector<8x32xf32> to vector<8x8xf32>
    %595 = vector.extract_strided_slice %544 {offsets = [0, 24], sizes = [8, 8], strides = [1, 1]} : vector<8x32xf32> to vector<8x8xf32>
    %cst_174 = arith.constant dense<0.000000e+00> : vector<8x8xf32>
    %596 = tpu.matmul %594, %595, %cst_174 {dimension_numbers = #tpu.dot_dimension_numbers<[1], [1], [0], [0], [0, 0, 1, 0], [], []>} : vector<8x8xf32>, vector<8x8xf32>, vector<8x8xf32> -> vector<8x8xf32>
    %597 = arith.addf %596, %42 : vector<8x8xf32>
    %cst_175 = arith.constant dense<0xFF800000> : vector<8xf32>
    %598 = vector.multi_reduction <maximumf>, %597, %cst_175 [1] : vector<8x8xf32> to vector<8xf32>
    %599 = vector.shape_cast %598 : vector<8xf32> to vector<8x1xf32>
    %600 = vector.broadcast %599 : vector<8x1xf32> to vector<8x8xf32>
    %601 = arith.subf %597, %600 : vector<8x8xf32>
    %602 = math.exp %601 : vector<8x8xf32>
    %cst_176 = arith.constant dense<0.000000e+00> : vector<8xf32>
    %603 = vector.multi_reduction <add>, %602, %cst_176 [1] : vector<8x8xf32> to vector<8xf32>
    %604 = vector.shape_cast %603 : vector<8xf32> to vector<8x1xf32>
    %605 = tpu.reciprocal %604 {approx = true} : vector<8x1xf32> -> vector<8x1xf32>
    %606 = vector.broadcast %605 : vector<8x1xf32> to vector<8x8xf32>
    %607 = arith.mulf %602, %606 : vector<8x8xf32>
    %608 = vector.extract_strided_slice %545 {offsets = [0, 24], sizes = [8, 8], strides = [1, 1]} : vector<8x32xf32> to vector<8x8xf32>
    %cst_177 = arith.constant dense<0.000000e+00> : vector<8x8xf32>
    %609 = tpu.matmul %607, %608, %cst_177 {dimension_numbers = #tpu.dot_dimension_numbers<[1], [0], [0], [1], [0, 0, 1, 1], [], []>} : vector<8x8xf32>, vector<8x8xf32>, vector<8x8xf32> -> vector<8x8xf32>
    %610 = tpu.concatenate %561, %577, %593, %609 in 1 : vector<8x8xf32>, vector<8x8xf32>, vector<8x8xf32>, vector<8x8xf32> -> vector<8x32xf32>
    %611 = vector.extract_strided_slice %542 {offsets = [8, 0], sizes = [8, 32], strides = [1, 1]} : vector<16x96xf32> to vector<8x32xf32>
    %612 = vector.extract_strided_slice %542 {offsets = [8, 32], sizes = [8, 32], strides = [1, 1]} : vector<16x96xf32> to vector<8x32xf32>
    %613 = vector.extract_strided_slice %542 {offsets = [8, 64], sizes = [8, 32], strides = [1, 1]} : vector<16x96xf32> to vector<8x32xf32>
    %614 = vector.extract_strided_slice %611 {offsets = [0, 0], sizes = [8, 8], strides = [1, 1]} : vector<8x32xf32> to vector<8x8xf32>
    %615 = vector.extract_strided_slice %612 {offsets = [0, 0], sizes = [8, 8], strides = [1, 1]} : vector<8x32xf32> to vector<8x8xf32>
    %cst_178 = arith.constant dense<0.000000e+00> : vector<8x8xf32>
    %616 = tpu.matmul %614, %615, %cst_178 {dimension_numbers = #tpu.dot_dimension_numbers<[1], [1], [0], [0], [0, 0, 1, 0], [], []>} : vector<8x8xf32>, vector<8x8xf32>, vector<8x8xf32> -> vector<8x8xf32>
    %617 = arith.addf %616, %49 : vector<8x8xf32>
    %cst_179 = arith.constant dense<0xFF800000> : vector<8xf32>
    %618 = vector.multi_reduction <maximumf>, %617, %cst_179 [1] : vector<8x8xf32> to vector<8xf32>
    %619 = vector.shape_cast %618 : vector<8xf32> to vector<8x1xf32>
    %620 = vector.broadcast %619 : vector<8x1xf32> to vector<8x8xf32>
    %621 = arith.subf %617, %620 : vector<8x8xf32>
    %622 = math.exp %621 : vector<8x8xf32>
    %cst_180 = arith.constant dense<0.000000e+00> : vector<8xf32>
    %623 = vector.multi_reduction <add>, %622, %cst_180 [1] : vector<8x8xf32> to vector<8xf32>
    %624 = vector.shape_cast %623 : vector<8xf32> to vector<8x1xf32>
    %625 = tpu.reciprocal %624 {approx = true} : vector<8x1xf32> -> vector<8x1xf32>
    %626 = vector.broadcast %625 : vector<8x1xf32> to vector<8x8xf32>
    %627 = arith.mulf %622, %626 : vector<8x8xf32>
    %628 = vector.extract_strided_slice %613 {offsets = [0, 0], sizes = [8, 8], strides = [1, 1]} : vector<8x32xf32> to vector<8x8xf32>
    %cst_181 = arith.constant dense<0.000000e+00> : vector<8x8xf32>
    %629 = tpu.matmul %627, %628, %cst_181 {dimension_numbers = #tpu.dot_dimension_numbers<[1], [0], [0], [1], [0, 0, 1, 1], [], []>} : vector<8x8xf32>, vector<8x8xf32>, vector<8x8xf32> -> vector<8x8xf32>
    %630 = vector.extract_strided_slice %611 {offsets = [0, 8], sizes = [8, 8], strides = [1, 1]} : vector<8x32xf32> to vector<8x8xf32>
    %631 = vector.extract_strided_slice %612 {offsets = [0, 8], sizes = [8, 8], strides = [1, 1]} : vector<8x32xf32> to vector<8x8xf32>
    %cst_182 = arith.constant dense<0.000000e+00> : vector<8x8xf32>
    %632 = tpu.matmul %630, %631, %cst_182 {dimension_numbers = #tpu.dot_dimension_numbers<[1], [1], [0], [0], [0, 0, 1, 0], [], []>} : vector<8x8xf32>, vector<8x8xf32>, vector<8x8xf32> -> vector<8x8xf32>
    %633 = arith.addf %632, %49 : vector<8x8xf32>
    %cst_183 = arith.constant dense<0xFF800000> : vector<8xf32>
    %634 = vector.multi_reduction <maximumf>, %633, %cst_183 [1] : vector<8x8xf32> to vector<8xf32>
    %635 = vector.shape_cast %634 : vector<8xf32> to vector<8x1xf32>
    %636 = vector.broadcast %635 : vector<8x1xf32> to vector<8x8xf32>
    %637 = arith.subf %633, %636 : vector<8x8xf32>
    %638 = math.exp %637 : vector<8x8xf32>
    %cst_184 = arith.constant dense<0.000000e+00> : vector<8xf32>
    %639 = vector.multi_reduction <add>, %638, %cst_184 [1] : vector<8x8xf32> to vector<8xf32>
    %640 = vector.shape_cast %639 : vector<8xf32> to vector<8x1xf32>
    %641 = tpu.reciprocal %640 {approx = true} : vector<8x1xf32> -> vector<8x1xf32>
    %642 = vector.broadcast %641 : vector<8x1xf32> to vector<8x8xf32>
    %643 = arith.mulf %638, %642 : vector<8x8xf32>
    %644 = vector.extract_strided_slice %613 {offsets = [0, 8], sizes = [8, 8], strides = [1, 1]} : vector<8x32xf32> to vector<8x8xf32>
    %cst_185 = arith.constant dense<0.000000e+00> : vector<8x8xf32>
    %645 = tpu.matmul %643, %644, %cst_185 {dimension_numbers = #tpu.dot_dimension_numbers<[1], [0], [0], [1], [0, 0, 1, 1], [], []>} : vector<8x8xf32>, vector<8x8xf32>, vector<8x8xf32> -> vector<8x8xf32>
    %646 = vector.extract_strided_slice %611 {offsets = [0, 16], sizes = [8, 8], strides = [1, 1]} : vector<8x32xf32> to vector<8x8xf32>
    %647 = vector.extract_strided_slice %612 {offsets = [0, 16], sizes = [8, 8], strides = [1, 1]} : vector<8x32xf32> to vector<8x8xf32>
    %cst_186 = arith.constant dense<0.000000e+00> : vector<8x8xf32>
    %648 = tpu.matmul %646, %647, %cst_186 {dimension_numbers = #tpu.dot_dimension_numbers<[1], [1], [0], [0], [0, 0, 1, 0], [], []>} : vector<8x8xf32>, vector<8x8xf32>, vector<8x8xf32> -> vector<8x8xf32>
    %649 = arith.addf %648, %49 : vector<8x8xf32>
    %cst_187 = arith.constant dense<0xFF800000> : vector<8xf32>
    %650 = vector.multi_reduction <maximumf>, %649, %cst_187 [1] : vector<8x8xf32> to vector<8xf32>
    %651 = vector.shape_cast %650 : vector<8xf32> to vector<8x1xf32>
    %652 = vector.broadcast %651 : vector<8x1xf32> to vector<8x8xf32>
    %653 = arith.subf %649, %652 : vector<8x8xf32>
    %654 = math.exp %653 : vector<8x8xf32>
    %cst_188 = arith.constant dense<0.000000e+00> : vector<8xf32>
    %655 = vector.multi_reduction <add>, %654, %cst_188 [1] : vector<8x8xf32> to vector<8xf32>
    %656 = vector.shape_cast %655 : vector<8xf32> to vector<8x1xf32>
    %657 = tpu.reciprocal %656 {approx = true} : vector<8x1xf32> -> vector<8x1xf32>
    %658 = vector.broadcast %657 : vector<8x1xf32> to vector<8x8xf32>
    %659 = arith.mulf %654, %658 : vector<8x8xf32>
    %660 = vector.extract_strided_slice %613 {offsets = [0, 16], sizes = [8, 8], strides = [1, 1]} : vector<8x32xf32> to vector<8x8xf32>
    %cst_189 = arith.constant dense<0.000000e+00> : vector<8x8xf32>
    %661 = tpu.matmul %659, %660, %cst_189 {dimension_numbers = #tpu.dot_dimension_numbers<[1], [0], [0], [1], [0, 0, 1, 1], [], []>} : vector<8x8xf32>, vector<8x8xf32>, vector<8x8xf32> -> vector<8x8xf32>
    %662 = vector.extract_strided_slice %611 {offsets = [0, 24], sizes = [8, 8], strides = [1, 1]} : vector<8x32xf32> to vector<8x8xf32>
    %663 = vector.extract_strided_slice %612 {offsets = [0, 24], sizes = [8, 8], strides = [1, 1]} : vector<8x32xf32> to vector<8x8xf32>
    %cst_190 = arith.constant dense<0.000000e+00> : vector<8x8xf32>
    %664 = tpu.matmul %662, %663, %cst_190 {dimension_numbers = #tpu.dot_dimension_numbers<[1], [1], [0], [0], [0, 0, 1, 0], [], []>} : vector<8x8xf32>, vector<8x8xf32>, vector<8x8xf32> -> vector<8x8xf32>
    %665 = arith.addf %664, %49 : vector<8x8xf32>
    %cst_191 = arith.constant dense<0xFF800000> : vector<8xf32>
    %666 = vector.multi_reduction <maximumf>, %665, %cst_191 [1] : vector<8x8xf32> to vector<8xf32>
    %667 = vector.shape_cast %666 : vector<8xf32> to vector<8x1xf32>
    %668 = vector.broadcast %667 : vector<8x1xf32> to vector<8x8xf32>
    %669 = arith.subf %665, %668 : vector<8x8xf32>
    %670 = math.exp %669 : vector<8x8xf32>
    %cst_192 = arith.constant dense<0.000000e+00> : vector<8xf32>
    %671 = vector.multi_reduction <add>, %670, %cst_192 [1] : vector<8x8xf32> to vector<8xf32>
    %672 = vector.shape_cast %671 : vector<8xf32> to vector<8x1xf32>
    %673 = tpu.reciprocal %672 {approx = true} : vector<8x1xf32> -> vector<8x1xf32>
    %674 = vector.broadcast %673 : vector<8x1xf32> to vector<8x8xf32>
    %675 = arith.mulf %670, %674 : vector<8x8xf32>
    %676 = vector.extract_strided_slice %613 {offsets = [0, 24], sizes = [8, 8], strides = [1, 1]} : vector<8x32xf32> to vector<8x8xf32>
    %cst_193 = arith.constant dense<0.000000e+00> : vector<8x8xf32>
    %677 = tpu.matmul %675, %676, %cst_193 {dimension_numbers = #tpu.dot_dimension_numbers<[1], [0], [0], [1], [0, 0, 1, 1], [], []>} : vector<8x8xf32>, vector<8x8xf32>, vector<8x8xf32> -> vector<8x8xf32>
    %678 = tpu.concatenate %629, %645, %661, %677 in 1 : vector<8x8xf32>, vector<8x8xf32>, vector<8x8xf32>, vector<8x8xf32> -> vector<8x32xf32>
    %679 = tpu.concatenate %610, %678 in 0 : vector<8x32xf32>, vector<8x32xf32> -> vector<16x32xf32>
    %c560 = arith.constant 560 : index
    %c0_194 = arith.constant 0 : index
    %680 = vector.load %arg4[%c560, %c0_194] : memref<1120x128xf32, #tpu.memory_space<vmem>>, vector<32x32xf32>
    %cst_195 = arith.constant dense<0.000000e+00> : vector<16x32xf32>
    %681 = tpu.matmul %679, %680, %cst_195 {dimension_numbers = #tpu.dot_dimension_numbers<[1], [0], [0], [1], [0, 0, 1, 1], [], []>} : vector<16x32xf32>, vector<32x32xf32>, vector<16x32xf32> -> vector<16x32xf32>
    %c592 = arith.constant 592 : index
    %c0_196 = arith.constant 0 : index
    %682 = vector.load %arg4[%c592, %c0_196] : memref<1120x128xf32, #tpu.memory_space<vmem>>, vector<1x32xf32>
    %683 = vector.broadcast %682 : vector<1x32xf32> to vector<16x32xf32>
    %684 = arith.addf %681, %683 : vector<16x32xf32>
    %685 = arith.addf %21, %684 : vector<16x32xf32>
    %c688 = arith.constant 688 : index
    %c0_197 = arith.constant 0 : index
    %686 = vector.load %arg4[%c688, %c0_197] : memref<1120x128xf32, #tpu.memory_space<vmem>>, vector<2x32xf32>
    %cst_198 = arith.constant dense<0.000000e+00> : vector<16xf32>
    %687 = vector.multi_reduction <add>, %685, %cst_198 [1] : vector<16x32xf32> to vector<16xf32>
    %688 = vector.shape_cast %687 : vector<16xf32> to vector<16x1xf32>
    %cst_199 = arith.constant 3.200000e+01 : f32
    %689 = vector.broadcast %cst_199 : f32 to vector<16x1xf32>
    %690 = arith.divf %688, %689 : vector<16x1xf32>
    %691 = vector.broadcast %690 : vector<16x1xf32> to vector<16x32xf32>
    %692 = arith.subf %685, %691 : vector<16x32xf32>
    %693 = arith.mulf %692, %692 : vector<16x32xf32>
    %cst_200 = arith.constant dense<0.000000e+00> : vector<16xf32>
    %694 = vector.multi_reduction <add>, %693, %cst_200 [1] : vector<16x32xf32> to vector<16xf32>
    %695 = vector.shape_cast %694 : vector<16xf32> to vector<16x1xf32>
    %cst_201 = arith.constant 3.200000e+01 : f32
    %696 = vector.broadcast %cst_201 : f32 to vector<16x1xf32>
    %697 = arith.divf %695, %696 : vector<16x1xf32>
    %698 = vector.broadcast %690 : vector<16x1xf32> to vector<16x32xf32>
    %699 = arith.subf %685, %698 : vector<16x32xf32>
    %cst_202 = arith.constant 9.99999997E-7 : f32
    %700 = vector.broadcast %cst_202 : f32 to vector<16x1xf32>
    %701 = arith.addf %697, %700 : vector<16x1xf32>
    %702 = math.rsqrt %701 : vector<16x1xf32>
    %703 = vector.broadcast %702 : vector<16x1xf32> to vector<16x32xf32>
    %704 = arith.mulf %699, %703 : vector<16x32xf32>
    %705 = vector.extract_strided_slice %686 {offsets = [0, 0], sizes = [1, 32], strides = [1, 1]} : vector<2x32xf32> to vector<1x32xf32>
    %706 = vector.broadcast %705 : vector<1x32xf32> to vector<16x32xf32>
    %707 = arith.mulf %704, %706 : vector<16x32xf32>
    %708 = vector.extract_strided_slice %686 {offsets = [1, 0], sizes = [1, 32], strides = [1, 1]} : vector<2x32xf32> to vector<1x32xf32>
    %709 = vector.broadcast %708 : vector<1x32xf32> to vector<16x32xf32>
    %710 = arith.addf %707, %709 : vector<16x32xf32>
    %c600 = arith.constant 600 : index
    %c0_203 = arith.constant 0 : index
    %711 = vector.load %arg4[%c600, %c0_203] : memref<1120x128xf32, #tpu.memory_space<vmem>>, vector<32x96xf32>
    %c632 = arith.constant 632 : index
    %c0_204 = arith.constant 0 : index
    %712 = vector.load %arg4[%c632, %c0_204] : memref<1120x128xf32, #tpu.memory_space<vmem>>, vector<1x96xf32>
    %713 = vector.extract_strided_slice %711 {offsets = [0, 0], sizes = [32, 32], strides = [1, 1]} : vector<32x96xf32> to vector<32x32xf32>
    %cst_205 = arith.constant dense<0.000000e+00> : vector<16x32xf32>
    %714 = tpu.matmul %710, %713, %cst_205 {dimension_numbers = #tpu.dot_dimension_numbers<[1], [0], [0], [1], [0, 0, 1, 1], [], []>} : vector<16x32xf32>, vector<32x32xf32>, vector<16x32xf32> -> vector<16x32xf32>
    %715 = vector.extract_strided_slice %712 {offsets = [0, 0], sizes = [1, 32], strides = [1, 1]} : vector<1x96xf32> to vector<1x32xf32>
    %716 = vector.broadcast %715 : vector<1x32xf32> to vector<16x32xf32>
    %717 = arith.addf %714, %716 : vector<16x32xf32>
    %718 = vector.extract_strided_slice %711 {offsets = [0, 32], sizes = [32, 64], strides = [1, 1]} : vector<32x96xf32> to vector<32x64xf32>
    %cst_206 = arith.constant dense<0.000000e+00> : vector<16x64xf32>
    %719 = tpu.matmul %512, %718, %cst_206 {dimension_numbers = #tpu.dot_dimension_numbers<[1], [0], [0], [1], [0, 0, 1, 1], [], []>} : vector<16x32xf32>, vector<32x64xf32>, vector<16x64xf32> -> vector<16x64xf32>
    %720 = vector.extract_strided_slice %712 {offsets = [0, 32], sizes = [1, 64], strides = [1, 1]} : vector<1x96xf32> to vector<1x64xf32>
    %721 = vector.broadcast %720 : vector<1x64xf32> to vector<16x64xf32>
    %722 = arith.addf %719, %721 : vector<16x64xf32>
    %723 = vector.extract_strided_slice %717 {offsets = [0, 0], sizes = [8, 32], strides = [1, 1]} : vector<16x32xf32> to vector<8x32xf32>
    %724 = vector.extract_strided_slice %722 {offsets = [0, 0], sizes = [8, 32], strides = [1, 1]} : vector<16x64xf32> to vector<8x32xf32>
    %725 = vector.extract_strided_slice %722 {offsets = [0, 32], sizes = [8, 32], strides = [1, 1]} : vector<16x64xf32> to vector<8x32xf32>
    %726 = vector.extract_strided_slice %723 {offsets = [0, 0], sizes = [8, 8], strides = [1, 1]} : vector<8x32xf32> to vector<8x8xf32>
    %727 = vector.extract_strided_slice %724 {offsets = [0, 0], sizes = [8, 8], strides = [1, 1]} : vector<8x32xf32> to vector<8x8xf32>
    %cst_207 = arith.constant dense<0.000000e+00> : vector<8x8xf32>
    %728 = tpu.matmul %726, %727, %cst_207 {dimension_numbers = #tpu.dot_dimension_numbers<[1], [1], [0], [0], [0, 0, 1, 0], [], []>} : vector<8x8xf32>, vector<8x8xf32>, vector<8x8xf32> -> vector<8x8xf32>
    %729 = vector.broadcast %28 : vector<1x8xf32> to vector<8x8xf32>
    %730 = arith.addf %728, %729 : vector<8x8xf32>
    %cst_208 = arith.constant dense<0xFF800000> : vector<8xf32>
    %731 = vector.multi_reduction <maximumf>, %730, %cst_208 [1] : vector<8x8xf32> to vector<8xf32>
    %732 = vector.shape_cast %731 : vector<8xf32> to vector<8x1xf32>
    %733 = vector.broadcast %732 : vector<8x1xf32> to vector<8x8xf32>
    %734 = arith.subf %730, %733 : vector<8x8xf32>
    %735 = math.exp %734 : vector<8x8xf32>
    %cst_209 = arith.constant dense<0.000000e+00> : vector<8xf32>
    %736 = vector.multi_reduction <add>, %735, %cst_209 [1] : vector<8x8xf32> to vector<8xf32>
    %737 = vector.shape_cast %736 : vector<8xf32> to vector<8x1xf32>
    %738 = tpu.reciprocal %737 {approx = true} : vector<8x1xf32> -> vector<8x1xf32>
    %739 = vector.broadcast %738 : vector<8x1xf32> to vector<8x8xf32>
    %740 = arith.mulf %735, %739 : vector<8x8xf32>
    %741 = vector.extract_strided_slice %725 {offsets = [0, 0], sizes = [8, 8], strides = [1, 1]} : vector<8x32xf32> to vector<8x8xf32>
    %cst_210 = arith.constant dense<0.000000e+00> : vector<8x8xf32>
    %742 = tpu.matmul %740, %741, %cst_210 {dimension_numbers = #tpu.dot_dimension_numbers<[1], [0], [0], [1], [0, 0, 1, 1], [], []>} : vector<8x8xf32>, vector<8x8xf32>, vector<8x8xf32> -> vector<8x8xf32>
    %743 = vector.extract_strided_slice %723 {offsets = [0, 8], sizes = [8, 8], strides = [1, 1]} : vector<8x32xf32> to vector<8x8xf32>
    %744 = vector.extract_strided_slice %724 {offsets = [0, 8], sizes = [8, 8], strides = [1, 1]} : vector<8x32xf32> to vector<8x8xf32>
    %cst_211 = arith.constant dense<0.000000e+00> : vector<8x8xf32>
    %745 = tpu.matmul %743, %744, %cst_211 {dimension_numbers = #tpu.dot_dimension_numbers<[1], [1], [0], [0], [0, 0, 1, 0], [], []>} : vector<8x8xf32>, vector<8x8xf32>, vector<8x8xf32> -> vector<8x8xf32>
    %746 = vector.broadcast %28 : vector<1x8xf32> to vector<8x8xf32>
    %747 = arith.addf %745, %746 : vector<8x8xf32>
    %cst_212 = arith.constant dense<0xFF800000> : vector<8xf32>
    %748 = vector.multi_reduction <maximumf>, %747, %cst_212 [1] : vector<8x8xf32> to vector<8xf32>
    %749 = vector.shape_cast %748 : vector<8xf32> to vector<8x1xf32>
    %750 = vector.broadcast %749 : vector<8x1xf32> to vector<8x8xf32>
    %751 = arith.subf %747, %750 : vector<8x8xf32>
    %752 = math.exp %751 : vector<8x8xf32>
    %cst_213 = arith.constant dense<0.000000e+00> : vector<8xf32>
    %753 = vector.multi_reduction <add>, %752, %cst_213 [1] : vector<8x8xf32> to vector<8xf32>
    %754 = vector.shape_cast %753 : vector<8xf32> to vector<8x1xf32>
    %755 = tpu.reciprocal %754 {approx = true} : vector<8x1xf32> -> vector<8x1xf32>
    %756 = vector.broadcast %755 : vector<8x1xf32> to vector<8x8xf32>
    %757 = arith.mulf %752, %756 : vector<8x8xf32>
    %758 = vector.extract_strided_slice %725 {offsets = [0, 8], sizes = [8, 8], strides = [1, 1]} : vector<8x32xf32> to vector<8x8xf32>
    %cst_214 = arith.constant dense<0.000000e+00> : vector<8x8xf32>
    %759 = tpu.matmul %757, %758, %cst_214 {dimension_numbers = #tpu.dot_dimension_numbers<[1], [0], [0], [1], [0, 0, 1, 1], [], []>} : vector<8x8xf32>, vector<8x8xf32>, vector<8x8xf32> -> vector<8x8xf32>
    %760 = vector.extract_strided_slice %723 {offsets = [0, 16], sizes = [8, 8], strides = [1, 1]} : vector<8x32xf32> to vector<8x8xf32>
    %761 = vector.extract_strided_slice %724 {offsets = [0, 16], sizes = [8, 8], strides = [1, 1]} : vector<8x32xf32> to vector<8x8xf32>
    %cst_215 = arith.constant dense<0.000000e+00> : vector<8x8xf32>
    %762 = tpu.matmul %760, %761, %cst_215 {dimension_numbers = #tpu.dot_dimension_numbers<[1], [1], [0], [0], [0, 0, 1, 0], [], []>} : vector<8x8xf32>, vector<8x8xf32>, vector<8x8xf32> -> vector<8x8xf32>
    %763 = vector.broadcast %28 : vector<1x8xf32> to vector<8x8xf32>
    %764 = arith.addf %762, %763 : vector<8x8xf32>
    %cst_216 = arith.constant dense<0xFF800000> : vector<8xf32>
    %765 = vector.multi_reduction <maximumf>, %764, %cst_216 [1] : vector<8x8xf32> to vector<8xf32>
    %766 = vector.shape_cast %765 : vector<8xf32> to vector<8x1xf32>
    %767 = vector.broadcast %766 : vector<8x1xf32> to vector<8x8xf32>
    %768 = arith.subf %764, %767 : vector<8x8xf32>
    %769 = math.exp %768 : vector<8x8xf32>
    %cst_217 = arith.constant dense<0.000000e+00> : vector<8xf32>
    %770 = vector.multi_reduction <add>, %769, %cst_217 [1] : vector<8x8xf32> to vector<8xf32>
    %771 = vector.shape_cast %770 : vector<8xf32> to vector<8x1xf32>
    %772 = tpu.reciprocal %771 {approx = true} : vector<8x1xf32> -> vector<8x1xf32>
    %773 = vector.broadcast %772 : vector<8x1xf32> to vector<8x8xf32>
    %774 = arith.mulf %769, %773 : vector<8x8xf32>
    %775 = vector.extract_strided_slice %725 {offsets = [0, 16], sizes = [8, 8], strides = [1, 1]} : vector<8x32xf32> to vector<8x8xf32>
    %cst_218 = arith.constant dense<0.000000e+00> : vector<8x8xf32>
    %776 = tpu.matmul %774, %775, %cst_218 {dimension_numbers = #tpu.dot_dimension_numbers<[1], [0], [0], [1], [0, 0, 1, 1], [], []>} : vector<8x8xf32>, vector<8x8xf32>, vector<8x8xf32> -> vector<8x8xf32>
    %777 = vector.extract_strided_slice %723 {offsets = [0, 24], sizes = [8, 8], strides = [1, 1]} : vector<8x32xf32> to vector<8x8xf32>
    %778 = vector.extract_strided_slice %724 {offsets = [0, 24], sizes = [8, 8], strides = [1, 1]} : vector<8x32xf32> to vector<8x8xf32>
    %cst_219 = arith.constant dense<0.000000e+00> : vector<8x8xf32>
    %779 = tpu.matmul %777, %778, %cst_219 {dimension_numbers = #tpu.dot_dimension_numbers<[1], [1], [0], [0], [0, 0, 1, 0], [], []>} : vector<8x8xf32>, vector<8x8xf32>, vector<8x8xf32> -> vector<8x8xf32>
    %780 = vector.broadcast %28 : vector<1x8xf32> to vector<8x8xf32>
    %781 = arith.addf %779, %780 : vector<8x8xf32>
    %cst_220 = arith.constant dense<0xFF800000> : vector<8xf32>
    %782 = vector.multi_reduction <maximumf>, %781, %cst_220 [1] : vector<8x8xf32> to vector<8xf32>
    %783 = vector.shape_cast %782 : vector<8xf32> to vector<8x1xf32>
    %784 = vector.broadcast %783 : vector<8x1xf32> to vector<8x8xf32>
    %785 = arith.subf %781, %784 : vector<8x8xf32>
    %786 = math.exp %785 : vector<8x8xf32>
    %cst_221 = arith.constant dense<0.000000e+00> : vector<8xf32>
    %787 = vector.multi_reduction <add>, %786, %cst_221 [1] : vector<8x8xf32> to vector<8xf32>
    %788 = vector.shape_cast %787 : vector<8xf32> to vector<8x1xf32>
    %789 = tpu.reciprocal %788 {approx = true} : vector<8x1xf32> -> vector<8x1xf32>
    %790 = vector.broadcast %789 : vector<8x1xf32> to vector<8x8xf32>
    %791 = arith.mulf %786, %790 : vector<8x8xf32>
    %792 = vector.extract_strided_slice %725 {offsets = [0, 24], sizes = [8, 8], strides = [1, 1]} : vector<8x32xf32> to vector<8x8xf32>
    %cst_222 = arith.constant dense<0.000000e+00> : vector<8x8xf32>
    %793 = tpu.matmul %791, %792, %cst_222 {dimension_numbers = #tpu.dot_dimension_numbers<[1], [0], [0], [1], [0, 0, 1, 1], [], []>} : vector<8x8xf32>, vector<8x8xf32>, vector<8x8xf32> -> vector<8x8xf32>
    %794 = tpu.concatenate %742, %759, %776, %793 in 1 : vector<8x8xf32>, vector<8x8xf32>, vector<8x8xf32>, vector<8x8xf32> -> vector<8x32xf32>
    %795 = vector.extract_strided_slice %717 {offsets = [8, 0], sizes = [8, 32], strides = [1, 1]} : vector<16x32xf32> to vector<8x32xf32>
    %796 = vector.extract_strided_slice %722 {offsets = [8, 0], sizes = [8, 32], strides = [1, 1]} : vector<16x64xf32> to vector<8x32xf32>
    %797 = vector.extract_strided_slice %722 {offsets = [8, 32], sizes = [8, 32], strides = [1, 1]} : vector<16x64xf32> to vector<8x32xf32>
    %798 = vector.extract_strided_slice %795 {offsets = [0, 0], sizes = [8, 8], strides = [1, 1]} : vector<8x32xf32> to vector<8x8xf32>
    %799 = vector.extract_strided_slice %796 {offsets = [0, 0], sizes = [8, 8], strides = [1, 1]} : vector<8x32xf32> to vector<8x8xf32>
    %cst_223 = arith.constant dense<0.000000e+00> : vector<8x8xf32>
    %800 = tpu.matmul %798, %799, %cst_223 {dimension_numbers = #tpu.dot_dimension_numbers<[1], [1], [0], [0], [0, 0, 1, 0], [], []>} : vector<8x8xf32>, vector<8x8xf32>, vector<8x8xf32> -> vector<8x8xf32>
    %801 = vector.broadcast %35 : vector<1x8xf32> to vector<8x8xf32>
    %802 = arith.addf %800, %801 : vector<8x8xf32>
    %cst_224 = arith.constant dense<0xFF800000> : vector<8xf32>
    %803 = vector.multi_reduction <maximumf>, %802, %cst_224 [1] : vector<8x8xf32> to vector<8xf32>
    %804 = vector.shape_cast %803 : vector<8xf32> to vector<8x1xf32>
    %805 = vector.broadcast %804 : vector<8x1xf32> to vector<8x8xf32>
    %806 = arith.subf %802, %805 : vector<8x8xf32>
    %807 = math.exp %806 : vector<8x8xf32>
    %cst_225 = arith.constant dense<0.000000e+00> : vector<8xf32>
    %808 = vector.multi_reduction <add>, %807, %cst_225 [1] : vector<8x8xf32> to vector<8xf32>
    %809 = vector.shape_cast %808 : vector<8xf32> to vector<8x1xf32>
    %810 = tpu.reciprocal %809 {approx = true} : vector<8x1xf32> -> vector<8x1xf32>
    %811 = vector.broadcast %810 : vector<8x1xf32> to vector<8x8xf32>
    %812 = arith.mulf %807, %811 : vector<8x8xf32>
    %813 = vector.extract_strided_slice %797 {offsets = [0, 0], sizes = [8, 8], strides = [1, 1]} : vector<8x32xf32> to vector<8x8xf32>
    %cst_226 = arith.constant dense<0.000000e+00> : vector<8x8xf32>
    %814 = tpu.matmul %812, %813, %cst_226 {dimension_numbers = #tpu.dot_dimension_numbers<[1], [0], [0], [1], [0, 0, 1, 1], [], []>} : vector<8x8xf32>, vector<8x8xf32>, vector<8x8xf32> -> vector<8x8xf32>
    %815 = vector.extract_strided_slice %795 {offsets = [0, 8], sizes = [8, 8], strides = [1, 1]} : vector<8x32xf32> to vector<8x8xf32>
    %816 = vector.extract_strided_slice %796 {offsets = [0, 8], sizes = [8, 8], strides = [1, 1]} : vector<8x32xf32> to vector<8x8xf32>
    %cst_227 = arith.constant dense<0.000000e+00> : vector<8x8xf32>
    %817 = tpu.matmul %815, %816, %cst_227 {dimension_numbers = #tpu.dot_dimension_numbers<[1], [1], [0], [0], [0, 0, 1, 0], [], []>} : vector<8x8xf32>, vector<8x8xf32>, vector<8x8xf32> -> vector<8x8xf32>
    %818 = vector.broadcast %35 : vector<1x8xf32> to vector<8x8xf32>
    %819 = arith.addf %817, %818 : vector<8x8xf32>
    %cst_228 = arith.constant dense<0xFF800000> : vector<8xf32>
    %820 = vector.multi_reduction <maximumf>, %819, %cst_228 [1] : vector<8x8xf32> to vector<8xf32>
    %821 = vector.shape_cast %820 : vector<8xf32> to vector<8x1xf32>
    %822 = vector.broadcast %821 : vector<8x1xf32> to vector<8x8xf32>
    %823 = arith.subf %819, %822 : vector<8x8xf32>
    %824 = math.exp %823 : vector<8x8xf32>
    %cst_229 = arith.constant dense<0.000000e+00> : vector<8xf32>
    %825 = vector.multi_reduction <add>, %824, %cst_229 [1] : vector<8x8xf32> to vector<8xf32>
    %826 = vector.shape_cast %825 : vector<8xf32> to vector<8x1xf32>
    %827 = tpu.reciprocal %826 {approx = true} : vector<8x1xf32> -> vector<8x1xf32>
    %828 = vector.broadcast %827 : vector<8x1xf32> to vector<8x8xf32>
    %829 = arith.mulf %824, %828 : vector<8x8xf32>
    %830 = vector.extract_strided_slice %797 {offsets = [0, 8], sizes = [8, 8], strides = [1, 1]} : vector<8x32xf32> to vector<8x8xf32>
    %cst_230 = arith.constant dense<0.000000e+00> : vector<8x8xf32>
    %831 = tpu.matmul %829, %830, %cst_230 {dimension_numbers = #tpu.dot_dimension_numbers<[1], [0], [0], [1], [0, 0, 1, 1], [], []>} : vector<8x8xf32>, vector<8x8xf32>, vector<8x8xf32> -> vector<8x8xf32>
    %832 = vector.extract_strided_slice %795 {offsets = [0, 16], sizes = [8, 8], strides = [1, 1]} : vector<8x32xf32> to vector<8x8xf32>
    %833 = vector.extract_strided_slice %796 {offsets = [0, 16], sizes = [8, 8], strides = [1, 1]} : vector<8x32xf32> to vector<8x8xf32>
    %cst_231 = arith.constant dense<0.000000e+00> : vector<8x8xf32>
    %834 = tpu.matmul %832, %833, %cst_231 {dimension_numbers = #tpu.dot_dimension_numbers<[1], [1], [0], [0], [0, 0, 1, 0], [], []>} : vector<8x8xf32>, vector<8x8xf32>, vector<8x8xf32> -> vector<8x8xf32>
    %835 = vector.broadcast %35 : vector<1x8xf32> to vector<8x8xf32>
    %836 = arith.addf %834, %835 : vector<8x8xf32>
    %cst_232 = arith.constant dense<0xFF800000> : vector<8xf32>
    %837 = vector.multi_reduction <maximumf>, %836, %cst_232 [1] : vector<8x8xf32> to vector<8xf32>
    %838 = vector.shape_cast %837 : vector<8xf32> to vector<8x1xf32>
    %839 = vector.broadcast %838 : vector<8x1xf32> to vector<8x8xf32>
    %840 = arith.subf %836, %839 : vector<8x8xf32>
    %841 = math.exp %840 : vector<8x8xf32>
    %cst_233 = arith.constant dense<0.000000e+00> : vector<8xf32>
    %842 = vector.multi_reduction <add>, %841, %cst_233 [1] : vector<8x8xf32> to vector<8xf32>
    %843 = vector.shape_cast %842 : vector<8xf32> to vector<8x1xf32>
    %844 = tpu.reciprocal %843 {approx = true} : vector<8x1xf32> -> vector<8x1xf32>
    %845 = vector.broadcast %844 : vector<8x1xf32> to vector<8x8xf32>
    %846 = arith.mulf %841, %845 : vector<8x8xf32>
    %847 = vector.extract_strided_slice %797 {offsets = [0, 16], sizes = [8, 8], strides = [1, 1]} : vector<8x32xf32> to vector<8x8xf32>
    %cst_234 = arith.constant dense<0.000000e+00> : vector<8x8xf32>
    %848 = tpu.matmul %846, %847, %cst_234 {dimension_numbers = #tpu.dot_dimension_numbers<[1], [0], [0], [1], [0, 0, 1, 1], [], []>} : vector<8x8xf32>, vector<8x8xf32>, vector<8x8xf32> -> vector<8x8xf32>
    %849 = vector.extract_strided_slice %795 {offsets = [0, 24], sizes = [8, 8], strides = [1, 1]} : vector<8x32xf32> to vector<8x8xf32>
    %850 = vector.extract_strided_slice %796 {offsets = [0, 24], sizes = [8, 8], strides = [1, 1]} : vector<8x32xf32> to vector<8x8xf32>
    %cst_235 = arith.constant dense<0.000000e+00> : vector<8x8xf32>
    %851 = tpu.matmul %849, %850, %cst_235 {dimension_numbers = #tpu.dot_dimension_numbers<[1], [1], [0], [0], [0, 0, 1, 0], [], []>} : vector<8x8xf32>, vector<8x8xf32>, vector<8x8xf32> -> vector<8x8xf32>
    %852 = vector.broadcast %35 : vector<1x8xf32> to vector<8x8xf32>
    %853 = arith.addf %851, %852 : vector<8x8xf32>
    %cst_236 = arith.constant dense<0xFF800000> : vector<8xf32>
    %854 = vector.multi_reduction <maximumf>, %853, %cst_236 [1] : vector<8x8xf32> to vector<8xf32>
    %855 = vector.shape_cast %854 : vector<8xf32> to vector<8x1xf32>
    %856 = vector.broadcast %855 : vector<8x1xf32> to vector<8x8xf32>
    %857 = arith.subf %853, %856 : vector<8x8xf32>
    %858 = math.exp %857 : vector<8x8xf32>
    %cst_237 = arith.constant dense<0.000000e+00> : vector<8xf32>
    %859 = vector.multi_reduction <add>, %858, %cst_237 [1] : vector<8x8xf32> to vector<8xf32>
    %860 = vector.shape_cast %859 : vector<8xf32> to vector<8x1xf32>
    %861 = tpu.reciprocal %860 {approx = true} : vector<8x1xf32> -> vector<8x1xf32>
    %862 = vector.broadcast %861 : vector<8x1xf32> to vector<8x8xf32>
    %863 = arith.mulf %858, %862 : vector<8x8xf32>
    %864 = vector.extract_strided_slice %797 {offsets = [0, 24], sizes = [8, 8], strides = [1, 1]} : vector<8x32xf32> to vector<8x8xf32>
    %cst_238 = arith.constant dense<0.000000e+00> : vector<8x8xf32>
    %865 = tpu.matmul %863, %864, %cst_238 {dimension_numbers = #tpu.dot_dimension_numbers<[1], [0], [0], [1], [0, 0, 1, 1], [], []>} : vector<8x8xf32>, vector<8x8xf32>, vector<8x8xf32> -> vector<8x8xf32>
    %866 = tpu.concatenate %814, %831, %848, %865 in 1 : vector<8x8xf32>, vector<8x8xf32>, vector<8x8xf32>, vector<8x8xf32> -> vector<8x32xf32>
    %867 = tpu.concatenate %794, %866 in 0 : vector<8x32xf32>, vector<8x32xf32> -> vector<16x32xf32>
    %c640 = arith.constant 640 : index
    %c0_239 = arith.constant 0 : index
    %868 = vector.load %arg4[%c640, %c0_239] : memref<1120x128xf32, #tpu.memory_space<vmem>>, vector<32x32xf32>
    %cst_240 = arith.constant dense<0.000000e+00> : vector<16x32xf32>
    %869 = tpu.matmul %867, %868, %cst_240 {dimension_numbers = #tpu.dot_dimension_numbers<[1], [0], [0], [1], [0, 0, 1, 1], [], []>} : vector<16x32xf32>, vector<32x32xf32>, vector<16x32xf32> -> vector<16x32xf32>
    %c672 = arith.constant 672 : index
    %c0_241 = arith.constant 0 : index
    %870 = vector.load %arg4[%c672, %c0_241] : memref<1120x128xf32, #tpu.memory_space<vmem>>, vector<1x32xf32>
    %871 = vector.broadcast %870 : vector<1x32xf32> to vector<16x32xf32>
    %872 = arith.addf %869, %871 : vector<16x32xf32>
    %873 = arith.addf %685, %872 : vector<16x32xf32>
    %c696 = arith.constant 696 : index
    %c0_242 = arith.constant 0 : index
    %874 = vector.load %arg4[%c696, %c0_242] : memref<1120x128xf32, #tpu.memory_space<vmem>>, vector<2x32xf32>
    %cst_243 = arith.constant dense<0.000000e+00> : vector<16xf32>
    %875 = vector.multi_reduction <add>, %873, %cst_243 [1] : vector<16x32xf32> to vector<16xf32>
    %876 = vector.shape_cast %875 : vector<16xf32> to vector<16x1xf32>
    %cst_244 = arith.constant 3.200000e+01 : f32
    %877 = vector.broadcast %cst_244 : f32 to vector<16x1xf32>
    %878 = arith.divf %876, %877 : vector<16x1xf32>
    %879 = vector.broadcast %878 : vector<16x1xf32> to vector<16x32xf32>
    %880 = arith.subf %873, %879 : vector<16x32xf32>
    %881 = arith.mulf %880, %880 : vector<16x32xf32>
    %cst_245 = arith.constant dense<0.000000e+00> : vector<16xf32>
    %882 = vector.multi_reduction <add>, %881, %cst_245 [1] : vector<16x32xf32> to vector<16xf32>
    %883 = vector.shape_cast %882 : vector<16xf32> to vector<16x1xf32>
    %cst_246 = arith.constant 3.200000e+01 : f32
    %884 = vector.broadcast %cst_246 : f32 to vector<16x1xf32>
    %885 = arith.divf %883, %884 : vector<16x1xf32>
    %886 = vector.broadcast %878 : vector<16x1xf32> to vector<16x32xf32>
    %887 = arith.subf %873, %886 : vector<16x32xf32>
    %cst_247 = arith.constant 9.99999997E-7 : f32
    %888 = vector.broadcast %cst_247 : f32 to vector<16x1xf32>
    %889 = arith.addf %885, %888 : vector<16x1xf32>
    %890 = math.rsqrt %889 : vector<16x1xf32>
    %891 = vector.broadcast %890 : vector<16x1xf32> to vector<16x32xf32>
    %892 = arith.mulf %887, %891 : vector<16x32xf32>
    %893 = vector.extract_strided_slice %874 {offsets = [0, 0], sizes = [1, 32], strides = [1, 1]} : vector<2x32xf32> to vector<1x32xf32>
    %894 = vector.broadcast %893 : vector<1x32xf32> to vector<16x32xf32>
    %895 = arith.mulf %892, %894 : vector<16x32xf32>
    %896 = vector.extract_strided_slice %874 {offsets = [1, 0], sizes = [1, 32], strides = [1, 1]} : vector<2x32xf32> to vector<1x32xf32>
    %897 = vector.broadcast %896 : vector<1x32xf32> to vector<16x32xf32>
    %898 = arith.addf %895, %897 : vector<16x32xf32>
    %c704 = arith.constant 704 : index
    %c0_248 = arith.constant 0 : index
    %899 = vector.load %arg4[%c704, %c0_248] : memref<1120x128xf32, #tpu.memory_space<vmem>>, vector<32x64xf32>
    %cst_249 = arith.constant dense<0.000000e+00> : vector<16x64xf32>
    %900 = tpu.matmul %898, %899, %cst_249 {dimension_numbers = #tpu.dot_dimension_numbers<[1], [0], [0], [1], [0, 0, 1, 1], [], []>} : vector<16x32xf32>, vector<32x64xf32>, vector<16x64xf32> -> vector<16x64xf32>
    %c736 = arith.constant 736 : index
    %c0_250 = arith.constant 0 : index
    %901 = vector.load %arg4[%c736, %c0_250] : memref<1120x128xf32, #tpu.memory_space<vmem>>, vector<1x64xf32>
    %902 = vector.broadcast %901 : vector<1x64xf32> to vector<16x64xf32>
    %903 = arith.addf %900, %902 : vector<16x64xf32>
    %cst_251 = arith.constant 0.000000e+00 : f32
    %904 = vector.broadcast %cst_251 : f32 to vector<16x64xf32>
    %905 = arith.maximumf %903, %904 : vector<16x64xf32>
    %c744 = arith.constant 744 : index
    %c0_252 = arith.constant 0 : index
    %906 = vector.load %arg4[%c744, %c0_252] : memref<1120x128xf32, #tpu.memory_space<vmem>>, vector<64x32xf32>
    %cst_253 = arith.constant dense<0.000000e+00> : vector<16x32xf32>
    %907 = tpu.matmul %905, %906, %cst_253 {dimension_numbers = #tpu.dot_dimension_numbers<[1], [0], [0], [1], [0, 0, 1, 1], [], []>} : vector<16x64xf32>, vector<64x32xf32>, vector<16x32xf32> -> vector<16x32xf32>
    %c808 = arith.constant 808 : index
    %c0_254 = arith.constant 0 : index
    %908 = vector.load %arg4[%c808, %c0_254] : memref<1120x128xf32, #tpu.memory_space<vmem>>, vector<1x32xf32>
    %909 = vector.broadcast %908 : vector<1x32xf32> to vector<16x32xf32>
    %910 = arith.addf %907, %909 : vector<16x32xf32>
    %911 = arith.addf %873, %910 : vector<16x32xf32>
    %c976 = arith.constant 976 : index
    %c0_255 = arith.constant 0 : index
    %912 = vector.load %arg4[%c976, %c0_255] : memref<1120x128xf32, #tpu.memory_space<vmem>>, vector<2x32xf32>
    %cst_256 = arith.constant dense<0.000000e+00> : vector<16xf32>
    %913 = vector.multi_reduction <add>, %911, %cst_256 [1] : vector<16x32xf32> to vector<16xf32>
    %914 = vector.shape_cast %913 : vector<16xf32> to vector<16x1xf32>
    %cst_257 = arith.constant 3.200000e+01 : f32
    %915 = vector.broadcast %cst_257 : f32 to vector<16x1xf32>
    %916 = arith.divf %914, %915 : vector<16x1xf32>
    %917 = vector.broadcast %916 : vector<16x1xf32> to vector<16x32xf32>
    %918 = arith.subf %911, %917 : vector<16x32xf32>
    %919 = arith.mulf %918, %918 : vector<16x32xf32>
    %cst_258 = arith.constant dense<0.000000e+00> : vector<16xf32>
    %920 = vector.multi_reduction <add>, %919, %cst_258 [1] : vector<16x32xf32> to vector<16xf32>
    %921 = vector.shape_cast %920 : vector<16xf32> to vector<16x1xf32>
    %cst_259 = arith.constant 3.200000e+01 : f32
    %922 = vector.broadcast %cst_259 : f32 to vector<16x1xf32>
    %923 = arith.divf %921, %922 : vector<16x1xf32>
    %924 = vector.broadcast %916 : vector<16x1xf32> to vector<16x32xf32>
    %925 = arith.subf %911, %924 : vector<16x32xf32>
    %cst_260 = arith.constant 9.99999997E-7 : f32
    %926 = vector.broadcast %cst_260 : f32 to vector<16x1xf32>
    %927 = arith.addf %923, %926 : vector<16x1xf32>
    %928 = math.rsqrt %927 : vector<16x1xf32>
    %929 = vector.broadcast %928 : vector<16x1xf32> to vector<16x32xf32>
    %930 = arith.mulf %925, %929 : vector<16x32xf32>
    %931 = vector.extract_strided_slice %912 {offsets = [0, 0], sizes = [1, 32], strides = [1, 1]} : vector<2x32xf32> to vector<1x32xf32>
    %932 = vector.broadcast %931 : vector<1x32xf32> to vector<16x32xf32>
    %933 = arith.mulf %930, %932 : vector<16x32xf32>
    %934 = vector.extract_strided_slice %912 {offsets = [1, 0], sizes = [1, 32], strides = [1, 1]} : vector<2x32xf32> to vector<1x32xf32>
    %935 = vector.broadcast %934 : vector<1x32xf32> to vector<16x32xf32>
    %936 = arith.addf %933, %935 : vector<16x32xf32>
    %c816 = arith.constant 816 : index
    %c0_261 = arith.constant 0 : index
    %937 = vector.load %arg4[%c816, %c0_261] : memref<1120x128xf32, #tpu.memory_space<vmem>>, vector<32x96xf32>
    %cst_262 = arith.constant dense<0.000000e+00> : vector<16x96xf32>
    %938 = tpu.matmul %936, %937, %cst_262 {dimension_numbers = #tpu.dot_dimension_numbers<[1], [0], [0], [1], [0, 0, 1, 1], [], []>} : vector<16x32xf32>, vector<32x96xf32>, vector<16x96xf32> -> vector<16x96xf32>
    %c848 = arith.constant 848 : index
    %c0_263 = arith.constant 0 : index
    %939 = vector.load %arg4[%c848, %c0_263] : memref<1120x128xf32, #tpu.memory_space<vmem>>, vector<1x96xf32>
    %940 = vector.broadcast %939 : vector<1x96xf32> to vector<16x96xf32>
    %941 = arith.addf %938, %940 : vector<16x96xf32>
    %942 = vector.extract_strided_slice %941 {offsets = [0, 0], sizes = [8, 32], strides = [1, 1]} : vector<16x96xf32> to vector<8x32xf32>
    %943 = vector.extract_strided_slice %941 {offsets = [0, 32], sizes = [8, 32], strides = [1, 1]} : vector<16x96xf32> to vector<8x32xf32>
    %944 = vector.extract_strided_slice %941 {offsets = [0, 64], sizes = [8, 32], strides = [1, 1]} : vector<16x96xf32> to vector<8x32xf32>
    %945 = vector.extract_strided_slice %942 {offsets = [0, 0], sizes = [8, 8], strides = [1, 1]} : vector<8x32xf32> to vector<8x8xf32>
    %946 = vector.extract_strided_slice %943 {offsets = [0, 0], sizes = [8, 8], strides = [1, 1]} : vector<8x32xf32> to vector<8x8xf32>
    %cst_264 = arith.constant dense<0.000000e+00> : vector<8x8xf32>
    %947 = tpu.matmul %945, %946, %cst_264 {dimension_numbers = #tpu.dot_dimension_numbers<[1], [1], [0], [0], [0, 0, 1, 0], [], []>} : vector<8x8xf32>, vector<8x8xf32>, vector<8x8xf32> -> vector<8x8xf32>
    %948 = arith.addf %947, %42 : vector<8x8xf32>
    %cst_265 = arith.constant dense<0xFF800000> : vector<8xf32>
    %949 = vector.multi_reduction <maximumf>, %948, %cst_265 [1] : vector<8x8xf32> to vector<8xf32>
    %950 = vector.shape_cast %949 : vector<8xf32> to vector<8x1xf32>
    %951 = vector.broadcast %950 : vector<8x1xf32> to vector<8x8xf32>
    %952 = arith.subf %948, %951 : vector<8x8xf32>
    %953 = math.exp %952 : vector<8x8xf32>
    %cst_266 = arith.constant dense<0.000000e+00> : vector<8xf32>
    %954 = vector.multi_reduction <add>, %953, %cst_266 [1] : vector<8x8xf32> to vector<8xf32>
    %955 = vector.shape_cast %954 : vector<8xf32> to vector<8x1xf32>
    %956 = tpu.reciprocal %955 {approx = true} : vector<8x1xf32> -> vector<8x1xf32>
    %957 = vector.broadcast %956 : vector<8x1xf32> to vector<8x8xf32>
    %958 = arith.mulf %953, %957 : vector<8x8xf32>
    %959 = vector.extract_strided_slice %944 {offsets = [0, 0], sizes = [8, 8], strides = [1, 1]} : vector<8x32xf32> to vector<8x8xf32>
    %cst_267 = arith.constant dense<0.000000e+00> : vector<8x8xf32>
    %960 = tpu.matmul %958, %959, %cst_267 {dimension_numbers = #tpu.dot_dimension_numbers<[1], [0], [0], [1], [0, 0, 1, 1], [], []>} : vector<8x8xf32>, vector<8x8xf32>, vector<8x8xf32> -> vector<8x8xf32>
    %961 = vector.extract_strided_slice %942 {offsets = [0, 8], sizes = [8, 8], strides = [1, 1]} : vector<8x32xf32> to vector<8x8xf32>
    %962 = vector.extract_strided_slice %943 {offsets = [0, 8], sizes = [8, 8], strides = [1, 1]} : vector<8x32xf32> to vector<8x8xf32>
    %cst_268 = arith.constant dense<0.000000e+00> : vector<8x8xf32>
    %963 = tpu.matmul %961, %962, %cst_268 {dimension_numbers = #tpu.dot_dimension_numbers<[1], [1], [0], [0], [0, 0, 1, 0], [], []>} : vector<8x8xf32>, vector<8x8xf32>, vector<8x8xf32> -> vector<8x8xf32>
    %964 = arith.addf %963, %42 : vector<8x8xf32>
    %cst_269 = arith.constant dense<0xFF800000> : vector<8xf32>
    %965 = vector.multi_reduction <maximumf>, %964, %cst_269 [1] : vector<8x8xf32> to vector<8xf32>
    %966 = vector.shape_cast %965 : vector<8xf32> to vector<8x1xf32>
    %967 = vector.broadcast %966 : vector<8x1xf32> to vector<8x8xf32>
    %968 = arith.subf %964, %967 : vector<8x8xf32>
    %969 = math.exp %968 : vector<8x8xf32>
    %cst_270 = arith.constant dense<0.000000e+00> : vector<8xf32>
    %970 = vector.multi_reduction <add>, %969, %cst_270 [1] : vector<8x8xf32> to vector<8xf32>
    %971 = vector.shape_cast %970 : vector<8xf32> to vector<8x1xf32>
    %972 = tpu.reciprocal %971 {approx = true} : vector<8x1xf32> -> vector<8x1xf32>
    %973 = vector.broadcast %972 : vector<8x1xf32> to vector<8x8xf32>
    %974 = arith.mulf %969, %973 : vector<8x8xf32>
    %975 = vector.extract_strided_slice %944 {offsets = [0, 8], sizes = [8, 8], strides = [1, 1]} : vector<8x32xf32> to vector<8x8xf32>
    %cst_271 = arith.constant dense<0.000000e+00> : vector<8x8xf32>
    %976 = tpu.matmul %974, %975, %cst_271 {dimension_numbers = #tpu.dot_dimension_numbers<[1], [0], [0], [1], [0, 0, 1, 1], [], []>} : vector<8x8xf32>, vector<8x8xf32>, vector<8x8xf32> -> vector<8x8xf32>
    %977 = vector.extract_strided_slice %942 {offsets = [0, 16], sizes = [8, 8], strides = [1, 1]} : vector<8x32xf32> to vector<8x8xf32>
    %978 = vector.extract_strided_slice %943 {offsets = [0, 16], sizes = [8, 8], strides = [1, 1]} : vector<8x32xf32> to vector<8x8xf32>
    %cst_272 = arith.constant dense<0.000000e+00> : vector<8x8xf32>
    %979 = tpu.matmul %977, %978, %cst_272 {dimension_numbers = #tpu.dot_dimension_numbers<[1], [1], [0], [0], [0, 0, 1, 0], [], []>} : vector<8x8xf32>, vector<8x8xf32>, vector<8x8xf32> -> vector<8x8xf32>
    %980 = arith.addf %979, %42 : vector<8x8xf32>
    %cst_273 = arith.constant dense<0xFF800000> : vector<8xf32>
    %981 = vector.multi_reduction <maximumf>, %980, %cst_273 [1] : vector<8x8xf32> to vector<8xf32>
    %982 = vector.shape_cast %981 : vector<8xf32> to vector<8x1xf32>
    %983 = vector.broadcast %982 : vector<8x1xf32> to vector<8x8xf32>
    %984 = arith.subf %980, %983 : vector<8x8xf32>
    %985 = math.exp %984 : vector<8x8xf32>
    %cst_274 = arith.constant dense<0.000000e+00> : vector<8xf32>
    %986 = vector.multi_reduction <add>, %985, %cst_274 [1] : vector<8x8xf32> to vector<8xf32>
    %987 = vector.shape_cast %986 : vector<8xf32> to vector<8x1xf32>
    %988 = tpu.reciprocal %987 {approx = true} : vector<8x1xf32> -> vector<8x1xf32>
    %989 = vector.broadcast %988 : vector<8x1xf32> to vector<8x8xf32>
    %990 = arith.mulf %985, %989 : vector<8x8xf32>
    %991 = vector.extract_strided_slice %944 {offsets = [0, 16], sizes = [8, 8], strides = [1, 1]} : vector<8x32xf32> to vector<8x8xf32>
    %cst_275 = arith.constant dense<0.000000e+00> : vector<8x8xf32>
    %992 = tpu.matmul %990, %991, %cst_275 {dimension_numbers = #tpu.dot_dimension_numbers<[1], [0], [0], [1], [0, 0, 1, 1], [], []>} : vector<8x8xf32>, vector<8x8xf32>, vector<8x8xf32> -> vector<8x8xf32>
    %993 = vector.extract_strided_slice %942 {offsets = [0, 24], sizes = [8, 8], strides = [1, 1]} : vector<8x32xf32> to vector<8x8xf32>
    %994 = vector.extract_strided_slice %943 {offsets = [0, 24], sizes = [8, 8], strides = [1, 1]} : vector<8x32xf32> to vector<8x8xf32>
    %cst_276 = arith.constant dense<0.000000e+00> : vector<8x8xf32>
    %995 = tpu.matmul %993, %994, %cst_276 {dimension_numbers = #tpu.dot_dimension_numbers<[1], [1], [0], [0], [0, 0, 1, 0], [], []>} : vector<8x8xf32>, vector<8x8xf32>, vector<8x8xf32> -> vector<8x8xf32>
    %996 = arith.addf %995, %42 : vector<8x8xf32>
    %cst_277 = arith.constant dense<0xFF800000> : vector<8xf32>
    %997 = vector.multi_reduction <maximumf>, %996, %cst_277 [1] : vector<8x8xf32> to vector<8xf32>
    %998 = vector.shape_cast %997 : vector<8xf32> to vector<8x1xf32>
    %999 = vector.broadcast %998 : vector<8x1xf32> to vector<8x8xf32>
    %1000 = arith.subf %996, %999 : vector<8x8xf32>
    %1001 = math.exp %1000 : vector<8x8xf32>
    %cst_278 = arith.constant dense<0.000000e+00> : vector<8xf32>
    %1002 = vector.multi_reduction <add>, %1001, %cst_278 [1] : vector<8x8xf32> to vector<8xf32>
    %1003 = vector.shape_cast %1002 : vector<8xf32> to vector<8x1xf32>
    %1004 = tpu.reciprocal %1003 {approx = true} : vector<8x1xf32> -> vector<8x1xf32>
    %1005 = vector.broadcast %1004 : vector<8x1xf32> to vector<8x8xf32>
    %1006 = arith.mulf %1001, %1005 : vector<8x8xf32>
    %1007 = vector.extract_strided_slice %944 {offsets = [0, 24], sizes = [8, 8], strides = [1, 1]} : vector<8x32xf32> to vector<8x8xf32>
    %cst_279 = arith.constant dense<0.000000e+00> : vector<8x8xf32>
    %1008 = tpu.matmul %1006, %1007, %cst_279 {dimension_numbers = #tpu.dot_dimension_numbers<[1], [0], [0], [1], [0, 0, 1, 1], [], []>} : vector<8x8xf32>, vector<8x8xf32>, vector<8x8xf32> -> vector<8x8xf32>
    %1009 = tpu.concatenate %960, %976, %992, %1008 in 1 : vector<8x8xf32>, vector<8x8xf32>, vector<8x8xf32>, vector<8x8xf32> -> vector<8x32xf32>
    %1010 = vector.extract_strided_slice %941 {offsets = [8, 0], sizes = [8, 32], strides = [1, 1]} : vector<16x96xf32> to vector<8x32xf32>
    %1011 = vector.extract_strided_slice %941 {offsets = [8, 32], sizes = [8, 32], strides = [1, 1]} : vector<16x96xf32> to vector<8x32xf32>
    %1012 = vector.extract_strided_slice %941 {offsets = [8, 64], sizes = [8, 32], strides = [1, 1]} : vector<16x96xf32> to vector<8x32xf32>
    %1013 = vector.extract_strided_slice %1010 {offsets = [0, 0], sizes = [8, 8], strides = [1, 1]} : vector<8x32xf32> to vector<8x8xf32>
    %1014 = vector.extract_strided_slice %1011 {offsets = [0, 0], sizes = [8, 8], strides = [1, 1]} : vector<8x32xf32> to vector<8x8xf32>
    %cst_280 = arith.constant dense<0.000000e+00> : vector<8x8xf32>
    %1015 = tpu.matmul %1013, %1014, %cst_280 {dimension_numbers = #tpu.dot_dimension_numbers<[1], [1], [0], [0], [0, 0, 1, 0], [], []>} : vector<8x8xf32>, vector<8x8xf32>, vector<8x8xf32> -> vector<8x8xf32>
    %1016 = arith.addf %1015, %49 : vector<8x8xf32>
    %cst_281 = arith.constant dense<0xFF800000> : vector<8xf32>
    %1017 = vector.multi_reduction <maximumf>, %1016, %cst_281 [1] : vector<8x8xf32> to vector<8xf32>
    %1018 = vector.shape_cast %1017 : vector<8xf32> to vector<8x1xf32>
    %1019 = vector.broadcast %1018 : vector<8x1xf32> to vector<8x8xf32>
    %1020 = arith.subf %1016, %1019 : vector<8x8xf32>
    %1021 = math.exp %1020 : vector<8x8xf32>
    %cst_282 = arith.constant dense<0.000000e+00> : vector<8xf32>
    %1022 = vector.multi_reduction <add>, %1021, %cst_282 [1] : vector<8x8xf32> to vector<8xf32>
    %1023 = vector.shape_cast %1022 : vector<8xf32> to vector<8x1xf32>
    %1024 = tpu.reciprocal %1023 {approx = true} : vector<8x1xf32> -> vector<8x1xf32>
    %1025 = vector.broadcast %1024 : vector<8x1xf32> to vector<8x8xf32>
    %1026 = arith.mulf %1021, %1025 : vector<8x8xf32>
    %1027 = vector.extract_strided_slice %1012 {offsets = [0, 0], sizes = [8, 8], strides = [1, 1]} : vector<8x32xf32> to vector<8x8xf32>
    %cst_283 = arith.constant dense<0.000000e+00> : vector<8x8xf32>
    %1028 = tpu.matmul %1026, %1027, %cst_283 {dimension_numbers = #tpu.dot_dimension_numbers<[1], [0], [0], [1], [0, 0, 1, 1], [], []>} : vector<8x8xf32>, vector<8x8xf32>, vector<8x8xf32> -> vector<8x8xf32>
    %1029 = vector.extract_strided_slice %1010 {offsets = [0, 8], sizes = [8, 8], strides = [1, 1]} : vector<8x32xf32> to vector<8x8xf32>
    %1030 = vector.extract_strided_slice %1011 {offsets = [0, 8], sizes = [8, 8], strides = [1, 1]} : vector<8x32xf32> to vector<8x8xf32>
    %cst_284 = arith.constant dense<0.000000e+00> : vector<8x8xf32>
    %1031 = tpu.matmul %1029, %1030, %cst_284 {dimension_numbers = #tpu.dot_dimension_numbers<[1], [1], [0], [0], [0, 0, 1, 0], [], []>} : vector<8x8xf32>, vector<8x8xf32>, vector<8x8xf32> -> vector<8x8xf32>
    %1032 = arith.addf %1031, %49 : vector<8x8xf32>
    %cst_285 = arith.constant dense<0xFF800000> : vector<8xf32>
    %1033 = vector.multi_reduction <maximumf>, %1032, %cst_285 [1] : vector<8x8xf32> to vector<8xf32>
    %1034 = vector.shape_cast %1033 : vector<8xf32> to vector<8x1xf32>
    %1035 = vector.broadcast %1034 : vector<8x1xf32> to vector<8x8xf32>
    %1036 = arith.subf %1032, %1035 : vector<8x8xf32>
    %1037 = math.exp %1036 : vector<8x8xf32>
    %cst_286 = arith.constant dense<0.000000e+00> : vector<8xf32>
    %1038 = vector.multi_reduction <add>, %1037, %cst_286 [1] : vector<8x8xf32> to vector<8xf32>
    %1039 = vector.shape_cast %1038 : vector<8xf32> to vector<8x1xf32>
    %1040 = tpu.reciprocal %1039 {approx = true} : vector<8x1xf32> -> vector<8x1xf32>
    %1041 = vector.broadcast %1040 : vector<8x1xf32> to vector<8x8xf32>
    %1042 = arith.mulf %1037, %1041 : vector<8x8xf32>
    %1043 = vector.extract_strided_slice %1012 {offsets = [0, 8], sizes = [8, 8], strides = [1, 1]} : vector<8x32xf32> to vector<8x8xf32>
    %cst_287 = arith.constant dense<0.000000e+00> : vector<8x8xf32>
    %1044 = tpu.matmul %1042, %1043, %cst_287 {dimension_numbers = #tpu.dot_dimension_numbers<[1], [0], [0], [1], [0, 0, 1, 1], [], []>} : vector<8x8xf32>, vector<8x8xf32>, vector<8x8xf32> -> vector<8x8xf32>
    %1045 = vector.extract_strided_slice %1010 {offsets = [0, 16], sizes = [8, 8], strides = [1, 1]} : vector<8x32xf32> to vector<8x8xf32>
    %1046 = vector.extract_strided_slice %1011 {offsets = [0, 16], sizes = [8, 8], strides = [1, 1]} : vector<8x32xf32> to vector<8x8xf32>
    %cst_288 = arith.constant dense<0.000000e+00> : vector<8x8xf32>
    %1047 = tpu.matmul %1045, %1046, %cst_288 {dimension_numbers = #tpu.dot_dimension_numbers<[1], [1], [0], [0], [0, 0, 1, 0], [], []>} : vector<8x8xf32>, vector<8x8xf32>, vector<8x8xf32> -> vector<8x8xf32>
    %1048 = arith.addf %1047, %49 : vector<8x8xf32>
    %cst_289 = arith.constant dense<0xFF800000> : vector<8xf32>
    %1049 = vector.multi_reduction <maximumf>, %1048, %cst_289 [1] : vector<8x8xf32> to vector<8xf32>
    %1050 = vector.shape_cast %1049 : vector<8xf32> to vector<8x1xf32>
    %1051 = vector.broadcast %1050 : vector<8x1xf32> to vector<8x8xf32>
    %1052 = arith.subf %1048, %1051 : vector<8x8xf32>
    %1053 = math.exp %1052 : vector<8x8xf32>
    %cst_290 = arith.constant dense<0.000000e+00> : vector<8xf32>
    %1054 = vector.multi_reduction <add>, %1053, %cst_290 [1] : vector<8x8xf32> to vector<8xf32>
    %1055 = vector.shape_cast %1054 : vector<8xf32> to vector<8x1xf32>
    %1056 = tpu.reciprocal %1055 {approx = true} : vector<8x1xf32> -> vector<8x1xf32>
    %1057 = vector.broadcast %1056 : vector<8x1xf32> to vector<8x8xf32>
    %1058 = arith.mulf %1053, %1057 : vector<8x8xf32>
    %1059 = vector.extract_strided_slice %1012 {offsets = [0, 16], sizes = [8, 8], strides = [1, 1]} : vector<8x32xf32> to vector<8x8xf32>
    %cst_291 = arith.constant dense<0.000000e+00> : vector<8x8xf32>
    %1060 = tpu.matmul %1058, %1059, %cst_291 {dimension_numbers = #tpu.dot_dimension_numbers<[1], [0], [0], [1], [0, 0, 1, 1], [], []>} : vector<8x8xf32>, vector<8x8xf32>, vector<8x8xf32> -> vector<8x8xf32>
    %1061 = vector.extract_strided_slice %1010 {offsets = [0, 24], sizes = [8, 8], strides = [1, 1]} : vector<8x32xf32> to vector<8x8xf32>
    %1062 = vector.extract_strided_slice %1011 {offsets = [0, 24], sizes = [8, 8], strides = [1, 1]} : vector<8x32xf32> to vector<8x8xf32>
    %cst_292 = arith.constant dense<0.000000e+00> : vector<8x8xf32>
    %1063 = tpu.matmul %1061, %1062, %cst_292 {dimension_numbers = #tpu.dot_dimension_numbers<[1], [1], [0], [0], [0, 0, 1, 0], [], []>} : vector<8x8xf32>, vector<8x8xf32>, vector<8x8xf32> -> vector<8x8xf32>
    %1064 = arith.addf %1063, %49 : vector<8x8xf32>
    %cst_293 = arith.constant dense<0xFF800000> : vector<8xf32>
    %1065 = vector.multi_reduction <maximumf>, %1064, %cst_293 [1] : vector<8x8xf32> to vector<8xf32>
    %1066 = vector.shape_cast %1065 : vector<8xf32> to vector<8x1xf32>
    %1067 = vector.broadcast %1066 : vector<8x1xf32> to vector<8x8xf32>
    %1068 = arith.subf %1064, %1067 : vector<8x8xf32>
    %1069 = math.exp %1068 : vector<8x8xf32>
    %cst_294 = arith.constant dense<0.000000e+00> : vector<8xf32>
    %1070 = vector.multi_reduction <add>, %1069, %cst_294 [1] : vector<8x8xf32> to vector<8xf32>
    %1071 = vector.shape_cast %1070 : vector<8xf32> to vector<8x1xf32>
    %1072 = tpu.reciprocal %1071 {approx = true} : vector<8x1xf32> -> vector<8x1xf32>
    %1073 = vector.broadcast %1072 : vector<8x1xf32> to vector<8x8xf32>
    %1074 = arith.mulf %1069, %1073 : vector<8x8xf32>
    %1075 = vector.extract_strided_slice %1012 {offsets = [0, 24], sizes = [8, 8], strides = [1, 1]} : vector<8x32xf32> to vector<8x8xf32>
    %cst_295 = arith.constant dense<0.000000e+00> : vector<8x8xf32>
    %1076 = tpu.matmul %1074, %1075, %cst_295 {dimension_numbers = #tpu.dot_dimension_numbers<[1], [0], [0], [1], [0, 0, 1, 1], [], []>} : vector<8x8xf32>, vector<8x8xf32>, vector<8x8xf32> -> vector<8x8xf32>
    %1077 = tpu.concatenate %1028, %1044, %1060, %1076 in 1 : vector<8x8xf32>, vector<8x8xf32>, vector<8x8xf32>, vector<8x8xf32> -> vector<8x32xf32>
    %1078 = tpu.concatenate %1009, %1077 in 0 : vector<8x32xf32>, vector<8x32xf32> -> vector<16x32xf32>
    %c856 = arith.constant 856 : index
    %c0_296 = arith.constant 0 : index
    %1079 = vector.load %arg4[%c856, %c0_296] : memref<1120x128xf32, #tpu.memory_space<vmem>>, vector<32x32xf32>
    %cst_297 = arith.constant dense<0.000000e+00> : vector<16x32xf32>
    %1080 = tpu.matmul %1078, %1079, %cst_297 {dimension_numbers = #tpu.dot_dimension_numbers<[1], [0], [0], [1], [0, 0, 1, 1], [], []>} : vector<16x32xf32>, vector<32x32xf32>, vector<16x32xf32> -> vector<16x32xf32>
    %c888 = arith.constant 888 : index
    %c0_298 = arith.constant 0 : index
    %1081 = vector.load %arg4[%c888, %c0_298] : memref<1120x128xf32, #tpu.memory_space<vmem>>, vector<1x32xf32>
    %1082 = vector.broadcast %1081 : vector<1x32xf32> to vector<16x32xf32>
    %1083 = arith.addf %1080, %1082 : vector<16x32xf32>
    %1084 = arith.addf %911, %1083 : vector<16x32xf32>
    %c984 = arith.constant 984 : index
    %c0_299 = arith.constant 0 : index
    %1085 = vector.load %arg4[%c984, %c0_299] : memref<1120x128xf32, #tpu.memory_space<vmem>>, vector<2x32xf32>
    %cst_300 = arith.constant dense<0.000000e+00> : vector<16xf32>
    %1086 = vector.multi_reduction <add>, %1084, %cst_300 [1] : vector<16x32xf32> to vector<16xf32>
    %1087 = vector.shape_cast %1086 : vector<16xf32> to vector<16x1xf32>
    %cst_301 = arith.constant 3.200000e+01 : f32
    %1088 = vector.broadcast %cst_301 : f32 to vector<16x1xf32>
    %1089 = arith.divf %1087, %1088 : vector<16x1xf32>
    %1090 = vector.broadcast %1089 : vector<16x1xf32> to vector<16x32xf32>
    %1091 = arith.subf %1084, %1090 : vector<16x32xf32>
    %1092 = arith.mulf %1091, %1091 : vector<16x32xf32>
    %cst_302 = arith.constant dense<0.000000e+00> : vector<16xf32>
    %1093 = vector.multi_reduction <add>, %1092, %cst_302 [1] : vector<16x32xf32> to vector<16xf32>
    %1094 = vector.shape_cast %1093 : vector<16xf32> to vector<16x1xf32>
    %cst_303 = arith.constant 3.200000e+01 : f32
    %1095 = vector.broadcast %cst_303 : f32 to vector<16x1xf32>
    %1096 = arith.divf %1094, %1095 : vector<16x1xf32>
    %1097 = vector.broadcast %1089 : vector<16x1xf32> to vector<16x32xf32>
    %1098 = arith.subf %1084, %1097 : vector<16x32xf32>
    %cst_304 = arith.constant 9.99999997E-7 : f32
    %1099 = vector.broadcast %cst_304 : f32 to vector<16x1xf32>
    %1100 = arith.addf %1096, %1099 : vector<16x1xf32>
    %1101 = math.rsqrt %1100 : vector<16x1xf32>
    %1102 = vector.broadcast %1101 : vector<16x1xf32> to vector<16x32xf32>
    %1103 = arith.mulf %1098, %1102 : vector<16x32xf32>
    %1104 = vector.extract_strided_slice %1085 {offsets = [0, 0], sizes = [1, 32], strides = [1, 1]} : vector<2x32xf32> to vector<1x32xf32>
    %1105 = vector.broadcast %1104 : vector<1x32xf32> to vector<16x32xf32>
    %1106 = arith.mulf %1103, %1105 : vector<16x32xf32>
    %1107 = vector.extract_strided_slice %1085 {offsets = [1, 0], sizes = [1, 32], strides = [1, 1]} : vector<2x32xf32> to vector<1x32xf32>
    %1108 = vector.broadcast %1107 : vector<1x32xf32> to vector<16x32xf32>
    %1109 = arith.addf %1106, %1108 : vector<16x32xf32>
    %c896 = arith.constant 896 : index
    %c0_305 = arith.constant 0 : index
    %1110 = vector.load %arg4[%c896, %c0_305] : memref<1120x128xf32, #tpu.memory_space<vmem>>, vector<32x96xf32>
    %c928 = arith.constant 928 : index
    %c0_306 = arith.constant 0 : index
    %1111 = vector.load %arg4[%c928, %c0_306] : memref<1120x128xf32, #tpu.memory_space<vmem>>, vector<1x96xf32>
    %1112 = vector.extract_strided_slice %1110 {offsets = [0, 0], sizes = [32, 32], strides = [1, 1]} : vector<32x96xf32> to vector<32x32xf32>
    %cst_307 = arith.constant dense<0.000000e+00> : vector<16x32xf32>
    %1113 = tpu.matmul %1109, %1112, %cst_307 {dimension_numbers = #tpu.dot_dimension_numbers<[1], [0], [0], [1], [0, 0, 1, 1], [], []>} : vector<16x32xf32>, vector<32x32xf32>, vector<16x32xf32> -> vector<16x32xf32>
    %1114 = vector.extract_strided_slice %1111 {offsets = [0, 0], sizes = [1, 32], strides = [1, 1]} : vector<1x96xf32> to vector<1x32xf32>
    %1115 = vector.broadcast %1114 : vector<1x32xf32> to vector<16x32xf32>
    %1116 = arith.addf %1113, %1115 : vector<16x32xf32>
    %1117 = vector.extract_strided_slice %1110 {offsets = [0, 32], sizes = [32, 64], strides = [1, 1]} : vector<32x96xf32> to vector<32x64xf32>
    %cst_308 = arith.constant dense<0.000000e+00> : vector<16x64xf32>
    %1118 = tpu.matmul %512, %1117, %cst_308 {dimension_numbers = #tpu.dot_dimension_numbers<[1], [0], [0], [1], [0, 0, 1, 1], [], []>} : vector<16x32xf32>, vector<32x64xf32>, vector<16x64xf32> -> vector<16x64xf32>
    %1119 = vector.extract_strided_slice %1111 {offsets = [0, 32], sizes = [1, 64], strides = [1, 1]} : vector<1x96xf32> to vector<1x64xf32>
    %1120 = vector.broadcast %1119 : vector<1x64xf32> to vector<16x64xf32>
    %1121 = arith.addf %1118, %1120 : vector<16x64xf32>
    %1122 = vector.extract_strided_slice %1116 {offsets = [0, 0], sizes = [8, 32], strides = [1, 1]} : vector<16x32xf32> to vector<8x32xf32>
    %1123 = vector.extract_strided_slice %1121 {offsets = [0, 0], sizes = [8, 32], strides = [1, 1]} : vector<16x64xf32> to vector<8x32xf32>
    %1124 = vector.extract_strided_slice %1121 {offsets = [0, 32], sizes = [8, 32], strides = [1, 1]} : vector<16x64xf32> to vector<8x32xf32>
    %1125 = vector.extract_strided_slice %1122 {offsets = [0, 0], sizes = [8, 8], strides = [1, 1]} : vector<8x32xf32> to vector<8x8xf32>
    %1126 = vector.extract_strided_slice %1123 {offsets = [0, 0], sizes = [8, 8], strides = [1, 1]} : vector<8x32xf32> to vector<8x8xf32>
    %cst_309 = arith.constant dense<0.000000e+00> : vector<8x8xf32>
    %1127 = tpu.matmul %1125, %1126, %cst_309 {dimension_numbers = #tpu.dot_dimension_numbers<[1], [1], [0], [0], [0, 0, 1, 0], [], []>} : vector<8x8xf32>, vector<8x8xf32>, vector<8x8xf32> -> vector<8x8xf32>
    %1128 = vector.broadcast %28 : vector<1x8xf32> to vector<8x8xf32>
    %1129 = arith.addf %1127, %1128 : vector<8x8xf32>
    %cst_310 = arith.constant dense<0xFF800000> : vector<8xf32>
    %1130 = vector.multi_reduction <maximumf>, %1129, %cst_310 [1] : vector<8x8xf32> to vector<8xf32>
    %1131 = vector.shape_cast %1130 : vector<8xf32> to vector<8x1xf32>
    %1132 = vector.broadcast %1131 : vector<8x1xf32> to vector<8x8xf32>
    %1133 = arith.subf %1129, %1132 : vector<8x8xf32>
    %1134 = math.exp %1133 : vector<8x8xf32>
    %cst_311 = arith.constant dense<0.000000e+00> : vector<8xf32>
    %1135 = vector.multi_reduction <add>, %1134, %cst_311 [1] : vector<8x8xf32> to vector<8xf32>
    %1136 = vector.shape_cast %1135 : vector<8xf32> to vector<8x1xf32>
    %1137 = tpu.reciprocal %1136 {approx = true} : vector<8x1xf32> -> vector<8x1xf32>
    %1138 = vector.broadcast %1137 : vector<8x1xf32> to vector<8x8xf32>
    %1139 = arith.mulf %1134, %1138 : vector<8x8xf32>
    %1140 = vector.extract_strided_slice %1124 {offsets = [0, 0], sizes = [8, 8], strides = [1, 1]} : vector<8x32xf32> to vector<8x8xf32>
    %cst_312 = arith.constant dense<0.000000e+00> : vector<8x8xf32>
    %1141 = tpu.matmul %1139, %1140, %cst_312 {dimension_numbers = #tpu.dot_dimension_numbers<[1], [0], [0], [1], [0, 0, 1, 1], [], []>} : vector<8x8xf32>, vector<8x8xf32>, vector<8x8xf32> -> vector<8x8xf32>
    %1142 = vector.extract_strided_slice %1122 {offsets = [0, 8], sizes = [8, 8], strides = [1, 1]} : vector<8x32xf32> to vector<8x8xf32>
    %1143 = vector.extract_strided_slice %1123 {offsets = [0, 8], sizes = [8, 8], strides = [1, 1]} : vector<8x32xf32> to vector<8x8xf32>
    %cst_313 = arith.constant dense<0.000000e+00> : vector<8x8xf32>
    %1144 = tpu.matmul %1142, %1143, %cst_313 {dimension_numbers = #tpu.dot_dimension_numbers<[1], [1], [0], [0], [0, 0, 1, 0], [], []>} : vector<8x8xf32>, vector<8x8xf32>, vector<8x8xf32> -> vector<8x8xf32>
    %1145 = vector.broadcast %28 : vector<1x8xf32> to vector<8x8xf32>
    %1146 = arith.addf %1144, %1145 : vector<8x8xf32>
    %cst_314 = arith.constant dense<0xFF800000> : vector<8xf32>
    %1147 = vector.multi_reduction <maximumf>, %1146, %cst_314 [1] : vector<8x8xf32> to vector<8xf32>
    %1148 = vector.shape_cast %1147 : vector<8xf32> to vector<8x1xf32>
    %1149 = vector.broadcast %1148 : vector<8x1xf32> to vector<8x8xf32>
    %1150 = arith.subf %1146, %1149 : vector<8x8xf32>
    %1151 = math.exp %1150 : vector<8x8xf32>
    %cst_315 = arith.constant dense<0.000000e+00> : vector<8xf32>
    %1152 = vector.multi_reduction <add>, %1151, %cst_315 [1] : vector<8x8xf32> to vector<8xf32>
    %1153 = vector.shape_cast %1152 : vector<8xf32> to vector<8x1xf32>
    %1154 = tpu.reciprocal %1153 {approx = true} : vector<8x1xf32> -> vector<8x1xf32>
    %1155 = vector.broadcast %1154 : vector<8x1xf32> to vector<8x8xf32>
    %1156 = arith.mulf %1151, %1155 : vector<8x8xf32>
    %1157 = vector.extract_strided_slice %1124 {offsets = [0, 8], sizes = [8, 8], strides = [1, 1]} : vector<8x32xf32> to vector<8x8xf32>
    %cst_316 = arith.constant dense<0.000000e+00> : vector<8x8xf32>
    %1158 = tpu.matmul %1156, %1157, %cst_316 {dimension_numbers = #tpu.dot_dimension_numbers<[1], [0], [0], [1], [0, 0, 1, 1], [], []>} : vector<8x8xf32>, vector<8x8xf32>, vector<8x8xf32> -> vector<8x8xf32>
    %1159 = vector.extract_strided_slice %1122 {offsets = [0, 16], sizes = [8, 8], strides = [1, 1]} : vector<8x32xf32> to vector<8x8xf32>
    %1160 = vector.extract_strided_slice %1123 {offsets = [0, 16], sizes = [8, 8], strides = [1, 1]} : vector<8x32xf32> to vector<8x8xf32>
    %cst_317 = arith.constant dense<0.000000e+00> : vector<8x8xf32>
    %1161 = tpu.matmul %1159, %1160, %cst_317 {dimension_numbers = #tpu.dot_dimension_numbers<[1], [1], [0], [0], [0, 0, 1, 0], [], []>} : vector<8x8xf32>, vector<8x8xf32>, vector<8x8xf32> -> vector<8x8xf32>
    %1162 = vector.broadcast %28 : vector<1x8xf32> to vector<8x8xf32>
    %1163 = arith.addf %1161, %1162 : vector<8x8xf32>
    %cst_318 = arith.constant dense<0xFF800000> : vector<8xf32>
    %1164 = vector.multi_reduction <maximumf>, %1163, %cst_318 [1] : vector<8x8xf32> to vector<8xf32>
    %1165 = vector.shape_cast %1164 : vector<8xf32> to vector<8x1xf32>
    %1166 = vector.broadcast %1165 : vector<8x1xf32> to vector<8x8xf32>
    %1167 = arith.subf %1163, %1166 : vector<8x8xf32>
    %1168 = math.exp %1167 : vector<8x8xf32>
    %cst_319 = arith.constant dense<0.000000e+00> : vector<8xf32>
    %1169 = vector.multi_reduction <add>, %1168, %cst_319 [1] : vector<8x8xf32> to vector<8xf32>
    %1170 = vector.shape_cast %1169 : vector<8xf32> to vector<8x1xf32>
    %1171 = tpu.reciprocal %1170 {approx = true} : vector<8x1xf32> -> vector<8x1xf32>
    %1172 = vector.broadcast %1171 : vector<8x1xf32> to vector<8x8xf32>
    %1173 = arith.mulf %1168, %1172 : vector<8x8xf32>
    %1174 = vector.extract_strided_slice %1124 {offsets = [0, 16], sizes = [8, 8], strides = [1, 1]} : vector<8x32xf32> to vector<8x8xf32>
    %cst_320 = arith.constant dense<0.000000e+00> : vector<8x8xf32>
    %1175 = tpu.matmul %1173, %1174, %cst_320 {dimension_numbers = #tpu.dot_dimension_numbers<[1], [0], [0], [1], [0, 0, 1, 1], [], []>} : vector<8x8xf32>, vector<8x8xf32>, vector<8x8xf32> -> vector<8x8xf32>
    %1176 = vector.extract_strided_slice %1122 {offsets = [0, 24], sizes = [8, 8], strides = [1, 1]} : vector<8x32xf32> to vector<8x8xf32>
    %1177 = vector.extract_strided_slice %1123 {offsets = [0, 24], sizes = [8, 8], strides = [1, 1]} : vector<8x32xf32> to vector<8x8xf32>
    %cst_321 = arith.constant dense<0.000000e+00> : vector<8x8xf32>
    %1178 = tpu.matmul %1176, %1177, %cst_321 {dimension_numbers = #tpu.dot_dimension_numbers<[1], [1], [0], [0], [0, 0, 1, 0], [], []>} : vector<8x8xf32>, vector<8x8xf32>, vector<8x8xf32> -> vector<8x8xf32>
    %1179 = vector.broadcast %28 : vector<1x8xf32> to vector<8x8xf32>
    %1180 = arith.addf %1178, %1179 : vector<8x8xf32>
    %cst_322 = arith.constant dense<0xFF800000> : vector<8xf32>
    %1181 = vector.multi_reduction <maximumf>, %1180, %cst_322 [1] : vector<8x8xf32> to vector<8xf32>
    %1182 = vector.shape_cast %1181 : vector<8xf32> to vector<8x1xf32>
    %1183 = vector.broadcast %1182 : vector<8x1xf32> to vector<8x8xf32>
    %1184 = arith.subf %1180, %1183 : vector<8x8xf32>
    %1185 = math.exp %1184 : vector<8x8xf32>
    %cst_323 = arith.constant dense<0.000000e+00> : vector<8xf32>
    %1186 = vector.multi_reduction <add>, %1185, %cst_323 [1] : vector<8x8xf32> to vector<8xf32>
    %1187 = vector.shape_cast %1186 : vector<8xf32> to vector<8x1xf32>
    %1188 = tpu.reciprocal %1187 {approx = true} : vector<8x1xf32> -> vector<8x1xf32>
    %1189 = vector.broadcast %1188 : vector<8x1xf32> to vector<8x8xf32>
    %1190 = arith.mulf %1185, %1189 : vector<8x8xf32>
    %1191 = vector.extract_strided_slice %1124 {offsets = [0, 24], sizes = [8, 8], strides = [1, 1]} : vector<8x32xf32> to vector<8x8xf32>
    %cst_324 = arith.constant dense<0.000000e+00> : vector<8x8xf32>
    %1192 = tpu.matmul %1190, %1191, %cst_324 {dimension_numbers = #tpu.dot_dimension_numbers<[1], [0], [0], [1], [0, 0, 1, 1], [], []>} : vector<8x8xf32>, vector<8x8xf32>, vector<8x8xf32> -> vector<8x8xf32>
    %1193 = tpu.concatenate %1141, %1158, %1175, %1192 in 1 : vector<8x8xf32>, vector<8x8xf32>, vector<8x8xf32>, vector<8x8xf32> -> vector<8x32xf32>
    %1194 = vector.extract_strided_slice %1116 {offsets = [8, 0], sizes = [8, 32], strides = [1, 1]} : vector<16x32xf32> to vector<8x32xf32>
    %1195 = vector.extract_strided_slice %1121 {offsets = [8, 0], sizes = [8, 32], strides = [1, 1]} : vector<16x64xf32> to vector<8x32xf32>
    %1196 = vector.extract_strided_slice %1121 {offsets = [8, 32], sizes = [8, 32], strides = [1, 1]} : vector<16x64xf32> to vector<8x32xf32>
    %1197 = vector.extract_strided_slice %1194 {offsets = [0, 0], sizes = [8, 8], strides = [1, 1]} : vector<8x32xf32> to vector<8x8xf32>
    %1198 = vector.extract_strided_slice %1195 {offsets = [0, 0], sizes = [8, 8], strides = [1, 1]} : vector<8x32xf32> to vector<8x8xf32>
    %cst_325 = arith.constant dense<0.000000e+00> : vector<8x8xf32>
    %1199 = tpu.matmul %1197, %1198, %cst_325 {dimension_numbers = #tpu.dot_dimension_numbers<[1], [1], [0], [0], [0, 0, 1, 0], [], []>} : vector<8x8xf32>, vector<8x8xf32>, vector<8x8xf32> -> vector<8x8xf32>
    %1200 = vector.broadcast %35 : vector<1x8xf32> to vector<8x8xf32>
    %1201 = arith.addf %1199, %1200 : vector<8x8xf32>
    %cst_326 = arith.constant dense<0xFF800000> : vector<8xf32>
    %1202 = vector.multi_reduction <maximumf>, %1201, %cst_326 [1] : vector<8x8xf32> to vector<8xf32>
    %1203 = vector.shape_cast %1202 : vector<8xf32> to vector<8x1xf32>
    %1204 = vector.broadcast %1203 : vector<8x1xf32> to vector<8x8xf32>
    %1205 = arith.subf %1201, %1204 : vector<8x8xf32>
    %1206 = math.exp %1205 : vector<8x8xf32>
    %cst_327 = arith.constant dense<0.000000e+00> : vector<8xf32>
    %1207 = vector.multi_reduction <add>, %1206, %cst_327 [1] : vector<8x8xf32> to vector<8xf32>
    %1208 = vector.shape_cast %1207 : vector<8xf32> to vector<8x1xf32>
    %1209 = tpu.reciprocal %1208 {approx = true} : vector<8x1xf32> -> vector<8x1xf32>
    %1210 = vector.broadcast %1209 : vector<8x1xf32> to vector<8x8xf32>
    %1211 = arith.mulf %1206, %1210 : vector<8x8xf32>
    %1212 = vector.extract_strided_slice %1196 {offsets = [0, 0], sizes = [8, 8], strides = [1, 1]} : vector<8x32xf32> to vector<8x8xf32>
    %cst_328 = arith.constant dense<0.000000e+00> : vector<8x8xf32>
    %1213 = tpu.matmul %1211, %1212, %cst_328 {dimension_numbers = #tpu.dot_dimension_numbers<[1], [0], [0], [1], [0, 0, 1, 1], [], []>} : vector<8x8xf32>, vector<8x8xf32>, vector<8x8xf32> -> vector<8x8xf32>
    %1214 = vector.extract_strided_slice %1194 {offsets = [0, 8], sizes = [8, 8], strides = [1, 1]} : vector<8x32xf32> to vector<8x8xf32>
    %1215 = vector.extract_strided_slice %1195 {offsets = [0, 8], sizes = [8, 8], strides = [1, 1]} : vector<8x32xf32> to vector<8x8xf32>
    %cst_329 = arith.constant dense<0.000000e+00> : vector<8x8xf32>
    %1216 = tpu.matmul %1214, %1215, %cst_329 {dimension_numbers = #tpu.dot_dimension_numbers<[1], [1], [0], [0], [0, 0, 1, 0], [], []>} : vector<8x8xf32>, vector<8x8xf32>, vector<8x8xf32> -> vector<8x8xf32>
    %1217 = vector.broadcast %35 : vector<1x8xf32> to vector<8x8xf32>
    %1218 = arith.addf %1216, %1217 : vector<8x8xf32>
    %cst_330 = arith.constant dense<0xFF800000> : vector<8xf32>
    %1219 = vector.multi_reduction <maximumf>, %1218, %cst_330 [1] : vector<8x8xf32> to vector<8xf32>
    %1220 = vector.shape_cast %1219 : vector<8xf32> to vector<8x1xf32>
    %1221 = vector.broadcast %1220 : vector<8x1xf32> to vector<8x8xf32>
    %1222 = arith.subf %1218, %1221 : vector<8x8xf32>
    %1223 = math.exp %1222 : vector<8x8xf32>
    %cst_331 = arith.constant dense<0.000000e+00> : vector<8xf32>
    %1224 = vector.multi_reduction <add>, %1223, %cst_331 [1] : vector<8x8xf32> to vector<8xf32>
    %1225 = vector.shape_cast %1224 : vector<8xf32> to vector<8x1xf32>
    %1226 = tpu.reciprocal %1225 {approx = true} : vector<8x1xf32> -> vector<8x1xf32>
    %1227 = vector.broadcast %1226 : vector<8x1xf32> to vector<8x8xf32>
    %1228 = arith.mulf %1223, %1227 : vector<8x8xf32>
    %1229 = vector.extract_strided_slice %1196 {offsets = [0, 8], sizes = [8, 8], strides = [1, 1]} : vector<8x32xf32> to vector<8x8xf32>
    %cst_332 = arith.constant dense<0.000000e+00> : vector<8x8xf32>
    %1230 = tpu.matmul %1228, %1229, %cst_332 {dimension_numbers = #tpu.dot_dimension_numbers<[1], [0], [0], [1], [0, 0, 1, 1], [], []>} : vector<8x8xf32>, vector<8x8xf32>, vector<8x8xf32> -> vector<8x8xf32>
    %1231 = vector.extract_strided_slice %1194 {offsets = [0, 16], sizes = [8, 8], strides = [1, 1]} : vector<8x32xf32> to vector<8x8xf32>
    %1232 = vector.extract_strided_slice %1195 {offsets = [0, 16], sizes = [8, 8], strides = [1, 1]} : vector<8x32xf32> to vector<8x8xf32>
    %cst_333 = arith.constant dense<0.000000e+00> : vector<8x8xf32>
    %1233 = tpu.matmul %1231, %1232, %cst_333 {dimension_numbers = #tpu.dot_dimension_numbers<[1], [1], [0], [0], [0, 0, 1, 0], [], []>} : vector<8x8xf32>, vector<8x8xf32>, vector<8x8xf32> -> vector<8x8xf32>
    %1234 = vector.broadcast %35 : vector<1x8xf32> to vector<8x8xf32>
    %1235 = arith.addf %1233, %1234 : vector<8x8xf32>
    %cst_334 = arith.constant dense<0xFF800000> : vector<8xf32>
    %1236 = vector.multi_reduction <maximumf>, %1235, %cst_334 [1] : vector<8x8xf32> to vector<8xf32>
    %1237 = vector.shape_cast %1236 : vector<8xf32> to vector<8x1xf32>
    %1238 = vector.broadcast %1237 : vector<8x1xf32> to vector<8x8xf32>
    %1239 = arith.subf %1235, %1238 : vector<8x8xf32>
    %1240 = math.exp %1239 : vector<8x8xf32>
    %cst_335 = arith.constant dense<0.000000e+00> : vector<8xf32>
    %1241 = vector.multi_reduction <add>, %1240, %cst_335 [1] : vector<8x8xf32> to vector<8xf32>
    %1242 = vector.shape_cast %1241 : vector<8xf32> to vector<8x1xf32>
    %1243 = tpu.reciprocal %1242 {approx = true} : vector<8x1xf32> -> vector<8x1xf32>
    %1244 = vector.broadcast %1243 : vector<8x1xf32> to vector<8x8xf32>
    %1245 = arith.mulf %1240, %1244 : vector<8x8xf32>
    %1246 = vector.extract_strided_slice %1196 {offsets = [0, 16], sizes = [8, 8], strides = [1, 1]} : vector<8x32xf32> to vector<8x8xf32>
    %cst_336 = arith.constant dense<0.000000e+00> : vector<8x8xf32>
    %1247 = tpu.matmul %1245, %1246, %cst_336 {dimension_numbers = #tpu.dot_dimension_numbers<[1], [0], [0], [1], [0, 0, 1, 1], [], []>} : vector<8x8xf32>, vector<8x8xf32>, vector<8x8xf32> -> vector<8x8xf32>
    %1248 = vector.extract_strided_slice %1194 {offsets = [0, 24], sizes = [8, 8], strides = [1, 1]} : vector<8x32xf32> to vector<8x8xf32>
    %1249 = vector.extract_strided_slice %1195 {offsets = [0, 24], sizes = [8, 8], strides = [1, 1]} : vector<8x32xf32> to vector<8x8xf32>
    %cst_337 = arith.constant dense<0.000000e+00> : vector<8x8xf32>
    %1250 = tpu.matmul %1248, %1249, %cst_337 {dimension_numbers = #tpu.dot_dimension_numbers<[1], [1], [0], [0], [0, 0, 1, 0], [], []>} : vector<8x8xf32>, vector<8x8xf32>, vector<8x8xf32> -> vector<8x8xf32>
    %1251 = vector.broadcast %35 : vector<1x8xf32> to vector<8x8xf32>
    %1252 = arith.addf %1250, %1251 : vector<8x8xf32>
    %cst_338 = arith.constant dense<0xFF800000> : vector<8xf32>
    %1253 = vector.multi_reduction <maximumf>, %1252, %cst_338 [1] : vector<8x8xf32> to vector<8xf32>
    %1254 = vector.shape_cast %1253 : vector<8xf32> to vector<8x1xf32>
    %1255 = vector.broadcast %1254 : vector<8x1xf32> to vector<8x8xf32>
    %1256 = arith.subf %1252, %1255 : vector<8x8xf32>
    %1257 = math.exp %1256 : vector<8x8xf32>
    %cst_339 = arith.constant dense<0.000000e+00> : vector<8xf32>
    %1258 = vector.multi_reduction <add>, %1257, %cst_339 [1] : vector<8x8xf32> to vector<8xf32>
    %1259 = vector.shape_cast %1258 : vector<8xf32> to vector<8x1xf32>
    %1260 = tpu.reciprocal %1259 {approx = true} : vector<8x1xf32> -> vector<8x1xf32>
    %1261 = vector.broadcast %1260 : vector<8x1xf32> to vector<8x8xf32>
    %1262 = arith.mulf %1257, %1261 : vector<8x8xf32>
    %1263 = vector.extract_strided_slice %1196 {offsets = [0, 24], sizes = [8, 8], strides = [1, 1]} : vector<8x32xf32> to vector<8x8xf32>
    %cst_340 = arith.constant dense<0.000000e+00> : vector<8x8xf32>
    %1264 = tpu.matmul %1262, %1263, %cst_340 {dimension_numbers = #tpu.dot_dimension_numbers<[1], [0], [0], [1], [0, 0, 1, 1], [], []>} : vector<8x8xf32>, vector<8x8xf32>, vector<8x8xf32> -> vector<8x8xf32>
    %1265 = tpu.concatenate %1213, %1230, %1247, %1264 in 1 : vector<8x8xf32>, vector<8x8xf32>, vector<8x8xf32>, vector<8x8xf32> -> vector<8x32xf32>
    %1266 = tpu.concatenate %1193, %1265 in 0 : vector<8x32xf32>, vector<8x32xf32> -> vector<16x32xf32>
    %c936 = arith.constant 936 : index
    %c0_341 = arith.constant 0 : index
    %1267 = vector.load %arg4[%c936, %c0_341] : memref<1120x128xf32, #tpu.memory_space<vmem>>, vector<32x32xf32>
    %cst_342 = arith.constant dense<0.000000e+00> : vector<16x32xf32>
    %1268 = tpu.matmul %1266, %1267, %cst_342 {dimension_numbers = #tpu.dot_dimension_numbers<[1], [0], [0], [1], [0, 0, 1, 1], [], []>} : vector<16x32xf32>, vector<32x32xf32>, vector<16x32xf32> -> vector<16x32xf32>
    %c968 = arith.constant 968 : index
    %c0_343 = arith.constant 0 : index
    %1269 = vector.load %arg4[%c968, %c0_343] : memref<1120x128xf32, #tpu.memory_space<vmem>>, vector<1x32xf32>
    %1270 = vector.broadcast %1269 : vector<1x32xf32> to vector<16x32xf32>
    %1271 = arith.addf %1268, %1270 : vector<16x32xf32>
    %1272 = arith.addf %1084, %1271 : vector<16x32xf32>
    %c992 = arith.constant 992 : index
    %c0_344 = arith.constant 0 : index
    %1273 = vector.load %arg4[%c992, %c0_344] : memref<1120x128xf32, #tpu.memory_space<vmem>>, vector<2x32xf32>
    %cst_345 = arith.constant dense<0.000000e+00> : vector<16xf32>
    %1274 = vector.multi_reduction <add>, %1272, %cst_345 [1] : vector<16x32xf32> to vector<16xf32>
    %1275 = vector.shape_cast %1274 : vector<16xf32> to vector<16x1xf32>
    %cst_346 = arith.constant 3.200000e+01 : f32
    %1276 = vector.broadcast %cst_346 : f32 to vector<16x1xf32>
    %1277 = arith.divf %1275, %1276 : vector<16x1xf32>
    %1278 = vector.broadcast %1277 : vector<16x1xf32> to vector<16x32xf32>
    %1279 = arith.subf %1272, %1278 : vector<16x32xf32>
    %1280 = arith.mulf %1279, %1279 : vector<16x32xf32>
    %cst_347 = arith.constant dense<0.000000e+00> : vector<16xf32>
    %1281 = vector.multi_reduction <add>, %1280, %cst_347 [1] : vector<16x32xf32> to vector<16xf32>
    %1282 = vector.shape_cast %1281 : vector<16xf32> to vector<16x1xf32>
    %cst_348 = arith.constant 3.200000e+01 : f32
    %1283 = vector.broadcast %cst_348 : f32 to vector<16x1xf32>
    %1284 = arith.divf %1282, %1283 : vector<16x1xf32>
    %1285 = vector.broadcast %1277 : vector<16x1xf32> to vector<16x32xf32>
    %1286 = arith.subf %1272, %1285 : vector<16x32xf32>
    %cst_349 = arith.constant 9.99999997E-7 : f32
    %1287 = vector.broadcast %cst_349 : f32 to vector<16x1xf32>
    %1288 = arith.addf %1284, %1287 : vector<16x1xf32>
    %1289 = math.rsqrt %1288 : vector<16x1xf32>
    %1290 = vector.broadcast %1289 : vector<16x1xf32> to vector<16x32xf32>
    %1291 = arith.mulf %1286, %1290 : vector<16x32xf32>
    %1292 = vector.extract_strided_slice %1273 {offsets = [0, 0], sizes = [1, 32], strides = [1, 1]} : vector<2x32xf32> to vector<1x32xf32>
    %1293 = vector.broadcast %1292 : vector<1x32xf32> to vector<16x32xf32>
    %1294 = arith.mulf %1291, %1293 : vector<16x32xf32>
    %1295 = vector.extract_strided_slice %1273 {offsets = [1, 0], sizes = [1, 32], strides = [1, 1]} : vector<2x32xf32> to vector<1x32xf32>
    %1296 = vector.broadcast %1295 : vector<1x32xf32> to vector<16x32xf32>
    %1297 = arith.addf %1294, %1296 : vector<16x32xf32>
    %c1000 = arith.constant 1000 : index
    %c0_350 = arith.constant 0 : index
    %1298 = vector.load %arg4[%c1000, %c0_350] : memref<1120x128xf32, #tpu.memory_space<vmem>>, vector<32x64xf32>
    %cst_351 = arith.constant dense<0.000000e+00> : vector<16x64xf32>
    %1299 = tpu.matmul %1297, %1298, %cst_351 {dimension_numbers = #tpu.dot_dimension_numbers<[1], [0], [0], [1], [0, 0, 1, 1], [], []>} : vector<16x32xf32>, vector<32x64xf32>, vector<16x64xf32> -> vector<16x64xf32>
    %c1032 = arith.constant 1032 : index
    %c0_352 = arith.constant 0 : index
    %1300 = vector.load %arg4[%c1032, %c0_352] : memref<1120x128xf32, #tpu.memory_space<vmem>>, vector<1x64xf32>
    %1301 = vector.broadcast %1300 : vector<1x64xf32> to vector<16x64xf32>
    %1302 = arith.addf %1299, %1301 : vector<16x64xf32>
    %cst_353 = arith.constant 0.000000e+00 : f32
    %1303 = vector.broadcast %cst_353 : f32 to vector<16x64xf32>
    %1304 = arith.maximumf %1302, %1303 : vector<16x64xf32>
    %c1040 = arith.constant 1040 : index
    %c0_354 = arith.constant 0 : index
    %1305 = vector.load %arg4[%c1040, %c0_354] : memref<1120x128xf32, #tpu.memory_space<vmem>>, vector<64x32xf32>
    %cst_355 = arith.constant dense<0.000000e+00> : vector<16x32xf32>
    %1306 = tpu.matmul %1304, %1305, %cst_355 {dimension_numbers = #tpu.dot_dimension_numbers<[1], [0], [0], [1], [0, 0, 1, 1], [], []>} : vector<16x64xf32>, vector<64x32xf32>, vector<16x32xf32> -> vector<16x32xf32>
    %c1104 = arith.constant 1104 : index
    %c0_356 = arith.constant 0 : index
    %1307 = vector.load %arg4[%c1104, %c0_356] : memref<1120x128xf32, #tpu.memory_space<vmem>>, vector<1x32xf32>
    %1308 = vector.broadcast %1307 : vector<1x32xf32> to vector<16x32xf32>
    %1309 = arith.addf %1306, %1308 : vector<16x32xf32>
    %1310 = arith.addf %1272, %1309 : vector<16x32xf32>
    %c1112 = arith.constant 1112 : index
    %c0_357 = arith.constant 0 : index
    %1311 = vector.load %arg4[%c1112, %c0_357] : memref<1120x128xf32, #tpu.memory_space<vmem>>, vector<2x32xf32>
    %cst_358 = arith.constant dense<0.000000e+00> : vector<16xf32>
    %1312 = vector.multi_reduction <add>, %1310, %cst_358 [1] : vector<16x32xf32> to vector<16xf32>
    %1313 = vector.shape_cast %1312 : vector<16xf32> to vector<16x1xf32>
    %cst_359 = arith.constant 3.200000e+01 : f32
    %1314 = vector.broadcast %cst_359 : f32 to vector<16x1xf32>
    %1315 = arith.divf %1313, %1314 : vector<16x1xf32>
    %1316 = vector.broadcast %1315 : vector<16x1xf32> to vector<16x32xf32>
    %1317 = arith.subf %1310, %1316 : vector<16x32xf32>
    %1318 = arith.mulf %1317, %1317 : vector<16x32xf32>
    %cst_360 = arith.constant dense<0.000000e+00> : vector<16xf32>
    %1319 = vector.multi_reduction <add>, %1318, %cst_360 [1] : vector<16x32xf32> to vector<16xf32>
    %1320 = vector.shape_cast %1319 : vector<16xf32> to vector<16x1xf32>
    %cst_361 = arith.constant 3.200000e+01 : f32
    %1321 = vector.broadcast %cst_361 : f32 to vector<16x1xf32>
    %1322 = arith.divf %1320, %1321 : vector<16x1xf32>
    %1323 = vector.broadcast %1315 : vector<16x1xf32> to vector<16x32xf32>
    %1324 = arith.subf %1310, %1323 : vector<16x32xf32>
    %cst_362 = arith.constant 9.99999997E-7 : f32
    %1325 = vector.broadcast %cst_362 : f32 to vector<16x1xf32>
    %1326 = arith.addf %1322, %1325 : vector<16x1xf32>
    %1327 = math.rsqrt %1326 : vector<16x1xf32>
    %1328 = vector.broadcast %1327 : vector<16x1xf32> to vector<16x32xf32>
    %1329 = arith.mulf %1324, %1328 : vector<16x32xf32>
    %1330 = vector.extract_strided_slice %1311 {offsets = [0, 0], sizes = [1, 32], strides = [1, 1]} : vector<2x32xf32> to vector<1x32xf32>
    %1331 = vector.broadcast %1330 : vector<1x32xf32> to vector<16x32xf32>
    %1332 = arith.mulf %1329, %1331 : vector<16x32xf32>
    %1333 = vector.extract_strided_slice %1311 {offsets = [1, 0], sizes = [1, 32], strides = [1, 1]} : vector<2x32xf32> to vector<1x32xf32>
    %1334 = vector.broadcast %1333 : vector<1x32xf32> to vector<16x32xf32>
    %1335 = arith.addf %1332, %1334 : vector<16x32xf32>
    %1336 = vector.extract_strided_slice %1335 {offsets = [0, 0], sizes = [8, 32], strides = [1, 1]} : vector<16x32xf32> to vector<8x32xf32>
    %c0_363 = arith.constant 0 : index
    %c0_364 = arith.constant 0 : index
    %c0_365 = arith.constant 0 : index
    %1337 = vector.load %arg5[%c0_363, %c0_364, %c0_365] : memref<2x8x32xf32, #tpu.memory_space<vmem>>, vector<1x8x32xf32>
    %1338 = vector.shape_cast %1337 : vector<1x8x32xf32> to vector<8x32xf32>
    %1339 = vector.shape_cast %1336 : vector<8x32xf32> to vector<1x8x32xf32>
    tpu.vector_store %arg5[%c0_363, %c0_364, %c0_365], %1339 {strides = array<i32>} : memref<2x8x32xf32, #tpu.memory_space<vmem>>, vector<1x8x32xf32>,
    %1340 = vector.extract_strided_slice %1335 {offsets = [8, 0], sizes = [8, 32], strides = [1, 1]} : vector<16x32xf32> to vector<8x32xf32>
    %c1_366 = arith.constant 1 : index
    %c0_367 = arith.constant 0 : index
    %c0_368 = arith.constant 0 : index
    %1341 = vector.load %arg5[%c1_366, %c0_367, %c0_368] : memref<2x8x32xf32, #tpu.memory_space<vmem>>, vector<1x8x32xf32>
    %1342 = vector.shape_cast %1341 : vector<1x8x32xf32> to vector<8x32xf32>
    %1343 = vector.shape_cast %1340 : vector<8x32xf32> to vector<1x8x32xf32>
    tpu.vector_store %arg5[%c1_366, %c0_367, %c0_368], %1343 {strides = array<i32>} : memref<2x8x32xf32, #tpu.memory_space<vmem>>, vector<1x8x32xf32>,
    return
  }
}

</mosaic_0001>

<bundles_post_ra>
// kernel: encoder_decoder_forward.1
= control target key start
LH: loop header
LB: loop body
LE: loop exit
PB: predicated region body
PF: predicated region fallthrough
CT: control target
= control target key end

     0   :  { %10 = vsyncpa [#allocation3], 0  ;;  %s14209_s0 = inlined_call_operand.vmem [shape: s32[16,1], index: 0, kind: input, shape index: {}]   ;;  %s14210_s1 = inlined_call_operand.vmem [shape: s32[16,1], index: 1, kind: input, shape index: {}]   ;;  %s14211_s2 = inlined_call_operand.vmem [shape: f32[2,1,8], index: 2, kind: input, shape index: {}]   ;;  %s14212_s3 = inlined_call_operand.vmem [shape: f32[2,8,8], index: 3, kind: input, shape index: {}]   ;;  %s14213_s4 = inlined_call_operand.hbm [shape: f32[1120,128], index: 4, kind: input, shape index: {}]   ;;  %s14214_s5 = inlined_call_operand.hbm [shape: f32[2,8,32], index: 5, kind: output, shape index: {}]  }
   0x1   :  { %11 = vsyncpa [#allocation4], 0  ;;  %s12758_s18 = smov [#allocation2]   ;;  %s12710_s22 = scalar_lea.hbm %s14213_s4, 17920 }
   0x2   :  { %s25_s19 = sshll.u32 %s12758_s18, 4  ;;  %p12711_p0 = scmp.ne.s32.totalorder %s14213_s4, %s12710_s22  ;;  %s26_s19 = int_to_ptr.vmem [resolvable:$true] %s25_s19 }
   0x3   :  { %p12714_p1 = scmp.lt.u32.totalorder %s12710_s22, %s14213_s4 }
   0x5   :  { %p12716_p2 = pnand %p12714_p1, %p12711_p0 }
   0x7   :  { %12719 = shalt.err (!%p12716_p2)
}
   0x8   :  { %s12720_s27 = scalar_lea.vmem %s26_s19, 17920  ;;  %p12725_p4 = scmp.lt.s32.totalorder %s26_s19, %s26_s19 }
   0x9   :  { %p12721_p3 = scmp.ne.s32.totalorder %s26_s19, %s12720_s27  ;;  %p12726_p5 = scmp.lt.s32.totalorder %s12720_s27, %s12720_s27 }
   0xb   :  { %p12727_p6 = por %p12726_p5, %p12725_p4 }
   0xd   :  { %p12728_p7 = pnand %p12727_p6, %p12721_p3 }
   0xf   :  { %12731 = shalt.err (!%p12728_p7)
}
  0x10   :  { %s12759_s28 = smov 128   ;;  %s12760_s29 = smov 8  }
  0x11   :  { %31 = dma.hbm_to_vmem [thread:$0]  %s14213_s4, 17920, %s26_s19, [#allocation3], %s12759_s28, %s12759_s28, %s12760_s29  }
  0x12   :  { %12754 = dma.done.wait [#allocation3], 17920  }
  0x13   :  { %12755 = vsyncadd [#allocation3], 4294949376  ;;  %v12761_v0 = vmov 0   ;;  %v35_v1 = vld [vmem:[%s14209_s0] sm:$0xff]  ;;  %v52_v3 = vld [vmem:[#allocation2 + $0x8] sm:$0xff]  ;;  %v12762_v6 = vmov 0.0   ;;  %v37_v7 = vlaneseq }
  0x14   :  { %12447 = vset.pattern.permute.xlu0 %v12761_v0  ;;  %12448 = vset.pattern.permute.xlu1 %v12761_v0  ;;  %v51_v2 = vld [vmem:[#allocation2] sm:$0xff]  ;;  %v36_v4 = vld [vmem:[%s14209_s0 + $0x8] sm:$0xff]  ;;  %vm54_vm0 = vcmask 130048   ;;  %vm248_vm3 = vcmask 261120   ;;  %v150_v31 = vld [vmem:[#allocation2 + $0x10] sm:$0xff]  ;;  %vm12763_vm6 = vmmov 0  }
  0x15   :  { %40 = vperm.xlu0 %12447, %v35_v1   ;;  %v12210_v5 = vpack.c.bf16 %v52_v3, %v51_v2  ;;  %v12831_v8 = vand.u32 127, %v37_v7  ;;  %v53_v13 = vld [vmem:[#allocation2 + $0x20] sm:$0xff]  ;;  %v151_v32 = vld [vmem:[#allocation2 + $0x18] sm:$0xff]  ;;  %v137_v33 = vld [vmem:[%s14210_s1 + $0x8] sm:$0xff]  ;;  %v277_v43 = vshrl.u32 %v37_v7, 7  ;;  %s12765_s13 = smov 96  }
  0x16   :  { %v136_v30 = vld [vmem:[%s14210_s1] sm:$0xff]  ;;  %v12214_v34 = vpack.c.bf16 %v151_v32, %v150_v31  ;;  %v289_v36 = vld [vmem:[#allocation2 + $0x68] sm:$0xff]  ;;  %v290_v48 = vld [vmem:[#allocation2 + $0x70] sm:$0xff]  ;;  %s12764_s1 = smov 120   ;;  %s12766_s14 = smov 88   ;;  %vm387_vm7 = vcmask 64512  }
  0x17   :  { %12211 = vmatprep.subr.bf16.mxu0 %v12210_v5  ;;  %v288_v35 = vld [vmem:[#allocation2 + $0x60] sm:$0xff]  ;;  %v12858_v46 = vsub.s32 0, %v277_v43  ;;  %v291_v49 = vld [vmem:[#allocation2 + $0x78] sm:$0xff]  ;;  %v247_v50 = vld [vmem:[#allocation2 + $0xb0] sm:$0x3]  ;;  %v12862_v51 = vsub.s32 1, %v277_v43 }
  0x18   :  { %12213 = vmatpush3.bf16.msra.mxu0 %v12210_v5  ;;  %12215 = vmatprep.subr.bf16.mxu1 %v12214_v34  ;;  %v12218_v37 = vpack.c.bf16 %v289_v36, %v288_v35  ;;  %v12222_v53 = vpack.c.bf16 %v291_v49, %v290_v48  ;;  %v10886_v3 = vld [vmem:[#allocation2 + $0x80] ss:$0 sm:$0xff]  ;;  %s12767_s15 = smov 80   ;;  %s12768_s16 = smov 72   ;;  %vm1058_vm10 = vcmask 195584   ;;  %vm1976_vm11 = vcmask 523264  }
  0x19   :  { %43 = vperm.xlu0 %12447, %v36_v4   ;;  %11477 = vmatprep.subr.mxu0 %v12762_v6  ;;  %v279_v55 = vrot.slane %v247_v50, %v12858_v46  ;;  %v285_v58 = vrot.slane %v247_v50, %v12862_v51  ;;  %s12769_s17 = smov 112   ;;  %s12770_s18 = smov 64  }
  0x1a   :  { %12217 = vmatpush3.bf16.msra.mxu1 %v12214_v34  ;;  %s12771_s19 = smov 104   ;;  %s12772_s20 = smov 56  }
  0x1b   :  { %12219 = vmatprep.subr.bf16.mxu1 %v12218_v37  ;;  %s12775_s25 = smov 48   ;;  %s12776_s26 = smov 16  }
  0x1c   :  { %s12777_s27 = smov 24  }
  0x94   :  { %v41_v9 = vpop.permute.xlu0 %40 }
  0x95   :  { %vm45_vm1 = vcmp.eq.s32.totalorder %v41_v9, %v12831_v8 }
  0x96   :  { %v10876_v10 = vsel %vm45_vm1, 1.0, %v12762_v6 }
  0x97   :  { %11446 = vmatprep.mubr.msk.f32.mxu0 %vm54_vm0, %v10876_v10 }
  0x98   :  { %v44_v11 = vpop.permute.xlu0 %43 }
  0x99   :  { %vm46_vm2 = vcmp.eq.s32.totalorder %v44_v11, %v12831_v8 }
  0x9a   :  { %v10877_v12 = vsel %vm46_vm2, 1.0, %v12762_v6 }
  0x9b   :  { %11447 = vmatmul.mubr.msk.f32.vlgmr.msra.gmra.mrb[0].mxu0 %vm54_vm0, %v10877_v12 }
  0x9c   :  { %11479 = vmatprep.mubr.msk.f32.mxu0 %vm12763_vm6, %v12762_v6 }
 0x16e   :  { %v11448_v14 = vpop.f32.mrb[0].mxu0 }
 0x16f   :  { %v127_v15 = vpop.f32.mrb[1].mxu0  ;;  %v12841_v17 = vadd.f32 %v11448_v14, %v53_v13 }
 0x170   :  { %v12839_v16 = vadd.f32 %v127_v15, %v53_v13 }
 0x171   :  { %v252_v19 = vsel %vm248_vm3, %v12841_v17, 0.0 }
 0x172   :  { %v249_v18 = vsel %vm248_vm3, %v12839_v16, 0.0 }
 0x173   :  { %250 = vadd.xlane.f32.xlu1 %v249_v18 }
 0x177   :  { %253 = vadd.xlane.f32.xlu1 %v252_v19 }
 0x200   :  { %v251_v20 = vpop.xlane.xlu1 %250 }
 0x201   :  { %v256_v21 = vmul.f32 0.03125, %v251_v20 }
 0x203   :  { %v258_v22 = vsub.f32 %v12839_v16, %v256_v21 }
 0x204   :  { %v254_v23 = vpop.xlane.xlu1 %253 }
 0x205   :  { %v257_v24 = vmul.f32 0.03125, %v254_v23  ;;  %v260_v25 = vmul.f32 %v258_v22, %v258_v22 }
 0x207   :  { %v259_v26 = vsub.f32 %v12841_v17, %v257_v24  ;;  %v262_v27 = vsel %vm248_vm3, %v260_v25, 0.0 }
 0x208   :  { %263 = vadd.xlane.f32.xlu0 %v262_v27  ;;  %v12773_v27 = vmov -1e+09  }
 0x209   :  { %v261_v28 = vmul.f32 %v259_v26, %v259_v26 }
 0x20b   :  { %v265_v29 = vsel %vm248_vm3, %v261_v28, 0.0 }
 0x20c   :  { %266 = vadd.xlane.f32.xlu1 %v265_v29 }
 0x21d   :  { %139 = vperm.xlu1 %12448, %v136_v30  }
 0x221   :  { %142 = vperm.xlu1 %12448, %v137_v33  }
 0x295   :  { %v264_v38 = vpop.xlane.xlu0 %263 }
 0x296   :  { %v268_v39 = vmul.f32 0.03125, %v264_v38 }
 0x298   :  { %v270_v40 = vadd.f32 1e-06, %v268_v39 }
 0x299   :  { %v267_v41 = vpop.xlane.xlu1 %266 }
 0x29a   :  { %12469 = vrsqrt.f32 %v270_v40  ;;  %v269_v42 = vmul.f32 0.03125, %v267_v41  ;;  %v10884_v41 = vld [vmem:[%s14211_s2 + $0x1] sm:$0x1] }
 0x29b   :  { %vm238_vm9 = vcmp.gt.f32.partialorder %v10884_v41, 0.0 }
 0x29c   :  { %v271_v44 = vadd.f32 1e-06, %v269_v42 }
 0x29d   :  { %v140_v45 = vpop.permute.xlu1 %139 }
 0x29e   :  { %12471 = vrsqrt.f32 %v271_v44  ;;  %vm144_vm4 = vcmp.eq.s32.totalorder %v140_v45, %v12831_v8  ;;  %v239_v44 = vsel %vm238_vm9, 0.0, %v12773_v27 }
 0x29f   :  { %v10880_v47 = vsel %vm144_vm4, 1.0, %v12762_v6  ;;  %v12976_v49 = vrot.slane %v239_v44, %v12858_v46 }
 0x2a0   :  { %11453 = vmatprep.mubr.msk.f32.mxu1 %vm54_vm0, %v10880_v47 }
 0x2a1   :  { %v143_v52 = vpop.permute.xlu1 %142 }
 0x2a2   :  { %vm145_vm5 = vcmp.eq.s32.totalorder %v143_v52, %v12831_v8 }
 0x2a3   :  { %v10881_v54 = vsel %vm145_vm5, 1.0, %v12762_v6 }
 0x2a4   :  { %v12470_v56 = vpop.eup %12469  ;;  %11454 = vmatmul.mubr.msk.f32.vlgmr.msra.gmra.mrb[0].mxu1 %vm54_vm0, %v10881_v54 }
 0x2a5   :  { %12221 = vmatpush3.bf16.msra.mxu1 %v12218_v37  ;;  %v274_v57 = vmul.f32 %v12470_v56, %v258_v22 }
 0x2a6   :  { %12223 = vmatprep.subr.bf16.mxu1 %v12222_v53 }
 0x2a7   :  { %v280_v59 = vmul.f32 %v279_v55, %v274_v57 }
 0x2a8   :  { %v12472_v60 = vpop.eup %12471 }
 0x2a9   :  { %v275_v61 = vmul.f32 %v12472_v60, %v259_v26  ;;  %v286_v62 = vadd.f32 %v285_v58, %v280_v59  ;;  %12225 = vmatpush3.bf16.msra.mxu1 %v12222_v53  ;;  %v233_v26 = vld [vmem:[%s14211_s2] sm:$0x1]  ;;  %s12774_s2 = smov 40  }
 0x2aa   :  { %11467 = vmatprep.subr.mxu1 %v12762_v6  ;;  %vm234_vm8 = vcmp.gt.f32.partialorder %v233_v26, 0.0 }
 0x2ab   :  { %v281_v63 = vmul.f32 %v279_v55, %v275_v61  ;;  %11464 = vmatprep.mubr.msk.f32.mxu1 %vm248_vm3, %v286_v62  ;;  %v235_v28 = vsel %vm234_vm8, 0.0, %v12773_v27 }
 0x2ac   :  { %v12961_v29 = vrot.slane %v235_v28, %v12858_v46 }
 0x2ad   :  { %v287_v0 = vadd.f32 %v285_v58, %v281_v63 }
 0x2af   :  { %11465 = vmatmul.mubr.msk.f32.vlgmr.msra.gmra.mrb[2].mxu1 %vm248_vm3, %v287_v0 }
 0x2b0   :  { %11469 = vmatprep.mubr.msk.f32.mxu1 %vm12763_vm6, %v12762_v6 }
 0x377   :  { %v12872_v1 = vpop.f32.mrb[0].mxu1 }
 0x378   :  { %v12874_v2 = vpop.f32.mrb[1].mxu1 }
 0x382   :  { %v11466_v4 = vpop.f32.mrb[2].mxu1 }
 0x383   :  { %v369_v5 = vpop.f32.mrb[3].mxu1  ;;  %v12886_v8 = vadd.f32 %v11466_v4, %v10886_v3 }
 0x384   :  { %v12880_v7 = vadd.f32 %v10886_v3, %v369_v5 }
 0x386   :  { %549 = vrot.lane.b32.xlu0 %v12880_v7, %s12764_s1  ;;  %385 = vrot.lane.b32.xlu1 %v12880_v7, %s12765_s13 }
 0x38a   :  { %1232 = vrot.lane.b32.xlu0 %v12886_v8, %s12766_s14  ;;  %551 = vrot.lane.b32.xlu1 %v12880_v7, %s12766_s14 }
 0x38e   :  { %1397 = vrot.lane.b32.xlu0 %v12886_v8, %s12767_s15  ;;  %716 = vrot.lane.b32.xlu1 %v12880_v7, %s12767_s15 }
 0x392   :  { %1562 = vrot.lane.b32.xlu0 %v12886_v8, %s12768_s16  ;;  %714 = vrot.lane.b32.xlu1 %v12880_v7, %s12769_s17 }
 0x396   :  { %473 = vrot.lane.b32.xlu0 %v12880_v7, %s12770_s18  ;;  %881 = vrot.lane.b32.xlu1 %v12880_v7, %s12768_s16 }
 0x39a   :  { %879 = vrot.lane.b32.xlu1 %v12880_v7, %s12771_s19 }
 0x39e   :  { %1067 = vrot.lane.b32.xlu1 %v12886_v8, %s12765_s13 }
 0x3a2   :  { %1230 = vrot.lane.b32.xlu1 %v12886_v8, %s12764_s1 }
 0x3a6   :  { %1395 = vrot.lane.b32.xlu1 %v12886_v8, %s12769_s17 }
 0x3aa   :  { %1560 = vrot.lane.b32.xlu1 %v12886_v8, %s12771_s19 }
 0x3ae   :  { %638 = vrot.lane.b32.xlu1 %v12880_v7, %s12772_s20 }
 0x3f8   :  { %v550_v9 = vpop.permute.xlu0 %549  ;;  %v386_v10 = vpop.permute.xlu1 %385 }
 0x3f9   :  { %11468 = vmatpush3.xpose.msk.msra.mxu1 %vm387_vm7, %v386_v10 }
 0x3fa   :  { %11472 = vmatprep.subr.mxu1 %v12762_v6 }
 0x3fc   :  { %v1233_v11 = vpop.permute.xlu0 %1232  ;;  %11470 = vmatmul.mubr.msk.f32.vlgmr.msra.gmra.mrb[4].mxu1 %vm387_vm7, %v12880_v7  ;;  %v552_v12 = vpop.permute.xlu1 %551 }
 0x3fd   :  { %11478 = vmatpush3.xpose.msk.msra.mxu0 %vm387_vm7, %v552_v12  ;;  %11474 = vmatprep.mubr.msk.f32.mxu1 %vm12763_vm6, %v12762_v6 }
 0x3fe   :  { %11487 = vmatprep.subr.mxu0 %v12762_v6 }
 0x400   :  { %v1398_v13 = vpop.permute.xlu0 %1397  ;;  %11480 = vmatmul.mubr.msk.f32.vlgmr.msra.gmra.mrb[2].mxu0 %vm387_vm7, %v550_v9  ;;  %v717_v14 = vpop.permute.xlu1 %716 }
 0x401   :  { %11488 = vmatpush3.xpose.msk.msra.mxu0 %vm387_vm7, %v717_v14  ;;  %11489 = vmatprep.mubr.msk.f32.mxu0 %vm12763_vm6, %v12762_v6 }
 0x402   :  { %11497 = vmatprep.subr.mxu0 %v12762_v6 }
 0x404   :  { %v1563_v15 = vpop.permute.xlu0 %1562  ;;  %v715_v18 = vpop.permute.xlu1 %714 }
 0x405   :  { %11490 = vmatmul.mubr.msk.f32.vlgmr.msra.gmra.mrb[4].mxu0 %vm387_vm7, %v715_v18 }
 0x406   :  { %11499 = vmatprep.mubr.msk.f32.mxu0 %vm12763_vm6, %v12762_v6 }
 0x408   :  { %v474_v19 = vpop.permute.xlu0 %473  ;;  %v882_v20 = vpop.permute.xlu1 %881 }
 0x409   :  { %11473 = vmatpush3.msra.mxu1 %v474_v19  ;;  %11498 = vmatpush3.xpose.msk.msra.mxu0 %vm387_vm7, %v882_v20 }
 0x40a   :  { %11507 = vmatprep.subr.mxu0 %v12762_v6  ;;  %11482 = vmatprep.subr.mxu1 %v12762_v6 }
 0x40c   :  { %v880_v21 = vpop.permute.xlu1 %879 }
 0x40d   :  { %11500 = vmatmul.mubr.msk.f32.vlgmr.msra.gmra.mrb[6].mxu0 %vm387_vm7, %v880_v21 }
 0x40e   :  { %11509 = vmatprep.mubr.msk.f32.mxu0 %vm12763_vm6, %v12762_v6 }
 0x410   :  { %v1068_v22 = vpop.permute.xlu1 %1067 }
 0x411   :  { %11508 = vmatpush3.xpose.msk.msra.mxu0 %vm387_vm7, %v1068_v22 }
 0x412   :  { %11517 = vmatprep.subr.mxu0 %v12762_v6 }
 0x414   :  { %11510 = vmatmul.mubr.msk.f32.vlgmr.msra.gmra.mrb[8].mxu0 %vm387_vm7, %v12886_v8  ;;  %v1231_v23 = vpop.permute.xlu1 %1230 }
 0x415   :  { %11518 = vmatpush3.xpose.msk.msra.mxu0 %vm387_vm7, %v1233_v11  ;;  %11519 = vmatprep.mubr.msk.f32.mxu0 %vm12763_vm6, %v12762_v6 }
 0x416   :  { %11527 = vmatprep.subr.mxu0 %v12762_v6 }
 0x418   :  { %11520 = vmatmul.mubr.msk.f32.vlgmr.msra.gmra.mrb[10].mxu0 %vm387_vm7, %v1231_v23  ;;  %v1396_v24 = vpop.permute.xlu1 %1395 }
 0x419   :  { %11528 = vmatpush3.xpose.msk.msra.mxu0 %vm387_vm7, %v1398_v13  ;;  %11529 = vmatprep.mubr.msk.f32.mxu0 %vm12763_vm6, %v12762_v6 }
 0x41a   :  { %11537 = vmatprep.subr.mxu0 %v12762_v6 }
 0x41c   :  { %11530 = vmatmul.mubr.msk.f32.vlgmr.msra.gmra.mrb[12].mxu0 %vm387_vm7, %v1396_v24  ;;  %v1561_v25 = vpop.permute.xlu1 %1560 }
 0x41d   :  { %11538 = vmatpush3.xpose.msk.msra.mxu0 %vm387_vm7, %v1563_v15  ;;  %11539 = vmatprep.mubr.msk.f32.mxu0 %vm12763_vm6, %v12762_v6 }
 0x420   :  { %11540 = vmatmul.mubr.msk.f32.vlgmr.msra.gmra.mrb[14].mxu0 %vm387_vm7, %v1561_v25  ;;  %v12990_v5 = vpop.permute.xlu1 %638 }
 0x4cf   :  { %v458_v30 = vpop.f32.mrb[4].mxu1 }
 0x4d0   :  { %v459_v31 = vadd.f32 %v458_v30, %v12961_v29  ;;  %v11471_v32 = vpop.f32.mrb[5].mxu1 }
 0x4d2   :  { %v462_v33 = vsel %vm387_vm7, %v459_v31, -inf }
 0x4d3   :  { %463 = vmax.xlane.f32.xlu0 %v462_v33  ;;  %v623_v34 = vpop.f32.mrb[2].mxu0 }
 0x4d4   :  { %v624_v35 = vadd.f32 %v623_v34, %v12961_v29  ;;  %v11481_v36 = vpop.f32.mrb[3].mxu0 }
 0x4d6   :  { %v627_v37 = vsel %vm387_vm7, %v624_v35, -inf }
 0x4d7   :  { %628 = vmax.xlane.f32.xlu1 %v627_v37 }
 0x4d8   :  { %v788_v38 = vpop.f32.mrb[4].mxu0 }
 0x4d9   :  { %v789_v39 = vadd.f32 %v788_v38, %v12961_v29  ;;  %v11491_v40 = vpop.f32.mrb[5].mxu0 }
 0x4db   :  { %v792_v42 = vsel %vm387_vm7, %v789_v39, -inf }
 0x4dc   :  { %793 = vmax.xlane.f32.xlu0 %v792_v42 }
 0x4e0   :  { %v953_v43 = vpop.f32.mrb[6].mxu0 }
 0x4e1   :  { %v954_v45 = vadd.f32 %v953_v43, %v12961_v29  ;;  %v11501_v47 = vpop.f32.mrb[7].mxu0 }
 0x4e3   :  { %v957_v48 = vsel %vm387_vm7, %v954_v45, -inf }
 0x4e4   :  { %958 = vmax.xlane.f32.xlu0 %v957_v48 }
 0x4e7   :  { %v1139_v50 = vpop.f32.mrb[8].mxu0 }
 0x4e8   :  { %v1140_v52 = vadd.f32 %v1139_v50, %v12976_v49  ;;  %v11511_v53 = vpop.f32.mrb[9].mxu0 }
 0x4ea   :  { %v1143_v54 = vsel %vm387_vm7, %v1140_v52, -inf }
 0x4eb   :  { %1144 = vmax.xlane.f32.xlu1 %v1143_v54  ;;  %v1304_v55 = vpop.f32.mrb[10].mxu0 }
 0x4ec   :  { %v1305_v56 = vadd.f32 %v1304_v55, %v12976_v49  ;;  %v11521_v57 = vpop.f32.mrb[11].mxu0 }
 0x4ee   :  { %v1308_v58 = vsel %vm387_vm7, %v1305_v56, -inf }
 0x4ef   :  { %1309 = vmax.xlane.f32.xlu0 %v1308_v58  ;;  %v1469_v59 = vpop.f32.mrb[12].mxu0 }
 0x4f0   :  { %v1470_v60 = vadd.f32 %v1469_v59, %v12976_v49  ;;  %v11531_v61 = vpop.f32.mrb[13].mxu0 }
 0x4f2   :  { %v1473_v62 = vsel %vm387_vm7, %v1470_v60, -inf }
 0x4f3   :  { %1474 = vmax.xlane.f32.xlu1 %v1473_v62  ;;  %v1634_v63 = vpop.f32.mrb[14].mxu0 }
 0x4f4   :  { %v1635_v0 = vadd.f32 %v1634_v63, %v12976_v49  ;;  %v11541_v3 = vpop.f32.mrb[15].mxu0 }
 0x4f6   :  { %v1638_v4 = vsel %vm387_vm7, %v1635_v0, -inf }
 0x4f7   :  { %1639 = vmax.xlane.f32.xlu0 %v1638_v4 }
 0x504   :  { %968 = vrot.lane.b32.xlu1 %v12880_v7, %s12774_s2 }
 0x50d   :  { %803 = vrot.lane.b32.xlu0 %v12880_v7, %s12775_s25 }
 0x560   :  { %v464_v9 = vpop.xlane.xlu0 %463 }
 0x561   :  { %v465_v10 = vsub.f32 %v459_v31, %v464_v9 }
 0x563   :  { %v466_v11 = vmul.f32 1.442695, %v465_v10 }
 0x564   :  { %v629_v12 = vpop.xlane.xlu1 %628 }
 0x565   :  { %12473 = vpow2.f32 %v466_v11  ;;  %v630_v13 = vsub.f32 %v624_v35, %v629_v12 }
 0x567   :  { %v631_v14 = vmul.f32 1.442695, %v630_v13 }
 0x569   :  { %12475 = vpow2.f32 %v631_v14  ;;  %v794_v15 = vpop.xlane.xlu0 %793 }
 0x56a   :  { %v795_v18 = vsub.f32 %v789_v39, %v794_v15 }
 0x56c   :  { %v796_v19 = vmul.f32 1.442695, %v795_v18 }
 0x56e   :  { %12477 = vpow2.f32 %v796_v19 }
 0x56f   :  { %v12474_v20 = vpop.eup %12473 }
 0x570   :  { %v468_v21 = vsel %vm387_vm7, %v12474_v20, 0.0 }
 0x571   :  { %v959_v22 = vpop.xlane.xlu0 %958  ;;  %469 = vadd.xlane.f32.xlu1 %v468_v21 }
 0x572   :  { %v960_v7 = vsub.f32 %v954_v45, %v959_v22 }
 0x573   :  { %v12476_v23 = vpop.eup %12475 }
 0x574   :  { %v961_v24 = vmul.f32 1.442695, %v960_v7  ;;  %v633_v25 = vsel %vm387_vm7, %v12476_v23, 0.0 }
 0x575   :  { %634 = vadd.xlane.f32.xlu0 %v633_v25 }
 0x576   :  { %12479 = vpow2.f32 %v961_v24 }
 0x578   :  { %v12478_v26 = vpop.eup %12477  ;;  %v1145_v32 = vpop.xlane.xlu1 %1144 }
 0x579   :  { %v798_v28 = vsel %vm387_vm7, %v12478_v26, 0.0  ;;  %v1146_v33 = vsub.f32 %v1140_v52, %v1145_v32 }
 0x57a   :  { %799 = vadd.xlane.f32.xlu1 %v798_v28 }
 0x57b   :  { %v1147_v36 = vmul.f32 1.442695, %v1146_v33 }
 0x57c   :  { %v1310_v34 = vpop.xlane.xlu0 %1309 }
 0x57d   :  { %v1311_v39 = vsub.f32 %v1305_v56, %v1310_v34  ;;  %12481 = vpow2.f32 %v1147_v36  ;;  %v1740_v36 = vld [vmem:[#allocation2 + $0x88] sm:$0xff] }
 0x57f   :  { %v1312_v42 = vmul.f32 1.442695, %v1311_v39  ;;  %v1742_v39 = vld [vmem:[#allocation2 + $0x98] sm:$0xff] }
 0x580   :  { %v12995_v30 = vpop.eup %12479  ;;  %v1475_v35 = vpop.xlane.xlu1 %1474 }
 0x581   :  { %v963_v31 = vsel %vm387_vm7, %v12995_v30, 0.0  ;;  %v1476_v37 = vsub.f32 %v1470_v60, %v1475_v35 }
 0x582   :  { %964 = vadd.xlane.f32.xlu0 %v963_v31 }
 0x583   :  { %v1477_v40 = vmul.f32 1.442695, %v1476_v37  ;;  %v1741_v37 = vld [vmem:[#allocation2 + $0x90] sm:$0xff] }
 0x584   :  { %v1640_v38 = vpop.xlane.xlu0 %1639  ;;  %v969_v55 = vpop.permute.xlu1 %968 }
 0x585   :  { %v1641_v41 = vsub.f32 %v1635_v0, %v1640_v38  ;;  %12483 = vpow2.f32 %v1477_v40  ;;  %v12226_v38 = vpack.c.bf16 %v1741_v37, %v1740_v36  ;;  %v1743_v40 = vld [vmem:[#allocation2 + $0xa0] sm:$0xff]  ;;  %v1967_v37 = vld [vmem:[#allocation2 + $0x108] sm:$0xff] }
 0x586   :  { %12485 = vpow2.f32 %v1312_v42  ;;  %v12230_v42 = vpack.c.bf16 %v1743_v40, %v1742_v39 }
 0x587   :  { %v1642_v43 = vmul.f32 1.442695, %v1641_v41  ;;  %v12482_v44 = vpop.eup %12481  ;;  %12227 = vmatprep.subr.bf16.mxu0 %v12226_v38 }
 0x588   :  { %v1149_v45 = vsel %vm387_vm7, %v12482_v44, 0.0  ;;  %v804_v56 = vpop.permute.xlu0 %803  ;;  %12229 = vmatpush3.bf16.msra.mxu0 %v12226_v38  ;;  %v1968_v38 = vld [vmem:[#allocation2 + $0x110] sm:$0xff] }
 0x589   :  { %12487 = vpow2.f32 %v1642_v43  ;;  %12231 = vmatprep.subr.bf16.mxu0 %v12230_v42  ;;  %v12250_v39 = vpack.c.bf16 %v1968_v38, %v1967_v37 }
 0x58b   :  { %1319 = vrot.lane.b32.xlu1 %v12886_v8, %s12772_s20 }
 0x58c   :  { %12233 = vmatpush3.bf16.msra.mxu0 %v12230_v42 }
 0x58f   :  { %v13004_v47 = vpop.eup %12483 }
 0x590   :  { %v12486_v48 = vpop.eup %12485  ;;  %v1479_v50 = vsel %vm387_vm7, %v13004_v47, 0.0 }
 0x591   :  { %v1314_v53 = vsel %vm387_vm7, %v12486_v48, 0.0 }
 0x593   :  { %v13008_v52 = vpop.eup %12487 }
 0x594   :  { %v1644_v54 = vsel %vm387_vm7, %v13008_v52, 0.0 }
 0x598   :  { %1154 = vrot.lane.b32.xlu0 %v12886_v8, %s12770_s18 }
 0x5af   :  { %1150 = vadd.xlane.f32.xlu1 %v1149_v45 }
 0x5b3   :  { %1480 = vadd.xlane.f32.xlu1 %v1479_v50 }
 0x5b7   :  { %1315 = vadd.xlane.f32.xlu0 %v1314_v53  ;;  %1645 = vadd.xlane.f32.xlu1 %v1644_v54 }
 0x5c8   :  { %1649 = vrot.lane.b32.xlu1 %v12886_v8, %s12774_s2 }
 0x5cd   :  { %1484 = vrot.lane.b32.xlu0 %v12886_v8, %s12775_s25 }
 0x5fe   :  { %v470_v57 = vpop.xlane.xlu1 %469 }
 0x5ff   :  { %12489 = vrcp.f32 %v470_v57 }
 0x602   :  { %v635_v58 = vpop.xlane.xlu0 %634 }
 0x603   :  { %12491 = vrcp.f32 %v635_v58 }
 0x607   :  { %v800_v59 = vpop.xlane.xlu1 %799 }
 0x608   :  { %12493 = vrcp.f32 %v800_v59 }
 0x609   :  { %v12490_v60 = vpop.eup %12489 }
 0x60a   :  { %v472_v61 = vmul.f32 %v12490_v60, %v12474_v20 }
 0x60b   :  { %v1320_v10 = vpop.permute.xlu1 %1319 }
 0x60c   :  { %11475 = vmatmul.mubr.msk.f32.vlgmr.msra.gmra.mrb[6].mxu1 %vm387_vm7, %v472_v61 }
 0x60d   :  { %v12492_v62 = vpop.eup %12491  ;;  %11483 = vmatpush3.msra.mxu1 %v12990_v5  ;;  %11484 = vmatprep.mubr.msk.f32.mxu1 %vm12763_vm6, %v12762_v6 }
 0x60e   :  { %11492 = vmatprep.subr.mxu1 %v12762_v6  ;;  %v637_v8 = vmul.f32 %v12492_v62, %v12476_v23 }
 0x60f   :  { %v965_v63 = vpop.xlane.xlu0 %964 }
 0x610   :  { %12495 = vrcp.f32 %v965_v63  ;;  %11485 = vmatmul.mubr.msk.f32.vlgmr.msra.gmra.mrb[8].mxu1 %vm387_vm7, %v637_v8 }
 0x611   :  { %11493 = vmatpush3.msra.mxu1 %v804_v56  ;;  %11494 = vmatprep.mubr.msk.f32.mxu1 %vm12763_vm6, %v12762_v6 }
 0x612   :  { %v12494_v0 = vpop.eup %12493  ;;  %11502 = vmatprep.subr.mxu1 %v12762_v6 }
 0x613   :  { %v802_v3 = vmul.f32 %v12494_v0, %v12478_v26  ;;  %v1155_v9 = vpop.permute.xlu0 %1154  ;;  %v10913_v0 = vld [vmem:[#allocation2 + $0xa8] ss:$0 sm:$0xff] }
 0x615   :  { %11495 = vmatmul.mubr.msk.f32.vlgmr.msra.gmra.mrb[10].mxu1 %vm387_vm7, %v802_v3 }
 0x616   :  { %11503 = vmatpush3.msra.mxu1 %v969_v55  ;;  %11504 = vmatprep.mubr.msk.f32.mxu1 %vm12763_vm6, %v12762_v6 }
 0x617   :  { %11512 = vmatprep.subr.mxu1 %v12762_v6 }
 0x61a   :  { %v12496_v4 = vpop.eup %12495 }
 0x61b   :  { %v967_v5 = vmul.f32 %v12496_v4, %v12995_v30 }
 0x61d   :  { %11505 = vmatmul.mubr.msk.f32.vlgmr.msra.gmra.mrb[12].mxu1 %vm387_vm7, %v967_v5 }
 0x61e   :  { %11513 = vmatpush3.msra.mxu1 %v1155_v9  ;;  %11514 = vmatprep.mubr.msk.f32.mxu1 %vm12763_vm6, %v12762_v6 }
 0x61f   :  { %11522 = vmatprep.subr.mxu1 %v12762_v6 }
 0x63c   :  { %v1151_v11 = vpop.xlane.xlu1 %1150 }
 0x63d   :  { %12497 = vrcp.f32 %v1151_v11 }
 0x640   :  { %v1481_v12 = vpop.xlane.xlu1 %1480 }
 0x644   :  { %v1316_v13 = vpop.xlane.xlu0 %1315  ;;  %v1646_v15 = vpop.xlane.xlu1 %1645 }
 0x645   :  { %12499 = vrcp.f32 %v1316_v13 }
 0x646   :  { %12501 = vrcp.f32 %v1481_v12 }
 0x647   :  { %v12498_v14 = vpop.eup %12497  ;;  %12503 = vrcp.f32 %v1646_v15 }
 0x648   :  { %v1153_v18 = vmul.f32 %v12498_v14, %v12482_v44  ;;  %v1485_v22 = vpop.permute.xlu0 %1484  ;;  %v1650_v24 = vpop.permute.xlu1 %1649 }
 0x64a   :  { %11515 = vmatmul.mubr.msk.f32.vlgmr.msra.gmra.mrb[14].mxu1 %vm387_vm7, %v1153_v18 }
 0x64b   :  { %11523 = vmatpush3.msra.mxu1 %v1320_v10  ;;  %11524 = vmatprep.mubr.msk.f32.mxu1 %vm12763_vm6, %v12762_v6 }
 0x64c   :  { %11532 = vmatprep.subr.mxu1 %v12762_v6 }
 0x64f   :  { %v12500_v19 = vpop.eup %12499 }
 0x650   :  { %v1318_v20 = vmul.f32 %v12500_v19, %v12486_v48  ;;  %v12502_v21 = vpop.eup %12501 }
 0x651   :  { %v1483_v7 = vmul.f32 %v12502_v21, %v13004_v47  ;;  %v12504_v23 = vpop.eup %12503 }
 0x652   :  { %11525 = vmatmul.mubr.msk.f32.vlgmr.msra.gmra.mrb[16].mxu1 %vm387_vm7, %v1318_v20  ;;  %v1648_v25 = vmul.f32 %v12504_v23, %v13008_v52  ;;  %v1871_v23 = vld [vmem:[#allocation2 + $0xc0] sm:$0xff] }
 0x653   :  { %11533 = vmatpush3.msra.mxu1 %v1485_v22  ;;  %11534 = vmatprep.mubr.msk.f32.mxu1 %vm12763_vm6, %v12762_v6 }
 0x654   :  { %11542 = vmatprep.subr.mxu1 %v12762_v6 }
 0x656   :  { %11535 = vmatmul.mubr.msk.f32.vlgmr.msra.gmra.mrb[18].mxu1 %vm387_vm7, %v1483_v7 }
 0x657   :  { %11543 = vmatpush3.msra.mxu1 %v1650_v24  ;;  %11544 = vmatprep.mubr.msk.f32.mxu1 %vm12763_vm6, %v12762_v6  ;;  %v1872_v24 = vld [vmem:[#allocation2 + $0xc8] sm:$0xff] }
 0x65a   :  { %11545 = vmatmul.mubr.msk.f32.vlgmr.msra.gmra.mrb[20].mxu1 %vm387_vm7, %v1648_v25  ;;  %v12234_v25 = vpack.c.bf16 %v1872_v24, %v1871_v23 }
 0x65c   :  { %12235 = vmatprep.subr.bf16.mxu1 %v12234_v25 }
 0x65d   :  { %12237 = vmatpush3.bf16.msra.mxu1 %v12234_v25 }
 0x6df   :  { %v545_v26 = vpop.f32.mrb[6].mxu1 }
 0x6e0   :  { %v11476_v28 = vpop.f32.mrb[7].mxu1 }
 0x6e1   :  { %v1874_v28 = vld [vmem:[#allocation2 + $0xd8] sm:$0xff] }
 0x6e3   :  { %v710_v30 = vpop.f32.mrb[8].mxu1 }
 0x6e4   :  { %1045 = vrot.lane.b32.xlu0 %v710_v30, %s12760_s29  ;;  %v11486_v31 = vpop.f32.mrb[9].mxu1 }
 0x6e5   :  { %v1963_v31 = vld [vmem:[#allocation2 + $0xe8] sm:$0xff] }
 0x6e8   :  { %v875_v32 = vpop.f32.mrb[10].mxu1 }
 0x6e9   :  { %1049 = vrot.lane.b32.xlu1 %v875_v32, %s12776_s26  ;;  %v11496_v33 = vpop.f32.mrb[11].mxu1  ;;  %v1964_v32 = vld [vmem:[#allocation2 + $0xf0] sm:$0xff] }
 0x6ea   :  { %v1965_v33 = vld [vmem:[#allocation2 + $0xf8] sm:$0xff] }
 0x6f0   :  { %v1040_v34 = vpop.f32.mrb[12].mxu1 }
 0x6f1   :  { %1053 = vrot.lane.b32.xlu1 %v1040_v34, %s12777_s27  ;;  %v11506_v35 = vpop.f32.mrb[13].mxu1  ;;  %v12242_v34 = vpack.c.bf16 %v1964_v32, %v1963_v31  ;;  %v2100_v31 = vld [vmem:[#allocation2 + $0x138] sm:$0xff] }
 0x6f2   :  { %v1966_v35 = vld [vmem:[#allocation2 + $0x100] sm:$0xff] }
 0x6f3   :  { %v12246_v36 = vpack.c.bf16 %v1966_v35, %v1965_v33  ;;  %12243 = vmatprep.subr.bf16.mxu0 %v12242_v34  ;;  %v2101_v33 = vld [vmem:[#allocation2 + $0x140] sm:$0xff] }
 0x71d   :  { %v1226_v41 = vpop.f32.mrb[14].mxu1 }
 0x71e   :  { %v11516_v43 = vpop.f32.mrb[15].mxu1 }
 0x725   :  { %v1391_v44 = vpop.f32.mrb[16].mxu1 }
 0x726   :  { %1726 = vrot.lane.b32.xlu0 %v1391_v44, %s12760_s29  ;;  %v11526_v45 = vpop.f32.mrb[17].mxu1 }
 0x729   :  { %v1556_v47 = vpop.f32.mrb[18].mxu1 }
 0x72a   :  { %1730 = vrot.lane.b32.xlu0 %v1556_v47, %s12776_s26  ;;  %v11536_v48 = vpop.f32.mrb[19].mxu1  ;;  %v1832_v47 = vld [vmem:[#allocation2 + $0xb8] sm:$0x3] }
 0x72b   :  { %v1862_v48 = vrot.slane %v1832_v47, %v12858_v46 }
 0x72d   :  { %v1721_v50 = vpop.f32.mrb[20].mxu1 }
 0x72e   :  { %1734 = vrot.lane.b32.xlu1 %v1721_v50, %s12777_s27  ;;  %v11546_v52 = vpop.f32.mrb[21].mxu1 }
 0x756   :  { %v1046_v53 = vpop.permute.xlu0 %1045 }
 0x757   :  { %v1056_v55 = vsel %vm387_vm7, %v545_v26, %v1046_v53  ;;  %v1873_v26 = vld [vmem:[#allocation2 + $0xd0] sm:$0xff]  ;;  %v1868_v53 = vrot.slane %v1832_v47, %v12862_v51 }
 0x758   :  { %v12238_v30 = vpack.c.bf16 %v1874_v28, %v1873_v26 }
 0x75a   :  { %12239 = vmatprep.subr.bf16.mxu1 %v12238_v30 }
 0x75b   :  { %v1050_v54 = vpop.permute.xlu1 %1049  ;;  %12241 = vmatpush3.bf16.msra.mxu1 %v12238_v30  ;;  %v2099_v30 = vld [vmem:[#allocation2 + $0x130] sm:$0xff] }
 0x75c   :  { %v1057_v56 = vsel %vm54_vm0, %v1056_v55, %v1050_v54  ;;  %v12258_v32 = vpack.c.bf16 %v2100_v31, %v2099_v30 }
 0x75e   :  { %12259 = vmatprep.subr.bf16.mxu1 %v12258_v32 }
 0x763   :  { %v1054_v57 = vpop.permute.xlu1 %1053 }
 0x764   :  { %v1059_v58 = vsel %vm1058_vm10, %v1057_v56, %v1054_v57 }
 0x765   :  { %11555 = vmatprep.mubr.msk.f32.mxu0 %vm248_vm3, %v1059_v58 }
 0x798   :  { %v1727_v59 = vpop.permute.xlu0 %1726 }
 0x799   :  { %v1737_v61 = vsel %vm387_vm7, %v1226_v41, %v1727_v59 }
 0x79c   :  { %v1731_v60 = vpop.permute.xlu0 %1730 }
 0x79d   :  { %v1738_v62 = vsel %vm54_vm0, %v1737_v61, %v1731_v60  ;;  %v1969_v60 = vld [vmem:[#allocation2 + $0x118] sm:$0xff]  ;;  %v1970_v61 = vld [vmem:[#allocation2 + $0x120] sm:$0xff] }
 0x7a0   :  { %v1735_v8 = vpop.permute.xlu1 %1734 }
 0x7a1   :  { %v1739_v63 = vsel %vm1058_vm10, %v1738_v62, %v1735_v8  ;;  %v12254_v62 = vpack.c.bf16 %v1970_v61, %v1969_v60  ;;  %v10916_v8 = vld [vmem:[#allocation2 + $0xe0] ss:$0 sm:$0xff] }
 0x7a2   :  { %11556 = vmatmul.mubr.msk.f32.vlgmr.msra.gmra.mrb[16].mxu0 %vm248_vm3, %v1739_v63 }
 0x7a3   :  { %12245 = vmatpush3.bf16.msra.mxu0 %v12242_v34  ;;  %v2102_v34 = vld [vmem:[#allocation2 + $0x148] sm:$0xff] }
 0x7a4   :  { %12247 = vmatprep.subr.bf16.mxu0 %v12246_v36  ;;  %v12262_v35 = vpack.c.bf16 %v2102_v34, %v2101_v33 }
 0x7a7   :  { %12249 = vmatpush3.bf16.msra.mxu0 %v12246_v36 }
 0x7a8   :  { %12251 = vmatprep.subr.bf16.mxu0 %v12250_v39 }
 0x7ab   :  { %12253 = vmatpush3.bf16.msra.mxu0 %v12250_v39 }
 0x7ac   :  { %12255 = vmatprep.subr.bf16.mxu0 %v12254_v62 }
 0x7af   :  { %12257 = vmatpush3.bf16.msra.mxu0 %v12254_v62 }
 0x7b0   :  { %11609 = vmatprep.subr.mxu0 %v12762_v6 }
 0x875   :  { %v11557_v3 = vpop.f32.mrb[16].mxu0 }
 0x876   :  { %v1827_v4 = vadd.f32 %v11557_v3, %v10913_v0  ;;  %v1821_v5 = vpop.f32.mrb[17].mxu0 }
 0x877   :  { %v1822_v9 = vadd.f32 %v10913_v0, %v1821_v5 }
 0x878   :  { %v13064_v10 = vadd.f32 %v1827_v4, %v12841_v17 }
 0x879   :  { %v13067_v11 = vadd.f32 %v1822_v9, %v12839_v16 }
 0x87a   :  { %v1836_v12 = vsel %vm248_vm3, %v13064_v10, 0.0 }
 0x87b   :  { %1837 = vadd.xlane.f32.xlu1 %v1836_v12  ;;  %v1833_v13 = vsel %vm248_vm3, %v13067_v11, 0.0  ;;  %v10919_v12 = vld [vmem:[#allocation2 + $0x128] ss:$0 sm:$0xff] }
 0x87c   :  { %1834 = vadd.xlane.f32.xlu0 %v1833_v13 }
 0x908   :  { %v1838_v14 = vpop.xlane.xlu1 %1837 }
 0x909   :  { %v1840_v15 = vmul.f32 0.03125, %v1838_v14  ;;  %v1835_v18 = vpop.xlane.xlu0 %1834 }
 0x90a   :  { %v1839_v19 = vmul.f32 0.03125, %v1835_v18 }
 0x90b   :  { %v1842_v20 = vsub.f32 %v13064_v10, %v1840_v15 }
 0x90c   :  { %v1841_v17 = vsub.f32 %v13067_v11, %v1839_v19 }
 0x90d   :  { %v1844_v22 = vmul.f32 %v1842_v20, %v1842_v20 }
 0x90e   :  { %v1843_v21 = vmul.f32 %v1841_v17, %v1841_v17 }
 0x90f   :  { %v1848_v7 = vsel %vm248_vm3, %v1844_v22, 0.0 }
 0x910   :  { %v1845_v16 = vsel %vm248_vm3, %v1843_v21, 0.0 }
 0x911   :  { %1846 = vadd.xlane.f32.xlu0 %v1845_v16 }
 0x915   :  { %1849 = vadd.xlane.f32.xlu0 %v1848_v7 }
 0x99e   :  { %v1847_v40 = vpop.xlane.xlu0 %1846 }
 0x99f   :  { %v1851_v41 = vmul.f32 0.03125, %v1847_v40 }
 0x9a1   :  { %v1853_v42 = vadd.f32 1e-06, %v1851_v41 }
 0x9a2   :  { %v1850_v43 = vpop.xlane.xlu0 %1849 }
 0x9a3   :  { %12505 = vrsqrt.f32 %v1853_v42  ;;  %v1852_v44 = vmul.f32 0.03125, %v1850_v43  ;;  %v2060_v42 = vld [vmem:[#allocation2 + $0x180] sm:$0x3] }
 0x9a4   :  { %v2090_v43 = vrot.slane %v2060_v42, %v12858_v46 }
 0x9a5   :  { %v1854_v45 = vadd.f32 1e-06, %v1852_v44 }
 0x9a7   :  { %12507 = vrsqrt.f32 %v1854_v45 }
 0x9ad   :  { %v12506_v50 = vpop.eup %12505 }
 0x9ae   :  { %v1857_v52 = vmul.f32 %v12506_v50, %v1841_v17  ;;  %v2096_v50 = vrot.slane %v2060_v42, %v12862_v51 }
 0x9b0   :  { %v1863_v54 = vmul.f32 %v1862_v48, %v1857_v52 }
 0x9b1   :  { %v12508_v55 = vpop.eup %12507 }
 0x9b2   :  { %v1858_v56 = vmul.f32 %v12508_v55, %v1842_v20  ;;  %v1869_v57 = vadd.f32 %v1868_v53, %v1863_v54 }
 0x9b4   :  { %v1864_v58 = vmul.f32 %v1862_v48, %v1858_v56  ;;  %11566 = vmatprep.mubr.msk.f32.mxu1 %vm248_vm3, %v1869_v57  ;;  %v10922_v56 = vld [vmem:[#allocation2 + $0x150] ss:$0 sm:$0xff] }
 0x9b6   :  { %v1870_v59 = vadd.f32 %v1868_v53, %v1864_v58 }
 0x9b8   :  { %11567 = vmatmul.mubr.msk.f32.vlgmr.msra.gmra.mrb[22].mxu1 %vm248_vm3, %v1870_v59 }
 0x9b9   :  { %12261 = vmatpush3.bf16.msra.mxu1 %v12258_v32 }
 0x9ba   :  { %12263 = vmatprep.subr.bf16.mxu1 %v12262_v35 }
 0x9bd   :  { %12265 = vmatpush3.bf16.msra.mxu1 %v12262_v35 }
 0x9be   :  { %11599 = vmatprep.subr.mxu1 %v12762_v6 }
 0xa8b   :  { %v11568_v63 = vpop.f32.mrb[22].mxu1 }
 0xa8c   :  { %v1958_v0 = vadd.f32 %v11568_v63, %v10916_v8  ;;  %v1952_v3 = vpop.f32.mrb[23].mxu1 }
 0xa8d   :  { %v1953_v4 = vadd.f32 %v10916_v8, %v1952_v3 }
 0xa8e   :  { %v1962_v9 = vmax.f32 %v1958_v0, 0.0 }
 0xa8f   :  { %v1961_v5 = vmax.f32 %v1953_v4, 0.0 }
 0xa91   :  { %11585 = vmatprep.mubr.msk.f32.mxu0 %vm1976_vm11, %v1961_v5 }
 0xa92   :  { %11586 = vmatmul.mubr.msk.f32.vlgmr.msra.gmra.mrb[18].mxu0 %vm1976_vm11, %v1962_v9 }
 0xa93   :  { %11611 = vmatprep.mubr.msk.f32.mxu0 %vm12763_vm6, %v12762_v6 }
 0xb65   :  { %v11587_v13 = vpop.f32.mrb[18].mxu0 }
 0xb66   :  { %v2055_v14 = vadd.f32 %v11587_v13, %v10919_v12  ;;  %v2049_v15 = vpop.f32.mrb[19].mxu0 }
 0xb67   :  { %v2050_v18 = vadd.f32 %v10919_v12, %v2049_v15 }
 0xb68   :  { %v13087_v19 = vadd.f32 %v2055_v14, %v13064_v10 }
 0xb69   :  { %v13090_v20 = vadd.f32 %v2050_v18, %v13067_v11 }
 0xb6a   :  { %v2064_v17 = vsel %vm248_vm3, %v13087_v19, 0.0 }
 0xb6b   :  { %2065 = vadd.xlane.f32.xlu0 %v2064_v17  ;;  %v2061_v21 = vsel %vm248_vm3, %v13090_v20, 0.0 }
 0xb6c   :  { %2062 = vadd.xlane.f32.xlu1 %v2061_v21 }
 0xbf8   :  { %v2066_v16 = vpop.xlane.xlu0 %2065 }
 0xbf9   :  { %v2068_v22 = vmul.f32 0.03125, %v2066_v16  ;;  %v2063_v7 = vpop.xlane.xlu1 %2062 }
 0xbfa   :  { %v2067_v23 = vmul.f32 0.03125, %v2063_v7 }
 0xbfb   :  { %v2070_v24 = vsub.f32 %v13087_v19, %v2068_v22 }
 0xbfc   :  { %v2069_v10 = vsub.f32 %v13090_v20, %v2067_v23 }
 0xbfd   :  { %v2072_v25 = vmul.f32 %v2070_v24, %v2070_v24 }
 0xbfe   :  { %v2071_v26 = vmul.f32 %v2069_v10, %v2069_v10 }
 0xbff   :  { %v2076_v11 = vsel %vm248_vm3, %v2072_v25, 0.0 }
 0xc00   :  { %2077 = vadd.xlane.f32.xlu0 %v2076_v11  ;;  %v2073_v28 = vsel %vm248_vm3, %v2071_v26, 0.0 }
 0xc01   :  { %2074 = vadd.xlane.f32.xlu1 %v2073_v28 }
 0xc8d   :  { %v2078_v36 = vpop.xlane.xlu0 %2077 }
 0xc8e   :  { %v2080_v37 = vmul.f32 0.03125, %v2078_v36  ;;  %v2075_v38 = vpop.xlane.xlu1 %2074 }
 0xc8f   :  { %v2079_v39 = vmul.f32 0.03125, %v2075_v38 }
 0xc90   :  { %v2082_v40 = vadd.f32 1e-06, %v2080_v37 }
 0xc91   :  { %v2081_v41 = vadd.f32 1e-06, %v2079_v39 }
 0xc92   :  { %12509 = vrsqrt.f32 %v2082_v40 }
 0xc93   :  { %12511 = vrsqrt.f32 %v2081_v41 }
 0xc9c   :  { %v12510_v44 = vpop.eup %12509 }
 0xc9d   :  { %v12512_v45 = vpop.eup %12511  ;;  %v2086_v47 = vmul.f32 %v12510_v44, %v2070_v24 }
 0xc9e   :  { %v2085_v48 = vmul.f32 %v12512_v45, %v2069_v10 }
 0xc9f   :  { %v2092_v52 = vmul.f32 %v2090_v43, %v2086_v47 }
 0xca0   :  { %v2091_v53 = vmul.f32 %v2090_v43, %v2085_v48 }
 0xca1   :  { %v2098_v55 = vadd.f32 %v2096_v50, %v2092_v52 }
 0xca2   :  { %v2097_v54 = vadd.f32 %v2096_v50, %v2091_v53 }
 0xca4   :  { %11596 = vmatprep.mubr.msk.f32.mxu1 %vm248_vm3, %v2097_v54 }
 0xca5   :  { %11597 = vmatmul.mubr.msk.f32.vlgmr.msra.gmra.mrb[24].mxu1 %vm248_vm3, %v2098_v55 }
 0xca6   :  { %11601 = vmatprep.mubr.msk.f32.mxu1 %vm12763_vm6, %v12762_v6 }
 0xd78   :  { %v11598_v57 = vpop.f32.mrb[24].mxu1 }
 0xd79   :  { %v2180_v58 = vpop.f32.mrb[25].mxu1  ;;  %v13121_v60 = vadd.f32 %v11598_v57, %v10922_v56 }
 0xd7a   :  { %v13107_v59 = vadd.f32 %v10922_v56, %v2180_v58 }
 0xd7c   :  { %2355 = vrot.lane.b32.xlu0 %v13107_v59, %s12766_s14  ;;  %2190 = vrot.lane.b32.xlu1 %v13107_v59, %s12765_s13 }
 0xd80   :  { %2518 = vrot.lane.b32.xlu0 %v13107_v59, %s12769_s17  ;;  %2353 = vrot.lane.b32.xlu1 %v13107_v59, %s12764_s1 }
 0xd84   :  { %2683 = vrot.lane.b32.xlu0 %v13107_v59, %s12771_s19  ;;  %2520 = vrot.lane.b32.xlu1 %v13107_v59, %s12767_s15 }
 0xd88   :  { %3029 = vrot.lane.b32.xlu0 %v13121_v60, %s12766_s14  ;;  %2685 = vrot.lane.b32.xlu1 %v13107_v59, %s12768_s16 }
 0xd8c   :  { %3194 = vrot.lane.b32.xlu0 %v13121_v60, %s12767_s15  ;;  %2864 = vrot.lane.b32.xlu1 %v13121_v60, %s12765_s13 }
 0xd90   :  { %3359 = vrot.lane.b32.xlu0 %v13121_v60, %s12768_s16  ;;  %3027 = vrot.lane.b32.xlu1 %v13121_v60, %s12764_s1 }
 0xd94   :  { %2277 = vrot.lane.b32.xlu0 %v13107_v59, %s12770_s18  ;;  %3192 = vrot.lane.b32.xlu1 %v13121_v60, %s12769_s17 }
 0xd98   :  { %3357 = vrot.lane.b32.xlu1 %v13121_v60, %s12771_s19 }
 0xd9c   :  { %2442 = vrot.lane.b32.xlu1 %v13107_v59, %s12772_s20 }
 0xdee   :  { %v2356_v61 = vpop.permute.xlu0 %2355  ;;  %v2191_v62 = vpop.permute.xlu1 %2190 }
 0xdef   :  { %11600 = vmatpush3.xpose.msk.msra.mxu1 %vm387_vm7, %v2191_v62  ;;  %11610 = vmatpush3.xpose.msk.msra.mxu0 %vm387_vm7, %v2356_v61 }
 0xdf0   :  { %11619 = vmatprep.subr.mxu0 %v12762_v6  ;;  %11604 = vmatprep.subr.mxu1 %v12762_v6 }
 0xdf2   :  { %v2519_v8 = vpop.permute.xlu0 %2518  ;;  %11602 = vmatmul.mubr.msk.f32.vlgmr.msra.gmra.mrb[26].mxu1 %vm387_vm7, %v13107_v59  ;;  %v2354_v63 = vpop.permute.xlu1 %2353 }
 0xdf3   :  { %11612 = vmatmul.mubr.msk.f32.vlgmr.msra.gmra.mrb[20].mxu0 %vm387_vm7, %v2354_v63  ;;  %11606 = vmatprep.mubr.msk.f32.mxu1 %vm12763_vm6, %v12762_v6 }
 0xdf4   :  { %11621 = vmatprep.mubr.msk.f32.mxu0 %vm12763_vm6, %v12762_v6 }
 0xdf6   :  { %v2684_v0 = vpop.permute.xlu0 %2683  ;;  %v2521_v3 = vpop.permute.xlu1 %2520 }
 0xdf7   :  { %11620 = vmatpush3.xpose.msk.msra.mxu0 %vm387_vm7, %v2521_v3 }
 0xdf8   :  { %11629 = vmatprep.subr.mxu0 %v12762_v6 }
 0xdfa   :  { %v3030_v4 = vpop.permute.xlu0 %3029  ;;  %11622 = vmatmul.mubr.msk.f32.vlgmr.msra.gmra.mrb[22].mxu0 %vm387_vm7, %v2519_v8  ;;  %v2686_v5 = vpop.permute.xlu1 %2685 }
 0xdfb   :  { %11630 = vmatpush3.xpose.msk.msra.mxu0 %vm387_vm7, %v2686_v5  ;;  %11631 = vmatprep.mubr.msk.f32.mxu0 %vm12763_vm6, %v12762_v6 }
 0xdfc   :  { %11639 = vmatprep.subr.mxu0 %v12762_v6 }
 0xdfe   :  { %v3195_v9 = vpop.permute.xlu0 %3194  ;;  %11632 = vmatmul.mubr.msk.f32.vlgmr.msra.gmra.mrb[24].mxu0 %vm387_vm7, %v2684_v0  ;;  %v2865_v12 = vpop.permute.xlu1 %2864 }
 0xdff   :  { %11640 = vmatpush3.xpose.msk.msra.mxu0 %vm387_vm7, %v2865_v12  ;;  %11641 = vmatprep.mubr.msk.f32.mxu0 %vm12763_vm6, %v12762_v6 }
 0xe00   :  { %11649 = vmatprep.subr.mxu0 %v12762_v6 }
 0xe02   :  { %v3360_v13 = vpop.permute.xlu0 %3359  ;;  %11642 = vmatmul.mubr.msk.f32.vlgmr.msra.gmra.mrb[26].mxu0 %vm387_vm7, %v13121_v60  ;;  %v3028_v14 = vpop.permute.xlu1 %3027 }
 0xe03   :  { %11650 = vmatpush3.xpose.msk.msra.mxu0 %vm387_vm7, %v3030_v4  ;;  %11651 = vmatprep.mubr.msk.f32.mxu0 %vm12763_vm6, %v12762_v6 }
 0xe04   :  { %11659 = vmatprep.subr.mxu0 %v12762_v6 }
 0xe06   :  { %v2278_v15 = vpop.permute.xlu0 %2277  ;;  %11652 = vmatmul.mubr.msk.f32.vlgmr.msra.gmra.mrb[28].mxu0 %vm387_vm7, %v3028_v14  ;;  %v3193_v18 = vpop.permute.xlu1 %3192 }
 0xe07   :  { %11605 = vmatpush3.msra.mxu1 %v2278_v15  ;;  %11660 = vmatpush3.xpose.msk.msra.mxu0 %vm387_vm7, %v3195_v9 }
 0xe08   :  { %11661 = vmatprep.mubr.msk.f32.mxu0 %vm12763_vm6, %v12762_v6  ;;  %11669 = vmatprep.subr.mxu0 %v12762_v6 }
 0xe09   :  { %11614 = vmatprep.subr.mxu1 %v12762_v6 }
 0xe0a   :  { %11662 = vmatmul.mubr.msk.f32.vlgmr.msra.gmra.mrb[30].mxu0 %vm387_vm7, %v3193_v18  ;;  %v3358_v17 = vpop.permute.xlu1 %3357 }
 0xe0b   :  { %11670 = vmatpush3.xpose.msk.msra.mxu0 %vm387_vm7, %v3360_v13  ;;  %11671 = vmatprep.mubr.msk.f32.mxu0 %vm12763_vm6, %v12762_v6 }
 0xe0e   :  { %11672 = vmatmul.mubr.msk.f32.vlgmr.msra.gmra.mrb[32].mxu0 %vm387_vm7, %v3358_v17  ;;  %v13203_v54 = vpop.permute.xlu1 %2442 }
 0xec5   :  { %v2262_v21 = vpop.f32.mrb[26].mxu1 }
 0xec6   :  { %v2263_v16 = vadd.f32 %v2262_v21, %v12961_v29  ;;  %v11603_v22 = vpop.f32.mrb[27].mxu1  ;;  %v2427_v7 = vpop.f32.mrb[20].mxu0 }
 0xec7   :  { %v2428_v23 = vadd.f32 %v2427_v7, %v12961_v29  ;;  %v11613_v24 = vpop.f32.mrb[21].mxu0 }
 0xec8   :  { %v2266_v10 = vsel %vm387_vm7, %v2263_v16, -inf }
 0xec9   :  { %2267 = vmax.xlane.f32.xlu0 %v2266_v10  ;;  %v2431_v25 = vsel %vm387_vm7, %v2428_v23, -inf }
 0xeca   :  { %2432 = vmax.xlane.f32.xlu1 %v2431_v25 }
 0xecd   :  { %v2592_v26 = vpop.f32.mrb[22].mxu0 }
 0xece   :  { %v2593_v11 = vadd.f32 %v2592_v26, %v12961_v29  ;;  %v11623_v28 = vpop.f32.mrb[23].mxu0 }
 0xed0   :  { %v2596_v30 = vsel %vm387_vm7, %v2593_v11, -inf }
 0xed1   :  { %2597 = vmax.xlane.f32.xlu0 %v2596_v30  ;;  %v2757_v31 = vpop.f32.mrb[24].mxu0 }
 0xed2   :  { %v2758_v32 = vadd.f32 %v2757_v31, %v12961_v29  ;;  %v11633_v33 = vpop.f32.mrb[25].mxu0 }
 0xed4   :  { %v2761_v34 = vsel %vm387_vm7, %v2758_v32, -inf }
 0xed5   :  { %2762 = vmax.xlane.f32.xlu0 %v2761_v34  ;;  %v2936_v35 = vpop.f32.mrb[26].mxu0 }
 0xed6   :  { %v2937_v36 = vadd.f32 %v2936_v35, %v12976_v49  ;;  %v11643_v37 = vpop.f32.mrb[27].mxu0 }
 0xed8   :  { %v2940_v38 = vsel %vm387_vm7, %v2937_v36, -inf }
 0xed9   :  { %2941 = vmax.xlane.f32.xlu1 %v2940_v38  ;;  %v3101_v39 = vpop.f32.mrb[28].mxu0 }
 0xeda   :  { %v3102_v40 = vadd.f32 %v3101_v39, %v12976_v49  ;;  %v11653_v41 = vpop.f32.mrb[29].mxu0 }
 0xedc   :  { %v3105_v42 = vsel %vm387_vm7, %v3102_v40, -inf }
 0xedd   :  { %3106 = vmax.xlane.f32.xlu0 %v3105_v42  ;;  %v3266_v43 = vpop.f32.mrb[30].mxu0 }
 0xede   :  { %v3267_v44 = vadd.f32 %v3266_v43, %v12976_v49  ;;  %v11663_v45 = vpop.f32.mrb[31].mxu0 }
 0xee0   :  { %v3270_v47 = vsel %vm387_vm7, %v3267_v44, -inf }
 0xee1   :  { %3271 = vmax.xlane.f32.xlu1 %v3270_v47  ;;  %v3431_v48 = vpop.f32.mrb[32].mxu0 }
 0xee2   :  { %v3432_v50 = vadd.f32 %v3431_v48, %v12976_v49  ;;  %v11673_v52 = vpop.f32.mrb[33].mxu0 }
 0xee4   :  { %v3435_v53 = vsel %vm387_vm7, %v3432_v50, -inf }
 0xee5   :  { %3436 = vmax.xlane.f32.xlu0 %v3435_v53 }
 0xef2   :  { %2772 = vrot.lane.b32.xlu1 %v13107_v59, %s12774_s2 }
 0xefb   :  { %2607 = vrot.lane.b32.xlu0 %v13107_v59, %s12775_s25 }
 0xf56   :  { %v2268_v55 = vpop.xlane.xlu0 %2267 }
 0xf57   :  { %v2269_v56 = vsub.f32 %v2263_v16, %v2268_v55  ;;  %v2433_v57 = vpop.xlane.xlu1 %2432 }
 0xf58   :  { %v2434_v58 = vsub.f32 %v2428_v23, %v2433_v57 }
 0xf59   :  { %v2270_v61 = vmul.f32 1.442695, %v2269_v56 }
 0xf5a   :  { %v2435_v62 = vmul.f32 1.442695, %v2434_v58 }
 0xf5b   :  { %12513 = vpow2.f32 %v2270_v61 }
 0xf5c   :  { %12515 = vpow2.f32 %v2435_v62 }
 0xf5e   :  { %v2598_v8 = vpop.xlane.xlu0 %2597 }
 0xf5f   :  { %v2599_v63 = vsub.f32 %v2593_v11, %v2598_v8 }
 0xf61   :  { %v2600_v0 = vmul.f32 1.442695, %v2599_v63 }
 0xf62   :  { %v2763_v3 = vpop.xlane.xlu0 %2762 }
 0xf63   :  { %12517 = vpow2.f32 %v2600_v0  ;;  %v2764_v4 = vsub.f32 %v2758_v32, %v2763_v3 }
 0xf65   :  { %v12514_v5 = vpop.eup %12513  ;;  %v2765_v9 = vmul.f32 1.442695, %v2764_v4 }
 0xf66   :  { %v12516_v12 = vpop.eup %12515  ;;  %v2272_v59 = vsel %vm387_vm7, %v12514_v5, 0.0  ;;  %v2942_v21 = vpop.xlane.xlu1 %2941 }
 0xf67   :  { %12519 = vpow2.f32 %v2765_v9  ;;  %2273 = vadd.xlane.f32.xlu1 %v2272_v59  ;;  %v2437_v13 = vsel %vm387_vm7, %v12516_v12, 0.0  ;;  %v2943_v16 = vsub.f32 %v2937_v36, %v2942_v21 }
 0xf68   :  { %2438 = vadd.xlane.f32.xlu0 %v2437_v13 }
 0xf69   :  { %v2944_v24 = vmul.f32 1.442695, %v2943_v16 }
 0xf6a   :  { %v3107_v22 = vpop.xlane.xlu0 %3106 }
 0xf6b   :  { %v3108_v23 = vsub.f32 %v3102_v40, %v3107_v22  ;;  %12521 = vpow2.f32 %v2944_v24  ;;  %v3538_v24 = vld [vmem:[#allocation2 + $0x160] sm:$0xff] }
 0xf6d   :  { %v12518_v14 = vpop.eup %12517  ;;  %v3109_v26 = vmul.f32 1.442695, %v3108_v23  ;;  %v3537_v23 = vld [vmem:[#allocation2 + $0x158] sm:$0xff] }
 0xf6e   :  { %v2602_v15 = vsel %vm387_vm7, %v12518_v14, 0.0  ;;  %v3272_v7 = vpop.xlane.xlu1 %3271 }
 0xf6f   :  { %2603 = vadd.xlane.f32.xlu1 %v2602_v15  ;;  %v3273_v10 = vsub.f32 %v3267_v44, %v3272_v7  ;;  %12523 = vpow2.f32 %v3109_v26  ;;  %v3540_v26 = vld [vmem:[#allocation2 + $0x170] sm:$0xff] }
 0xf71   :  { %v13208_v18 = vpop.eup %12519  ;;  %v3274_v11 = vmul.f32 1.442695, %v3273_v10  ;;  %v12266_v10 = vpack.c.bf16 %v3538_v24, %v3537_v23 }
 0xf72   :  { %v2767_v17 = vsel %vm387_vm7, %v13208_v18, 0.0  ;;  %v3437_v25 = vpop.xlane.xlu0 %3436  ;;  %v2773_v39 = vpop.permute.xlu1 %2772 }
 0xf73   :  { %2768 = vadd.xlane.f32.xlu0 %v2767_v17  ;;  %v3438_v28 = vsub.f32 %v3432_v50, %v3437_v25  ;;  %12525 = vpow2.f32 %v3274_v11  ;;  %12267 = vmatprep.subr.bf16.mxu0 %v12266_v10  ;;  %v3539_v25 = vld [vmem:[#allocation2 + $0x168] sm:$0xff] }
 0xf74   :  { %12269 = vmatpush3.bf16.msra.mxu0 %v12266_v10  ;;  %v12270_v11 = vpack.c.bf16 %v3540_v26, %v3539_v25  ;;  %v3668_v10 = vld [vmem:[#allocation2 + $0x190] sm:$0xff]  ;;  %v3669_v25 = vld [vmem:[#allocation2 + $0x198] sm:$0xff] }
 0xf75   :  { %v3439_v30 = vmul.f32 1.442695, %v3438_v28  ;;  %v12522_v31 = vpop.eup %12521  ;;  %v12274_v26 = vpack.c.bf16 %v3669_v25, %v3668_v10 }
 0xf76   :  { %v2946_v33 = vsel %vm387_vm7, %v12522_v31, 0.0  ;;  %v2608_v40 = vpop.permute.xlu0 %2607  ;;  %12271 = vmatprep.subr.bf16.mxu0 %v12270_v11 }
 0xf77   :  { %12527 = vpow2.f32 %v3439_v30 }
 0xf78   :  { %12273 = vmatpush3.bf16.msra.mxu0 %v12270_v11  ;;  %v3670_v11 = vld [vmem:[#allocation2 + $0x1a0] sm:$0xff] }
 0xf79   :  { %v13216_v32 = vpop.eup %12523 }
 0xf7a   :  { %v3111_v35 = vsel %vm387_vm7, %v13216_v32, 0.0 }
 0xf7d   :  { %v13219_v34 = vpop.eup %12525 }
 0xf7e   :  { %v3276_v36 = vsel %vm387_vm7, %v13219_v34, 0.0 }
 0xf80   :  { %3116 = vrot.lane.b32.xlu1 %v13121_v60, %s12772_s20 }
 0xf81   :  { %v13225_v37 = vpop.eup %12527 }
 0xf82   :  { %v3441_v38 = vsel %vm387_vm7, %v13225_v37, 0.0 }
 0xf89   :  { %2951 = vrot.lane.b32.xlu0 %v13121_v60, %s12770_s18 }
 0xfa4   :  { %2947 = vadd.xlane.f32.xlu1 %v2946_v33 }
 0xfa8   :  { %3112 = vadd.xlane.f32.xlu0 %v3111_v35  ;;  %3277 = vadd.xlane.f32.xlu1 %v3276_v36 }
 0xfac   :  { %3442 = vadd.xlane.f32.xlu1 %v3441_v38 }
 0xfbd   :  { %3446 = vrot.lane.b32.xlu1 %v13121_v60, %s12774_s2 }
 0xfbe   :  { %3281 = vrot.lane.b32.xlu0 %v13121_v60, %s12775_s25 }
 0xff4   :  { %v2274_v41 = vpop.xlane.xlu1 %2273 }
 0xff5   :  { %12529 = vrcp.f32 %v2274_v41  ;;  %v2439_v42 = vpop.xlane.xlu0 %2438 }
 0xff6   :  { %12531 = vrcp.f32 %v2439_v42 }
 0xffc   :  { %v2604_v43 = vpop.xlane.xlu1 %2603 }
 0xffd   :  { %12533 = vrcp.f32 %v2604_v43 }
 0xfff   :  { %v12530_v44 = vpop.eup %12529 }
0x1000   :  { %v2769_v45 = vpop.xlane.xlu0 %2768  ;;  %v2276_v47 = vmul.f32 %v12530_v44, %v12514_v5  ;;  %v12532_v48 = vpop.eup %12531 }
0x1001   :  { %12535 = vrcp.f32 %v2769_v45  ;;  %v2441_v60 = vmul.f32 %v12532_v48, %v12516_v12  ;;  %v3117_v56 = vpop.permute.xlu1 %3116 }
0x1002   :  { %11607 = vmatmul.mubr.msk.f32.vlgmr.msra.gmra.mrb[28].mxu1 %vm387_vm7, %v2276_v47 }
0x1003   :  { %11615 = vmatpush3.msra.mxu1 %v13203_v54  ;;  %11616 = vmatprep.mubr.msk.f32.mxu1 %vm12763_vm6, %v12762_v6 }
0x1004   :  { %11624 = vmatprep.subr.mxu1 %v12762_v6  ;;  %v2952_v55 = vpop.permute.xlu0 %2951 }
0x1006   :  { %11617 = vmatmul.mubr.msk.f32.vlgmr.msra.gmra.mrb[30].mxu1 %vm387_vm7, %v2441_v60 }
0x1007   :  { %v12534_v50 = vpop.eup %12533  ;;  %11625 = vmatpush3.msra.mxu1 %v2608_v40  ;;  %11626 = vmatprep.mubr.msk.f32.mxu1 %vm12763_vm6, %v12762_v6 }
0x1008   :  { %11634 = vmatprep.subr.mxu1 %v12762_v6  ;;  %v2606_v52 = vmul.f32 %v12534_v50, %v12518_v14  ;;  %v10949_v50 = vld [vmem:[#allocation2 + $0x178] ss:$0 sm:$0xff] }
0x100a   :  { %11627 = vmatmul.mubr.msk.f32.vlgmr.msra.gmra.mrb[32].mxu1 %vm387_vm7, %v2606_v52 }
0x100b   :  { %v12536_v53 = vpop.eup %12535  ;;  %11635 = vmatpush3.msra.mxu1 %v2773_v39  ;;  %11636 = vmatprep.mubr.msk.f32.mxu1 %vm12763_vm6, %v12762_v6 }
0x100c   :  { %11644 = vmatprep.subr.mxu1 %v12762_v6  ;;  %v2771_v54 = vmul.f32 %v12536_v53, %v13208_v18 }
0x100e   :  { %11637 = vmatmul.mubr.msk.f32.vlgmr.msra.gmra.mrb[34].mxu1 %vm387_vm7, %v2771_v54 }
0x100f   :  { %11645 = vmatpush3.msra.mxu1 %v2952_v55  ;;  %11646 = vmatprep.mubr.msk.f32.mxu1 %vm12763_vm6, %v12762_v6 }
0x1010   :  { %11654 = vmatprep.subr.mxu1 %v12762_v6 }
0x1031   :  { %v2948_v57 = vpop.xlane.xlu1 %2947 }
0x1032   :  { %12537 = vrcp.f32 %v2948_v57 }
0x1035   :  { %v3113_v58 = vpop.xlane.xlu0 %3112  ;;  %v3278_v61 = vpop.xlane.xlu1 %3277 }
0x1036   :  { %12539 = vrcp.f32 %v3113_v58 }
0x1037   :  { %12541 = vrcp.f32 %v3278_v61  ;;  %v12709_v61 = vld [vmem:[#allocation2 + $0x20] sm:$0xff] }
0x1039   :  { %v3443_v62 = vpop.xlane.xlu1 %3442  ;;  %v3282_v5 = vpop.permute.xlu0 %3281 }
0x103a   :  { %12543 = vrcp.f32 %v3443_v62  ;;  %v13289_v62 = vadd.f32 %v12709_v61, %v12874_v2 }
0x103c   :  { %v12538_v8 = vpop.eup %12537 }
0x103d   :  { %v2950_v63 = vmul.f32 %v12538_v8, %v12522_v31  ;;  %v3447_v59 = vpop.permute.xlu1 %3446 }
0x103f   :  { %11647 = vmatmul.mubr.msk.f32.vlgmr.msra.gmra.mrb[36].mxu1 %vm387_vm7, %v2950_v63  ;;  %v13294_v63 = vadd.f32 %v12709_v61, %v12872_v1 }
0x1040   :  { %v12540_v0 = vpop.eup %12539  ;;  %11655 = vmatpush3.msra.mxu1 %v3117_v56  ;;  %11656 = vmatprep.mubr.msk.f32.mxu1 %vm12763_vm6, %v12762_v6 }
0x1041   :  { %11664 = vmatprep.subr.mxu1 %v12762_v6  ;;  %v3115_v3 = vmul.f32 %v12540_v0, %v13216_v32  ;;  %v12542_v4 = vpop.eup %12541 }
0x1042   :  { %v3280_v9 = vmul.f32 %v12542_v4, %v13219_v34 }
0x1043   :  { %11657 = vmatmul.mubr.msk.f32.vlgmr.msra.gmra.mrb[38].mxu1 %vm387_vm7, %v3115_v3 }
0x1044   :  { %11665 = vmatpush3.msra.mxu1 %v3282_v5  ;;  %11666 = vmatprep.mubr.msk.f32.mxu1 %vm12763_vm6, %v12762_v6  ;;  %v12544_v12 = vpop.eup %12543 }
0x1045   :  { %11674 = vmatprep.subr.mxu1 %v12762_v6  ;;  %v3445_v13 = vmul.f32 %v12544_v12, %v13225_v37 }
0x1047   :  { %11667 = vmatmul.mubr.msk.f32.vlgmr.msra.gmra.mrb[40].mxu1 %vm387_vm7, %v3280_v9 }
0x1048   :  { %11675 = vmatpush3.msra.mxu1 %v3447_v59  ;;  %11676 = vmatprep.mubr.msk.f32.mxu1 %vm12763_vm6, %v12762_v6 }
0x1049   :  { %12275 = vmatprep.subr.bf16.mxu1 %v12274_v26 }
0x104b   :  { %11677 = vmatmul.mubr.msk.f32.vlgmr.msra.gmra.mrb[42].mxu1 %vm387_vm7, %v3445_v13 }
0x104c   :  { %12277 = vmatpush3.bf16.msra.mxu1 %v12274_v26 }
0x10d5   :  { %v2349_v14 = vpop.f32.mrb[28].mxu1 }
0x10d6   :  { %v11608_v15 = vpop.f32.mrb[29].mxu1 }
0x10d9   :  { %v2514_v18 = vpop.f32.mrb[30].mxu1 }
0x10da   :  { %2849 = vrot.lane.b32.xlu0 %v2514_v18, %s12760_s29  ;;  %v11618_v17 = vpop.f32.mrb[31].mxu1 }
0x10dd   :  { %v2679_v21 = vpop.f32.mrb[32].mxu1 }
0x10de   :  { %2853 = vrot.lane.b32.xlu1 %v2679_v21, %s12776_s26  ;;  %v11628_v16 = vpop.f32.mrb[33].mxu1 }
0x10e1   :  { %v2844_v22 = vpop.f32.mrb[34].mxu1 }
0x10e2   :  { %2857 = vrot.lane.b32.xlu1 %v2844_v22, %s12777_s27  ;;  %v11638_v7 = vpop.f32.mrb[35].mxu1 }
0x1112   :  { %v3023_v28 = vpop.f32.mrb[36].mxu1 }
0x1113   :  { %v11648_v30 = vpop.f32.mrb[37].mxu1 }
0x1116   :  { %v3188_v31 = vpop.f32.mrb[38].mxu1 }
0x1117   :  { %3523 = vrot.lane.b32.xlu0 %v3188_v31, %s12760_s29  ;;  %v11658_v32 = vpop.f32.mrb[39].mxu1  ;;  %v3934_v31 = vld [vmem:[#allocation2 + $0x208] sm:$0xff] }
0x1118   :  { %v3935_v32 = vld [vmem:[#allocation2 + $0x210] sm:$0xff] }
0x111a   :  { %v3353_v33 = vpop.f32.mrb[40].mxu1 }
0x111b   :  { %3527 = vrot.lane.b32.xlu0 %v3353_v33, %s12776_s26  ;;  %v11668_v34 = vpop.f32.mrb[41].mxu1  ;;  %v12298_v33 = vpack.c.bf16 %v3935_v32, %v3934_v31 }
0x111c   :  { %v3760_v34 = vld [vmem:[#allocation2 + $0x1b8] sm:$0xff] }
0x111e   :  { %v3518_v35 = vpop.f32.mrb[42].mxu1 }
0x111f   :  { %3531 = vrot.lane.b32.xlu1 %v3518_v35, %s12777_s27  ;;  %v11678_v36 = vpop.f32.mrb[43].mxu1  ;;  %v3761_v35 = vld [vmem:[#allocation2 + $0x1c0] sm:$0xff] }
0x1120   :  { %v3762_v36 = vld [vmem:[#allocation2 + $0x1c8] sm:$0xff] }
0x114c   :  { %v2850_v37 = vpop.permute.xlu0 %2849 }
0x114d   :  { %v2860_v39 = vsel %vm387_vm7, %v2349_v14, %v2850_v37  ;;  %v12282_v37 = vpack.c.bf16 %v3761_v35, %v3760_v34 }
0x114f   :  { %12283 = vmatprep.subr.bf16.mxu0 %v12282_v37 }
0x1150   :  { %v2854_v38 = vpop.permute.xlu1 %2853 }
0x1151   :  { %v2861_v40 = vsel %vm54_vm0, %v2860_v39, %v2854_v38  ;;  %v3763_v38 = vld [vmem:[#allocation2 + $0x1d0] sm:$0xff] }
0x1152   :  { %v12286_v39 = vpack.c.bf16 %v3763_v38, %v3762_v36  ;;  %v10958_v36 = vld [vmem:[#allocation2 + $0x228] ss:$0 sm:$0xff] }
0x1154   :  { %v2858_v41 = vpop.permute.xlu1 %2857 }
0x1155   :  { %v2862_v42 = vsel %vm1058_vm10, %v2861_v40, %v2858_v41  ;;  %v3764_v40 = vld [vmem:[#allocation2 + $0x1d8] sm:$0xff]  ;;  %v3765_v41 = vld [vmem:[#allocation2 + $0x1e0] sm:$0xff] }
0x1156   :  { %11687 = vmatprep.mubr.msk.f32.mxu0 %vm248_vm3, %v2862_v42  ;;  %v12290_v42 = vpack.c.bf16 %v3765_v41, %v3764_v40 }
0x1189   :  { %v3524_v43 = vpop.permute.xlu0 %3523 }
0x118a   :  { %v3534_v45 = vsel %vm387_vm7, %v3023_v28, %v3524_v43  ;;  %v3671_v28 = vld [vmem:[#allocation2 + $0x1a8] sm:$0xff] }
0x118b   :  { %v12278_v30 = vpack.c.bf16 %v3671_v28, %v3670_v11  ;;  %v3767_v11 = vld [vmem:[#allocation2 + $0x1f0] sm:$0xff] }
0x118d   :  { %v3528_v44 = vpop.permute.xlu0 %3527  ;;  %12279 = vmatprep.subr.bf16.mxu1 %v12278_v30 }
0x118e   :  { %v3535_v47 = vsel %vm54_vm0, %v3534_v45, %v3528_v44  ;;  %12281 = vmatpush3.bf16.msra.mxu1 %v12278_v30 }
0x118f   :  { %12299 = vmatprep.subr.bf16.mxu1 %v12298_v33 }
0x1191   :  { %v3532_v48 = vpop.permute.xlu1 %3531 }
0x1192   :  { %v3536_v60 = vsel %vm1058_vm10, %v3535_v47, %v3532_v48 }
0x1193   :  { %11688 = vmatmul.mubr.msk.f32.vlgmr.msra.gmra.mrb[34].mxu0 %vm248_vm3, %v3536_v60 }
0x1194   :  { %12285 = vmatpush3.bf16.msra.mxu0 %v12282_v37 }
0x1195   :  { %12287 = vmatprep.subr.bf16.mxu0 %v12286_v39 }
0x1198   :  { %12289 = vmatpush3.bf16.msra.mxu0 %v12286_v39 }
0x1199   :  { %12291 = vmatprep.subr.bf16.mxu0 %v12290_v42 }
0x119c   :  { %12293 = vmatpush3.bf16.msra.mxu0 %v12290_v42 }
0x1266   :  { %v11689_v52 = vpop.f32.mrb[34].mxu0 }
0x1267   :  { %v3624_v53 = vadd.f32 %v11689_v52, %v10949_v50  ;;  %v3618_v54 = vpop.f32.mrb[35].mxu0 }
0x1268   :  { %v3619_v55 = vadd.f32 %v10949_v50, %v3618_v54 }
0x1269   :  { %v13281_v56 = vadd.f32 %v3624_v53, %v13087_v19  ;;  %v3896_v19 = vsel %vm248_vm3, %v13289_v62, 0.0 }
0x126a   :  { %v13284_v57 = vadd.f32 %v3619_v55, %v13090_v20  ;;  %v3899_v20 = vsel %vm248_vm3, %v13294_v63, 0.0 }
0x126b   :  { %v3633_v58 = vsel %vm248_vm3, %v13281_v56, 0.0 }
0x126c   :  { %3634 = vadd.xlane.f32.xlu1 %v3633_v58  ;;  %v3630_v8 = vsel %vm248_vm3, %v13284_v57, 0.0  ;;  %v3629_v58 = vld [vmem:[#allocation2 + $0x188] sm:$0x3] }
0x126d   :  { %3631 = vadd.xlane.f32.xlu0 %v3630_v8  ;;  %v3659_v8 = vrot.slane %v3629_v58, %v12858_v46 }
0x1271   :  { %3897 = vadd.xlane.f32.xlu0 %v3896_v19 }
0x1275   :  { %3900 = vadd.xlane.f32.xlu0 %v3899_v20 }
0x12f9   :  { %v3635_v0 = vpop.xlane.xlu1 %3634 }
0x12fa   :  { %v3637_v3 = vmul.f32 0.03125, %v3635_v0  ;;  %v3632_v2 = vpop.xlane.xlu0 %3631 }
0x12fb   :  { %v3636_v4 = vmul.f32 0.03125, %v3632_v2 }
0x12fc   :  { %v13301_v5 = vsub.f32 %v13281_v56, %v3637_v3  ;;  %v3895_v3 = vld [vmem:[#allocation2 + $0x2a8] sm:$0x3] }
0x12fd   :  { %v13304_v9 = vsub.f32 %v13284_v57, %v3636_v4  ;;  %v3665_v4 = vrot.slane %v3629_v58, %v12862_v51 }
0x12fe   :  { %v3898_v1 = vpop.xlane.xlu0 %3897  ;;  %v3641_v12 = vmul.f32 %v13301_v5, %v13301_v5 }
0x12ff   :  { %v3902_v59 = vmul.f32 0.03125, %v3898_v1  ;;  %v3640_v13 = vmul.f32 %v13304_v9, %v13304_v9 }
0x1300   :  { %v3645_v14 = vsel %vm248_vm3, %v3641_v12, 0.0 }
0x1301   :  { %v13312_v15 = vsub.f32 %v13289_v62, %v3902_v59  ;;  %3646 = vadd.xlane.f32.xlu0 %v3645_v14  ;;  %v3642_v18 = vsel %vm248_vm3, %v3640_v13, 0.0  ;;  %v3936_v59 = vld [vmem:[#allocation2 + $0x218] sm:$0xff]  ;;  %v3937_v13 = vld [vmem:[#allocation2 + $0x220] sm:$0xff]  ;;  %v3925_v14 = vrot.slane %v3895_v3, %v12858_v46 }
0x1302   :  { %3643 = vadd.xlane.f32.xlu1 %v3642_v18  ;;  %v3901_v17 = vpop.xlane.xlu0 %3900 }
0x1303   :  { %v3903_v21 = vmul.f32 0.03125, %v3901_v17  ;;  %v3906_v16 = vmul.f32 %v13312_v15, %v13312_v15 }
0x1305   :  { %v13318_v22 = vsub.f32 %v13294_v63, %v3903_v21  ;;  %v3908_v7 = vsel %vm248_vm3, %v3906_v16, 0.0  ;;  %v3931_v16 = vrot.slane %v3895_v3, %v12862_v51 }
0x1306   :  { %3909 = vadd.xlane.f32.xlu1 %v3908_v7 }
0x1307   :  { %v3907_v23 = vmul.f32 %v13318_v22, %v13318_v22 }
0x1309   :  { %v3911_v24 = vsel %vm248_vm3, %v3907_v23, 0.0  ;;  %v12302_v23 = vpack.c.bf16 %v3937_v13, %v3936_v59 }
0x130a   :  { %3912 = vadd.xlane.f32.xlu0 %v3911_v24 }
0x138e   :  { %v3647_v43 = vpop.xlane.xlu0 %3646 }
0x138f   :  { %v3649_v44 = vmul.f32 0.03125, %v3647_v43  ;;  %v3644_v45 = vpop.xlane.xlu1 %3643 }
0x1390   :  { %v3648_v47 = vmul.f32 0.03125, %v3644_v45 }
0x1391   :  { %v3651_v48 = vadd.f32 1e-06, %v3649_v44 }
0x1392   :  { %v3650_v60 = vadd.f32 1e-06, %v3648_v47 }
0x1393   :  { %12545 = vrsqrt.f32 %v3651_v48  ;;  %v3910_v50 = vpop.xlane.xlu1 %3909 }
0x1394   :  { %12547 = vrsqrt.f32 %v3650_v60  ;;  %v3914_v52 = vmul.f32 0.03125, %v3910_v50 }
0x1396   :  { %v3916_v53 = vadd.f32 1e-06, %v3914_v52 }
0x1397   :  { %v3913_v54 = vpop.xlane.xlu0 %3912 }
0x1398   :  { %12549 = vrsqrt.f32 %v3916_v53  ;;  %v3915_v55 = vmul.f32 0.03125, %v3913_v54 }
0x139a   :  { %v3917_v61 = vadd.f32 1e-06, %v3915_v55 }
0x139c   :  { %12551 = vrsqrt.f32 %v3917_v61 }
0x139d   :  { %v12546_v19 = vpop.eup %12545 }
0x139e   :  { %v12548_v20 = vpop.eup %12547  ;;  %v3655_v0 = vmul.f32 %v12546_v19, %v13301_v5 }
0x139f   :  { %v3654_v2 = vmul.f32 %v12548_v20, %v13304_v9  ;;  %v240_v20 = vld [vmem:[%s14212_s3] sm:$0xff] }
0x13a0   :  { %v3661_v1 = vmul.f32 %v3659_v8, %v3655_v0  ;;  %vm241_vm12 = vcmp.gt.f32.partialorder %v240_v20, 0.0 }
0x13a1   :  { %v3660_v12 = vmul.f32 %v3659_v8, %v3654_v2  ;;  %v13428_v0 = vsel %vm241_vm12, 0.0, %v12773_v27 }
0x13a2   :  { %v12550_v18 = vpop.eup %12549  ;;  %v3667_v7 = vadd.f32 %v3665_v4, %v3661_v1 }
0x13a3   :  { %v3666_v17 = vadd.f32 %v3665_v4, %v3660_v12  ;;  %v3920_v21 = vmul.f32 %v12550_v18, %v13312_v15  ;;  %v3766_v15 = vld [vmem:[#allocation2 + $0x1e8] sm:$0xff] }
0x13a4   :  { %v12294_v28 = vpack.c.bf16 %v3767_v11, %v3766_v15 }
0x13a5   :  { %11698 = vmatprep.mubr.msk.f32.mxu1 %vm248_vm3, %v3666_v17  ;;  %v3926_v5 = vmul.f32 %v3925_v14, %v3920_v21  ;;  %v10885_v17 = vld [vmem:[%s14212_s3 + $0x8] sm:$0xff]  ;;  %s12778_s3 = smov [#allocation5]  }
0x13a6   :  { %v12552_v9 = vpop.eup %12551  ;;  %11699 = vmatmul.mubr.msk.f32.vlgmr.msra.gmra.mrb[44].mxu1 %vm248_vm3, %v3667_v7  ;;  %12295 = vmatprep.subr.bf16.mxu0 %v12294_v28  ;;  %vm245_vm13 = vcmp.gt.f32.partialorder %v10885_v17, 0.0  ;;  %s10864_s9 = sshll.u32 %s12778_s3, 4  ;;  %s10865_s9 = int_to_ptr.vmem [resolvable:$true] %s10864_s9 }
0x13a7   :  { %v3921_v24 = vmul.f32 %v12552_v9, %v13318_v22  ;;  %12301 = vmatpush3.bf16.msra.mxu1 %v12298_v33  ;;  %v3932_v10 = vadd.f32 %v3931_v16, %v3926_v5  ;;  %12297 = vmatpush3.bf16.msra.mxu0 %v12294_v28  ;;  %v10952_v22 = vld [vmem:[#allocation2 + $0x1b0] ss:$0 sm:$0xff]  ;;  %s12732_s10 = scalar_lea.vmem %s10865_s9, 256  ;;  %p12737_p9 = scmp.lt.s32.totalorder %s10865_s9, %s10865_s9 }
0x13a8   :  { %12303 = vmatprep.subr.bf16.mxu1 %v12302_v23  ;;  %11741 = vmatprep.subr.mxu0 %v12762_v6  ;;  %p12733_p8 = scmp.ne.s32.totalorder %s10865_s9, %s12732_s10  ;;  %p12738_p10 = scmp.lt.s32.totalorder %s12732_s10, %s12732_s10 }
0x13a9   :  { %v3927_v25 = vmul.f32 %v3925_v14, %v3921_v24  ;;  %11728 = vmatprep.mubr.msk.f32.mxu1 %vm248_vm3, %v3932_v10  ;;  %v13441_v24 = vsel %vm245_vm13, 0.0, %v12773_v27 }
0x13aa   :  { %p12739_p11 = por %p12738_p10, %p12737_p9 }
0x13ab   :  { %v3933_v26 = vadd.f32 %v3931_v16, %v3927_v25  ;;  %12305 = vmatpush3.bf16.msra.mxu1 %v12302_v23 }
0x13ac   :  { %11731 = vmatprep.subr.mxu1 %v12762_v6  ;;  %p12740_p12 = pnand %p12739_p11, %p12733_p8 }
0x13ae   :  { %11729 = vmatmul.mubr.msk.f32.vlgmr.msra.gmra.mrb[46].mxu1 %vm248_vm3, %v3933_v26 }
0x13af   :  { %11733 = vmatprep.mubr.msk.f32.mxu1 %vm12763_vm6, %v12762_v6 }
0x1479   :  { %v11700_v30 = vpop.f32.mrb[44].mxu1 }
0x147a   :  { %v3755_v31 = vadd.f32 %v11700_v30, %v10952_v22  ;;  %v3749_v32 = vpop.f32.mrb[45].mxu1 }
0x147b   :  { %v3750_v33 = vadd.f32 %v10952_v22, %v3749_v32 }
0x147c   :  { %v3759_v35 = vmax.f32 %v3755_v31, 0.0 }
0x147d   :  { %v3758_v34 = vmax.f32 %v3750_v33, 0.0 }
0x147f   :  { %11717 = vmatprep.mubr.msk.f32.mxu0 %vm1976_vm11, %v3758_v34 }
0x1480   :  { %11718 = vmatmul.mubr.msk.f32.vlgmr.msra.gmra.mrb[36].mxu0 %vm1976_vm11, %v3759_v35 }
0x1481   :  { %v11730_v37 = vpop.f32.mrb[46].mxu1  ;;  %11743 = vmatprep.mubr.msk.f32.mxu0 %vm12763_vm6, %v12762_v6 }
0x1482   :  { %v4015_v38 = vpop.f32.mrb[47].mxu1  ;;  %v13358_v40 = vadd.f32 %v11730_v37, %v10958_v36 }
0x1483   :  { %v13344_v39 = vadd.f32 %v10958_v36, %v4015_v38 }
0x1485   :  { %4190 = vrot.lane.b32.xlu0 %v13344_v39, %s12766_s14  ;;  %4025 = vrot.lane.b32.xlu1 %v13344_v39, %s12765_s13 }
0x1489   :  { %4353 = vrot.lane.b32.xlu0 %v13344_v39, %s12769_s17  ;;  %4188 = vrot.lane.b32.xlu1 %v13344_v39, %s12764_s1 }
0x148d   :  { %4518 = vrot.lane.b32.xlu0 %v13344_v39, %s12771_s19  ;;  %4355 = vrot.lane.b32.xlu1 %v13344_v39, %s12767_s15 }
0x1491   :  { %4864 = vrot.lane.b32.xlu0 %v13358_v40, %s12766_s14  ;;  %4520 = vrot.lane.b32.xlu1 %v13344_v39, %s12768_s16 }
0x1495   :  { %5029 = vrot.lane.b32.xlu0 %v13358_v40, %s12767_s15  ;;  %4699 = vrot.lane.b32.xlu1 %v13358_v40, %s12765_s13 }
0x1499   :  { %5194 = vrot.lane.b32.xlu0 %v13358_v40, %s12768_s16  ;;  %4862 = vrot.lane.b32.xlu1 %v13358_v40, %s12764_s1 }
0x149d   :  { %4112 = vrot.lane.b32.xlu0 %v13344_v39, %s12770_s18  ;;  %5027 = vrot.lane.b32.xlu1 %v13358_v40, %s12769_s17 }
0x14a1   :  { %5192 = vrot.lane.b32.xlu1 %v13358_v40, %s12771_s19 }
0x14a5   :  { %4277 = vrot.lane.b32.xlu1 %v13344_v39, %s12772_s20 }
0x14f7   :  { %v4191_v41 = vpop.permute.xlu0 %4190  ;;  %v4026_v42 = vpop.permute.xlu1 %4025 }
0x14f8   :  { %11732 = vmatpush3.xpose.msk.msra.mxu1 %vm387_vm7, %v4026_v42  ;;  %11742 = vmatpush3.xpose.msk.msra.mxu0 %vm387_vm7, %v4191_v41 }
0x14f9   :  { %11751 = vmatprep.subr.mxu0 %v12762_v6  ;;  %11736 = vmatprep.subr.mxu1 %v12762_v6 }
0x14fb   :  { %v4354_v43 = vpop.permute.xlu0 %4353  ;;  %11734 = vmatmul.mubr.msk.f32.vlgmr.msra.gmra.mrb[48].mxu1 %vm387_vm7, %v13344_v39  ;;  %v4189_v44 = vpop.permute.xlu1 %4188 }
0x14fc   :  { %11744 = vmatmul.mubr.msk.f32.vlgmr.msra.gmra.mrb[38].mxu0 %vm387_vm7, %v4189_v44  ;;  %11738 = vmatprep.mubr.msk.f32.mxu1 %vm12763_vm6, %v12762_v6 }
0x14fd   :  { %11753 = vmatprep.mubr.msk.f32.mxu0 %vm12763_vm6, %v12762_v6 }
0x14ff   :  { %v4519_v45 = vpop.permute.xlu0 %4518  ;;  %v4356_v47 = vpop.permute.xlu1 %4355 }
0x1500   :  { %11752 = vmatpush3.xpose.msk.msra.mxu0 %vm387_vm7, %v4356_v47 }
0x1501   :  { %11761 = vmatprep.subr.mxu0 %v12762_v6 }
0x1503   :  { %v4865_v48 = vpop.permute.xlu0 %4864  ;;  %11754 = vmatmul.mubr.msk.f32.vlgmr.msra.gmra.mrb[40].mxu0 %vm387_vm7, %v4354_v43  ;;  %v4521_v60 = vpop.permute.xlu1 %4520 }
0x1504   :  { %11762 = vmatpush3.xpose.msk.msra.mxu0 %vm387_vm7, %v4521_v60  ;;  %11763 = vmatprep.mubr.msk.f32.mxu0 %vm12763_vm6, %v12762_v6 }
0x1505   :  { %11771 = vmatprep.subr.mxu0 %v12762_v6 }
0x1507   :  { %v5030_v50 = vpop.permute.xlu0 %5029  ;;  %11764 = vmatmul.mubr.msk.f32.vlgmr.msra.gmra.mrb[42].mxu0 %vm387_vm7, %v4519_v45  ;;  %v4700_v52 = vpop.permute.xlu1 %4699 }
0x1508   :  { %11772 = vmatpush3.xpose.msk.msra.mxu0 %vm387_vm7, %v4700_v52  ;;  %11773 = vmatprep.mubr.msk.f32.mxu0 %vm12763_vm6, %v12762_v6 }
0x1509   :  { %11781 = vmatprep.subr.mxu0 %v12762_v6 }
0x150b   :  { %v5195_v53 = vpop.permute.xlu0 %5194  ;;  %11774 = vmatmul.mubr.msk.f32.vlgmr.msra.gmra.mrb[44].mxu0 %vm387_vm7, %v13358_v40  ;;  %v4863_v54 = vpop.permute.xlu1 %4862 }
0x150c   :  { %11782 = vmatpush3.xpose.msk.msra.mxu0 %vm387_vm7, %v4865_v48  ;;  %11783 = vmatprep.mubr.msk.f32.mxu0 %vm12763_vm6, %v12762_v6 }
0x150d   :  { %11791 = vmatprep.subr.mxu0 %v12762_v6 }
0x150f   :  { %v4113_v55 = vpop.permute.xlu0 %4112  ;;  %11784 = vmatmul.mubr.msk.f32.vlgmr.msra.gmra.mrb[46].mxu0 %vm387_vm7, %v4863_v54  ;;  %v5028_v58 = vpop.permute.xlu1 %5027 }
0x1510   :  { %11737 = vmatpush3.msra.mxu1 %v4113_v55  ;;  %11792 = vmatpush3.xpose.msk.msra.mxu0 %vm387_vm7, %v5030_v50 }
0x1511   :  { %11793 = vmatprep.mubr.msk.f32.mxu0 %vm12763_vm6, %v12762_v6  ;;  %11801 = vmatprep.subr.mxu0 %v12762_v6 }
0x1512   :  { %11746 = vmatprep.subr.mxu1 %v12762_v6 }
0x1513   :  { %11794 = vmatmul.mubr.msk.f32.vlgmr.msra.gmra.mrb[48].mxu0 %vm387_vm7, %v5028_v58  ;;  %v5193_v61 = vpop.permute.xlu1 %5192 }
0x1514   :  { %11802 = vmatpush3.xpose.msk.msra.mxu0 %vm387_vm7, %v5195_v53  ;;  %11803 = vmatprep.mubr.msk.f32.mxu0 %vm12763_vm6, %v12762_v6 }
0x1517   :  { %11804 = vmatmul.mubr.msk.f32.vlgmr.msra.gmra.mrb[50].mxu0 %vm387_vm7, %v5193_v61  ;;  %v13456_v41 = vpop.permute.xlu1 %4277 }
0x1553   :  { %v13420_v8 = vpop.f32.mrb[36].mxu0 }
0x1554   :  { %v13422_v19 = vpop.f32.mrb[37].mxu0 }
0x15ce   :  { %v4097_v3 = vpop.f32.mrb[48].mxu1 }
0x15cf   :  { %v4098_v2 = vadd.f32 %v4097_v3, %v13428_v0  ;;  %v11735_v4 = vpop.f32.mrb[49].mxu1  ;;  %v4262_v1 = vpop.f32.mrb[38].mxu0 }
0x15d0   :  { %v4263_v12 = vadd.f32 %v4262_v1, %v13428_v0  ;;  %v11745_v59 = vpop.f32.mrb[39].mxu0 }
0x15d1   :  { %v4101_v13 = vsel %vm387_vm7, %v4098_v2, -inf }
0x15d2   :  { %4102 = vmax.xlane.f32.xlu0 %v4101_v13  ;;  %v4266_v14 = vsel %vm387_vm7, %v4263_v12, -inf }
0x15d3   :  { %4267 = vmax.xlane.f32.xlu1 %v4266_v14 }
0x15d6   :  { %v4427_v18 = vpop.f32.mrb[40].mxu0 }
0x15d7   :  { %v4428_v21 = vadd.f32 %v4427_v18, %v13428_v0  ;;  %v11755_v16 = vpop.f32.mrb[41].mxu0 }
0x15d9   :  { %v4431_v7 = vsel %vm387_vm7, %v4428_v21, -inf }
0x15da   :  { %4432 = vmax.xlane.f32.xlu0 %v4431_v7  ;;  %v4592_v23 = vpop.f32.mrb[42].mxu0 }
0x15db   :  { %v4593_v5 = vadd.f32 %v4592_v23, %v13428_v0  ;;  %v11765_v9 = vpop.f32.mrb[43].mxu0 }
0x15dd   :  { %v4596_v10 = vsel %vm387_vm7, %v4593_v5, -inf }
0x15de   :  { %4597 = vmax.xlane.f32.xlu0 %v4596_v10  ;;  %v4771_v25 = vpop.f32.mrb[44].mxu0 }
0x15df   :  { %v4772_v26 = vadd.f32 %v4771_v25, %v13441_v24  ;;  %v11775_v15 = vpop.f32.mrb[45].mxu0 }
0x15e1   :  { %v4775_v11 = vsel %vm387_vm7, %v4772_v26, -inf }
0x15e2   :  { %4776 = vmax.xlane.f32.xlu1 %v4775_v11  ;;  %v4936_v28 = vpop.f32.mrb[46].mxu0 }
0x15e3   :  { %v4937_v22 = vadd.f32 %v4936_v28, %v13441_v24  ;;  %v11785_v30 = vpop.f32.mrb[47].mxu0 }
0x15e5   :  { %v4940_v31 = vsel %vm387_vm7, %v4937_v22, -inf }
0x15e6   :  { %4941 = vmax.xlane.f32.xlu0 %v4940_v31  ;;  %v5101_v32 = vpop.f32.mrb[48].mxu0 }
0x15e7   :  { %v5102_v27 = vadd.f32 %v5101_v32, %v13441_v24  ;;  %v11795_v33 = vpop.f32.mrb[49].mxu0 }
0x15e9   :  { %v5105_v34 = vsel %vm387_vm7, %v5102_v27, -inf }
0x15ea   :  { %5106 = vmax.xlane.f32.xlu1 %v5105_v34  ;;  %v5266_v35 = vpop.f32.mrb[50].mxu0 }
0x15eb   :  { %v5267_v36 = vadd.f32 %v5266_v35, %v13441_v24  ;;  %v11805_v37 = vpop.f32.mrb[51].mxu0 }
0x15ed   :  { %v5270_v38 = vsel %vm387_vm7, %v5267_v36, -inf }
0x15ee   :  { %5271 = vmax.xlane.f32.xlu0 %v5270_v38 }
0x15fb   :  { %4607 = vrot.lane.b32.xlu1 %v13344_v39, %s12774_s2 }
0x1604   :  { %4442 = vrot.lane.b32.xlu0 %v13344_v39, %s12775_s25 }
0x165f   :  { %v4103_v42 = vpop.xlane.xlu0 %4102 }
0x1660   :  { %v4104_v43 = vsub.f32 %v4098_v2, %v4103_v42  ;;  %v4268_v44 = vpop.xlane.xlu1 %4267 }
0x1661   :  { %v4269_v45 = vsub.f32 %v4263_v12, %v4268_v44 }
0x1662   :  { %v4105_v47 = vmul.f32 1.442695, %v4104_v43 }
0x1663   :  { %v4270_v48 = vmul.f32 1.442695, %v4269_v45 }
0x1664   :  { %12553 = vpow2.f32 %v4105_v47 }
0x1665   :  { %12555 = vpow2.f32 %v4270_v48 }
0x1667   :  { %v4433_v60 = vpop.xlane.xlu0 %4432 }
0x1668   :  { %v4434_v50 = vsub.f32 %v4428_v21, %v4433_v60 }
0x166a   :  { %v4435_v52 = vmul.f32 1.442695, %v4434_v50 }
0x166b   :  { %v4598_v53 = vpop.xlane.xlu0 %4597 }
0x166c   :  { %12557 = vpow2.f32 %v4435_v52  ;;  %v4599_v54 = vsub.f32 %v4593_v5, %v4598_v53 }
0x166e   :  { %v12554_v55 = vpop.eup %12553  ;;  %v4600_v58 = vmul.f32 1.442695, %v4599_v54 }
0x166f   :  { %v12556_v61 = vpop.eup %12555  ;;  %v4107_v39 = vsel %vm387_vm7, %v12554_v55, 0.0  ;;  %v4777_v12 = vpop.xlane.xlu1 %4776 }
0x1670   :  { %12559 = vpow2.f32 %v4600_v58  ;;  %4108 = vadd.xlane.f32.xlu1 %v4107_v39  ;;  %v4272_v20 = vsel %vm387_vm7, %v12556_v61, 0.0  ;;  %v4778_v59 = vsub.f32 %v4772_v26, %v4777_v12 }
0x1671   :  { %4273 = vadd.xlane.f32.xlu0 %v4272_v20 }
0x1672   :  { %v4779_v17 = vmul.f32 1.442695, %v4778_v59 }
0x1673   :  { %v4942_v13 = vpop.xlane.xlu0 %4941 }
0x1674   :  { %v4943_v18 = vsub.f32 %v4937_v22, %v4942_v13  ;;  %12561 = vpow2.f32 %v4779_v17 }
0x1676   :  { %v12558_v3 = vpop.eup %12557  ;;  %v4944_v7 = vmul.f32 1.442695, %v4943_v18 }
0x1677   :  { %v4437_v2 = vsel %vm387_vm7, %v12558_v3, 0.0  ;;  %v5107_v14 = vpop.xlane.xlu1 %5106 }
0x1678   :  { %4438 = vadd.xlane.f32.xlu1 %v4437_v2  ;;  %v5108_v21 = vsub.f32 %v5102_v27, %v5107_v14  ;;  %12563 = vpow2.f32 %v4944_v7  ;;  %v5373_v7 = vld [vmem:[#allocation2 + $0x238] sm:$0xff] }
0x167a   :  { %v13461_v4 = vpop.eup %12559  ;;  %v5109_v23 = vmul.f32 1.442695, %v5108_v21 }
0x167b   :  { %v4602_v1 = vsel %vm387_vm7, %v13461_v4, 0.0  ;;  %v5272_v16 = vpop.xlane.xlu0 %5271  ;;  %v4608_v31 = vpop.permute.xlu1 %4607 }
0x167c   :  { %4603 = vadd.xlane.f32.xlu0 %v4602_v1  ;;  %v5273_v5 = vsub.f32 %v5267_v36, %v5272_v16  ;;  %12565 = vpow2.f32 %v5109_v23  ;;  %v5372_v16 = vld [vmem:[#allocation2 + $0x230] sm:$0xff] }
0x167d   :  { %v12306_v23 = vpack.c.bf16 %v5373_v7, %v5372_v16 }
0x167e   :  { %v5274_v9 = vmul.f32 1.442695, %v5273_v5  ;;  %v12562_v10 = vpop.eup %12561  ;;  %v5374_v5 = vld [vmem:[#allocation2 + $0x240] sm:$0xff] }
0x167f   :  { %v4781_v15 = vsel %vm387_vm7, %v12562_v10, 0.0  ;;  %v4443_v32 = vpop.permute.xlu0 %4442  ;;  %12307 = vmatprep.subr.bf16.mxu0 %v12306_v23 }
0x1680   :  { %12567 = vpow2.f32 %v5274_v9  ;;  %12309 = vmatpush3.bf16.msra.mxu0 %v12306_v23  ;;  %v5375_v9 = vld [vmem:[#allocation2 + $0x248] sm:$0xff] }
0x1682   :  { %v13469_v25 = vpop.eup %12563 }
0x1683   :  { %v4946_v11 = vsel %vm387_vm7, %v13469_v25, 0.0 }
0x1686   :  { %v13472_v26 = vpop.eup %12565 }
0x1687   :  { %v5111_v28 = vsel %vm387_vm7, %v13472_v26, 0.0 }
0x1689   :  { %4951 = vrot.lane.b32.xlu1 %v13358_v40, %s12772_s20 }
0x168a   :  { %v13478_v22 = vpop.eup %12567 }
0x168b   :  { %v5276_v30 = vsel %vm387_vm7, %v13478_v22, 0.0 }
0x1692   :  { %4786 = vrot.lane.b32.xlu0 %v13358_v40, %s12770_s18 }
0x16ad   :  { %4782 = vadd.xlane.f32.xlu1 %v4781_v15 }
0x16b1   :  { %4947 = vadd.xlane.f32.xlu0 %v4946_v11  ;;  %5112 = vadd.xlane.f32.xlu1 %v5111_v28 }
0x16b5   :  { %5277 = vadd.xlane.f32.xlu1 %v5276_v30 }
0x16c6   :  { %5281 = vrot.lane.b32.xlu1 %v13358_v40, %s12774_s2 }
0x16c7   :  { %5116 = vrot.lane.b32.xlu0 %v13358_v40, %s12775_s25 }
0x16fd   :  { %v4109_v27 = vpop.xlane.xlu1 %4108 }
0x16fe   :  { %12569 = vrcp.f32 %v4109_v27  ;;  %v4274_v33 = vpop.xlane.xlu0 %4273 }
0x16ff   :  { %12571 = vrcp.f32 %v4274_v33 }
0x1705   :  { %v4439_v34 = vpop.xlane.xlu1 %4438 }
0x1706   :  { %12573 = vrcp.f32 %v4439_v34 }
0x1708   :  { %v12570_v35 = vpop.eup %12569 }
0x1709   :  { %v4604_v36 = vpop.xlane.xlu0 %4603  ;;  %v4111_v37 = vmul.f32 %v12570_v35, %v12554_v55  ;;  %v12572_v38 = vpop.eup %12571 }
0x170a   :  { %12575 = vrcp.f32 %v4604_v36  ;;  %v4276_v40 = vmul.f32 %v12572_v38, %v12556_v61  ;;  %v4952_v47 = vpop.permute.xlu1 %4951 }
0x170b   :  { %11739 = vmatmul.mubr.msk.f32.vlgmr.msra.gmra.mrb[50].mxu1 %vm387_vm7, %v4111_v37 }
0x170c   :  { %11747 = vmatpush3.msra.mxu1 %v13456_v41  ;;  %11748 = vmatprep.mubr.msk.f32.mxu1 %vm12763_vm6, %v12762_v6 }
0x170d   :  { %11756 = vmatprep.subr.mxu1 %v12762_v6  ;;  %v4787_v45 = vpop.permute.xlu0 %4786 }
0x170f   :  { %11749 = vmatmul.mubr.msk.f32.vlgmr.msra.gmra.mrb[52].mxu1 %vm387_vm7, %v4276_v40 }
0x1710   :  { %v12574_v42 = vpop.eup %12573  ;;  %11757 = vmatpush3.msra.mxu1 %v4443_v32  ;;  %11758 = vmatprep.mubr.msk.f32.mxu1 %vm12763_vm6, %v12762_v6  ;;  %v10955_v32 = vld [vmem:[#allocation2 + $0x1f8] ss:$0 sm:$0xff] }
0x1711   :  { %11766 = vmatprep.subr.mxu1 %v12762_v6  ;;  %v4441_v43 = vmul.f32 %v12574_v42, %v12558_v3  ;;  %v3846_v27 = vadd.f32 %v10955_v32, %v13422_v19  ;;  %v3851_v35 = vadd.f32 %v13420_v8, %v10955_v32 }
0x1713   :  { %11759 = vmatmul.mubr.msk.f32.vlgmr.msra.gmra.mrb[54].mxu1 %vm387_vm7, %v4441_v43  ;;  %v3854_v33 = vadd.f32 %v3846_v27, %v13284_v57  ;;  %v3855_v36 = vadd.f32 %v3851_v35, %v13281_v56  ;;  %v5503_v27 = vld [vmem:[#allocation2 + $0x258] sm:$0xff]  ;;  %v5505_v35 = vld [vmem:[#allocation2 + $0x268] sm:$0xff] }
0x1714   :  { %v12576_v44 = vpop.eup %12575  ;;  %11767 = vmatpush3.msra.mxu1 %v4608_v31  ;;  %11768 = vmatprep.mubr.msk.f32.mxu1 %vm12763_vm6, %v12762_v6 }
0x1715   :  { %11776 = vmatprep.subr.mxu1 %v12762_v6  ;;  %v4606_v41 = vmul.f32 %v12576_v44, %v13461_v4  ;;  %v3857_v34 = vsel %vm248_vm3, %v3854_v33, 0.0  ;;  %v3860_v37 = vsel %vm248_vm3, %v3855_v36, 0.0 }
0x1717   :  { %11769 = vmatmul.mubr.msk.f32.vlgmr.msra.gmra.mrb[56].mxu1 %vm387_vm7, %v4606_v41 }
0x1718   :  { %11777 = vmatpush3.msra.mxu1 %v4787_v45  ;;  %11778 = vmatprep.mubr.msk.f32.mxu1 %vm12763_vm6, %v12762_v6 }
0x1719   :  { %11786 = vmatprep.subr.mxu1 %v12762_v6 }
0x173a   :  { %v4783_v48 = vpop.xlane.xlu1 %4782 }
0x173b   :  { %12577 = vrcp.f32 %v4783_v48 }
0x173e   :  { %v4948_v60 = vpop.xlane.xlu0 %4947  ;;  %v5113_v50 = vpop.xlane.xlu1 %5112 }
0x173f   :  { %12579 = vrcp.f32 %v4948_v60 }
0x1740   :  { %12581 = vrcp.f32 %v5113_v50 }
0x1742   :  { %v5278_v52 = vpop.xlane.xlu1 %5277  ;;  %v5117_v39 = vpop.permute.xlu0 %5116 }
0x1743   :  { %12583 = vrcp.f32 %v5278_v52 }
0x1745   :  { %v12578_v53 = vpop.eup %12577 }
0x1746   :  { %v4785_v54 = vmul.f32 %v12578_v53, %v12562_v10  ;;  %v5282_v2 = vpop.permute.xlu1 %5281  ;;  %v12310_v10 = vpack.c.bf16 %v5375_v9, %v5374_v5 }
0x1748   :  { %11779 = vmatmul.mubr.msk.f32.vlgmr.msra.gmra.mrb[58].mxu1 %vm387_vm7, %v4785_v54  ;;  %12311 = vmatprep.subr.bf16.mxu0 %v12310_v10 }
0x1749   :  { %v12580_v55 = vpop.eup %12579  ;;  %11787 = vmatpush3.msra.mxu1 %v4952_v47  ;;  %11788 = vmatprep.mubr.msk.f32.mxu1 %vm12763_vm6, %v12762_v6 }
0x174a   :  { %11796 = vmatprep.subr.mxu1 %v12762_v6  ;;  %v4950_v58 = vmul.f32 %v12580_v55, %v13469_v25  ;;  %v12582_v61 = vpop.eup %12581  ;;  %12313 = vmatpush3.bf16.msra.mxu0 %v12310_v10 }
0x174b   :  { %v5115_v20 = vmul.f32 %v12582_v61, %v13472_v26 }
0x174c   :  { %11789 = vmatmul.mubr.msk.f32.vlgmr.msra.gmra.mrb[60].mxu1 %vm387_vm7, %v4950_v58 }
0x174d   :  { %11797 = vmatpush3.msra.mxu1 %v5117_v39  ;;  %11798 = vmatprep.mubr.msk.f32.mxu1 %vm12763_vm6, %v12762_v6  ;;  %v12584_v3 = vpop.eup %12583  ;;  %v10985_v39 = vld [vmem:[#allocation2 + $0x250] ss:$0 sm:$0xff] }
0x174e   :  { %11806 = vmatprep.subr.mxu1 %v12762_v6  ;;  %v5280_v4 = vmul.f32 %v12584_v3, %v13478_v22 }
0x1750   :  { %11799 = vmatmul.mubr.msk.f32.vlgmr.msra.gmra.mrb[62].mxu1 %vm387_vm7, %v5115_v20 }
0x1751   :  { %11807 = vmatpush3.msra.mxu1 %v5282_v2  ;;  %11808 = vmatprep.mubr.msk.f32.mxu1 %vm12763_vm6, %v12762_v6 }
0x1754   :  { %11809 = vmatmul.mubr.msk.f32.vlgmr.msra.gmra.mrb[64].mxu1 %vm387_vm7, %v5280_v4  ;;  %v3856_v4 = vld [vmem:[#allocation2 + $0x200] sm:$0x3] }
0x1755   :  { %v13552_v7 = vrot.slane %v3856_v4, %v12862_v51 }
0x17de   :  { %v4184_v1 = vpop.f32.mrb[50].mxu1 }
0x17df   :  { %v11740_v12 = vpop.f32.mrb[51].mxu1 }
0x17e2   :  { %v4349_v59 = vpop.f32.mrb[52].mxu1 }
0x17e3   :  { %4684 = vrot.lane.b32.xlu0 %v4349_v59, %s12760_s29  ;;  %v11750_v13 = vpop.f32.mrb[53].mxu1 }
0x17e4   :  { %v13544_v13 = vrot.slane %v3856_v4, %v12858_v46 }
0x17e6   :  { %v4514_v14 = vpop.f32.mrb[54].mxu1 }
0x17e7   :  { %4688 = vrot.lane.b32.xlu1 %v4514_v14, %s12776_s26  ;;  %v11760_v18 = vpop.f32.mrb[55].mxu1 }
0x17ea   :  { %v4679_v17 = vpop.f32.mrb[56].mxu1 }
0x17eb   :  { %4692 = vrot.lane.b32.xlu1 %v4679_v17, %s12777_s27  ;;  %v11770_v21 = vpop.f32.mrb[57].mxu1 }
0x181b   :  { %v4858_v25 = vpop.f32.mrb[58].mxu1 }
0x181c   :  { %v11780_v15 = vpop.f32.mrb[59].mxu1 }
0x181f   :  { %v5023_v26 = vpop.f32.mrb[60].mxu1 }
0x1820   :  { %5358 = vrot.lane.b32.xlu0 %v5023_v26, %s12760_s29  ;;  %v11790_v11 = vpop.f32.mrb[61].mxu1 }
0x1823   :  { %v5188_v28 = vpop.f32.mrb[62].mxu1 }
0x1824   :  { %5362 = vrot.lane.b32.xlu0 %v5188_v28, %s12776_s26  ;;  %v11800_v22 = vpop.f32.mrb[63].mxu1 }
0x1827   :  { %v5353_v30 = vpop.f32.mrb[64].mxu1 }
0x1828   :  { %5366 = vrot.lane.b32.xlu1 %v5353_v30, %s12777_s27  ;;  %v11810_v31 = vpop.f32.mrb[65].mxu1 }
0x1843   :  { %3858 = vadd.xlane.f32.xlu0 %v3857_v34 }
0x184c   :  { %3861 = vadd.xlane.f32.xlu1 %v3860_v37 }
0x1855   :  { %v4685_v38 = vpop.permute.xlu0 %4684 }
0x1856   :  { %v4695_v42 = vsel %vm387_vm7, %v4184_v1, %v4685_v38 }
0x1859   :  { %v4689_v40 = vpop.permute.xlu1 %4688 }
0x185a   :  { %v4696_v43 = vsel %vm54_vm0, %v4695_v42, %v4689_v40  ;;  %v13570_v42 = vld [vmem:[#allocation2 + $0x278] ss:$0 sm:$0xff] }
0x185d   :  { %v4693_v44 = vpop.permute.xlu1 %4692 }
0x185e   :  { %v4697_v19 = vsel %vm1058_vm10, %v4696_v43, %v4693_v44 }
0x185f   :  { %11819 = vmatprep.mubr.msk.f32.mxu0 %vm248_vm3, %v4697_v19 }
0x1892   :  { %v5359_v57 = vpop.permute.xlu0 %5358 }
0x1893   :  { %v5369_v8 = vsel %vm387_vm7, %v4858_v25, %v5359_v57 }
0x1896   :  { %v5363_v41 = vpop.permute.xlu0 %5362 }
0x1897   :  { %v5370_v56 = vsel %vm54_vm0, %v5369_v8, %v5363_v41 }
0x189a   :  { %v5367_v45 = vpop.permute.xlu1 %5366 }
0x189b   :  { %v5371_v47 = vsel %vm1058_vm10, %v5370_v56, %v5367_v45 }
0x189c   :  { %11820 = vmatmul.mubr.msk.f32.vlgmr.msra.gmra.mrb[52].mxu0 %vm248_vm3, %v5371_v47 }
0x18d0   :  { %v3859_v48 = vpop.xlane.xlu0 %3858 }
0x18d1   :  { %v3863_v60 = vmul.f32 0.03125, %v3859_v48 }
0x18d3   :  { %v3865_v50 = vsub.f32 %v3854_v33, %v3863_v60  ;;  %v5504_v33 = vld [vmem:[#allocation2 + $0x260] sm:$0xff] }
0x18d4   :  { %v12449_v34 = vpack.i.bf16 %v5504_v33, %v5503_v27  ;;  %v12314_v38 = vpack.c.bf16 %v5504_v33, %v5503_v27 }
0x18d5   :  { %v3867_v52 = vmul.f32 %v3865_v50, %v3865_v50 }
0x18d6   :  { %12315 = vmatprep.subr.bf16.mxu1 %v12314_v38 }
0x18d7   :  { %v3869_v53 = vsel %vm248_vm3, %v3867_v52, 0.0  ;;  %12317 = vmatpush3.bf16.msra.mxu1 %v12314_v38 }
0x18d8   :  { %3870 = vadd.xlane.f32.xlu1 %v3869_v53 }
0x18d9   :  { %v3862_v54 = vpop.xlane.xlu1 %3861 }
0x18da   :  { %v3864_v3 = vmul.f32 0.03125, %v3862_v54 }
0x18dc   :  { %v3866_v18 = vsub.f32 %v3855_v36, %v3864_v3  ;;  %v5506_v36 = vld [vmem:[#allocation2 + $0x270] sm:$0xff] }
0x18dd   :  { %v12454_v37 = vpack.i.bf16 %v5506_v36, %v5505_v35  ;;  %v12318_v40 = vpack.c.bf16 %v5506_v36, %v5505_v35  ;;  %v5464_v3 = vld [vmem:[#allocation2 + $0x2b0] sm:$0x3] }
0x18de   :  { %v3868_v9 = vmul.f32 %v3866_v18, %v3866_v18 }
0x18df   :  { %12319 = vmatprep.subr.bf16.mxu1 %v12318_v40 }
0x18e0   :  { %12321 = vmatpush3.bf16.msra.mxu1 %v12318_v40 }
0x18e1   :  { %11844 = vmatprep.subr.mxu1 %v12762_v6 }
0x1965   :  { %v3871_v55 = vpop.xlane.xlu1 %3870 }
0x1966   :  { %v3875_v58 = vmul.f32 0.03125, %v3871_v55 }
0x1968   :  { %v3877_v61 = vadd.f32 1e-06, %v3875_v58 }
0x196a   :  { %12585 = vrsqrt.f32 %v3877_v61 }
0x196f   :  { %v11821_v20 = vpop.f32.mrb[52].mxu0 }
0x1970   :  { %v5453_v2 = vpop.f32.mrb[53].mxu0  ;;  %v5459_v1 = vadd.f32 %v11821_v20, %v10985_v39 }
0x1971   :  { %v5454_v12 = vadd.f32 %v10985_v39, %v5453_v2  ;;  %v5494_v2 = vrot.slane %v5464_v3, %v12858_v46 }
0x1972   :  { %v13547_v17 = vadd.f32 %v5459_v1, %v13294_v63  ;;  %v3872_v63 = vsel %vm248_vm3, %v3868_v9, 0.0 }
0x1973   :  { %v13541_v59 = vadd.f32 %v5454_v12, %v13289_v62 }
0x1974   :  { %v12586_v14 = vpop.eup %12585  ;;  %v5468_v62 = vsel %vm248_vm3, %v13547_v17, 0.0 }
0x1975   :  { %v5465_v21 = vsel %vm248_vm3, %v13541_v59, 0.0  ;;  %v3881_v16 = vmul.f32 %v12586_v14, %v3865_v50  ;;  %v5500_v14 = vrot.slane %v5464_v3, %v12862_v51 }
0x1976   :  { %5466 = vadd.xlane.f32.xlu0 %v5465_v21 }
0x1977   :  { %v3887_v23 = vmul.f32 %v13544_v13, %v3881_v16 }
0x1979   :  { %v13558_v5 = vadd.f32 %v13552_v7, %v3887_v23 }
0x197a   :  { %5469 = vadd.xlane.f32.xlu0 %v5468_v62 }
0x197b   :  { %11841 = vmatprep.mubr.msk.f32.mxu0 %vm248_vm3, %v13558_v5 }
0x197e   :  { %3873 = vadd.xlane.f32.xlu0 %v3872_v63 }
0x1a03   :  { %v5467_v10 = vpop.xlane.xlu0 %5466 }
0x1a04   :  { %v5471_v25 = vmul.f32 0.03125, %v5467_v10 }
0x1a06   :  { %v5473_v15 = vsub.f32 %v13541_v59, %v5471_v25 }
0x1a07   :  { %v5470_v26 = vpop.xlane.xlu0 %5469 }
0x1a08   :  { %v5472_v11 = vmul.f32 0.03125, %v5470_v26  ;;  %v5475_v28 = vmul.f32 %v5473_v15, %v5473_v15 }
0x1a0a   :  { %v5474_v22 = vsub.f32 %v13547_v17, %v5472_v11  ;;  %v5477_v30 = vsel %vm248_vm3, %v5475_v28, 0.0 }
0x1a0b   :  { %5478 = vadd.xlane.f32.xlu1 %v5477_v30  ;;  %v3874_v43 = vpop.xlane.xlu0 %3873 }
0x1a0c   :  { %v5476_v31 = vmul.f32 %v5474_v22, %v5474_v22  ;;  %v3876_v44 = vmul.f32 0.03125, %v3874_v43 }
0x1a0e   :  { %v5480_v32 = vsel %vm248_vm3, %v5476_v31, 0.0  ;;  %v3878_v19 = vadd.f32 1e-06, %v3876_v44 }
0x1a0f   :  { %5481 = vadd.xlane.f32.xlu0 %v5480_v32 }
0x1a10   :  { %12587 = vrsqrt.f32 %v3878_v19 }
0x1a1a   :  { %v12588_v56 = vpop.eup %12587 }
0x1a1b   :  { %v3882_v52 = vmul.f32 %v12588_v56, %v3866_v18 }
0x1a1c   :  { %12450 = vrot.lane.b32.xlu1 %v12449_v34, %s12765_s13 }
0x1a1d   :  { %v3888_v20 = vmul.f32 %v13544_v13, %v3882_v52 }
0x1a1f   :  { %v13577_v1 = vadd.f32 %v13552_v7, %v3888_v20 }
0x1a20   :  { %5610 = vrot.lane.b32.xlu1 %v13570_v42, %s12765_s13 }
0x1a25   :  { %12455 = vrot.lane.b32.xlu0 %v12454_v37, %s12765_s13 }
0x1a98   :  { %v5479_v57 = vpop.xlane.xlu1 %5478 }
0x1a99   :  { %v5483_v41 = vmul.f32 0.03125, %v5479_v57 }
0x1a9b   :  { %v5485_v8 = vadd.f32 1e-06, %v5483_v41 }
0x1a9c   :  { %v5482_v45 = vpop.xlane.xlu0 %5481  ;;  %v12451_v47 = vpop.permute.xlu1 %12450 }
0x1a9d   :  { %12589 = vrsqrt.f32 %v5485_v8  ;;  %v5484_v48 = vmul.f32 0.03125, %v5482_v45  ;;  %v12453_v60 = vunpack.i.h.bf16 %v12451_v47  ;;  %v12452_v50 = vunpack.i.l.bf16 %v12451_v47 }
0x1a9f   :  { %v5486_v53 = vadd.f32 1e-06, %v5484_v48  ;;  %v12322_v54 = vpack.c.bf16 %v12453_v60, %v12452_v50 }
0x1aa0   :  { %v12456_v55 = vpop.permute.xlu0 %12455  ;;  %v5611_v62 = vpop.permute.xlu1 %5610 }
0x1aa1   :  { %12591 = vrsqrt.f32 %v5486_v53  ;;  %v12458_v58 = vunpack.i.h.bf16 %v12456_v55  ;;  %v12457_v61 = vunpack.i.l.bf16 %v12456_v55  ;;  %12323 = vmatprep.subr.bf16.mxu0 %v12322_v54 }
0x1aa2   :  { %12325 = vmatpush3.bf16.msra.mxu0 %v12322_v54 }
0x1aa3   :  { %v12326_v39 = vpack.c.bf16 %v12458_v58, %v12457_v61 }
0x1aa5   :  { %12327 = vmatprep.subr.bf16.mxu0 %v12326_v39 }
0x1aa6   :  { %12329 = vmatpush3.bf16.msra.mxu0 %v12326_v39 }
0x1aa7   :  { %v12590_v4 = vpop.eup %12589  ;;  %11854 = vmatprep.subr.mxu0 %v12762_v6 }
0x1aa8   :  { %v5489_v12 = vmul.f32 %v12590_v4, %v5473_v15 }
0x1aa9   :  { %11842 = vmatmul.mubr.msk.f32.vlgmr.msra.gmra.mrb[54].mxu0 %vm248_vm3, %v13577_v1 }
0x1aaa   :  { %v5495_v18 = vmul.f32 %v5494_v2, %v5489_v12  ;;  %11856 = vmatprep.mubr.msk.f32.mxu0 %vm12763_vm6, %v12762_v6 }
0x1aab   :  { %v12592_v13 = vpop.eup %12591 }
0x1aac   :  { %v5490_v21 = vmul.f32 %v12592_v13, %v5474_v22  ;;  %v5501_v16 = vadd.f32 %v5500_v14, %v5495_v18 }
0x1aae   :  { %v5496_v23 = vmul.f32 %v5494_v2, %v5490_v21  ;;  %11830 = vmatprep.mubr.msk.f32.mxu1 %vm248_vm3, %v5501_v16 }
0x1ab0   :  { %v5502_v7 = vadd.f32 %v5500_v14, %v5496_v23 }
0x1ab2   :  { %11831 = vmatmul.mubr.msk.f32.vlgmr.msra.gmra.mrb[66].mxu1 %vm248_vm3, %v5502_v7 }
0x1ab3   :  { %11846 = vmatprep.mubr.msk.f32.mxu1 %vm12763_vm6, %v12762_v6 }
0x1b7c   :  { %v11843_v9 = vpop.f32.mrb[54].mxu0 }
0x1b7d   :  { %v5685_v63 = vpop.f32.mrb[55].mxu0  ;;  %v13603_v11 = vadd.f32 %v11843_v9, %v5611_v62 }
0x1b7e   :  { %v13589_v10 = vadd.f32 %v5685_v63, %v5611_v62 }
0x1b80   :  { %5859 = vrot.lane.b32.xlu1 %v13589_v10, %s12764_s1  ;;  %11845 = vmatpush3.xpose.msk.msra.mxu1 %vm387_vm7, %v13589_v10 }
0x1b81   :  { %11849 = vmatprep.subr.mxu1 %v12762_v6 }
0x1b84   :  { %6024 = vrot.lane.b32.xlu1 %v13589_v10, %s12769_s17 }
0x1b85   :  { %v11832_v25 = vpop.f32.mrb[66].mxu1 }
0x1b86   :  { %v5584_v15 = vpop.f32.mrb[67].mxu1  ;;  %v5590_v28 = vadd.f32 %v11832_v25, %v13570_v42 }
0x1b87   :  { %v5585_v26 = vadd.f32 %v13570_v42, %v5584_v15 }
0x1b88   :  { %6189 = vrot.lane.b32.xlu1 %v13589_v10, %s12771_s19 }
0x1b89   :  { %5857 = vrot.lane.b32.xlu0 %v5585_v26, %s12764_s1  ;;  %11847 = vmatmul.mubr.msk.f32.vlgmr.msra.gmra.mrb[68].mxu1 %vm387_vm7, %v5585_v26 }
0x1b8a   :  { %11851 = vmatprep.mubr.msk.f32.mxu1 %vm12763_vm6, %v12762_v6 }
0x1b8c   :  { %6532 = vrot.lane.b32.xlu1 %v13603_v11, %s12764_s1 }
0x1b8d   :  { %6022 = vrot.lane.b32.xlu0 %v5585_v26, %s12769_s17 }
0x1b90   :  { %6697 = vrot.lane.b32.xlu1 %v13603_v11, %s12769_s17 }
0x1b91   :  { %6187 = vrot.lane.b32.xlu0 %v5585_v26, %s12771_s19 }
0x1b94   :  { %6862 = vrot.lane.b32.xlu1 %v13603_v11, %s12771_s19 }
0x1b95   :  { %6530 = vrot.lane.b32.xlu0 %v5590_v28, %s12764_s1 }
0x1b98   :  { %5781 = vrot.lane.b32.xlu1 %v13589_v10, %s12765_s13 }
0x1b99   :  { %6695 = vrot.lane.b32.xlu0 %v5590_v28, %s12769_s17 }
0x1b9d   :  { %6860 = vrot.lane.b32.xlu0 %v5590_v28, %s12771_s19 }
0x1bf2   :  { %v5860_v22 = vpop.permute.xlu1 %5859 }
0x1bf3   :  { %11855 = vmatpush3.xpose.msk.msra.mxu0 %vm387_vm7, %v5860_v22 }
0x1bf4   :  { %11864 = vmatprep.subr.mxu0 %v12762_v6 }
0x1bf6   :  { %v6025_v30 = vpop.permute.xlu1 %6024 }
0x1bfa   :  { %v6190_v31 = vpop.permute.xlu1 %6189 }
0x1bfb   :  { %v5858_v32 = vpop.permute.xlu0 %5857 }
0x1bfc   :  { %11857 = vmatmul.mubr.msk.f32.vlgmr.msra.gmra.mrb[56].mxu0 %vm387_vm7, %v5858_v32 }
0x1bfd   :  { %11865 = vmatpush3.xpose.msk.msra.mxu0 %vm387_vm7, %v6025_v30  ;;  %11866 = vmatprep.mubr.msk.f32.mxu0 %vm12763_vm6, %v12762_v6 }
0x1bfe   :  { %v6533_v27 = vpop.permute.xlu1 %6532  ;;  %11874 = vmatprep.subr.mxu0 %v12762_v6 }
0x1bff   :  { %v6023_v33 = vpop.permute.xlu0 %6022 }
0x1c00   :  { %11867 = vmatmul.mubr.msk.f32.vlgmr.msra.gmra.mrb[58].mxu0 %vm387_vm7, %v6023_v33 }
0x1c01   :  { %11875 = vmatpush3.xpose.msk.msra.mxu0 %vm387_vm7, %v6190_v31  ;;  %11876 = vmatprep.mubr.msk.f32.mxu0 %vm12763_vm6, %v12762_v6 }
0x1c02   :  { %v6698_v34 = vpop.permute.xlu1 %6697  ;;  %11884 = vmatprep.subr.mxu0 %v12762_v6 }
0x1c03   :  { %v6188_v35 = vpop.permute.xlu0 %6187 }
0x1c04   :  { %11877 = vmatmul.mubr.msk.f32.vlgmr.msra.gmra.mrb[60].mxu0 %vm387_vm7, %v6188_v35 }
0x1c05   :  { %11885 = vmatpush3.xpose.msk.msra.mxu0 %vm387_vm7, %v13603_v11  ;;  %11886 = vmatprep.mubr.msk.f32.mxu0 %vm12763_vm6, %v12762_v6 }
0x1c06   :  { %v6863_v36 = vpop.permute.xlu1 %6862  ;;  %11894 = vmatprep.subr.mxu0 %v12762_v6 }
0x1c07   :  { %v6531_v37 = vpop.permute.xlu0 %6530 }
0x1c08   :  { %11887 = vmatmul.mubr.msk.f32.vlgmr.msra.gmra.mrb[62].mxu0 %vm387_vm7, %v5590_v28 }
0x1c09   :  { %11895 = vmatpush3.xpose.msk.msra.mxu0 %vm387_vm7, %v6533_v27  ;;  %11896 = vmatprep.mubr.msk.f32.mxu0 %vm12763_vm6, %v12762_v6 }
0x1c0a   :  { %v5782_v38 = vpop.permute.xlu1 %5781  ;;  %11904 = vmatprep.subr.mxu0 %v12762_v6 }
0x1c0b   :  { %11850 = vmatpush3.msra.mxu1 %v5782_v38  ;;  %v6696_v40 = vpop.permute.xlu0 %6695 }
0x1c0c   :  { %11897 = vmatmul.mubr.msk.f32.vlgmr.msra.gmra.mrb[64].mxu0 %vm387_vm7, %v6531_v37  ;;  %11859 = vmatprep.subr.mxu1 %v12762_v6 }
0x1c0d   :  { %11905 = vmatpush3.xpose.msk.msra.mxu0 %vm387_vm7, %v6698_v34  ;;  %11906 = vmatprep.mubr.msk.f32.mxu0 %vm12763_vm6, %v12762_v6 }
0x1c0e   :  { %11914 = vmatprep.subr.mxu0 %v12762_v6 }
0x1c0f   :  { %v6861_v42 = vpop.permute.xlu0 %6860 }
0x1c10   :  { %11907 = vmatmul.mubr.msk.f32.vlgmr.msra.gmra.mrb[66].mxu0 %vm387_vm7, %v6696_v40 }
0x1c11   :  { %11915 = vmatpush3.xpose.msk.msra.mxu0 %vm387_vm7, %v6863_v36  ;;  %11916 = vmatprep.mubr.msk.f32.mxu0 %vm12763_vm6, %v12762_v6 }
0x1c14   :  { %11917 = vmatmul.mubr.msk.f32.vlgmr.msra.gmra.mrb[68].mxu0 %vm387_vm7, %v6861_v42 }
0x1c5c   :  { %v5766_v43 = vpop.f32.mrb[68].mxu1 }
0x1c5d   :  { %v5767_v44 = vadd.f32 %v5766_v43, %v12961_v29  ;;  %v11848_v19 = vpop.f32.mrb[69].mxu1 }
0x1c5f   :  { %v5770_v57 = vsel %vm387_vm7, %v5767_v44, -inf }
0x1c60   :  { %5771 = vmax.xlane.f32.xlu1 %v5770_v57 }
0x1ccf   :  { %v5931_v41 = vpop.f32.mrb[56].mxu0 }
0x1cd0   :  { %v5932_v8 = vadd.f32 %v5931_v41, %v12961_v29  ;;  %v11858_v56 = vpop.f32.mrb[57].mxu0 }
0x1cd2   :  { %v5935_v45 = vsel %vm387_vm7, %v5932_v8, -inf }
0x1cd3   :  { %5936 = vmax.xlane.f32.xlu0 %v5935_v45  ;;  %v6096_v47 = vpop.f32.mrb[58].mxu0 }
0x1cd4   :  { %v6097_v48 = vadd.f32 %v6096_v47, %v12961_v29  ;;  %v11868_v60 = vpop.f32.mrb[59].mxu0 }
0x1cd6   :  { %v6100_v50 = vsel %vm387_vm7, %v6097_v48, -inf }
0x1cd7   :  { %6101 = vmax.xlane.f32.xlu0 %v6100_v50  ;;  %v6261_v52 = vpop.f32.mrb[60].mxu0 }
0x1cd8   :  { %v6262_v53 = vadd.f32 %v6261_v52, %v12961_v29  ;;  %v11878_v54 = vpop.f32.mrb[61].mxu0 }
0x1cda   :  { %v6265_v55 = vsel %vm387_vm7, %v6262_v53, -inf }
0x1cdb   :  { %v6439_v58 = vpop.f32.mrb[62].mxu0  ;;  %6266 = vmax.xlane.f32.xlu1 %v6265_v55 }
0x1cdc   :  { %v6440_v61 = vadd.f32 %v6439_v58, %v12976_v49  ;;  %v11888_v39 = vpop.f32.mrb[63].mxu0 }
0x1cde   :  { %v6443_v20 = vsel %vm387_vm7, %v6440_v61, -inf }
0x1cdf   :  { %6444 = vmax.xlane.f32.xlu0 %v6443_v20  ;;  %v6604_v3 = vpop.f32.mrb[64].mxu0 }
0x1ce0   :  { %v6605_v2 = vadd.f32 %v6604_v3, %v12976_v49  ;;  %v11898_v4 = vpop.f32.mrb[65].mxu0 }
0x1ce2   :  { %v6608_v12 = vsel %vm387_vm7, %v6605_v2, -inf }
0x1ce3   :  { %v6769_v14 = vpop.f32.mrb[66].mxu0  ;;  %6609 = vmax.xlane.f32.xlu1 %v6608_v12 }
0x1ce4   :  { %v6770_v18 = vadd.f32 %v6769_v14, %v12976_v49  ;;  %v11908_v13 = vpop.f32.mrb[67].mxu0 }
0x1ce6   :  { %v6773_v21 = vsel %vm387_vm7, %v6770_v18, -inf }
0x1ce7   :  { %6774 = vmax.xlane.f32.xlu0 %v6773_v21  ;;  %v6934_v16 = vpop.f32.mrb[68].mxu0 }
0x1ce8   :  { %v11918_v23 = vpop.f32.mrb[69].mxu0  ;;  %v6935_v63 = vadd.f32 %v6934_v16, %v12976_v49 }
0x1cea   :  { %v6938_v25 = vsel %vm387_vm7, %v6935_v63, -inf }
0x1ced   :  { %v5772_v7 = vpop.xlane.xlu1 %5771 }
0x1cee   :  { %v5773_v62 = vsub.f32 %v5767_v44, %v5772_v7 }
0x1cf0   :  { %v5774_v9 = vmul.f32 1.442695, %v5773_v62 }
0x1cf2   :  { %12593 = vpow2.f32 %v5774_v9 }
0x1cf4   :  { %6111 = vrot.lane.b32.xlu1 %v13589_v10, %s12767_s15 }
0x1cfc   :  { %v12594_v15 = vpop.eup %12593 }
0x1cfd   :  { %5946 = vrot.lane.b32.xlu0 %v13589_v10, %s12766_s14  ;;  %v5776_v26 = vsel %vm387_vm7, %v12594_v15, 0.0 }
0x1d18   :  { %6939 = vmax.xlane.f32.xlu1 %v6938_v25 }
0x1d1c   :  { %5777 = vadd.xlane.f32.xlu0 %v5776_v26 }
0x1d29   :  { %6276 = vrot.lane.b32.xlu1 %v13589_v10, %s12768_s16 }
0x1d60   :  { %v5937_v28 = vpop.xlane.xlu0 %5936 }
0x1d61   :  { %v5938_v22 = vsub.f32 %v5932_v8, %v5937_v28 }
0x1d63   :  { %v5939_v30 = vmul.f32 1.442695, %v5938_v22 }
0x1d64   :  { %v6102_v31 = vpop.xlane.xlu0 %6101 }
0x1d65   :  { %12595 = vpow2.f32 %v5939_v30  ;;  %v6103_v32 = vsub.f32 %v6097_v48, %v6102_v31 }
0x1d67   :  { %v6104_v27 = vmul.f32 1.442695, %v6103_v32 }
0x1d68   :  { %v6267_v10 = vpop.xlane.xlu1 %6266 }
0x1d69   :  { %12597 = vpow2.f32 %v6104_v27  ;;  %v6268_v37 = vsub.f32 %v6262_v53, %v6267_v10 }
0x1d6b   :  { %v6269_v43 = vmul.f32 1.442695, %v6268_v37 }
0x1d6c   :  { %v6445_v38 = vpop.xlane.xlu0 %6444 }
0x1d6d   :  { %v6446_v42 = vsub.f32 %v6440_v61, %v6445_v38  ;;  %12599 = vpow2.f32 %v6269_v43 }
0x1d6f   :  { %v12596_v33 = vpop.eup %12595  ;;  %v6447_v57 = vmul.f32 1.442695, %v6446_v42 }
0x1d70   :  { %v5941_v34 = vsel %vm387_vm7, %v12596_v33, 0.0  ;;  %v6610_v40 = vpop.xlane.xlu1 %6609 }
0x1d71   :  { %5942 = vadd.xlane.f32.xlu1 %v5941_v34  ;;  %v6611_v44 = vsub.f32 %v6605_v2, %v6610_v40  ;;  %12601 = vpow2.f32 %v6447_v57 }
0x1d73   :  { %v13679_v35 = vpop.eup %12597  ;;  %v6612_v41 = vmul.f32 1.442695, %v6611_v44 }
0x1d74   :  { %v6106_v36 = vsel %vm387_vm7, %v13679_v35, 0.0  ;;  %v6775_v19 = vpop.xlane.xlu0 %6774  ;;  %v6112_v45 = vpop.permute.xlu1 %6111 }
0x1d75   :  { %6107 = vadd.xlane.f32.xlu0 %v6106_v36  ;;  %v6776_v8 = vsub.f32 %v6770_v18, %v6775_v19  ;;  %12603 = vpow2.f32 %v6612_v41  ;;  %v7040_v41 = vld [vmem:[#allocation2 + $0x280] sm:$0xff] }
0x1d77   :  { %v6777_v56 = vmul.f32 1.442695, %v6776_v8  ;;  %v12600_v47 = vpop.eup %12599  ;;  %v7041_v8 = vld [vmem:[#allocation2 + $0x288] sm:$0xff] }
0x1d78   :  { %v5947_v60 = vpop.permute.xlu0 %5946  ;;  %v6271_v52 = vsel %vm387_vm7, %v12600_v47, 0.0 }
0x1d79   :  { %12605 = vpow2.f32 %v6777_v56  ;;  %v12330_v56 = vpack.c.bf16 %v7041_v8, %v7040_v41  ;;  %v7265_v41 = vld [vmem:[#allocation2 + $0x2f8] sm:$0xff] }
0x1d7b   :  { %v13687_v48 = vpop.eup %12601  ;;  %12331 = vmatprep.subr.bf16.mxu0 %v12330_v56 }
0x1d7c   :  { %v6449_v61 = vsel %vm387_vm7, %v13687_v48, 0.0  ;;  %12333 = vmatpush3.bf16.msra.mxu0 %v12330_v56  ;;  %v7266_v56 = vld [vmem:[#allocation2 + $0x300] sm:$0xff] }
0x1d7f   :  { %v13690_v53 = vpop.eup %12603 }
0x1d80   :  { %v6614_v39 = vsel %vm387_vm7, %v13690_v53, 0.0 }
0x1d82   :  { %6454 = vrot.lane.b32.xlu1 %v13603_v11, %s12765_s13 }
0x1d83   :  { %v13696_v20 = vpop.eup %12605 }
0x1d84   :  { %v6779_v3 = vsel %vm387_vm7, %v13696_v20, 0.0 }
0x1d8b   :  { %6619 = vrot.lane.b32.xlu0 %v13603_v11, %s12766_s14 }
0x1da5   :  { %v6940_v50 = vpop.xlane.xlu1 %6939 }
0x1da6   :  { %v6941_v54 = vsub.f32 %v6935_v63, %v6940_v50  ;;  %6272 = vadd.xlane.f32.xlu1 %v6271_v52 }
0x1da8   :  { %v6942_v55 = vmul.f32 1.442695, %v6941_v54 }
0x1da9   :  { %v5778_v58 = vpop.xlane.xlu0 %5777  ;;  %v6277_v18 = vpop.permute.xlu1 %6276 }
0x1daa   :  { %12607 = vpow2.f32 %v6942_v55  ;;  %6450 = vadd.xlane.f32.xlu0 %v6449_v61  ;;  %6615 = vadd.xlane.f32.xlu1 %v6614_v39 }
0x1dab   :  { %12609 = vrcp.f32 %v5778_v58 }
0x1dae   :  { %6780 = vadd.xlane.f32.xlu0 %v6779_v3 }
0x1db4   :  { %v13700_v2 = vpop.eup %12607 }
0x1db5   :  { %v12610_v4 = vpop.eup %12609  ;;  %v6944_v12 = vsel %vm387_vm7, %v13700_v2, 0.0 }
0x1db6   :  { %6945 = vadd.xlane.f32.xlu0 %v6944_v12  ;;  %v5780_v14 = vmul.f32 %v12610_v4, %v12594_v15 }
0x1db8   :  { %11852 = vmatmul.mubr.msk.f32.vlgmr.msra.gmra.mrb[70].mxu1 %vm387_vm7, %v5780_v14 }
0x1db9   :  { %11860 = vmatpush3.msra.mxu1 %v5947_v60  ;;  %11861 = vmatprep.mubr.msk.f32.mxu1 %vm12763_vm6, %v12762_v6 }
0x1dba   :  { %11869 = vmatprep.subr.mxu1 %v12762_v6 }
0x1dbb   :  { %6784 = vrot.lane.b32.xlu1 %v13603_v11, %s12767_s15 }
0x1dcc   :  { %6949 = vrot.lane.b32.xlu0 %v13603_v11, %s12768_s16 }
0x1dfe   :  { %v5943_v13 = vpop.xlane.xlu1 %5942 }
0x1dff   :  { %12611 = vrcp.f32 %v5943_v13 }
0x1e02   :  { %v6108_v21 = vpop.xlane.xlu0 %6107  ;;  %v6455_v11 = vpop.permute.xlu1 %6454 }
0x1e03   :  { %12613 = vrcp.f32 %v6108_v21 }
0x1e06   :  { %v6620_v9 = vpop.permute.xlu0 %6619 }
0x1e09   :  { %v12612_v16 = vpop.eup %12611 }
0x1e0a   :  { %v5945_v23 = vmul.f32 %v12612_v16, %v12596_v33 }
0x1e0c   :  { %11862 = vmatmul.mubr.msk.f32.vlgmr.msra.gmra.mrb[72].mxu1 %vm387_vm7, %v5945_v23 }
0x1e0d   :  { %v12614_v7 = vpop.eup %12613  ;;  %11870 = vmatpush3.msra.mxu1 %v6112_v45  ;;  %11871 = vmatprep.mubr.msk.f32.mxu1 %vm12763_vm6, %v12762_v6 }
0x1e0e   :  { %11879 = vmatprep.subr.mxu1 %v12762_v6  ;;  %v6110_v62 = vmul.f32 %v12614_v7, %v13679_v35 }
0x1e10   :  { %11872 = vmatmul.mubr.msk.f32.vlgmr.msra.gmra.mrb[74].mxu1 %vm387_vm7, %v6110_v62 }
0x1e11   :  { %11880 = vmatpush3.msra.mxu1 %v6277_v18  ;;  %11881 = vmatprep.mubr.msk.f32.mxu1 %vm12763_vm6, %v12762_v6 }
0x1e12   :  { %11889 = vmatprep.subr.mxu1 %v12762_v6 }
0x1e33   :  { %v6273_v63 = vpop.xlane.xlu1 %6272 }
0x1e34   :  { %12615 = vrcp.f32 %v6273_v63 }
0x1e37   :  { %v6451_v25 = vpop.xlane.xlu0 %6450  ;;  %v6616_v15 = vpop.xlane.xlu1 %6615 }
0x1e38   :  { %12617 = vrcp.f32 %v6451_v25 }
0x1e39   :  { %12619 = vrcp.f32 %v6616_v15 }
0x1e3b   :  { %v6781_v26 = vpop.xlane.xlu0 %6780  ;;  %v6785_v35 = vpop.permute.xlu1 %6784 }
0x1e3c   :  { %12621 = vrcp.f32 %v6781_v26 }
0x1e3e   :  { %v12616_v28 = vpop.eup %12615 }
0x1e3f   :  { %v6275_v22 = vmul.f32 %v12616_v28, %v12600_v47  ;;  %v7042_v47 = vld [vmem:[#allocation2 + $0x290] sm:$0xff] }
0x1e41   :  { %11882 = vmatmul.mubr.msk.f32.vlgmr.msra.gmra.mrb[76].mxu1 %vm387_vm7, %v6275_v22 }
0x1e42   :  { %v12618_v30 = vpop.eup %12617  ;;  %11890 = vmatpush3.msra.mxu1 %v6455_v11  ;;  %11891 = vmatprep.mubr.msk.f32.mxu1 %vm12763_vm6, %v12762_v6  ;;  %v11017_v11 = vld [vmem:[#allocation2 + $0x2a0] ss:$0 sm:$0xff] }
0x1e43   :  { %v6946_v31 = vpop.xlane.xlu0 %6945  ;;  %11899 = vmatprep.subr.mxu1 %v12762_v6  ;;  %v6453_v32 = vmul.f32 %v12618_v30, %v13687_v48  ;;  %v12620_v27 = vpop.eup %12619  ;;  %v7043_v48 = vld [vmem:[#allocation2 + $0x298] sm:$0xff] }
0x1e44   :  { %12623 = vrcp.f32 %v6946_v31  ;;  %v6618_v33 = vmul.f32 %v12620_v27, %v13690_v53  ;;  %v12334_v50 = vpack.c.bf16 %v7043_v48, %v7042_v47  ;;  %v7267_v47 = vld [vmem:[#allocation2 + $0x308] sm:$0xff]  ;;  %v7268_v48 = vld [vmem:[#allocation2 + $0x310] sm:$0xff] }
0x1e45   :  { %11892 = vmatmul.mubr.msk.f32.vlgmr.msra.gmra.mrb[78].mxu1 %vm387_vm7, %v6453_v32 }
0x1e46   :  { %11900 = vmatpush3.msra.mxu1 %v6620_v9  ;;  %11901 = vmatprep.mubr.msk.f32.mxu1 %vm12763_vm6, %v12762_v6  ;;  %v12622_v34 = vpop.eup %12621 }
0x1e47   :  { %11909 = vmatprep.subr.mxu1 %v12762_v6  ;;  %v6783_v36 = vmul.f32 %v12622_v34, %v13696_v20  ;;  %v6950_v10 = vpop.permute.xlu0 %6949  ;;  %12335 = vmatprep.subr.bf16.mxu0 %v12334_v50 }
0x1e48   :  { %12337 = vmatpush3.bf16.msra.mxu0 %v12334_v50 }
0x1e49   :  { %11902 = vmatmul.mubr.msk.f32.vlgmr.msra.gmra.mrb[80].mxu1 %vm387_vm7, %v6618_v33 }
0x1e4a   :  { %11910 = vmatpush3.msra.mxu1 %v6785_v35  ;;  %11911 = vmatprep.mubr.msk.f32.mxu1 %vm12763_vm6, %v12762_v6 }
0x1e4b   :  { %11919 = vmatprep.subr.mxu1 %v12762_v6 }
0x1e4d   :  { %11912 = vmatmul.mubr.msk.f32.vlgmr.msra.gmra.mrb[82].mxu1 %vm387_vm7, %v6783_v36 }
0x1e4e   :  { %v12624_v37 = vpop.eup %12623  ;;  %11920 = vmatpush3.msra.mxu1 %v6950_v10  ;;  %11921 = vmatprep.mubr.msk.f32.mxu1 %vm12763_vm6, %v12762_v6 }
0x1e4f   :  { %v6948_v38 = vmul.f32 %v12624_v37, %v13700_v2  ;;  %v7171_v37 = vld [vmem:[#allocation2 + $0x2c0] sm:$0xff] }
0x1e51   :  { %11922 = vmatmul.mubr.msk.f32.vlgmr.msra.gmra.mrb[84].mxu1 %vm387_vm7, %v6948_v38  ;;  %v7172_v38 = vld [vmem:[#allocation2 + $0x2c8] sm:$0xff] }
0x1e8b   :  { %v5853_v40 = vpop.f32.mrb[70].mxu1 }
0x1e8c   :  { %v11853_v42 = vpop.f32.mrb[71].mxu1 }
0x1e8d   :  { %v7173_v42 = vld [vmem:[#allocation2 + $0x2d0] sm:$0xff] }
0x1edf   :  { %v6018_v43 = vpop.f32.mrb[72].mxu1 }
0x1ee0   :  { %6353 = vrot.lane.b32.xlu1 %v6018_v43, %s12760_s29  ;;  %v11863_v44 = vpop.f32.mrb[73].mxu1  ;;  %v7174_v43 = vld [vmem:[#allocation2 + $0x2d8] sm:$0xff] }
0x1ee1   :  { %v12342_v44 = vpack.c.bf16 %v7174_v43, %v7173_v42 }
0x1ee3   :  { %v6183_v19 = vpop.f32.mrb[74].mxu1 }
0x1ee4   :  { %6357 = vrot.lane.b32.xlu0 %v6183_v19, %s12776_s26  ;;  %v11873_v57 = vpop.f32.mrb[75].mxu1  ;;  %v7263_v19 = vld [vmem:[#allocation2 + $0x2e8] sm:$0xff] }
0x1ee5   :  { %v7264_v57 = vld [vmem:[#allocation2 + $0x2f0] sm:$0xff] }
0x1ee6   :  { %v12346_v8 = vpack.c.bf16 %v7264_v57, %v7263_v19  ;;  %v7398_v19 = vld [vmem:[#allocation2 + $0x330] sm:$0xff]  ;;  %v7399_v57 = vld [vmem:[#allocation2 + $0x338] sm:$0xff] }
0x1ee8   :  { %12347 = vmatprep.subr.bf16.mxu0 %v12346_v8 }
0x1f14   :  { %v6348_v45 = vpop.f32.mrb[76].mxu1 }
0x1f15   :  { %6361 = vrot.lane.b32.xlu0 %v6348_v45, %s12777_s27  ;;  %v11883_v60 = vpop.f32.mrb[77].mxu1  ;;  %v12350_v45 = vpack.c.bf16 %v7266_v56, %v7265_v41  ;;  %v12362_v41 = vpack.c.bf16 %v7399_v57, %v7398_v19  ;;  %v7401_v56 = vld [vmem:[#allocation2 + $0x348] sm:$0xff] }
0x1f16   :  { %v12354_v60 = vpack.c.bf16 %v7268_v48, %v7267_v47 }
0x1f18   :  { %v6526_v52 = vpop.f32.mrb[78].mxu1 }
0x1f19   :  { %v11893_v53 = vpop.f32.mrb[79].mxu1 }
0x1f1c   :  { %v6691_v54 = vpop.f32.mrb[80].mxu1 }
0x1f1d   :  { %7026 = vrot.lane.b32.xlu1 %v6691_v54, %s12760_s29  ;;  %v11903_v55 = vpop.f32.mrb[81].mxu1 }
0x1f20   :  { %v6856_v58 = vpop.f32.mrb[82].mxu1 }
0x1f21   :  { %7030 = vrot.lane.b32.xlu1 %v6856_v58, %s12776_s26  ;;  %v11913_v61 = vpop.f32.mrb[83].mxu1 }
0x1f22   :  { %v7132_v61 = vld [vmem:[#allocation2 + $0x2b8] sm:$0x3] }
0x1f24   :  { %v7021_v39 = vpop.f32.mrb[84].mxu1 }
0x1f25   :  { %7034 = vrot.lane.b32.xlu0 %v7021_v39, %s12777_s27  ;;  %v11923_v20 = vpop.f32.mrb[85].mxu1  ;;  %v7162_v39 = vrot.slane %v7132_v61, %v12858_v46 }
0x1f52   :  { %v6354_v3 = vpop.permute.xlu1 %6353 }
0x1f53   :  { %v6364_v4 = vsel %vm387_vm7, %v5853_v40, %v6354_v3  ;;  %v12338_v40 = vpack.c.bf16 %v7172_v38, %v7171_v37 }
0x1f55   :  { %12339 = vmatprep.subr.bf16.mxu1 %v12338_v40 }
0x1f56   :  { %v6358_v2 = vpop.permute.xlu0 %6357  ;;  %12341 = vmatpush3.bf16.msra.mxu1 %v12338_v40 }
0x1f57   :  { %v6365_v12 = vsel %vm54_vm0, %v6364_v4, %v6358_v2  ;;  %12343 = vmatprep.subr.bf16.mxu1 %v12342_v44 }
0x1f5a   :  { %12345 = vmatpush3.bf16.msra.mxu1 %v12342_v44 }
0x1f5b   :  { %12363 = vmatprep.subr.bf16.mxu1 %v12362_v41 }
0x1f87   :  { %v6362_v14 = vpop.permute.xlu0 %6361 }
0x1f88   :  { %v6366_v18 = vsel %vm1058_vm10, %v6365_v12, %v6362_v14  ;;  %v7168_v12 = vrot.slane %v7132_v61, %v12862_v51 }
0x1f89   :  { %11932 = vmatprep.mubr.msk.f32.mxu0 %vm248_vm3, %v6366_v18 }
0x1f8f   :  { %v7027_v13 = vpop.permute.xlu1 %7026 }
0x1f90   :  { %v7037_v16 = vsel %vm387_vm7, %v6526_v52, %v7027_v13 }
0x1f93   :  { %v7031_v21 = vpop.permute.xlu1 %7030 }
0x1f94   :  { %v7038_v23 = vsel %vm54_vm0, %v7037_v16, %v7031_v21  ;;  %v7269_v16 = vld [vmem:[#allocation2 + $0x318] sm:$0xff] }
0x1f97   :  { %v7035_v7 = vpop.permute.xlu0 %7034 }
0x1f98   :  { %v7039_v62 = vsel %vm1058_vm10, %v7038_v23, %v7035_v7  ;;  %v7270_v23 = vld [vmem:[#allocation2 + $0x320] sm:$0xff] }
0x1f99   :  { %11933 = vmatmul.mubr.msk.f32.vlgmr.msra.gmra.mrb[70].mxu0 %vm248_vm3, %v7039_v62  ;;  %v12358_v7 = vpack.c.bf16 %v7270_v23, %v7269_v16  ;;  %v11020_v62 = vld [vmem:[#allocation2 + $0x2e0] ss:$0 sm:$0xff] }
0x1f9a   :  { %12349 = vmatpush3.bf16.msra.mxu0 %v12346_v8  ;;  %v7400_v8 = vld [vmem:[#allocation2 + $0x340] sm:$0xff] }
0x1f9b   :  { %12351 = vmatprep.subr.bf16.mxu0 %v12350_v45 }
0x1f9e   :  { %12353 = vmatpush3.bf16.msra.mxu0 %v12350_v45  ;;  %v12366_v45 = vpack.c.bf16 %v7401_v56, %v7400_v8 }
0x1f9f   :  { %12355 = vmatprep.subr.bf16.mxu0 %v12354_v60 }
0x1fa2   :  { %12357 = vmatpush3.bf16.msra.mxu0 %v12354_v60 }
0x1fa3   :  { %12359 = vmatprep.subr.bf16.mxu0 %v12358_v7 }
0x1fa6   :  { %12361 = vmatpush3.bf16.msra.mxu0 %v12358_v7 }
0x1fa7   :  { %11986 = vmatprep.subr.mxu0 %v12762_v6 }
0x206c   :  { %v11934_v9 = vpop.f32.mrb[70].mxu0 }
0x206d   :  { %v7127_v63 = vadd.f32 %v11934_v9, %v11017_v11  ;;  %v7121_v25 = vpop.f32.mrb[71].mxu0 }
0x206e   :  { %v7122_v15 = vadd.f32 %v11017_v11, %v7121_v25 }
0x206f   :  { %v13756_v26 = vadd.f32 %v7127_v63, %v13547_v17 }
0x2070   :  { %v13759_v28 = vadd.f32 %v7122_v15, %v13541_v59 }
0x2071   :  { %v7136_v22 = vsel %vm248_vm3, %v13756_v26, 0.0 }
0x2072   :  { %7137 = vadd.xlane.f32.xlu0 %v7136_v22  ;;  %v7133_v30 = vsel %vm248_vm3, %v13759_v28, 0.0 }
0x2073   :  { %7134 = vadd.xlane.f32.xlu1 %v7133_v30  ;;  %v11023_v30 = vld [vmem:[#allocation2 + $0x328] ss:$0 sm:$0xff] }
0x20ff   :  { %v7138_v31 = vpop.xlane.xlu0 %7137 }
0x2100   :  { %v7140_v32 = vmul.f32 0.03125, %v7138_v31  ;;  %v7135_v27 = vpop.xlane.xlu1 %7134 }
0x2101   :  { %v7139_v33 = vmul.f32 0.03125, %v7135_v27 }
0x2102   :  { %v7142_v34 = vsub.f32 %v13756_v26, %v7140_v32 }
0x2103   :  { %v7141_v17 = vsub.f32 %v13759_v28, %v7139_v33 }
0x2104   :  { %v7144_v35 = vmul.f32 %v7142_v34, %v7142_v34 }
0x2105   :  { %v7143_v36 = vmul.f32 %v7141_v17, %v7141_v17 }
0x2106   :  { %v7148_v59 = vsel %vm248_vm3, %v7144_v35, 0.0 }
0x2107   :  { %7149 = vadd.xlane.f32.xlu1 %v7148_v59  ;;  %v7145_v10 = vsel %vm248_vm3, %v7143_v36, 0.0 }
0x2108   :  { %7146 = vadd.xlane.f32.xlu0 %v7145_v10 }
0x2194   :  { %v7150_v50 = vpop.xlane.xlu1 %7149 }
0x2195   :  { %v7152_v52 = vmul.f32 0.03125, %v7150_v50  ;;  %v7147_v53 = vpop.xlane.xlu0 %7146 }
0x2196   :  { %v7151_v54 = vmul.f32 0.03125, %v7147_v53 }
0x2197   :  { %v7154_v55 = vadd.f32 1e-06, %v7152_v52 }
0x2198   :  { %v7153_v58 = vadd.f32 1e-06, %v7151_v54  ;;  %v7359_v54 = vld [vmem:[#allocation2 + $0x3d0] sm:$0x3] }
0x2199   :  { %12625 = vrsqrt.f32 %v7154_v55  ;;  %v7389_v55 = vrot.slane %v7359_v54, %v12858_v46 }
0x219a   :  { %12627 = vrsqrt.f32 %v7153_v58 }
0x21a3   :  { %v12626_v20 = vpop.eup %12625 }
0x21a4   :  { %v12628_v3 = vpop.eup %12627  ;;  %v7158_v2 = vmul.f32 %v12626_v20, %v7142_v34 }
0x21a5   :  { %v7157_v4 = vmul.f32 %v12628_v3, %v7141_v17  ;;  %v7395_v3 = vrot.slane %v7359_v54, %v12862_v51 }
0x21a6   :  { %v7164_v14 = vmul.f32 %v7162_v39, %v7158_v2 }
0x21a7   :  { %v7163_v18 = vmul.f32 %v7162_v39, %v7157_v4 }
0x21a8   :  { %v7170_v21 = vadd.f32 %v7168_v12, %v7164_v14 }
0x21a9   :  { %v7169_v13 = vadd.f32 %v7168_v12, %v7163_v18  ;;  %v11026_v18 = vld [vmem:[#allocation2 + $0x350] ss:$0 sm:$0xff] }
0x21ab   :  { %11943 = vmatprep.mubr.msk.f32.mxu1 %vm248_vm3, %v7169_v13 }
0x21ac   :  { %11944 = vmatmul.mubr.msk.f32.vlgmr.msra.gmra.mrb[86].mxu1 %vm248_vm3, %v7170_v21 }
0x21ad   :  { %12365 = vmatpush3.bf16.msra.mxu1 %v12362_v41 }
0x21ae   :  { %12367 = vmatprep.subr.bf16.mxu1 %v12366_v45 }
0x21b1   :  { %12369 = vmatpush3.bf16.msra.mxu1 %v12366_v45 }
0x21b2   :  { %11976 = vmatprep.subr.mxu1 %v12762_v6 }
0x227f   :  { %v11945_v11 = vpop.f32.mrb[86].mxu1 }
0x2280   :  { %v7258_v9 = vadd.f32 %v11945_v11, %v11020_v62  ;;  %v7252_v63 = vpop.f32.mrb[87].mxu1 }
0x2281   :  { %v7253_v25 = vadd.f32 %v11020_v62, %v7252_v63 }
0x2282   :  { %v7262_v22 = vmax.f32 %v7258_v9, 0.0 }
0x2283   :  { %v7261_v15 = vmax.f32 %v7253_v25, 0.0 }
0x2285   :  { %11962 = vmatprep.mubr.msk.f32.mxu0 %vm1976_vm11, %v7261_v15 }
0x2286   :  { %11963 = vmatmul.mubr.msk.f32.vlgmr.msra.gmra.mrb[72].mxu0 %vm1976_vm11, %v7262_v22 }
0x2287   :  { %11988 = vmatprep.mubr.msk.f32.mxu0 %vm12763_vm6, %v12762_v6 }
0x2359   :  { %v11964_v31 = vpop.f32.mrb[72].mxu0 }
0x235a   :  { %v7354_v32 = vadd.f32 %v11964_v31, %v11023_v30  ;;  %v7348_v27 = vpop.f32.mrb[73].mxu0 }
0x235b   :  { %v7349_v33 = vadd.f32 %v11023_v30, %v7348_v27 }
0x235c   :  { %v13779_v34 = vadd.f32 %v7354_v32, %v13756_v26 }
0x235d   :  { %v13782_v17 = vadd.f32 %v7349_v33, %v13759_v28 }
0x235e   :  { %v7363_v35 = vsel %vm248_vm3, %v13779_v34, 0.0 }
0x235f   :  { %7364 = vadd.xlane.f32.xlu1 %v7363_v35  ;;  %v7360_v36 = vsel %vm248_vm3, %v13782_v17, 0.0 }
0x2360   :  { %7361 = vadd.xlane.f32.xlu0 %v7360_v36 }
0x23ec   :  { %v7365_v59 = vpop.xlane.xlu1 %7364 }
0x23ed   :  { %v7367_v10 = vmul.f32 0.03125, %v7365_v59  ;;  %v7362_v37 = vpop.xlane.xlu0 %7361 }
0x23ee   :  { %v7366_v38 = vmul.f32 0.03125, %v7362_v37 }
0x23ef   :  { %v7369_v40 = vsub.f32 %v13779_v34, %v7367_v10 }
0x23f0   :  { %v7368_v26 = vsub.f32 %v13782_v17, %v7366_v38 }
0x23f1   :  { %v7371_v42 = vmul.f32 %v7369_v40, %v7369_v40 }
0x23f2   :  { %v7370_v43 = vmul.f32 %v7368_v26, %v7368_v26 }
0x23f3   :  { %v7375_v28 = vsel %vm248_vm3, %v7371_v42, 0.0 }
0x23f4   :  { %7376 = vadd.xlane.f32.xlu1 %v7375_v28  ;;  %v7372_v44 = vsel %vm248_vm3, %v7370_v43, 0.0 }
0x23f5   :  { %7373 = vadd.xlane.f32.xlu0 %v7372_v44 }
0x2481   :  { %v7377_v47 = vpop.xlane.xlu1 %7376 }
0x2482   :  { %v7379_v48 = vmul.f32 0.03125, %v7377_v47  ;;  %v7374_v60 = vpop.xlane.xlu0 %7373 }
0x2483   :  { %v7378_v50 = vmul.f32 0.03125, %v7374_v60 }
0x2484   :  { %v7381_v52 = vadd.f32 1e-06, %v7379_v48 }
0x2485   :  { %v7380_v53 = vadd.f32 1e-06, %v7378_v50 }
0x2486   :  { %12629 = vrsqrt.f32 %v7381_v52 }
0x2487   :  { %12631 = vrsqrt.f32 %v7380_v53 }
0x2490   :  { %v12630_v58 = vpop.eup %12629 }
0x2491   :  { %v12632_v61 = vpop.eup %12631  ;;  %v7385_v39 = vmul.f32 %v12630_v58, %v7369_v40 }
0x2492   :  { %v7384_v20 = vmul.f32 %v12632_v61, %v7368_v26 }
0x2493   :  { %v7391_v2 = vmul.f32 %v7389_v55, %v7385_v39 }
0x2494   :  { %v7390_v4 = vmul.f32 %v7389_v55, %v7384_v20 }
0x2495   :  { %v7397_v14 = vadd.f32 %v7395_v3, %v7391_v2 }
0x2496   :  { %v7396_v12 = vadd.f32 %v7395_v3, %v7390_v4 }
0x2498   :  { %11973 = vmatprep.mubr.msk.f32.mxu1 %vm248_vm3, %v7396_v12 }
0x2499   :  { %11974 = vmatmul.mubr.msk.f32.vlgmr.msra.gmra.mrb[88].mxu1 %vm248_vm3, %v7397_v14 }
0x249a   :  { %11978 = vmatprep.mubr.msk.f32.mxu1 %vm12763_vm6, %v12762_v6 }
0x256c   :  { %v11975_v13 = vpop.f32.mrb[88].mxu1 }
0x256d   :  { %v7479_v21 = vpop.f32.mrb[89].mxu1  ;;  %v13813_v23 = vadd.f32 %v11975_v13, %v11026_v18 }
0x256e   :  { %v13799_v16 = vadd.f32 %v11026_v18, %v7479_v21 }
0x2570   :  { %7654 = vrot.lane.b32.xlu1 %v13799_v16, %s12766_s14  ;;  %7489 = vrot.lane.b32.xlu0 %v13799_v16, %s12765_s13 }
0x2574   :  { %7652 = vrot.lane.b32.xlu1 %v13799_v16, %s12764_s1  ;;  %7819 = vrot.lane.b32.xlu0 %v13799_v16, %s12767_s15 }
0x2578   :  { %7817 = vrot.lane.b32.xlu1 %v13799_v16, %s12769_s17  ;;  %7984 = vrot.lane.b32.xlu0 %v13799_v16, %s12768_s16 }
0x257c   :  { %7982 = vrot.lane.b32.xlu1 %v13799_v16, %s12771_s19  ;;  %8163 = vrot.lane.b32.xlu0 %v13813_v23, %s12765_s13 }
0x2580   :  { %8328 = vrot.lane.b32.xlu1 %v13813_v23, %s12766_s14  ;;  %8326 = vrot.lane.b32.xlu0 %v13813_v23, %s12764_s1 }
0x2584   :  { %8493 = vrot.lane.b32.xlu1 %v13813_v23, %s12767_s15  ;;  %8491 = vrot.lane.b32.xlu0 %v13813_v23, %s12769_s17 }
0x2588   :  { %8658 = vrot.lane.b32.xlu1 %v13813_v23, %s12768_s16  ;;  %8656 = vrot.lane.b32.xlu0 %v13813_v23, %s12771_s19 }
0x258c   :  { %7576 = vrot.lane.b32.xlu1 %v13799_v16, %s12770_s18 }
0x25e2   :  { %v7655_v7 = vpop.permute.xlu1 %7654  ;;  %v7490_v62 = vpop.permute.xlu0 %7489 }
0x25e3   :  { %11977 = vmatpush3.xpose.msk.msra.mxu1 %vm387_vm7, %v7490_v62  ;;  %11987 = vmatpush3.xpose.msk.msra.mxu0 %vm387_vm7, %v7655_v7 }
0x25e4   :  { %11996 = vmatprep.subr.mxu0 %v12762_v6  ;;  %11981 = vmatprep.subr.mxu1 %v12762_v6 }
0x25e6   :  { %v7653_v11 = vpop.permute.xlu1 %7652  ;;  %11979 = vmatmul.mubr.msk.f32.vlgmr.msra.gmra.mrb[90].mxu1 %vm387_vm7, %v13799_v16  ;;  %v7820_v9 = vpop.permute.xlu0 %7819 }
0x25e7   :  { %11989 = vmatmul.mubr.msk.f32.vlgmr.msra.gmra.mrb[74].mxu0 %vm387_vm7, %v7653_v11  ;;  %11983 = vmatprep.mubr.msk.f32.mxu1 %vm12763_vm6, %v12762_v6 }
0x25e8   :  { %11997 = vmatpush3.xpose.msk.msra.mxu0 %vm387_vm7, %v7820_v9  ;;  %11998 = vmatprep.mubr.msk.f32.mxu0 %vm12763_vm6, %v12762_v6 }
0x25e9   :  { %12006 = vmatprep.subr.mxu0 %v12762_v6 }
0x25ea   :  { %v7818_v63 = vpop.permute.xlu1 %7817  ;;  %v7985_v25 = vpop.permute.xlu0 %7984 }
0x25eb   :  { %11999 = vmatmul.mubr.msk.f32.vlgmr.msra.gmra.mrb[76].mxu0 %vm387_vm7, %v7818_v63 }
0x25ec   :  { %12007 = vmatpush3.xpose.msk.msra.mxu0 %vm387_vm7, %v7985_v25  ;;  %12008 = vmatprep.mubr.msk.f32.mxu0 %vm12763_vm6, %v12762_v6 }
0x25ed   :  { %12016 = vmatprep.subr.mxu0 %v12762_v6 }
0x25ee   :  { %v7983_v15 = vpop.permute.xlu1 %7982  ;;  %v8164_v22 = vpop.permute.xlu0 %8163 }
0x25ef   :  { %12009 = vmatmul.mubr.msk.f32.vlgmr.msra.gmra.mrb[78].mxu0 %vm387_vm7, %v7983_v15 }
0x25f0   :  { %12017 = vmatpush3.xpose.msk.msra.mxu0 %vm387_vm7, %v8164_v22  ;;  %12018 = vmatprep.mubr.msk.f32.mxu0 %vm12763_vm6, %v12762_v6 }
0x25f1   :  { %12026 = vmatprep.subr.mxu0 %v12762_v6 }
0x25f2   :  { %v8329_v30 = vpop.permute.xlu1 %8328  ;;  %v8327_v31 = vpop.permute.xlu0 %8326 }
0x25f3   :  { %12019 = vmatmul.mubr.msk.f32.vlgmr.msra.gmra.mrb[80].mxu0 %vm387_vm7, %v13813_v23 }
0x25f4   :  { %12027 = vmatpush3.xpose.msk.msra.mxu0 %vm387_vm7, %v8329_v30  ;;  %12028 = vmatprep.mubr.msk.f32.mxu0 %vm12763_vm6, %v12762_v6 }
0x25f5   :  { %12036 = vmatprep.subr.mxu0 %v12762_v6 }
0x25f6   :  { %v8494_v32 = vpop.permute.xlu1 %8493  ;;  %v8492_v27 = vpop.permute.xlu0 %8491 }
0x25f7   :  { %12029 = vmatmul.mubr.msk.f32.vlgmr.msra.gmra.mrb[82].mxu0 %vm387_vm7, %v8327_v31 }
0x25f8   :  { %12037 = vmatpush3.xpose.msk.msra.mxu0 %vm387_vm7, %v8494_v32  ;;  %12038 = vmatprep.mubr.msk.f32.mxu0 %vm12763_vm6, %v12762_v6 }
0x25f9   :  { %12046 = vmatprep.subr.mxu0 %v12762_v6 }
0x25fa   :  { %v8659_v33 = vpop.permute.xlu1 %8658  ;;  %v8657_v35 = vpop.permute.xlu0 %8656 }
0x25fb   :  { %12039 = vmatmul.mubr.msk.f32.vlgmr.msra.gmra.mrb[84].mxu0 %vm387_vm7, %v8492_v27 }
0x25fc   :  { %12047 = vmatpush3.xpose.msk.msra.mxu0 %vm387_vm7, %v8659_v33  ;;  %12048 = vmatprep.mubr.msk.f32.mxu0 %vm12763_vm6, %v12762_v6 }
0x25fe   :  { %v7577_v36 = vpop.permute.xlu1 %7576 }
0x25ff   :  { %11982 = vmatpush3.msra.mxu1 %v7577_v36  ;;  %12049 = vmatmul.mubr.msk.f32.vlgmr.msra.gmra.mrb[86].mxu0 %vm387_vm7, %v8657_v35 }
0x2600   :  { %11991 = vmatprep.subr.mxu1 %v12762_v6 }
0x26b9   :  { %v7561_v59 = vpop.f32.mrb[90].mxu1 }
0x26ba   :  { %v7562_v10 = vadd.f32 %v7561_v59, %v13428_v0  ;;  %v11980_v37 = vpop.f32.mrb[91].mxu1  ;;  %v7726_v38 = vpop.f32.mrb[74].mxu0 }
0x26bb   :  { %v7727_v40 = vadd.f32 %v7726_v38, %v13428_v0  ;;  %v11990_v26 = vpop.f32.mrb[75].mxu0 }
0x26bc   :  { %v7565_v42 = vsel %vm387_vm7, %v7562_v10, -inf }
0x26bd   :  { %7566 = vmax.xlane.f32.xlu1 %v7565_v42  ;;  %v7730_v43 = vsel %vm387_vm7, %v7727_v40, -inf }
0x26be   :  { %7731 = vmax.xlane.f32.xlu0 %v7730_v43  ;;  %v7891_v28 = vpop.f32.mrb[76].mxu0 }
0x26bf   :  { %v7892_v44 = vadd.f32 %v7891_v28, %v13428_v0  ;;  %v12000_v19 = vpop.f32.mrb[77].mxu0 }
0x26c1   :  { %v7895_v57 = vsel %vm387_vm7, %v7892_v44, -inf }
0x26c2   :  { %7896 = vmax.xlane.f32.xlu0 %v7895_v57  ;;  %v8056_v41 = vpop.f32.mrb[78].mxu0 }
0x26c3   :  { %v8057_v8 = vadd.f32 %v8056_v41, %v13428_v0  ;;  %v12010_v56 = vpop.f32.mrb[79].mxu0 }
0x26c5   :  { %v8060_v45 = vsel %vm387_vm7, %v8057_v8, -inf }
0x26c6   :  { %8061 = vmax.xlane.f32.xlu1 %v8060_v45  ;;  %v8235_v47 = vpop.f32.mrb[80].mxu0 }
0x26c7   :  { %v8236_v48 = vadd.f32 %v8235_v47, %v13441_v24  ;;  %v12020_v60 = vpop.f32.mrb[81].mxu0 }
0x26c9   :  { %v8239_v50 = vsel %vm387_vm7, %v8236_v48, -inf }
0x26ca   :  { %8240 = vmax.xlane.f32.xlu0 %v8239_v50  ;;  %v8400_v52 = vpop.f32.mrb[82].mxu0 }
0x26cb   :  { %v8401_v53 = vadd.f32 %v8400_v52, %v13441_v24  ;;  %v12030_v54 = vpop.f32.mrb[83].mxu0 }
0x26cd   :  { %v8404_v55 = vsel %vm387_vm7, %v8401_v53, -inf }
0x26ce   :  { %8405 = vmax.xlane.f32.xlu1 %v8404_v55  ;;  %v8565_v58 = vpop.f32.mrb[84].mxu0 }
0x26cf   :  { %v8566_v0 = vadd.f32 %v8565_v58, %v13441_v24  ;;  %v12040_v61 = vpop.f32.mrb[85].mxu0 }
0x26d1   :  { %v8569_v39 = vsel %vm387_vm7, %v8566_v0, -inf }
0x26d2   :  { %8570 = vmax.xlane.f32.xlu0 %v8569_v39  ;;  %v8730_v20 = vpop.f32.mrb[86].mxu0 }
0x26d3   :  { %v12050_v3 = vpop.f32.mrb[87].mxu0  ;;  %v8731_v2 = vadd.f32 %v8730_v20, %v13441_v24 }
0x26d5   :  { %v8734_v4 = vsel %vm387_vm7, %v8731_v2, -inf }
0x26df   :  { %7906 = vrot.lane.b32.xlu1 %v13799_v16, %s12775_s25 }
0x26e8   :  { %7741 = vrot.lane.b32.xlu0 %v13799_v16, %s12772_s20 }
0x2703   :  { %8735 = vmax.xlane.f32.xlu1 %v8734_v4 }
0x2714   :  { %8071 = vrot.lane.b32.xlu1 %v13799_v16, %s12774_s2 }
0x274a   :  { %v7567_v12 = vpop.xlane.xlu1 %7566 }
0x274b   :  { %v7568_v14 = vsub.f32 %v7562_v10, %v7567_v12  ;;  %v7732_v18 = vpop.xlane.xlu0 %7731 }
0x274c   :  { %v7733_v13 = vsub.f32 %v7727_v40, %v7732_v18 }
0x274d   :  { %v7569_v21 = vmul.f32 1.442695, %v7568_v14 }
0x274e   :  { %v7734_v7 = vmul.f32 1.442695, %v7733_v13 }
0x274f   :  { %12633 = vpow2.f32 %v7569_v21  ;;  %v7897_v62 = vpop.xlane.xlu0 %7896 }
0x2750   :  { %12635 = vpow2.f32 %v7734_v7  ;;  %v7898_v11 = vsub.f32 %v7892_v44, %v7897_v62 }
0x2752   :  { %v7899_v9 = vmul.f32 1.442695, %v7898_v11 }
0x2753   :  { %v8062_v30 = vpop.xlane.xlu1 %8061 }
0x2754   :  { %12637 = vpow2.f32 %v7899_v9  ;;  %v8063_v31 = vsub.f32 %v8057_v8, %v8062_v30 }
0x2756   :  { %v8064_v35 = vmul.f32 1.442695, %v8063_v31 }
0x2757   :  { %v8241_v32 = vpop.xlane.xlu0 %8240 }
0x2758   :  { %v8242_v33 = vsub.f32 %v8236_v48, %v8241_v32  ;;  %12639 = vpow2.f32 %v8064_v35 }
0x2759   :  { %v12634_v63 = vpop.eup %12633 }
0x275a   :  { %v12636_v24 = vpop.eup %12635  ;;  %v7571_v25 = vsel %vm387_vm7, %v12634_v63, 0.0  ;;  %v8243_v10 = vmul.f32 1.442695, %v8242_v33 }
0x275b   :  { %7572 = vadd.xlane.f32.xlu0 %v7571_v25  ;;  %v7736_v15 = vsel %vm387_vm7, %v12636_v24, 0.0  ;;  %v8406_v27 = vpop.xlane.xlu1 %8405 }
0x275c   :  { %7737 = vadd.xlane.f32.xlu1 %v7736_v15  ;;  %v8407_v36 = vsub.f32 %v8401_v53, %v8406_v27  ;;  %12641 = vpow2.f32 %v8243_v10  ;;  %v8837_v10 = vld [vmem:[#allocation2 + $0x360] sm:$0xff] }
0x275e   :  { %v13897_v16 = vpop.eup %12637  ;;  %v8408_v37 = vmul.f32 1.442695, %v8407_v36 }
0x275f   :  { %v7901_v22 = vsel %vm387_vm7, %v13897_v16, 0.0  ;;  %v8571_v59 = vpop.xlane.xlu0 %8570  ;;  %v7907_v26 = vpop.permute.xlu1 %7906 }
0x2760   :  { %7902 = vadd.xlane.f32.xlu0 %v7901_v22  ;;  %v8572_v38 = vsub.f32 %v8566_v0, %v8571_v59  ;;  %12643 = vpow2.f32 %v8408_v37  ;;  %v8836_v59 = vld [vmem:[#allocation2 + $0x358] sm:$0xff] }
0x2761   :  { %v12370_v37 = vpack.c.bf16 %v8837_v10, %v8836_v59 }
0x2762   :  { %v8573_v40 = vmul.f32 1.442695, %v8572_v38  ;;  %v12640_v42 = vpop.eup %12639 }
0x2763   :  { %v8066_v44 = vsel %vm387_vm7, %v12640_v42, 0.0  ;;  %v7742_v50 = vpop.permute.xlu0 %7741  ;;  %12371 = vmatprep.subr.bf16.mxu0 %v12370_v37 }
0x2764   :  { %12645 = vpow2.f32 %v8573_v40  ;;  %12373 = vmatpush3.bf16.msra.mxu0 %v12370_v37  ;;  %v8838_v40 = vld [vmem:[#allocation2 + $0x368] sm:$0xff] }
0x2766   :  { %v13905_v43 = vpop.eup %12641 }
0x2767   :  { %v8245_v56 = vsel %vm387_vm7, %v13905_v43, 0.0 }
0x276a   :  { %v13908_v19 = vpop.eup %12643 }
0x276b   :  { %v8410_v8 = vsel %vm387_vm7, %v13908_v19, 0.0 }
0x276d   :  { %8250 = vrot.lane.b32.xlu1 %v13813_v23, %s12770_s18 }
0x276e   :  { %v13914_v45 = vpop.eup %12645 }
0x276f   :  { %v8575_v47 = vsel %vm387_vm7, %v13914_v45, 0.0 }
0x2776   :  { %8415 = vrot.lane.b32.xlu0 %v13813_v23, %s12772_s20 }
0x2790   :  { %v8736_v28 = vpop.xlane.xlu1 %8735 }
0x2791   :  { %v8737_v57 = vsub.f32 %v8731_v2, %v8736_v28  ;;  %8067 = vadd.xlane.f32.xlu1 %v8066_v44 }
0x2793   :  { %v8738_v41 = vmul.f32 1.442695, %v8737_v57 }
0x2794   :  { %v8072_v52 = vpop.permute.xlu1 %8071 }
0x2795   :  { %12647 = vpow2.f32 %v8738_v41  ;;  %8411 = vadd.xlane.f32.xlu1 %v8410_v8  ;;  %8246 = vadd.xlane.f32.xlu0 %v8245_v56 }
0x2799   :  { %8576 = vadd.xlane.f32.xlu0 %v8575_v47 }
0x279f   :  { %v13918_v48 = vpop.eup %12647 }
0x27a0   :  { %v8740_v60 = vsel %vm387_vm7, %v13918_v48, 0.0 }
0x27a1   :  { %8741 = vadd.xlane.f32.xlu0 %v8740_v60 }
0x27a6   :  { %8580 = vrot.lane.b32.xlu1 %v13813_v23, %s12775_s25 }
0x27b7   :  { %8745 = vrot.lane.b32.xlu0 %v13813_v23, %s12774_s2 }
0x27e8   :  { %v7573_v53 = vpop.xlane.xlu0 %7572 }
0x27e9   :  { %12649 = vrcp.f32 %v7573_v53  ;;  %v7738_v54 = vpop.xlane.xlu1 %7737 }
0x27ea   :  { %12651 = vrcp.f32 %v7738_v54 }
0x27ed   :  { %v7903_v55 = vpop.xlane.xlu0 %7902  ;;  %v8251_v3 = vpop.permute.xlu1 %8250 }
0x27ee   :  { %12653 = vrcp.f32 %v7903_v55 }
0x27f1   :  { %v8416_v2 = vpop.permute.xlu0 %8415 }
0x27f3   :  { %v12650_v58 = vpop.eup %12649 }
0x27f4   :  { %v7575_v0 = vmul.f32 %v12650_v58, %v12634_v63  ;;  %v12652_v61 = vpop.eup %12651 }
0x27f5   :  { %v7740_v39 = vmul.f32 %v12652_v61, %v12636_v24 }
0x27f6   :  { %11984 = vmatmul.mubr.msk.f32.vlgmr.msra.gmra.mrb[92].mxu1 %vm387_vm7, %v7575_v0 }
0x27f7   :  { %11992 = vmatpush3.msra.mxu1 %v7742_v50  ;;  %11993 = vmatprep.mubr.msk.f32.mxu1 %vm12763_vm6, %v12762_v6 }
0x27f8   :  { %12001 = vmatprep.subr.mxu1 %v12762_v6  ;;  %v12654_v23 = vpop.eup %12653 }
0x27f9   :  { %v7905_v20 = vmul.f32 %v12654_v23, %v13897_v16  ;;  %v11053_v23 = vld [vmem:[#allocation2 + $0x378] ss:$0 sm:$0xff] }
0x27fa   :  { %11994 = vmatmul.mubr.msk.f32.vlgmr.msra.gmra.mrb[94].mxu1 %vm387_vm7, %v7740_v39 }
0x27fb   :  { %12002 = vmatpush3.msra.mxu1 %v7907_v26  ;;  %12003 = vmatprep.mubr.msk.f32.mxu1 %vm12763_vm6, %v12762_v6  ;;  %v8839_v26 = vld [vmem:[#allocation2 + $0x370] sm:$0xff] }
0x27fc   :  { %12011 = vmatprep.subr.mxu1 %v12762_v6 }
0x27fe   :  { %12004 = vmatmul.mubr.msk.f32.vlgmr.msra.gmra.mrb[96].mxu1 %vm387_vm7, %v7905_v20 }
0x27ff   :  { %12012 = vmatpush3.msra.mxu1 %v8072_v52  ;;  %12013 = vmatprep.mubr.msk.f32.mxu1 %vm12763_vm6, %v12762_v6 }
0x2800   :  { %12021 = vmatprep.subr.mxu1 %v12762_v6 }
0x281e   :  { %v8068_v4 = vpop.xlane.xlu1 %8067 }
0x281f   :  { %12655 = vrcp.f32 %v8068_v4 }
0x2822   :  { %v8247_v12 = vpop.xlane.xlu0 %8246  ;;  %v8412_v14 = vpop.xlane.xlu1 %8411 }
0x2823   :  { %12657 = vrcp.f32 %v8247_v12 }
0x2824   :  { %12659 = vrcp.f32 %v8412_v14 }
0x2826   :  { %v8577_v18 = vpop.xlane.xlu0 %8576  ;;  %v8581_v25 = vpop.permute.xlu1 %8580 }
0x2827   :  { %12661 = vrcp.f32 %v8577_v18 }
0x2829   :  { %v12656_v13 = vpop.eup %12655 }
0x282a   :  { %v8070_v21 = vmul.f32 %v12656_v13, %v12640_v42 }
0x282c   :  { %12014 = vmatmul.mubr.msk.f32.vlgmr.msra.gmra.mrb[98].mxu1 %vm387_vm7, %v8070_v21 }
0x282d   :  { %12022 = vmatpush3.msra.mxu1 %v8251_v3  ;;  %12023 = vmatprep.mubr.msk.f32.mxu1 %vm12763_vm6, %v12762_v6  ;;  %v12658_v7 = vpop.eup %12657 }
0x282e   :  { %v8742_v62 = vpop.xlane.xlu0 %8741  ;;  %12031 = vmatprep.subr.mxu1 %v12762_v6  ;;  %v8249_v11 = vmul.f32 %v12658_v7, %v13905_v43  ;;  %v12660_v9 = vpop.eup %12659  ;;  %v12374_v43 = vpack.c.bf16 %v8839_v26, %v8838_v40 }
0x282f   :  { %12663 = vrcp.f32 %v8742_v62  ;;  %v8414_v63 = vmul.f32 %v12660_v9, %v13908_v19 }
0x2830   :  { %12024 = vmatmul.mubr.msk.f32.vlgmr.msra.gmra.mrb[100].mxu1 %vm387_vm7, %v8249_v11  ;;  %12375 = vmatprep.subr.bf16.mxu0 %v12374_v43 }
0x2831   :  { %12032 = vmatpush3.msra.mxu1 %v8416_v2  ;;  %12033 = vmatprep.mubr.msk.f32.mxu1 %vm12763_vm6, %v12762_v6  ;;  %v12662_v24 = vpop.eup %12661 }
0x2832   :  { %12041 = vmatprep.subr.mxu1 %v12762_v6  ;;  %v8579_v15 = vmul.f32 %v12662_v24, %v13914_v45  ;;  %v8746_v22 = vpop.permute.xlu0 %8745  ;;  %12377 = vmatpush3.bf16.msra.mxu0 %v12374_v43 }
0x2834   :  { %12034 = vmatmul.mubr.msk.f32.vlgmr.msra.gmra.mrb[102].mxu1 %vm387_vm7, %v8414_v63 }
0x2835   :  { %12042 = vmatpush3.msra.mxu1 %v8581_v25  ;;  %12043 = vmatprep.mubr.msk.f32.mxu1 %vm12763_vm6, %v12762_v6  ;;  %v8969_v25 = vld [vmem:[#allocation2 + $0x390] sm:$0xff] }
0x2836   :  { %12051 = vmatprep.subr.mxu1 %v12762_v6 }
0x2838   :  { %12044 = vmatmul.mubr.msk.f32.vlgmr.msra.gmra.mrb[104].mxu1 %vm387_vm7, %v8579_v15  ;;  %v8970_v15 = vld [vmem:[#allocation2 + $0x398] sm:$0xff] }
0x2839   :  { %v12664_v16 = vpop.eup %12663  ;;  %12052 = vmatpush3.msra.mxu1 %v8746_v22  ;;  %12053 = vmatprep.mubr.msk.f32.mxu1 %vm12763_vm6, %v12762_v6  ;;  %v8967_v22 = vld [vmem:[#allocation2 + $0x380] sm:$0xff] }
0x283a   :  { %v8744_v30 = vmul.f32 %v12664_v16, %v13918_v48  ;;  %v12464_v16 = vpack.i.bf16 %v8970_v15, %v8969_v25 }
0x283c   :  { %12054 = vmatmul.mubr.msk.f32.vlgmr.msra.gmra.mrb[106].mxu1 %vm387_vm7, %v8744_v30  ;;  %v8968_v30 = vld [vmem:[#allocation2 + $0x388] sm:$0xff] }
0x28c9   :  { %v7648_v31 = vpop.f32.mrb[92].mxu1 }
0x28ca   :  { %v11985_v32 = vpop.f32.mrb[93].mxu1 }
0x28cb   :  { %v12378_v32 = vpack.c.bf16 %v8968_v30, %v8967_v22 }
0x28cd   :  { %v7813_v27 = vpop.f32.mrb[94].mxu1  ;;  %12379 = vmatprep.subr.bf16.mxu1 %v12378_v32 }
0x28ce   :  { %8148 = vrot.lane.b32.xlu1 %v7813_v27, %s12760_s29  ;;  %v11995_v33 = vpop.f32.mrb[95].mxu1  ;;  %12381 = vmatpush3.bf16.msra.mxu1 %v12378_v32  ;;  %v12382_v27 = vpack.c.bf16 %v8970_v15, %v8969_v25 }
0x28cf   :  { %v11056_v33 = vld [vmem:[#allocation2 + $0x3a0] ss:$0 sm:$0xff] }
0x28d0   :  { %12383 = vmatprep.subr.bf16.mxu1 %v12382_v27 }
0x28d1   :  { %v7978_v35 = vpop.f32.mrb[96].mxu1 }
0x28d2   :  { %8152 = vrot.lane.b32.xlu0 %v7978_v35, %s12776_s26  ;;  %v12005_v36 = vpop.f32.mrb[97].mxu1  ;;  %12385 = vmatpush3.bf16.msra.mxu1 %v12382_v27 }
0x28d3   :  { %12089 = vmatprep.subr.mxu1 %v12762_v6 }
0x28ff   :  { %v8143_v38 = vpop.f32.mrb[98].mxu1 }
0x2900   :  { %8156 = vrot.lane.b32.xlu0 %v8143_v38, %s12777_s27  ;;  %v12015_v42 = vpop.f32.mrb[99].mxu1 }
0x2903   :  { %v8322_v28 = vpop.f32.mrb[100].mxu1 }
0x2904   :  { %v12025_v44 = vpop.f32.mrb[101].mxu1 }
0x2907   :  { %v8487_v19 = vpop.f32.mrb[102].mxu1 }
0x2908   :  { %8822 = vrot.lane.b32.xlu1 %v8487_v19, %s12760_s29  ;;  %v12035_v57 = vpop.f32.mrb[103].mxu1 }
0x290b   :  { %v8652_v41 = vpop.f32.mrb[104].mxu1 }
0x290c   :  { %8826 = vrot.lane.b32.xlu1 %v8652_v41, %s12776_s26  ;;  %v12045_v8 = vpop.f32.mrb[105].mxu1  ;;  %v8928_v41 = vld [vmem:[#allocation2 + $0x3d8] sm:$0x3] }
0x290d   :  { %v8958_v8 = vrot.slane %v8928_v41, %v12858_v46 }
0x290f   :  { %v8817_v56 = vpop.f32.mrb[106].mxu1 }
0x2910   :  { %8830 = vrot.lane.b32.xlu0 %v8817_v56, %s12777_s27  ;;  %v12055_v45 = vpop.f32.mrb[107].mxu1 }
0x2940   :  { %v8149_v47 = vpop.permute.xlu1 %8148 }
0x2941   :  { %v8159_v60 = vsel %vm387_vm7, %v7648_v31, %v8149_v47  ;;  %v12459_v31 = vpack.i.bf16 %v8968_v30, %v8967_v22 }
0x2944   :  { %v8153_v48 = vpop.permute.xlu0 %8152 }
0x2945   :  { %v8160_v50 = vsel %vm54_vm0, %v8159_v60, %v8153_v48  ;;  %v8964_v60 = vrot.slane %v8928_v41, %v12862_v51 }
0x2972   :  { %v8157_v52 = vpop.permute.xlu0 %8156 }
0x2973   :  { %v8161_v53 = vsel %vm1058_vm10, %v8160_v50, %v8157_v52 }
0x2974   :  { %12064 = vmatprep.mubr.msk.f32.mxu0 %vm248_vm3, %v8161_v53 }
0x297a   :  { %v8823_v54 = vpop.permute.xlu1 %8822 }
0x297b   :  { %v8833_v58 = vsel %vm387_vm7, %v8322_v28, %v8823_v54 }
0x297e   :  { %v8827_v55 = vpop.permute.xlu1 %8826 }
0x297f   :  { %v8834_v0 = vsel %vm54_vm0, %v8833_v58, %v8827_v55 }
0x2982   :  { %v8831_v61 = vpop.permute.xlu0 %8830 }
0x2983   :  { %v8835_v39 = vsel %vm1058_vm10, %v8834_v0, %v8831_v61 }
0x2984   :  { %12065 = vmatmul.mubr.msk.f32.vlgmr.msra.gmra.mrb[88].mxu0 %vm248_vm3, %v8835_v39 }
0x2985   :  { %12086 = vmatprep.mubr.msk.f32.mxu0 %vm248_vm3, %v13558_v5 }
0x2a57   :  { %v12066_v20 = vpop.f32.mrb[88].mxu0 }
0x2a58   :  { %v8923_v3 = vadd.f32 %v12066_v20, %v11053_v23  ;;  %v8917_v2 = vpop.f32.mrb[89].mxu0 }
0x2a59   :  { %v8918_v4 = vadd.f32 %v11053_v23, %v8917_v2 }
0x2a5a   :  { %v13976_v12 = vadd.f32 %v8923_v3, %v13779_v34 }
0x2a5b   :  { %v13979_v14 = vadd.f32 %v8918_v4, %v13782_v17 }
0x2a5c   :  { %v8932_v18 = vsel %vm248_vm3, %v13976_v12, 0.0 }
0x2a5d   :  { %8933 = vadd.xlane.f32.xlu0 %v8932_v18  ;;  %v8929_v13 = vsel %vm248_vm3, %v13979_v14, 0.0 }
0x2a5e   :  { %8930 = vadd.xlane.f32.xlu1 %v8929_v13 }
0x2aea   :  { %v8934_v5 = vpop.xlane.xlu0 %8933 }
0x2aeb   :  { %v8936_v21 = vmul.f32 0.03125, %v8934_v5  ;;  %v8931_v7 = vpop.xlane.xlu1 %8930 }
0x2aec   :  { %v8935_v62 = vmul.f32 0.03125, %v8931_v7 }
0x2aed   :  { %v8938_v11 = vsub.f32 %v13976_v12, %v8936_v21 }
0x2aee   :  { %v8937_v34 = vsub.f32 %v13979_v14, %v8935_v62 }
0x2aef   :  { %v8940_v9 = vmul.f32 %v8938_v11, %v8938_v11 }
0x2af0   :  { %v8939_v63 = vmul.f32 %v8937_v34, %v8937_v34 }
0x2af1   :  { %v8944_v17 = vsel %vm248_vm3, %v8940_v9, 0.0 }
0x2af2   :  { %8945 = vadd.xlane.f32.xlu1 %v8944_v17  ;;  %v8941_v24 = vsel %vm248_vm3, %v8939_v63, 0.0 }
0x2af3   :  { %8942 = vadd.xlane.f32.xlu0 %v8941_v24 }
0x2b03   :  { %12465 = vrot.lane.b32.xlu1 %v12464_v16, %s12765_s13 }
0x2b07   :  { %9074 = vrot.lane.b32.xlu1 %v11056_v33, %s12765_s13 }
0x2b09   :  { %12460 = vrot.lane.b32.xlu0 %v12459_v31, %s12765_s13 }
0x2b7f   :  { %v8946_v35 = vpop.xlane.xlu1 %8945 }
0x2b80   :  { %v8948_v36 = vmul.f32 0.03125, %v8946_v35  ;;  %v8943_v59 = vpop.xlane.xlu0 %8942 }
0x2b81   :  { %v8947_v10 = vmul.f32 0.03125, %v8943_v59 }
0x2b82   :  { %v8950_v37 = vadd.f32 1e-06, %v8948_v36 }
0x2b83   :  { %v8949_v38 = vadd.f32 1e-06, %v8947_v10  ;;  %v12466_v40 = vpop.permute.xlu1 %12465 }
0x2b84   :  { %12665 = vrsqrt.f32 %v8950_v37  ;;  %v12461_v26 = vpop.permute.xlu0 %12460  ;;  %v12468_v42 = vunpack.i.h.bf16 %v12466_v40  ;;  %v12467_v43 = vunpack.i.l.bf16 %v12466_v40 }
0x2b85   :  { %12667 = vrsqrt.f32 %v8949_v38  ;;  %v12463_v28 = vunpack.i.h.bf16 %v12461_v26  ;;  %v12462_v44 = vunpack.i.l.bf16 %v12461_v26 }
0x2b86   :  { %v12390_v57 = vpack.c.bf16 %v12468_v42, %v12467_v43 }
0x2b87   :  { %v12386_v19 = vpack.c.bf16 %v12463_v28, %v12462_v44  ;;  %v9075_v55 = vpop.permute.xlu1 %9074 }
0x2b89   :  { %12387 = vmatprep.subr.bf16.mxu0 %v12386_v19 }
0x2b8a   :  { %12389 = vmatpush3.bf16.msra.mxu0 %v12386_v19 }
0x2b8b   :  { %12391 = vmatprep.subr.bf16.mxu0 %v12390_v57 }
0x2b8e   :  { %v12666_v56 = vpop.eup %12665  ;;  %12393 = vmatpush3.bf16.msra.mxu0 %v12390_v57 }
0x2b8f   :  { %v12668_v45 = vpop.eup %12667  ;;  %v8954_v47 = vmul.f32 %v12666_v56, %v8938_v11  ;;  %12099 = vmatprep.subr.mxu0 %v12762_v6 }
0x2b90   :  { %v8953_v48 = vmul.f32 %v12668_v45, %v8937_v34 }
0x2b91   :  { %12087 = vmatmul.mubr.msk.f32.vlgmr.msra.gmra.mrb[90].mxu0 %vm248_vm3, %v13577_v1  ;;  %v8960_v50 = vmul.f32 %v8958_v8, %v8954_v47 }
0x2b92   :  { %v8959_v52 = vmul.f32 %v8958_v8, %v8953_v48  ;;  %12101 = vmatprep.mubr.msk.f32.mxu0 %vm12763_vm6, %v12762_v6 }
0x2b93   :  { %v8966_v54 = vadd.f32 %v8964_v60, %v8960_v50 }
0x2b94   :  { %v8965_v53 = vadd.f32 %v8964_v60, %v8959_v52 }
0x2b96   :  { %12075 = vmatprep.mubr.msk.f32.mxu1 %vm248_vm3, %v8965_v53 }
0x2b97   :  { %12076 = vmatmul.mubr.msk.f32.vlgmr.msra.gmra.mrb[108].mxu1 %vm248_vm3, %v8966_v54 }
0x2b98   :  { %12091 = vmatprep.mubr.msk.f32.mxu1 %vm12763_vm6, %v12762_v6 }
0x2c64   :  { %v12088_v58 = vpop.f32.mrb[90].mxu0 }
0x2c65   :  { %v9143_v0 = vpop.f32.mrb[91].mxu0  ;;  %v14019_v20 = vadd.f32 %v12088_v58, %v9075_v55 }
0x2c66   :  { %v14004_v61 = vadd.f32 %v9143_v0, %v9075_v55 }
0x2c68   :  { %9317 = vrot.lane.b32.xlu0 %v14004_v61, %s12764_s1  ;;  %12090 = vmatpush3.xpose.msk.msra.mxu1 %vm387_vm7, %v14004_v61 }
0x2c69   :  { %12094 = vmatprep.subr.mxu1 %v12762_v6 }
0x2c6a   :  { %v12077_v1 = vpop.f32.mrb[108].mxu1 }
0x2c6b   :  { %v9048_v39 = vpop.f32.mrb[109].mxu1  ;;  %v9054_v3 = vadd.f32 %v12077_v1, %v11056_v33 }
0x2c6c   :  { %v9049_v23 = vadd.f32 %v11056_v33, %v9048_v39  ;;  %9482 = vrot.lane.b32.xlu0 %v14004_v61, %s12769_s17 }
0x2c6e   :  { %9315 = vrot.lane.b32.xlu1 %v9049_v23, %s12764_s1  ;;  %12092 = vmatmul.mubr.msk.f32.vlgmr.msra.gmra.mrb[110].mxu1 %vm387_vm7, %v9049_v23 }
0x2c6f   :  { %12096 = vmatprep.mubr.msk.f32.mxu1 %vm12763_vm6, %v12762_v6 }
0x2c70   :  { %9647 = vrot.lane.b32.xlu0 %v14004_v61, %s12771_s19 }
0x2c72   :  { %9480 = vrot.lane.b32.xlu1 %v9049_v23, %s12769_s17 }
0x2c74   :  { %9990 = vrot.lane.b32.xlu0 %v14019_v20, %s12764_s1 }
0x2c76   :  { %9645 = vrot.lane.b32.xlu1 %v9049_v23, %s12771_s19 }
0x2c78   :  { %10155 = vrot.lane.b32.xlu0 %v14019_v20, %s12769_s17 }
0x2c7a   :  { %9988 = vrot.lane.b32.xlu1 %v9054_v3, %s12764_s1 }
0x2c7c   :  { %10320 = vrot.lane.b32.xlu0 %v14019_v20, %s12771_s19 }
0x2c7e   :  { %10153 = vrot.lane.b32.xlu1 %v9054_v3, %s12769_s17 }
0x2c80   :  { %9239 = vrot.lane.b32.xlu0 %v14004_v61, %s12765_s13 }
0x2c82   :  { %10318 = vrot.lane.b32.xlu1 %v9054_v3, %s12771_s19 }
0x2c86   :  { %9404 = vrot.lane.b32.xlu1 %v14004_v61, %s12766_s14 }
0x2cda   :  { %v9318_v2 = vpop.permute.xlu0 %9317 }
0x2cdb   :  { %12100 = vmatpush3.xpose.msk.msra.mxu0 %vm387_vm7, %v9318_v2 }
0x2cdc   :  { %12109 = vmatprep.subr.mxu0 %v12762_v6 }
0x2cde   :  { %v9483_v4 = vpop.permute.xlu0 %9482 }
0x2ce0   :  { %v9316_v18 = vpop.permute.xlu1 %9315 }
0x2ce1   :  { %12102 = vmatmul.mubr.msk.f32.vlgmr.msra.gmra.mrb[92].mxu0 %vm387_vm7, %v9316_v18 }
0x2ce2   :  { %12110 = vmatpush3.xpose.msk.msra.mxu0 %vm387_vm7, %v9483_v4  ;;  %v9648_v13 = vpop.permute.xlu0 %9647  ;;  %12111 = vmatprep.mubr.msk.f32.mxu0 %vm12763_vm6, %v12762_v6 }
0x2ce3   :  { %12119 = vmatprep.subr.mxu0 %v12762_v6 }
0x2ce4   :  { %v9481_v5 = vpop.permute.xlu1 %9480 }
0x2ce5   :  { %12112 = vmatmul.mubr.msk.f32.vlgmr.msra.gmra.mrb[94].mxu0 %vm387_vm7, %v9481_v5 }
0x2ce6   :  { %12120 = vmatpush3.xpose.msk.msra.mxu0 %vm387_vm7, %v9648_v13  ;;  %v9991_v21 = vpop.permute.xlu0 %9990  ;;  %12121 = vmatprep.mubr.msk.f32.mxu0 %vm12763_vm6, %v12762_v6 }
0x2ce7   :  { %12129 = vmatprep.subr.mxu0 %v12762_v6 }
0x2ce8   :  { %v9646_v7 = vpop.permute.xlu1 %9645 }
0x2ce9   :  { %12122 = vmatmul.mubr.msk.f32.vlgmr.msra.gmra.mrb[96].mxu0 %vm387_vm7, %v9646_v7 }
0x2cea   :  { %12130 = vmatpush3.xpose.msk.msra.mxu0 %vm387_vm7, %v14019_v20  ;;  %v10156_v62 = vpop.permute.xlu0 %10155  ;;  %12131 = vmatprep.mubr.msk.f32.mxu0 %vm12763_vm6, %v12762_v6 }
0x2ceb   :  { %12139 = vmatprep.subr.mxu0 %v12762_v6 }
0x2cec   :  { %v9989_v11 = vpop.permute.xlu1 %9988 }
0x2ced   :  { %12132 = vmatmul.mubr.msk.f32.vlgmr.msra.gmra.mrb[98].mxu0 %vm387_vm7, %v9054_v3 }
0x2cee   :  { %12140 = vmatpush3.xpose.msk.msra.mxu0 %vm387_vm7, %v9991_v21  ;;  %v10321_v34 = vpop.permute.xlu0 %10320  ;;  %12141 = vmatprep.mubr.msk.f32.mxu0 %vm12763_vm6, %v12762_v6 }
0x2cef   :  { %12149 = vmatprep.subr.mxu0 %v12762_v6 }
0x2cf0   :  { %v10154_v9 = vpop.permute.xlu1 %10153 }
0x2cf1   :  { %12142 = vmatmul.mubr.msk.f32.vlgmr.msra.gmra.mrb[100].mxu0 %vm387_vm7, %v9989_v11 }
0x2cf2   :  { %12150 = vmatpush3.xpose.msk.msra.mxu0 %vm387_vm7, %v10156_v62  ;;  %v9240_v63 = vpop.permute.xlu0 %9239  ;;  %12151 = vmatprep.mubr.msk.f32.mxu0 %vm12763_vm6, %v12762_v6 }
0x2cf3   :  { %12095 = vmatpush3.msra.mxu1 %v9240_v63  ;;  %12159 = vmatprep.subr.mxu0 %v12762_v6 }
0x2cf4   :  { %12104 = vmatprep.subr.mxu1 %v12762_v6  ;;  %v10319_v17 = vpop.permute.xlu1 %10318 }
0x2cf5   :  { %12152 = vmatmul.mubr.msk.f32.vlgmr.msra.gmra.mrb[102].mxu0 %vm387_vm7, %v10154_v9 }
0x2cf6   :  { %12160 = vmatpush3.xpose.msk.msra.mxu0 %vm387_vm7, %v10321_v34  ;;  %12161 = vmatprep.mubr.msk.f32.mxu0 %vm12763_vm6, %v12762_v6 }
0x2cf8   :  { %v9405_v58 = vpop.permute.xlu1 %9404 }
0x2cf9   :  { %12162 = vmatmul.mubr.msk.f32.vlgmr.msra.gmra.mrb[104].mxu0 %vm387_vm7, %v10319_v17 }
0x2d41   :  { %v9224_v24 = vpop.f32.mrb[110].mxu1 }
0x2d42   :  { %v9225_v25 = vadd.f32 %v9224_v24, %v12961_v29  ;;  %v12093_v15 = vpop.f32.mrb[111].mxu1 }
0x2d44   :  { %v9228_v16 = vsel %vm387_vm7, %v9225_v25, -inf }
0x2d45   :  { %9229 = vmax.xlane.f32.xlu0 %v9228_v16 }
0x2db4   :  { %v9389_v22 = vpop.f32.mrb[92].mxu0 }
0x2db5   :  { %v9390_v30 = vadd.f32 %v9389_v22, %v12961_v29  ;;  %v12103_v31 = vpop.f32.mrb[93].mxu0 }
0x2db7   :  { %v9393_v32 = vsel %vm387_vm7, %v9390_v30, -inf }
0x2db8   :  { %9394 = vmax.xlane.f32.xlu1 %v9393_v32  ;;  %v9554_v27 = vpop.f32.mrb[94].mxu0 }
0x2db9   :  { %v9555_v33 = vadd.f32 %v9554_v27, %v12961_v29  ;;  %v12113_v35 = vpop.f32.mrb[95].mxu0 }
0x2dbb   :  { %v9558_v36 = vsel %vm387_vm7, %v9555_v33, -inf }
0x2dbc   :  { %v9719_v59 = vpop.f32.mrb[96].mxu0  ;;  %9559 = vmax.xlane.f32.xlu0 %v9558_v36 }
0x2dbd   :  { %v9720_v10 = vadd.f32 %v9719_v59, %v12961_v29  ;;  %v12123_v37 = vpop.f32.mrb[97].mxu0 }
0x2dbf   :  { %v9723_v38 = vsel %vm387_vm7, %v9720_v10, -inf }
0x2dc0   :  { %v9897_v40 = vpop.f32.mrb[98].mxu0  ;;  %9724 = vmax.xlane.f32.xlu0 %v9723_v38 }
0x2dc1   :  { %v9898_v26 = vadd.f32 %v9897_v40, %v12976_v49  ;;  %v12133_v42 = vpop.f32.mrb[99].mxu0 }
0x2dc3   :  { %v9901_v43 = vsel %vm387_vm7, %v9898_v26, -inf }
0x2dc4   :  { %9902 = vmax.xlane.f32.xlu1 %v9901_v43  ;;  %v10062_v28 = vpop.f32.mrb[100].mxu0 }
0x2dc5   :  { %v10063_v44 = vadd.f32 %v10062_v28, %v12976_v49  ;;  %v12143_v19 = vpop.f32.mrb[101].mxu0 }
0x2dc7   :  { %v10066_v57 = vsel %vm387_vm7, %v10063_v44, -inf }
0x2dc8   :  { %v10227_v41 = vpop.f32.mrb[102].mxu0  ;;  %10067 = vmax.xlane.f32.xlu0 %v10066_v57 }
0x2dc9   :  { %v10228_v29 = vadd.f32 %v10227_v41, %v12976_v49  ;;  %v12153_v8 = vpop.f32.mrb[103].mxu0 }
0x2dcb   :  { %v10231_v56 = vsel %vm387_vm7, %v10228_v29, -inf }
0x2dcc   :  { %10232 = vmax.xlane.f32.xlu1 %v10231_v56  ;;  %v10392_v45 = vpop.f32.mrb[104].mxu0 }
0x2dcd   :  { %v10393_v47 = vadd.f32 %v10392_v45, %v12976_v49  ;;  %v12163_v48 = vpop.f32.mrb[105].mxu0 }
0x2dcf   :  { %v10396_v60 = vsel %vm387_vm7, %v10393_v47, -inf }
0x2dd0   :  { %10397 = vmax.xlane.f32.xlu0 %v10396_v60 }
0x2dd2   :  { %v9230_v50 = vpop.xlane.xlu0 %9229 }
0x2dd3   :  { %v9231_v52 = vsub.f32 %v9225_v25, %v9230_v50 }
0x2dd5   :  { %v9232_v53 = vmul.f32 1.442695, %v9231_v52 }
0x2dd7   :  { %12669 = vpow2.f32 %v9232_v53 }
0x2ddd   :  { %9734 = vrot.lane.b32.xlu1 %v14004_v61, %s12768_s16 }
0x2de1   :  { %v12670_v54 = vpop.eup %12669 }
0x2de2   :  { %v9234_v55 = vsel %vm387_vm7, %v12670_v54, 0.0 }
0x2de6   :  { %9569 = vrot.lane.b32.xlu0 %v14004_v61, %s12767_s15 }
0x2e01   :  { %9235 = vadd.xlane.f32.xlu1 %v9234_v55 }
0x2e45   :  { %v9395_v49 = vpop.xlane.xlu1 %9394 }
0x2e46   :  { %v9396_v0 = vsub.f32 %v9390_v30, %v9395_v49 }
0x2e48   :  { %v9397_v1 = vmul.f32 1.442695, %v9396_v0 }
0x2e49   :  { %v9560_v39 = vpop.xlane.xlu0 %9559 }
0x2e4a   :  { %12671 = vpow2.f32 %v9397_v1  ;;  %v9561_v23 = vsub.f32 %v9555_v33, %v9560_v39 }
0x2e4c   :  { %v9562_v3 = vmul.f32 1.442695, %v9561_v23 }
0x2e4d   :  { %v9725_v2 = vpop.xlane.xlu0 %9724 }
0x2e4e   :  { %12673 = vpow2.f32 %v9562_v3  ;;  %v9726_v4 = vsub.f32 %v9720_v10, %v9725_v2 }
0x2e50   :  { %v9727_v61 = vmul.f32 1.442695, %v9726_v4 }
0x2e51   :  { %v9903_v11 = vpop.xlane.xlu1 %9902 }
0x2e52   :  { %12675 = vpow2.f32 %v9727_v61  ;;  %v9904_v34 = vsub.f32 %v9898_v26, %v9903_v11 }
0x2e54   :  { %v12672_v18 = vpop.eup %12671  ;;  %v9905_v24 = vmul.f32 1.442695, %v9904_v34  ;;  %v10500_v34 = vld [vmem:[#allocation2 + $0x3b8] sm:$0xff] }
0x2e55   :  { %v9399_v13 = vsel %vm387_vm7, %v12672_v18, 0.0  ;;  %v10068_v9 = vpop.xlane.xlu0 %10067 }
0x2e56   :  { %9400 = vadd.xlane.f32.xlu0 %v9399_v13  ;;  %v10069_v17 = vsub.f32 %v10063_v44, %v10068_v9  ;;  %12677 = vpow2.f32 %v9905_v24  ;;  %v10501_v9 = vld [vmem:[#allocation2 + $0x3c0] sm:$0xff] }
0x2e58   :  { %v12674_v5 = vpop.eup %12673  ;;  %v10070_v16 = vmul.f32 1.442695, %v10069_v17 }
0x2e59   :  { %v9564_v21 = vsel %vm387_vm7, %v12674_v5, 0.0  ;;  %v10233_v63 = vpop.xlane.xlu1 %10232 }
0x2e5a   :  { %9565 = vadd.xlane.f32.xlu1 %v9564_v21  ;;  %v10234_v25 = vsub.f32 %v10228_v29, %v10233_v63  ;;  %12679 = vpow2.f32 %v10070_v16  ;;  %v12398_v63 = vpack.c.bf16 %v10501_v9, %v10500_v34  ;;  %v10590_v9 = vld [vmem:[#allocation2 + $0x3e0] sm:$0x3] }
0x2e5c   :  { %v14093_v7 = vpop.eup %12675  ;;  %v10235_v22 = vmul.f32 1.442695, %v10234_v25 }
0x2e5d   :  { %v9729_v62 = vsel %vm387_vm7, %v14093_v7, 0.0  ;;  %v10398_v15 = vpop.xlane.xlu0 %10397  ;;  %v9735_v32 = vpop.permute.xlu1 %9734 }
0x2e5e   :  { %9730 = vadd.xlane.f32.xlu0 %v9729_v62  ;;  %v10399_v30 = vsub.f32 %v10393_v47, %v10398_v15  ;;  %12681 = vpow2.f32 %v10235_v22  ;;  %v10498_v62 = vld [vmem:[#allocation2 + $0x3a8] sm:$0xff] }
0x2e60   :  { %v10400_v31 = vmul.f32 1.442695, %v10399_v30  ;;  %v12678_v27 = vpop.eup %12677 }
0x2e61   :  { %v9907_v36 = vsel %vm387_vm7, %v12678_v27, 0.0  ;;  %v9570_v43 = vpop.permute.xlu0 %9569 }
0x2e62   :  { %12683 = vpow2.f32 %v10400_v31 }
0x2e64   :  { %v14101_v33 = vpop.eup %12679 }
0x2e65   :  { %v10072_v37 = vsel %vm387_vm7, %v14101_v33, 0.0 }
0x2e68   :  { %v14104_v59 = vpop.eup %12681 }
0x2e69   :  { %v10237_v10 = vsel %vm387_vm7, %v14104_v59, 0.0 }
0x2e6b   :  { %10077 = vrot.lane.b32.xlu1 %v14019_v20, %s12766_s14 }
0x2e6c   :  { %v14110_v38 = vpop.eup %12683 }
0x2e6d   :  { %v10402_v40 = vsel %vm387_vm7, %v14110_v38, 0.0 }
0x2e74   :  { %9912 = vrot.lane.b32.xlu0 %v14019_v20, %s12765_s13 }
0x2e8e   :  { %v9236_v35 = vpop.xlane.xlu1 %9235 }
0x2e8f   :  { %12685 = vrcp.f32 %v9236_v35  ;;  %9908 = vadd.xlane.f32.xlu1 %v9907_v36 }
0x2e93   :  { %10238 = vadd.xlane.f32.xlu1 %v10237_v10  ;;  %10073 = vadd.xlane.f32.xlu0 %v10072_v37 }
0x2e97   :  { %10403 = vadd.xlane.f32.xlu1 %v10402_v40 }
0x2e99   :  { %v12686_v26 = vpop.eup %12685 }
0x2e9a   :  { %v9238_v42 = vmul.f32 %v12686_v26, %v12670_v54 }
0x2e9c   :  { %12097 = vmatmul.mubr.msk.f32.vlgmr.msra.gmra.mrb[112].mxu1 %vm387_vm7, %v9238_v42 }
0x2e9d   :  { %12105 = vmatpush3.msra.mxu1 %v9405_v58  ;;  %12106 = vmatprep.mubr.msk.f32.mxu1 %vm12763_vm6, %v12762_v6 }
0x2e9e   :  { %12114 = vmatprep.subr.mxu1 %v12762_v6 }
0x2ea8   :  { %10407 = vrot.lane.b32.xlu1 %v14019_v20, %s12768_s16 }
0x2ea9   :  { %10242 = vrot.lane.b32.xlu0 %v14019_v20, %s12767_s15 }
0x2ee3   :  { %v9401_v28 = vpop.xlane.xlu0 %9400 }
0x2ee4   :  { %12687 = vrcp.f32 %v9401_v28 }
0x2ee7   :  { %v9566_v44 = vpop.xlane.xlu1 %9565 }
0x2ee8   :  { %12689 = vrcp.f32 %v9566_v44 }
0x2eeb   :  { %v9731_v19 = vpop.xlane.xlu0 %9730  ;;  %v10078_v47 = vpop.permute.xlu1 %10077 }
0x2eec   :  { %12691 = vrcp.f32 %v9731_v19 }
0x2eee   :  { %v12688_v57 = vpop.eup %12687 }
0x2eef   :  { %v9403_v41 = vmul.f32 %v12688_v57, %v12672_v18  ;;  %v9913_v45 = vpop.permute.xlu0 %9912 }
0x2ef1   :  { %12107 = vmatmul.mubr.msk.f32.vlgmr.msra.gmra.mrb[114].mxu1 %vm387_vm7, %v9403_v41 }
0x2ef2   :  { %v12690_v29 = vpop.eup %12689  ;;  %12115 = vmatpush3.msra.mxu1 %v9570_v43  ;;  %12116 = vmatprep.mubr.msk.f32.mxu1 %vm12763_vm6, %v12762_v6  ;;  %v11085_v43 = vld [vmem:[#allocation2 + $0x3c8] ss:$0 sm:$0xff] }
0x2ef3   :  { %v9568_v8 = vmul.f32 %v12690_v29, %v12674_v5  ;;  %12124 = vmatprep.subr.mxu1 %v12762_v6 }
0x2ef5   :  { %12117 = vmatmul.mubr.msk.f32.vlgmr.msra.gmra.mrb[116].mxu1 %vm387_vm7, %v9568_v8 }
0x2ef6   :  { %v12692_v20 = vpop.eup %12691  ;;  %12125 = vmatpush3.msra.mxu1 %v9735_v32  ;;  %12126 = vmatprep.mubr.msk.f32.mxu1 %vm12763_vm6, %v12762_v6 }
0x2ef7   :  { %v9733_v56 = vmul.f32 %v12692_v20, %v14093_v7  ;;  %12134 = vmatprep.subr.mxu1 %v12762_v6 }
0x2ef9   :  { %12127 = vmatmul.mubr.msk.f32.vlgmr.msra.gmra.mrb[118].mxu1 %vm387_vm7, %v9733_v56 }
0x2efa   :  { %12135 = vmatpush3.msra.mxu1 %v9913_v45  ;;  %12136 = vmatprep.mubr.msk.f32.mxu1 %vm12763_vm6, %v12762_v6 }
0x2efb   :  { %12144 = vmatprep.subr.mxu1 %v12762_v6 }
0x2f1c   :  { %v9909_v48 = vpop.xlane.xlu1 %9908 }
0x2f1d   :  { %12693 = vrcp.f32 %v9909_v48 }
0x2f20   :  { %v10239_v60 = vpop.xlane.xlu1 %10238  ;;  %v10074_v50 = vpop.xlane.xlu0 %10073 }
0x2f21   :  { %12695 = vrcp.f32 %v10074_v50 }
0x2f22   :  { %12697 = vrcp.f32 %v10239_v60 }
0x2f24   :  { %v10404_v52 = vpop.xlane.xlu1 %10403  ;;  %v10243_v0 = vpop.permute.xlu0 %10242 }
0x2f25   :  { %12699 = vrcp.f32 %v10404_v52 }
0x2f27   :  { %v12694_v53 = vpop.eup %12693 }
0x2f28   :  { %v9911_v54 = vmul.f32 %v12694_v53, %v12678_v27  ;;  %v10408_v23 = vpop.permute.xlu1 %10407 }
0x2f2a   :  { %12137 = vmatmul.mubr.msk.f32.vlgmr.msra.gmra.mrb[120].mxu1 %vm387_vm7, %v9911_v54  ;;  %v10629_v54 = vld [vmem:[#allocation2 + $0x3e8] sm:$0xff] }
0x2f2b   :  { %12145 = vmatpush3.msra.mxu1 %v10078_v47  ;;  %12146 = vmatprep.mubr.msk.f32.mxu1 %vm12763_vm6, %v12762_v6  ;;  %v12696_v55 = vpop.eup %12695 }
0x2f2c   :  { %12154 = vmatprep.subr.mxu1 %v12762_v6  ;;  %v10076_v58 = vmul.f32 %v12696_v55, %v14101_v33  ;;  %v12698_v49 = vpop.eup %12697  ;;  %v10630_v55 = vld [vmem:[#allocation2 + $0x3f0] sm:$0xff] }
0x2f2d   :  { %v10241_v1 = vmul.f32 %v12698_v49, %v14104_v59  ;;  %v10631_v49 = vld [vmem:[#allocation2 + $0x3f8] sm:$0xff] }
0x2f2e   :  { %12147 = vmatmul.mubr.msk.f32.vlgmr.msra.gmra.mrb[122].mxu1 %vm387_vm7, %v10076_v58  ;;  %v12402_v58 = vpack.c.bf16 %v10630_v55, %v10629_v54 }
0x2f2f   :  { %12155 = vmatpush3.msra.mxu1 %v10243_v0  ;;  %12156 = vmatprep.mubr.msk.f32.mxu1 %vm12763_vm6, %v12762_v6  ;;  %v12700_v39 = vpop.eup %12699  ;;  %v10632_v0 = vld [vmem:[#allocation2 + $0x400] sm:$0xff] }
0x2f30   :  { %12164 = vmatprep.subr.mxu1 %v12762_v6  ;;  %v10406_v3 = vmul.f32 %v12700_v39, %v14110_v38  ;;  %v10721_v39 = vld [vmem:[#allocation2 + $0x410] sm:$0xff] }
0x2f32   :  { %12157 = vmatmul.mubr.msk.f32.vlgmr.msra.gmra.mrb[124].mxu1 %vm387_vm7, %v10241_v1  ;;  %v12406_v1 = vpack.c.bf16 %v10632_v0, %v10631_v49 }
0x2f33   :  { %12165 = vmatpush3.msra.mxu1 %v10408_v23  ;;  %12166 = vmatprep.mubr.msk.f32.mxu1 %vm12763_vm6, %v12762_v6  ;;  %v10499_v6 = vld [vmem:[#allocation2 + $0x3b0] sm:$0xff]  ;;  %v10722_v23 = vld [vmem:[#allocation2 + $0x418] sm:$0xff] }
0x2f34   :  { %v12394_v11 = vpack.c.bf16 %v10499_v6, %v10498_v62  ;;  %12403 = vmatprep.subr.bf16.mxu1 %v12402_v58 }
0x2f36   :  { %12167 = vmatmul.mubr.msk.f32.vlgmr.msra.gmra.mrb[126].mxu1 %vm387_vm7, %v10406_v3  ;;  %12395 = vmatprep.subr.bf16.mxu0 %v12394_v11  ;;  %v10723_v3 = vld [vmem:[#allocation2 + $0x420] sm:$0xff] }
0x2f37   :  { %12397 = vmatpush3.bf16.msra.mxu0 %v12394_v11  ;;  %12405 = vmatpush3.bf16.msra.mxu1 %v12402_v58 }
0x2f38   :  { %12399 = vmatprep.subr.bf16.mxu0 %v12398_v63  ;;  %12407 = vmatprep.subr.bf16.mxu1 %v12406_v1 }
0x2f3b   :  { %12401 = vmatpush3.bf16.msra.mxu0 %v12398_v63  ;;  %12409 = vmatpush3.bf16.msra.mxu1 %v12406_v1  ;;  %v10620_v63 = vrot.slane %v10590_v9, %v12858_v46  ;;  %v10817_v1 = vld [vmem:[#allocation2 + $0x458] sm:$0x3] }
0x2f6f   :  { %v9311_v2 = vpop.f32.mrb[112].mxu1 }
0x2f70   :  { %v12098_v4 = vpop.f32.mrb[113].mxu1 }
0x2f71   :  { %v10724_v4 = vld [vmem:[#allocation2 + $0x428] sm:$0xff] }
0x2fc4   :  { %v9476_v61 = vpop.f32.mrb[114].mxu1 }
0x2fc5   :  { %9811 = vrot.lane.b32.xlu0 %v9476_v61, %s12760_s29  ;;  %v12108_v18 = vpop.f32.mrb[115].mxu1  ;;  %v12414_v61 = vpack.c.bf16 %v10724_v4, %v10723_v3  ;;  %v10853_v4 = vrot.slane %v10817_v1, %v12862_v51 }
0x2fc6   :  { %v10725_v18 = vld [vmem:[#allocation2 + $0x430] sm:$0xff] }
0x2fc8   :  { %v9641_v13 = vpop.f32.mrb[116].mxu1 }
0x2fc9   :  { %9815 = vrot.lane.b32.xlu1 %v9641_v13, %s12776_s26  ;;  %v12118_v5 = vpop.f32.mrb[117].mxu1  ;;  %v10726_v13 = vld [vmem:[#allocation2 + $0x438] sm:$0xff] }
0x2fca   :  { %v12418_v5 = vpack.c.bf16 %v10726_v13, %v10725_v18 }
0x2fcc   :  { %v9806_v21 = vpop.f32.mrb[118].mxu1 }
0x2fcd   :  { %9819 = vrot.lane.b32.xlu1 %v9806_v21, %s12777_s27  ;;  %v12128_v7 = vpop.f32.mrb[119].mxu1 }
0x2ffd   :  { %v9984_v17 = vpop.f32.mrb[120].mxu1 }
0x2ffe   :  { %v12138_v24 = vpop.f32.mrb[121].mxu1 }
0x3001   :  { %v10149_v25 = vpop.f32.mrb[122].mxu1 }
0x3002   :  { %10484 = vrot.lane.b32.xlu0 %v10149_v25, %s12760_s29  ;;  %v12148_v15 = vpop.f32.mrb[123].mxu1  ;;  %v10626_v25 = vrot.slane %v10590_v9, %v12862_v51 }
0x3005   :  { %v10314_v16 = vpop.f32.mrb[124].mxu1 }
0x3006   :  { %10488 = vrot.lane.b32.xlu0 %v10314_v16, %s12776_s26  ;;  %v12158_v22 = vpop.f32.mrb[125].mxu1 }
0x3009   :  { %v10479_v30 = vpop.f32.mrb[126].mxu1 }
0x300a   :  { %10492 = vrot.lane.b32.xlu1 %v10479_v30, %s12777_s27  ;;  %v12168_v31 = vpop.f32.mrb[127].mxu1 }
0x3037   :  { %v9812_v32 = vpop.permute.xlu0 %9811 }
0x3038   :  { %v9822_v33 = vsel %vm387_vm7, %v9311_v2, %v9812_v32  ;;  %v12410_v2 = vpack.c.bf16 %v10722_v23, %v10721_v39  ;;  %v10847_v39 = vrot.slane %v10817_v1, %v12858_v46 }
0x303a   :  { %12411 = vmatprep.subr.bf16.mxu0 %v12410_v2 }
0x303b   :  { %v9816_v27 = vpop.permute.xlu1 %9815 }
0x303c   :  { %v9823_v35 = vsel %vm54_vm0, %v9822_v33, %v9816_v27  ;;  %v10727_v27 = vld [vmem:[#allocation2 + $0x440] sm:$0xff]  ;;  %v10728_v33 = vld [vmem:[#allocation2 + $0x448] sm:$0xff] }
0x303f   :  { %v9820_v36 = vpop.permute.xlu1 %9819 }
0x3040   :  { %v9824_v59 = vsel %vm1058_vm10, %v9823_v35, %v9820_v36  ;;  %v12422_v35 = vpack.c.bf16 %v10728_v33, %v10727_v27  ;;  %v11088_v36 = vld [vmem:[#allocation2 + $0x408] ss:$0 sm:$0xff] }
0x3041   :  { %12177 = vmatprep.mubr.msk.f32.mxu0 %vm248_vm3, %v9824_v59 }
0x3074   :  { %v10485_v10 = vpop.permute.xlu0 %10484 }
0x3075   :  { %v10495_v38 = vsel %vm387_vm7, %v9984_v17, %v10485_v10 }
0x3078   :  { %v10489_v37 = vpop.permute.xlu0 %10488 }
0x3079   :  { %v10496_v40 = vsel %vm54_vm0, %v10495_v38, %v10489_v37 }
0x307c   :  { %v10493_v26 = vpop.permute.xlu1 %10492 }
0x307d   :  { %v10497_v42 = vsel %vm1058_vm10, %v10496_v40, %v10493_v26 }
0x307e   :  { %12178 = vmatmul.mubr.msk.f32.vlgmr.msra.gmra.mrb[106].mxu0 %vm248_vm3, %v10497_v42  ;;  %v11091_v42 = vld [vmem:[#allocation2 + $0x450] ss:$0 sm:$0xff] }
0x307f   :  { %12413 = vmatpush3.bf16.msra.mxu0 %v12410_v2 }
0x3080   :  { %12415 = vmatprep.subr.bf16.mxu0 %v12414_v61 }
0x3083   :  { %12417 = vmatpush3.bf16.msra.mxu0 %v12414_v61 }
0x3084   :  { %12419 = vmatprep.subr.bf16.mxu0 %v12418_v5 }
0x3087   :  { %12421 = vmatpush3.bf16.msra.mxu0 %v12418_v5 }
0x3088   :  { %12423 = vmatprep.subr.bf16.mxu0 %v12422_v35 }
0x308b   :  { %12425 = vmatpush3.bf16.msra.mxu0 %v12422_v35 }
0x3151   :  { %v12179_v28 = vpop.f32.mrb[106].mxu0 }
0x3152   :  { %v10585_v44 = vadd.f32 %v12179_v28, %v11085_v43  ;;  %v10579_v19 = vpop.f32.mrb[107].mxu0 }
0x3153   :  { %v10580_v57 = vadd.f32 %v11085_v43, %v10579_v19 }
0x3154   :  { %v14165_v41 = vadd.f32 %v10585_v44, %v13976_v12 }
0x3155   :  { %v14168_v29 = vadd.f32 %v10580_v57, %v13979_v14 }
0x3156   :  { %v10594_v8 = vsel %vm248_vm3, %v14165_v41, 0.0 }
0x3157   :  { %10595 = vadd.xlane.f32.xlu1 %v10594_v8  ;;  %v10591_v20 = vsel %vm248_vm3, %v14168_v29, 0.0 }
0x3158   :  { %10592 = vadd.xlane.f32.xlu0 %v10591_v20 }
0x31e4   :  { %v10596_v56 = vpop.xlane.xlu1 %10595 }
0x31e5   :  { %v10598_v45 = vmul.f32 0.03125, %v10596_v56  ;;  %v10593_v47 = vpop.xlane.xlu0 %10592 }
0x31e6   :  { %v10597_v48 = vmul.f32 0.03125, %v10593_v47 }
0x31e7   :  { %v10600_v60 = vsub.f32 %v14165_v41, %v10598_v45 }
0x31e8   :  { %v10599_v12 = vsub.f32 %v14168_v29, %v10597_v48 }
0x31e9   :  { %v10602_v52 = vmul.f32 %v10600_v60, %v10600_v60 }
0x31ea   :  { %v10601_v50 = vmul.f32 %v10599_v12, %v10599_v12 }
0x31eb   :  { %v10606_v53 = vsel %vm248_vm3, %v10602_v52, 0.0 }
0x31ec   :  { %v10603_v14 = vsel %vm248_vm3, %v10601_v50, 0.0 }
0x31ed   :  { %10604 = vadd.xlane.f32.xlu0 %v10603_v14 }
0x31f1   :  { %10607 = vadd.xlane.f32.xlu0 %v10606_v53 }
0x327a   :  { %v10605_v21 = vpop.xlane.xlu0 %10604 }
0x327b   :  { %v10609_v7 = vmul.f32 0.03125, %v10605_v21 }
0x327d   :  { %v10611_v62 = vadd.f32 1e-06, %v10609_v7 }
0x327e   :  { %v10608_v6 = vpop.xlane.xlu0 %10607 }
0x327f   :  { %12701 = vrsqrt.f32 %v10611_v62  ;;  %v10610_v11 = vmul.f32 0.03125, %v10608_v6 }
0x3281   :  { %v10612_v34 = vadd.f32 1e-06, %v10610_v11 }
0x3283   :  { %12703 = vrsqrt.f32 %v10612_v34 }
0x3289   :  { %v12702_v17 = vpop.eup %12701 }
0x328a   :  { %v10615_v24 = vmul.f32 %v12702_v17, %v10599_v12 }
0x328c   :  { %v10621_v15 = vmul.f32 %v10620_v63, %v10615_v24 }
0x328d   :  { %v12704_v16 = vpop.eup %12703 }
0x328e   :  { %v10616_v22 = vmul.f32 %v12704_v16, %v10600_v60  ;;  %v10627_v30 = vadd.f32 %v10626_v25, %v10621_v15 }
0x3290   :  { %v10622_v31 = vmul.f32 %v10620_v63, %v10616_v22  ;;  %12188 = vmatprep.mubr.msk.f32.mxu1 %vm248_vm3, %v10627_v30 }
0x3292   :  { %v10628_v32 = vadd.f32 %v10626_v25, %v10622_v31 }
0x3294   :  { %12189 = vmatmul.mubr.msk.f32.vlgmr.msra.gmra.mrb[128].mxu1 %vm248_vm3, %v10628_v32 }
0x3367   :  { %v12190_v59 = vpop.f32.mrb[128].mxu1 }
0x3368   :  { %v10716_v10 = vadd.f32 %v12190_v59, %v11088_v36  ;;  %v10710_v37 = vpop.f32.mrb[129].mxu1 }
0x3369   :  { %v10711_v38 = vadd.f32 %v11088_v36, %v10710_v37 }
0x336a   :  { %v10720_v26 = vmax.f32 %v10716_v10, 0.0 }
0x336b   :  { %v10719_v40 = vmax.f32 %v10711_v38, 0.0 }
0x336d   :  { %12207 = vmatprep.mubr.msk.f32.mxu0 %vm1976_vm11, %v10719_v40 }
0x336e   :  { %12208 = vmatmul.mubr.msk.f32.vlgmr.msra.gmra.mrb[108].mxu0 %vm1976_vm11, %v10720_v26 }
0x3441   :  { %v12209_v43 = vpop.f32.mrb[108].mxu0 }
0x3442   :  { %v10812_v28 = vadd.f32 %v12209_v43, %v11091_v42  ;;  %v10806_v44 = vpop.f32.mrb[109].mxu0 }
0x3443   :  { %v10807_v19 = vadd.f32 %v11091_v42, %v10806_v44 }
0x3444   :  { %v10816_v57 = vadd.f32 %v10812_v28, %v14165_v41 }
0x3445   :  { %v10815_v8 = vadd.f32 %v10807_v19, %v14168_v29 }
0x3446   :  { %v10821_v20 = vsel %vm248_vm3, %v10816_v57, 0.0 }
0x3447   :  { %10822 = vadd.xlane.f32.xlu0 %v10821_v20  ;;  %v10818_v56 = vsel %vm248_vm3, %v10815_v8, 0.0 }
0x3448   :  { %10819 = vadd.xlane.f32.xlu1 %v10818_v56 }
0x34d4   :  { %v10823_v45 = vpop.xlane.xlu0 %10822 }
0x34d5   :  { %v10825_v47 = vmul.f32 0.03125, %v10823_v45  ;;  %v10820_v48 = vpop.xlane.xlu1 %10819 }
0x34d6   :  { %v10824_v60 = vmul.f32 0.03125, %v10820_v48 }
0x34d7   :  { %v10827_v12 = vsub.f32 %v10816_v57, %v10825_v47 }
0x34d8   :  { %v10826_v50 = vsub.f32 %v10815_v8, %v10824_v60 }
0x34d9   :  { %v10829_v14 = vmul.f32 %v10827_v12, %v10827_v12 }
0x34da   :  { %v10828_v52 = vmul.f32 %v10826_v50, %v10826_v50 }
0x34db   :  { %v10833_v53 = vsel %vm248_vm3, %v10829_v14, 0.0 }
0x34dc   :  { %10834 = vadd.xlane.f32.xlu0 %v10833_v53  ;;  %v10830_v41 = vsel %vm248_vm3, %v10828_v52, 0.0 }
0x34dd   :  { %10831 = vadd.xlane.f32.xlu1 %v10830_v41 }
0x3569   :  { %v10835_v29 = vpop.xlane.xlu0 %10834 }
0x356a   :  { %v10837_v54 = vmul.f32 0.03125, %v10835_v29  ;;  %v10832_v55 = vpop.xlane.xlu1 %10831 }
0x356b   :  { %v10836_v58 = vmul.f32 0.03125, %v10832_v55 }
0x356c   :  { %v10839_v49 = vadd.f32 1e-06, %v10837_v54 }
0x356d   :  { %v10838_v0 = vadd.f32 1e-06, %v10836_v58 }
0x356e   :  { %12705 = vrsqrt.f32 %v10839_v49 }
0x356f   :  { %12707 = vrsqrt.f32 %v10838_v0 }
0x3578   :  { %v12706_v23 = vpop.eup %12705 }
0x3579   :  { %v12708_v3 = vpop.eup %12707  ;;  %v10843_v2 = vmul.f32 %v12706_v23, %v10827_v12 }
0x357a   :  { %v10842_v61 = vmul.f32 %v12708_v3, %v10826_v50 }
0x357b   :  { %v10849_v18 = vmul.f32 %v10847_v39, %v10843_v2 }
0x357c   :  { %v10848_v13 = vmul.f32 %v10847_v39, %v10842_v61 }
0x357d   :  { %v10855_v5 = vadd.f32 %v10853_v4, %v10849_v18 }
0x357e   :  { %v10854_v21 = vadd.f32 %v10853_v4, %v10848_v13 }
0x357f   :  { %10858 = vst.msk [vmem:[#allocation5 + $0x8] sm:$0xff] %vm248_vm3, %v10855_v5 }
0x3580   :  { %10856 = vst.msk [vmem:[#allocation5] sm:$0xff] %vm248_vm3, %v10854_v21 }
0x3581   :  { %12743 = shalt.err (!%p12740_p12)
}
0x3582   :  { %s12744_s11 = scalar_lea.hbm %s14214_s5, 256 }
0x3583   :  { %p12745_p13 = scmp.ne.s32.totalorder %s14214_s5, %s12744_s11  ;;  %p12748_p0 = scmp.lt.u32.totalorder %s12744_s11, %s14214_s5 }
0x3585   :  { %p12750_p1 = pnand %p12748_p0, %p12745_p13 }
0x3587   :  { %12753 = shalt.err (!%p12750_p1)
}
0x3588   :  { %10870 = dma.vmem_to_hbm [thread:$0]  %s10865_s9, 256, %s14214_s5, [#allocation4], %s12759_s28, %s12759_s28, %s12760_s29  }
0x3589   :  { %12756 = dma.done.wait [#allocation4], 256  }
0x358a   :  { %12757 = vsyncadd [#allocation4], 4294967040 }
0x358b   :  { %10874 = vsyncpa [#allocation3], 1 }
0x358c   :  { %10875 = vsyncpa [#allocation4], 1 }

</bundles_post_ra>
